<compile_context>
chip_gen: v5e
topology: v5e:2x2
jax: 0.10.0
libtpu: 0.0.40
codegen_flags: <defaults>
</compile_context>

<pallas_src>
import functools

import jax
import jax.numpy as jnp
from jax.experimental import pallas as pl
from jax.experimental.pallas import tpu as pltpu


def _round_up(x, m):
    return ((x + m - 1) // m) * m


def _vmem_limit(est_bytes):
    # 2x margin, floor at the per-generation defaults, cap well under v7x's
    # 64 MiB physical VMEM.
    return int(min(max(2 * est_bytes, 32 << 20), 48 << 20))


def _pick_tm(M, K, itemsize=4, cap_bytes=4 << 20, tm_max=4096):
    """Largest M-tile (pow2, >=512) whose x-block stays under cap_bytes."""
    tm = tm_max
    while tm > 512 and tm * K * itemsize > cap_bytes:
        tm //= 2
    return min(tm, _round_up(M, 8))


# --------------------- fused matmul + bias (+ReLU) kernel ---------------------

def _matmul_kernel(x_ref, w_ref, b_ref, o_ref, acc_ref, *, relu):
    k = pl.program_id(2)

    @pl.when(k == 0)
    def _():
        acc_ref[...] = jnp.zeros_like(acc_ref)

    acc_ref[...] += jnp.dot(x_ref[...], w_ref[...],
                            preferred_element_type=jnp.float32)

    @pl.when(k == pl.num_programs(2) - 1)
    def _():
        y = acc_ref[...] + b_ref[...].astype(jnp.float32)
        if relu:
            y = jnp.maximum(y, 0.0)
        o_ref[...] = y.astype(o_ref.dtype)


def gemm_bias_act(x, w, b, *, relu, tm, tk, tn, n_valid=None, cast_x=None):
    """y = x @ w + b (optional ReLU), f32 accumulation.

    x: (M, K) with K <= Kp.  w: (Kp, Np) already padded so Kp % tk == 0 and
    Np % tn == 0 (or tk/tn equal the full dims).  b: (Np,).  Returns
    (M, n_valid) in f32.
    """
    M, K = x.shape
    Kp, Np = w.shape
    assert K <= Kp and Kp % tk == 0 and Np % tn == 0 and tm % 8 == 0

    if cast_x is not None:
        x = x.astype(cast_x)
    Mp = _round_up(M, tm)
    xp = jnp.pad(x, ((0, Mp - M), (0, Kp - K)))     # x is small / activation only
    b2 = b.reshape(1, Np)

    grid = (Mp // tm, Np // tn, Kp // tk)
    est = (2 * (tm * tk * xp.dtype.itemsize + tk * tn * w.dtype.itemsize
                + tn * 4 + tm * tn * 4) + tm * tn * 4)

    out = pl.pallas_call(
        functools.partial(_matmul_kernel, relu=relu),
        out_shape=jax.ShapeDtypeStruct((Mp, Np), jnp.float32),
        grid_spec=pltpu.PrefetchScalarGridSpec(
            num_scalar_prefetch=0,
            grid=grid,
            in_specs=[
                pl.BlockSpec((tm, tk), lambda i, j, k: (i, k)),
                pl.BlockSpec((tk, tn), lambda i, j, k: (k, j)),
                pl.BlockSpec((1, tn), lambda i, j, k: (0, j)),
            ],
            out_specs=pl.BlockSpec((tm, tn), lambda i, j, k: (i, j)),
            scratch_shapes=[pltpu.VMEM((tm, tn), jnp.float32)],
        ),
        compiler_params=pltpu.CompilerParams(
            dimension_semantics=("parallel", "parallel", "arbitrary"),
            vmem_limit_bytes=_vmem_limit(est)),
    )(xp, w, b2)

    nv = Np if n_valid is None else n_valid
    return out[:M, :nv]


# ------------------------------ 2x2 max-pool ---------------------------------

def _max4_kernel(a_ref, b_ref, c_ref, d_ref, o_ref):
    o_ref[...] = jnp.maximum(jnp.maximum(a_ref[...], b_ref[...]),
                             jnp.maximum(c_ref[...], d_ref[...]))


def maxpool_2x2(x):
    """MaxPool2d(kernel=2, stride=2), floor mode (PyTorch default), NHWC."""
    N, H, W, C = x.shape
    Ho, Wo = H // 2, W // 2
    x = x[:, :Ho * 2, :Wo * 2, :]
    # Four phase views, flattened to lane-dense (N, Ho, Wo*C); the max runs in
    # the kernel with one grid step per image.
    views = [x[:, i::2, j::2, :].reshape(N, Ho, Wo * C)
             for i in (0, 1) for j in (0, 1)]
    spec = pl.BlockSpec((1, Ho, Wo * C), lambda n: (n, 0, 0))
    blk_bytes = Ho * Wo * C * 4
    out = pl.pallas_call(
        _max4_kernel,
        out_shape=jax.ShapeDtypeStruct((N, Ho, Wo * C), x.dtype),
        grid_spec=pltpu.PrefetchScalarGridSpec(
            num_scalar_prefetch=0,
            grid=(N,),
            in_specs=[spec, spec, spec, spec],
            out_specs=spec,
        ),
        compiler_params=pltpu.CompilerParams(
            dimension_semantics=("parallel",),
            vmem_limit_bytes=_vmem_limit(10 * blk_bytes)),
    )(*views)
    return out.reshape(N, Ho, Wo, C)


# ---------------------------- conv = im2col + GEMM ---------------------------

def conv2d_relu(x, w2d, b, kh, kw, padding):
    """x: (N,H,W,Cin) f32, w2d: (kh*kw*Cin, Cout) f32, b: (Cout,) f32."""
    if padding:
        x = jnp.pad(x, ((0, 0), (padding, padding), (padding, padding), (0, 0)))
    N, H, W, Cin = x.shape
    K, Cout = w2d.shape
    Ho, Wo = H - kh + 1, W - kw + 1
    # im2col via channel-wise concat (K ordering = (kh, kw, cin), matching w2d).
    cols = [x[:, i:i + Ho, j:j + Wo, :] for i in range(kh) for j in range(kw)]
    patches = jnp.concatenate(cols, axis=-1).reshape(N * Ho * Wo, K)
    tm = _pick_tm(N * Ho * Wo, K)
    # Full-dim K / Cout blocks: no padding of small K/N to 128.
    y = gemm_bias_act(patches, w2d, b, relu=True, tm=tm, tk=K, tn=Cout)
    return y.reshape(N, Ho, Wo, Cout)


# ------------------------------- parameters ----------------------------------

def init_params(key):
    ks = jax.random.split(key, 14)

    def conv_w(k, kh, kw, cin, cout):
        w = (jax.random.normal(k, (kh, kw, cin, cout), jnp.float32)
             * jnp.sqrt(2.0 / (kh * kw * cin)))
        return w.reshape(kh * kw * cin, cout)          # GEMM-ready, f32

    def fc_w(k, fin, fout, kp, np_):
        w = (jax.random.normal(k, (fin, fout), jnp.float32)
             * jnp.sqrt(2.0 / fin)).astype(jnp.bfloat16)
        return jnp.pad(w, ((0, kp - fin), (0, np_ - fout)))   # pad ONCE, bf16

    def bias(k, n, pad_to=0):
        b = 0.01 * jax.random.normal(k, (n,), jnp.float32)
        return jnp.pad(b, (0, pad_to - n)) if pad_to else b

    p = {}
    p["w1"], p["b1"] = conv_w(ks[0], 5, 5, 1, 32), bias(ks[1], 32)
    p["w2"], p["b2"] = conv_w(ks[2], 3, 3, 32, 64), bias(ks[3], 64)
    p["w3"], p["b3"] = conv_w(ks[4], 3, 3, 64, 128), bias(ks[5], 128)
    p["w4"], p["b4"] = conv_w(ks[6], 3, 3, 128, 256), bias(ks[7], 256)
    p["wf1"], p["bf1"] = fc_w(ks[8], 43264, 6362, 43264, 6400), bias(ks[9], 6362, 6400)
    p["wf2"], p["bf2"] = fc_w(ks[10], 6362, 935, 6400, 1024), bias(ks[11], 935, 1024)
    p["wf3"], p["bf3"] = fc_w(ks[12], 935, 136, 1024, 256), bias(ks[13], 136, 256)
    return p


# --------------------------------- forward -----------------------------------

def net_forward(params, x_nchw):
    # NCHW (PyTorch) -> NHWC (kernel layout)
    x = jnp.transpose(x_nchw, (0, 2, 3, 1))

    x = maxpool_2x2(conv2d_relu(x, params["w1"], params["b1"], 5, 5, 0))  # 220 -> 110
    x = maxpool_2x2(conv2d_relu(x, params["w2"], params["b2"], 3, 3, 1))  # 110 -> 55
    x = maxpool_2x2(conv2d_relu(x, params["w3"], params["b3"], 3, 3, 1))  # 55  -> 27
    x = maxpool_2x2(conv2d_relu(x, params["w4"], params["b4"], 3, 3, 1))  # 27  -> 13
    # dropout1..4: identity (eval mode)

    # Flatten in PyTorch NCHW order: x.view(-1, 13*13*256)
    N = x.shape[0]
    x = jnp.transpose(x, (0, 3, 1, 2)).reshape(N, 13 * 13 * 256)
    tm_fc = _round_up(min(N, 128), 8)

    # FC stack: pre-padded bf16 weights, f32 accumulation, dropout5/6 identity.
    x = gemm_bias_act(x, params["wf1"], params["bf1"], relu=True,
                      tm=tm_fc, tk=3328, tn=1280, n_valid=6362,
                      cast_x=jnp.bfloat16)
    x = gemm_bias_act(x, params["wf2"], params["bf2"], relu=True,
                      tm=tm_fc, tk=3200, tn=1024, n_valid=935,
                      cast_x=jnp.bfloat16)
    x = gemm_bias_act(x, params["wf3"], params["bf3"], relu=False,
                      tm=tm_fc, tk=1024, tn=256, n_valid=136,
                      cast_x=jnp.bfloat16)
    return x


if __name__ == "__main__":
    key = jax.random.PRNGKey(0)
    pkey, xkey = jax.random.split(key)
    params = init_params(pkey)

    # The module's fc1 (13*13*256 inputs) implies a 1-channel 224x224 image
    # (224 -> conv1 220 -> pool/conv chain -> 13x13x256); batch kept at 2.
    x = jax.random.normal(xkey, (2, 1, 224, 224), jnp.float32)

    out = net_forward(params, x)
    out = jax.block_until_ready(out)
    assert out.shape == (2, 136), out.shape
    assert bool(jnp.isfinite(out).all())
    print("KERNEL_OK")
</pallas_src>

<mosaic_0001>
module attributes {stable_mosaic.version = 11 : i64} {
  func.func @_matmul_kernel(%arg0: i32, %arg1: i32, %arg2: i32, %arg3: memref<4096x25xf32, #tpu.memory_space<vmem>>, %arg4: memref<25x32xf32, #tpu.memory_space<vmem>>, %arg5: memref<1x32xf32, #tpu.memory_space<vmem>>, %arg6: memref<4096x32xf32, #tpu.memory_space<vmem>>, %arg7: memref<4096x32xf32, #tpu.memory_space<vmem>>) attributes {dimension_semantics = [#tpu.dimension_semantics<parallel>, #tpu.dimension_semantics<parallel>, #tpu.dimension_semantics<arbitrary>], iteration_bounds = array<i64: 24, 1, 1>, scalar_prefetch = 0 : i64, scratch_operands = 1 : i64, tpu.core_type = #tpu.core_type<tc>, window_params = [{transform_indices = @transform_0, window_bounds = array<i64: 4096, 25>}, {transform_indices = @transform_1, window_bounds = array<i64: 25, 32>}, {transform_indices = @transform_2, window_bounds = array<i64: 1, 32>}, {transform_indices = @transform_3, window_bounds = array<i64: 4096, 32>}]} {
    %c0_i32 = arith.constant 0 : i32
    %0 = arith.cmpi eq, %arg2, %c0_i32 : i32
    %1 = arith.extui %0 : i1 to i32
    %c0_i32_0 = arith.constant 0 : i32
    %2 = arith.cmpi ne, %1, %c0_i32_0 : i32
    scf.if %2 {
      %cst_10 = arith.constant 0.000000e+00 : f32
      %12 = vector.broadcast %cst_10 : f32 to vector<4096x32xf32>
      %c0_11 = arith.constant 0 : index
      %c0_12 = arith.constant 0 : index
      %13 = vector.load %arg7[%c0_11, %c0_12] : memref<4096x32xf32, #tpu.memory_space<vmem>>, vector<4096x32xf32>
      tpu.vector_store %arg7[%c0_11, %c0_12], %12 {strides = array<i32>} : memref<4096x32xf32, #tpu.memory_space<vmem>>, vector<4096x32xf32>,
    } else {
    }
    %c0 = arith.constant 0 : index
    %c0_1 = arith.constant 0 : index
    %3 = vector.load %arg7[%c0, %c0_1] : memref<4096x32xf32, #tpu.memory_space<vmem>>, vector<4096x32xf32>
    %c0_2 = arith.constant 0 : index
    %c0_3 = arith.constant 0 : index
    %4 = vector.load %arg3[%c0_2, %c0_3] : memref<4096x25xf32, #tpu.memory_space<vmem>>, vector<4096x25xf32>
    %c0_4 = arith.constant 0 : index
    %c0_5 = arith.constant 0 : index
    %5 = vector.load %arg4[%c0_4, %c0_5] : memref<25x32xf32, #tpu.memory_space<vmem>>, vector<25x32xf32>
    %cst = arith.constant dense<0.000000e+00> : vector<4096x32xf32>
    %6 = tpu.matmul %4, %5, %cst {dimension_numbers = #tpu.dot_dimension_numbers<[1], [0], [0], [1], [0, 0, 1, 1], [], []>} : vector<4096x25xf32>, vector<25x32xf32>, vector<4096x32xf32> -> vector<4096x32xf32>
    %7 = arith.addf %3, %6 : vector<4096x32xf32>
    %c0_6 = arith.constant 0 : index
    %c0_7 = arith.constant 0 : index
    %8 = vector.load %arg7[%c0_6, %c0_7] : memref<4096x32xf32, #tpu.memory_space<vmem>>, vector<4096x32xf32>
    tpu.vector_store %arg7[%c0_6, %c0_7], %7 {strides = array<i32>} : memref<4096x32xf32, #tpu.memory_space<vmem>>, vector<4096x32xf32>,
    %c0_i32_8 = arith.constant 0 : i32
    %9 = arith.cmpi eq, %arg2, %c0_i32_8 : i32
    %10 = arith.extui %9 : i1 to i32
    %c0_i32_9 = arith.constant 0 : i32
    %11 = arith.cmpi ne, %10, %c0_i32_9 : i32
    scf.if %11 {
      %c0_10 = arith.constant 0 : index
      %c0_11 = arith.constant 0 : index
      %12 = vector.load %arg7[%c0_10, %c0_11] : memref<4096x32xf32, #tpu.memory_space<vmem>>, vector<4096x32xf32>
      %c0_12 = arith.constant 0 : index
      %c0_13 = arith.constant 0 : index
      %13 = vector.load %arg5[%c0_12, %c0_13] : memref<1x32xf32, #tpu.memory_space<vmem>>, vector<1x32xf32>
      %14 = vector.broadcast %13 : vector<1x32xf32> to vector<4096x32xf32>
      %15 = arith.addf %12, %14 : vector<4096x32xf32>
      %cst_14 = arith.constant 0.000000e+00 : f32
      %16 = vector.broadcast %cst_14 : f32 to vector<4096x32xf32>
      %17 = arith.maximumf %15, %16 : vector<4096x32xf32>
      %c0_15 = arith.constant 0 : index
      %c0_16 = arith.constant 0 : index
      %18 = vector.load %arg6[%c0_15, %c0_16] : memref<4096x32xf32, #tpu.memory_space<vmem>>, vector<4096x32xf32>
      tpu.vector_store %arg6[%c0_15, %c0_16], %17 {strides = array<i32>} : memref<4096x32xf32, #tpu.memory_space<vmem>>, vector<4096x32xf32>,
    } else {
    }
    return
  }
  func.func @transform_0(%arg0: i32, %arg1: i32, %arg2: i32) -> (i32, i32) {
    %c0_i32 = arith.constant 0 : i32
    return %arg0, %arg2 : i32, i32
  }
  func.func @transform_1(%arg0: i32, %arg1: i32, %arg2: i32) -> (i32, i32) {
    %c0_i32 = arith.constant 0 : i32
    return %arg2, %arg1 : i32, i32
  }
  func.func @transform_2(%arg0: i32, %arg1: i32, %arg2: i32) -> (i32, i32) {
    %c0_i32 = arith.constant 0 : i32
    %c0_i32_0 = arith.constant 0 : i32
    return %c0_i32, %arg1 : i32, i32
  }
  func.func @transform_3(%arg0: i32, %arg1: i32, %arg2: i32) -> (i32, i32) {
    %c0_i32 = arith.constant 0 : i32
    return %arg0, %arg1 : i32, i32
  }
}

</mosaic_0001>

<bundles_post_ra>
// kernel: tpu_custom_call.1
= control target key start
LH: loop header
LB: loop body
LE: loop exit
PB: predicated region body
PF: predicated region fallthrough
CT: control target
= control target key end

     0   :  { %8 = vsyncpa [#allocation4], 0  ;;  %s14434_s0 = inlined_call_operand.vmem [shape: f32[98304,25], index: 0, kind: input, shape index: {}]   ;;  %s14435_s1 = inlined_call_operand.hbm [shape: f32[25,32], index: 1, kind: input, shape index: {}]   ;;  %s14436_s2 = inlined_call_operand.hbm [shape: f32[1,32], index: 2, kind: input, shape index: {}]   ;;  %s14437_s3 = inlined_call_operand.vmem [shape: f32[98304,32], index: 3, kind: output, shape index: {}]  }
   0x1   :  { %9 = vsyncpa [#allocation6], 0  ;;  %s8805_s12 = smov 0   ;;  %s8807_s13 = smov 0  }
   0x2   :  { %s8809_s14 = smov 0  }
   0x3 LB: > { %s8089_s15 = sadd.s32 4294967295, %s8778_s14   ;;  %s34_s16 = sadd.s32 1, %s8774_s13  ;;  %s8778_s14 = sphi %s8809_s14, %s15_s14   ;;  %s8774_s13 = sphi %s8807_s13, %s14441_s13   ;;  %s8770_s12 = sphi %s8805_s12, %s14440_s12  }
   0x4   : > { %p36_p0 = scmp.ge.s32.totalorder %s34_s16, 24  ;;  %p8091_p1 = scmp.ge.s32.totalorder %s8778_s14, 1 }
   0x5   : > { %p149_p2 = scmp.lt.s32.totalorder %s8778_s14, 25  ;;  %p8830_p4 = scmp.eq.s32.totalorder %s8089_s15, 0 }
   0x6   : > { %s14443_s16 = smov (%p36_p0, %s34_s16), 0  ;;  %s164_s21 = sshll.u32 %s14435_s1, 4  ;;  %s165_s21 = int_to_ptr.hbm [resolvable:$true] %s164_s21 }
   0x7   : > { %p8826_p3 = pnand %p8091_p1, %p149_p2  ;;  %s8780_s22 = smov [#allocation3]  }
   0x8   : > { %s166_s23 = sshll.u32 %s8780_s22, 4  ;;  %s180_s26 = sshll.u32 %s14436_s2, 4  ;;  %s167_s23 = int_to_ptr.vmem [resolvable:$true] %s166_s23  ;;  %s181_s26 = int_to_ptr.hbm [resolvable:$true] %s180_s26 }
   0x9   : > { %p8637_p5 = pneg %p8826_p3  ;;  %s8781_s27 = smov 128  }
   0xa   : > { %s8782_s28 = smov 8   ;;  %s8783_s29 = smov [#allocation5]  }
   0xb   : > { %p8638_p6 = pnand %p8830_p4, %p8637_p5  ;;  %s182_s30 = sshll.u32 %s8783_s29, 4  ;;  %s183_s30 = int_to_ptr.vmem [resolvable:$true] %s182_s30 }
   0xc   : > { %207 = sbr.rel (%p8826_p3) target bundleno = 1564 (0x61c), region = 32 }
   0xd   : > { %8640 = dma.hbm_to_vmem [thread:$0]  (!%p8638_p6), %s165_s21, 512, %s167_s23, [#allocation4], %s8781_s27, %s8781_s27, %s8782_s28  }
   0xe   : > { %8643 = dma.hbm_to_vmem [thread:$0]  (!%p8638_p6), %s181_s26, 16, %s183_s30, [#allocation6]  }
  0x11   : > { %8761 = dma.done.wait (%p8830_p4), [#allocation4], 512  }
  0x12   : > { %8763 = vsyncadd (%p8830_p4), [#allocation4], 4294966784 }
  0x13   : > { %8765 = dma.done.wait (%p8830_p4), [#allocation6], 16  }
  0x14   : > { %8767 = vsyncadd (%p8830_p4), [#allocation6], 4294967280  ;;  %s8098_s4 = sshll.u32 %s8770_s12, 9  ;;  %vm3344_vm0 = vcmask 1040384   ;;  %v1806_v0 = vld [vmem:[#allocation3 + $0x18] sm:$0x1] }
  0x15   : > { %p244_p7 = scmp.lt.s32.totalorder %s8098_s4, 12287  ;;  %v1805_v1 = vld [vmem:[#allocation3 + $0x10] sm:$0xff]  ;;  %8618 = vmatpush.msk.msra.mxu2 %vm3344_vm0, %v1806_v0  ;;  %8619 = vmatpush.msk.msra.mxu3 %vm3344_vm0, %v1806_v0  ;;  %v1804_v2 = vld [vmem:[#allocation3 + $0x8] sm:$0xff]  ;;  %v1803_v3 = vld [vmem:[#allocation3] sm:$0xff]  ;;  %vm1807_vm1 = vcmask 203776   ;;  %vm266_vm2 = vcmask 261120  }
  0x16   : > { %8102 = vmatpush.msk.msra.mxu0 %vm3344_vm0, %v1806_v0  ;;  %8617 = vmatpush.msk.msra.mxu1 %vm3344_vm0, %v1806_v0  ;;  %v8784_v52 = vmov 0.0  }
  0x17   : > { %s14445_s4 = smov (!%p244_p7, %s8098_s4), 12287  ;;  %8621 = vmatpush.msra.mxu2 %v1805_v1  ;;  %8622 = vmatpush.msra.mxu3 %v1805_v1  ;;  %267 = vst.msk [vmem:[#allocation2] sm:$0xff] %vm266_vm2, %v8784_v52 }
  0x18   : > { %s8099_s5 = sshll.u32 %s14445_s4, 3  ;;  %3361 = vmatpush.msra.mxu0 %v1805_v1  ;;  %8620 = vmatpush.msra.mxu1 %v1805_v1  ;;  %268 = vst.msk [vmem:[#allocation2 + $0x8] sm:$0xff] %vm266_vm2, %v8784_v52 }
  0x19   : > { %s8863_s8 = scalar_lea.vmem %s14434_s0, %s8099_s5  ;;  %8624 = vmatpush.msra.mxu2 %v1804_v2  ;;  %8625 = vmatpush.msra.mxu3 %v1804_v2  ;;  %269 = vst.msk [vmem:[#allocation2 + $0x10] sm:$0xff] %vm266_vm2, %v8784_v52  ;;  %s9095_s11 = scalar_lea.vmem %s14437_s3, %s8099_s5 }
  0x1a   : > { %v1547_v4 = vld [vmem:[%s8863_s8 + $0x800] sm:$0xff]  ;;  %3362 = vmatpush.msra.mxu0 %v1804_v2  ;;  %8623 = vmatpush.msra.mxu1 %v1804_v2  ;;  %v1548_v8 = vld [vmem:[%s8863_s8 + $0x808] sm:$0xff]  ;;  %v1549_v12 = vld [vmem:[%s8863_s8 + $0x810] sm:$0xff]  ;;  %270 = vst.msk [vmem:[#allocation2 + $0x18] sm:$0xff] %vm266_vm2, %v8784_v52 }
  0x1b   : > { %v1675_v5 = vld [vmem:[%s8863_s8 + $0xc00] sm:$0xff]  ;;  %8627 = vmatpush.msra.mxu2 %v1803_v3  ;;  %8628 = vmatpush.msra.mxu3 %v1803_v3  ;;  %v1676_v9 = vld [vmem:[%s8863_s8 + $0xc08] sm:$0xff]  ;;  %v1677_v13 = vld [vmem:[%s8863_s8 + $0xc10] sm:$0xff]  ;;  %271 = vst.msk [vmem:[#allocation2 + $0x20] sm:$0xff] %vm266_vm2, %v8784_v52 }
  0x1c   : > { %v1291_v6 = vld [vmem:[%s8863_s8] sm:$0xff]  ;;  %8359 = vmatmul.msk.f32.vlgmr.msra.gmra.mxu2 %vm1807_vm1, %v1547_v4  ;;  %8487 = vmatmul.msk.f32.vlgmr.msra.gmra.mxu3 %vm1807_vm1, %v1675_v5  ;;  %v1292_v10 = vld [vmem:[%s8863_s8 + $0x8] sm:$0xff]  ;;  %v1293_v14 = vld [vmem:[%s8863_s8 + $0x10] sm:$0xff]  ;;  %272 = vst.msk [vmem:[#allocation2 + $0x28] sm:$0xff] %vm266_vm2, %v8784_v52 }
  0x1d   : > { %v1419_v7 = vld [vmem:[%s8863_s8 + $0x400] sm:$0xff]  ;;  %3363 = vmatpush.msra.mxu0 %v1803_v3  ;;  %8626 = vmatpush.msra.mxu1 %v1803_v3  ;;  %v1420_v11 = vld [vmem:[%s8863_s8 + $0x408] sm:$0xff]  ;;  %v1421_v15 = vld [vmem:[%s8863_s8 + $0x410] sm:$0xff]  ;;  %273 = vst.msk [vmem:[#allocation2 + $0x30] sm:$0xff] %vm266_vm2, %v8784_v52 }
  0x1e   : > { %8103 = vmatmul.msk.f32.vlgmr.msra.gmra.mxu0 %vm1807_vm1, %v1291_v6  ;;  %8231 = vmatmul.msk.f32.vlgmr.msra.gmra.mxu1 %vm1807_vm1, %v1419_v7  ;;  %v1550_v16 = vld [vmem:[%s8863_s8 + $0x818] sm:$0xff]  ;;  %v1551_v20 = vld [vmem:[%s8863_s8 + $0x820] sm:$0xff]  ;;  %v1552_v24 = vld [vmem:[%s8863_s8 + $0x828] sm:$0xff]  ;;  %274 = vst.msk [vmem:[#allocation2 + $0x38] sm:$0xff] %vm266_vm2, %v8784_v52 }
  0x1f   : > { %v1678_v17 = vld [vmem:[%s8863_s8 + $0xc18] sm:$0xff]  ;;  %v1679_v21 = vld [vmem:[%s8863_s8 + $0xc20] sm:$0xff]  ;;  %v1680_v25 = vld [vmem:[%s8863_s8 + $0xc28] sm:$0xff]  ;;  %275 = vst.msk [vmem:[#allocation2 + $0x40] sm:$0xff] %vm266_vm2, %v8784_v52 }
  0x20   : > { %v1294_v18 = vld [vmem:[%s8863_s8 + $0x18] sm:$0xff]  ;;  %v1295_v22 = vld [vmem:[%s8863_s8 + $0x20] sm:$0xff]  ;;  %v1296_v26 = vld [vmem:[%s8863_s8 + $0x28] sm:$0xff]  ;;  %276 = vst.msk [vmem:[#allocation2 + $0x48] sm:$0xff] %vm266_vm2, %v8784_v52 }
  0x21   : > { %v1422_v19 = vld [vmem:[%s8863_s8 + $0x418] sm:$0xff]  ;;  %v1423_v23 = vld [vmem:[%s8863_s8 + $0x420] sm:$0xff]  ;;  %v1424_v27 = vld [vmem:[%s8863_s8 + $0x428] sm:$0xff]  ;;  %277 = vst.msk [vmem:[#allocation2 + $0x50] sm:$0xff] %vm266_vm2, %v8784_v52 }
  0x22   : > { %v1553_v28 = vld [vmem:[%s8863_s8 + $0x830] sm:$0xff]  ;;  %v1554_v32 = vld [vmem:[%s8863_s8 + $0x838] sm:$0xff]  ;;  %v1555_v36 = vld [vmem:[%s8863_s8 + $0x840] sm:$0xff]  ;;  %278 = vst.msk [vmem:[#allocation2 + $0x58] sm:$0xff] %vm266_vm2, %v8784_v52 }
  0x23   : > { %v1681_v29 = vld [vmem:[%s8863_s8 + $0xc30] sm:$0xff]  ;;  %v1682_v33 = vld [vmem:[%s8863_s8 + $0xc38] sm:$0xff]  ;;  %v1683_v37 = vld [vmem:[%s8863_s8 + $0xc40] sm:$0xff]  ;;  %279 = vst.msk [vmem:[#allocation2 + $0x60] sm:$0xff] %vm266_vm2, %v8784_v52 }
  0x24   : > { %8360 = vmatmul.msk.f32.gmra.mxu2 %vm1807_vm1, %v1548_v8  ;;  %8488 = vmatmul.msk.f32.gmra.mxu3 %vm1807_vm1, %v1676_v9  ;;  %v1297_v30 = vld [vmem:[%s8863_s8 + $0x30] sm:$0xff]  ;;  %v1298_v34 = vld [vmem:[%s8863_s8 + $0x38] sm:$0xff]  ;;  %v1299_v38 = vld [vmem:[%s8863_s8 + $0x40] sm:$0xff]  ;;  %280 = vst.msk [vmem:[#allocation2 + $0x68] sm:$0xff] %vm266_vm2, %v8784_v52 }
  0x25   : > { %v1425_v31 = vld [vmem:[%s8863_s8 + $0x430] sm:$0xff]  ;;  %v1426_v35 = vld [vmem:[%s8863_s8 + $0x438] sm:$0xff]  ;;  %v1427_v39 = vld [vmem:[%s8863_s8 + $0x440] sm:$0xff]  ;;  %281 = vst.msk [vmem:[#allocation2 + $0x70] sm:$0xff] %vm266_vm2, %v8784_v52 }
  0x26   : > { %8104 = vmatmul.msk.f32.gmra.mxu0 %vm1807_vm1, %v1292_v10  ;;  %8232 = vmatmul.msk.f32.gmra.mxu1 %vm1807_vm1, %v1420_v11  ;;  %v1556_v40 = vld [vmem:[%s8863_s8 + $0x848] sm:$0xff]  ;;  %v1557_v44 = vld [vmem:[%s8863_s8 + $0x850] sm:$0xff]  ;;  %v1558_v48 = vld [vmem:[%s8863_s8 + $0x858] sm:$0xff]  ;;  %282 = vst.msk [vmem:[#allocation2 + $0x78] sm:$0xff] %vm266_vm2, %v8784_v52 }
  0x27   : > { %v1684_v41 = vld [vmem:[%s8863_s8 + $0xc48] sm:$0xff]  ;;  %v1685_v45 = vld [vmem:[%s8863_s8 + $0xc50] sm:$0xff]  ;;  %v1686_v49 = vld [vmem:[%s8863_s8 + $0xc58] sm:$0xff]  ;;  %283 = vst.msk [vmem:[#allocation2 + $0x80] sm:$0xff] %vm266_vm2, %v8784_v52 }
  0x28   : > { %v1300_v42 = vld [vmem:[%s8863_s8 + $0x48] sm:$0xff]  ;;  %v1301_v46 = vld [vmem:[%s8863_s8 + $0x50] sm:$0xff]  ;;  %v1302_v50 = vld [vmem:[%s8863_s8 + $0x58] sm:$0xff]  ;;  %284 = vst.msk [vmem:[#allocation2 + $0x88] sm:$0xff] %vm266_vm2, %v8784_v52 }
  0x29   : > { %v1428_v43 = vld [vmem:[%s8863_s8 + $0x448] sm:$0xff]  ;;  %v1429_v47 = vld [vmem:[%s8863_s8 + $0x450] sm:$0xff]  ;;  %v1430_v51 = vld [vmem:[%s8863_s8 + $0x458] sm:$0xff]  ;;  %285 = vst.msk [vmem:[#allocation2 + $0x90] sm:$0xff] %vm266_vm2, %v8784_v52 }
  0x2a   : > { %v1559_v53 = vld [vmem:[%s8863_s8 + $0x860] sm:$0xff]  ;;  %v1560_v57 = vld [vmem:[%s8863_s8 + $0x868] sm:$0xff]  ;;  %v1561_v61 = vld [vmem:[%s8863_s8 + $0x870] sm:$0xff]  ;;  %286 = vst.msk [vmem:[#allocation2 + $0x98] sm:$0xff] %vm266_vm2, %v8784_v52 }
  0x2b   : > { %v1687_v54 = vld [vmem:[%s8863_s8 + $0xc60] sm:$0xff]  ;;  %v1688_v58 = vld [vmem:[%s8863_s8 + $0xc68] sm:$0xff]  ;;  %v1689_v62 = vld [vmem:[%s8863_s8 + $0xc70] sm:$0xff]  ;;  %287 = vst.msk [vmem:[#allocation2 + $0xa0] sm:$0xff] %vm266_vm2, %v8784_v52 }
  0x2c   : > { %8361 = vmatmul.msk.f32.gmra.mxu2 %vm1807_vm1, %v1549_v12  ;;  %8489 = vmatmul.msk.f32.gmra.mxu3 %vm1807_vm1, %v1677_v13  ;;  %v1303_v55 = vld [vmem:[%s8863_s8 + $0x60] sm:$0xff]  ;;  %v1304_v59 = vld [vmem:[%s8863_s8 + $0x68] sm:$0xff]  ;;  %v1305_v63 = vld [vmem:[%s8863_s8 + $0x70] sm:$0xff]  ;;  %288 = vst.msk [vmem:[#allocation2 + $0xa8] sm:$0xff] %vm266_vm2, %v8784_v52 }
  0x2d   : > { %v1431_v56 = vld [vmem:[%s8863_s8 + $0x460] sm:$0xff]  ;;  %v1432_v60 = vld [vmem:[%s8863_s8 + $0x468] sm:$0xff]  ;;  %v1433_v0 = vld [vmem:[%s8863_s8 + $0x470] sm:$0xff]  ;;  %289 = vst.msk [vmem:[#allocation2 + $0xb0] sm:$0xff] %vm266_vm2, %v8784_v52 }
  0x2e   : > { %8105 = vmatmul.msk.f32.gmra.mxu0 %vm1807_vm1, %v1293_v14  ;;  %8233 = vmatmul.msk.f32.gmra.mxu1 %vm1807_vm1, %v1421_v15  ;;  %290 = vst.msk [vmem:[#allocation2 + $0xb8] sm:$0xff] %vm266_vm2, %v8784_v52  ;;  %v1562_v1 = vld [vmem:[%s8863_s8 + $0x878] sm:$0xff]  ;;  %v1563_v5 = vld [vmem:[%s8863_s8 + $0x880] sm:$0xff] }
  0x2f   : > { %291 = vst.msk [vmem:[#allocation2 + $0xc0] sm:$0xff] %vm266_vm2, %v8784_v52  ;;  %v1690_v2 = vld [vmem:[%s8863_s8 + $0xc78] sm:$0xff]  ;;  %v1691_v6 = vld [vmem:[%s8863_s8 + $0xc80] sm:$0xff] }
  0x30   : > { %292 = vst.msk [vmem:[#allocation2 + $0xc8] sm:$0xff] %vm266_vm2, %v8784_v52  ;;  %v1306_v3 = vld [vmem:[%s8863_s8 + $0x78] sm:$0xff]  ;;  %v779_v7 = vld [vmem:[#allocation2] sm:$0xff] }
  0x31   : > { %293 = vst.msk [vmem:[#allocation2 + $0xd0] sm:$0xff] %vm266_vm2, %v8784_v52  ;;  %v1434_v4 = vld [vmem:[%s8863_s8 + $0x478] sm:$0xff]  ;;  %v8677_v10 = vld [vmem:[#allocation5] ss:$0 sm:$0xff] }
  0x32   : > { %294 = vst.msk [vmem:[#allocation2 + $0xd8] sm:$0xff] %vm266_vm2, %v8784_v52 }
  0x33   : > { %295 = vst.msk [vmem:[#allocation2 + $0xe0] sm:$0xff] %vm266_vm2, %v8784_v52 }
  0x34   : > { %8362 = vmatmul.msk.f32.gmra.mxu2 %vm1807_vm1, %v1550_v16  ;;  %8490 = vmatmul.msk.f32.gmra.mxu3 %vm1807_vm1, %v1678_v17  ;;  %296 = vst.msk [vmem:[#allocation2 + $0xe8] sm:$0xff] %vm266_vm2, %v8784_v52  ;;  %v1307_v17 = vld [vmem:[%s8863_s8 + $0x80] sm:$0xff] }
  0x35   : > { %297 = vst.msk [vmem:[#allocation2 + $0xf0] sm:$0xff] %vm266_vm2, %v8784_v52 }
  0x36   : > { %8106 = vmatmul.msk.f32.gmra.mxu0 %vm1807_vm1, %v1294_v18  ;;  %8234 = vmatmul.msk.f32.gmra.mxu1 %vm1807_vm1, %v1422_v19  ;;  %298 = vst.msk [vmem:[#allocation2 + $0xf8] sm:$0xff] %vm266_vm2, %v8784_v52  ;;  %v1435_v18 = vld [vmem:[%s8863_s8 + $0x480] sm:$0xff]  ;;  %v1564_v19 = vld [vmem:[%s8863_s8 + $0x888] sm:$0xff] }
  0x37   : > { %299 = vst.msk [vmem:[#allocation2 + $0x100] sm:$0xff] %vm266_vm2, %v8784_v52 }
  0x38   : > { %300 = vst.msk [vmem:[#allocation2 + $0x108] sm:$0xff] %vm266_vm2, %v8784_v52 }
  0x39   : > { %301 = vst.msk [vmem:[#allocation2 + $0x110] sm:$0xff] %vm266_vm2, %v8784_v52 }
  0x3a   : > { %302 = vst.msk [vmem:[#allocation2 + $0x118] sm:$0xff] %vm266_vm2, %v8784_v52 }
  0x3b   : > { %303 = vst.msk [vmem:[#allocation2 + $0x120] sm:$0xff] %vm266_vm2, %v8784_v52 }
  0x3c   : > { %8363 = vmatmul.msk.f32.gmra.mxu2 %vm1807_vm1, %v1551_v20  ;;  %8491 = vmatmul.msk.f32.gmra.mxu3 %vm1807_vm1, %v1679_v21  ;;  %304 = vst.msk [vmem:[#allocation2 + $0x128] sm:$0xff] %vm266_vm2, %v8784_v52  ;;  %v1692_v20 = vld [vmem:[%s8863_s8 + $0xc88] sm:$0xff] }
  0x3d   : > { %305 = vst.msk [vmem:[#allocation2 + $0x130] sm:$0xff] %vm266_vm2, %v8784_v52 }
  0x3e   : > { %8107 = vmatmul.msk.f32.gmra.mxu0 %vm1807_vm1, %v1295_v22  ;;  %8235 = vmatmul.msk.f32.gmra.mxu1 %vm1807_vm1, %v1423_v23  ;;  %306 = vst.msk [vmem:[#allocation2 + $0x138] sm:$0xff] %vm266_vm2, %v8784_v52 }
  0x3f   : > { %307 = vst.msk [vmem:[#allocation2 + $0x140] sm:$0xff] %vm266_vm2, %v8784_v52 }
  0x40   : > { %308 = vst.msk [vmem:[#allocation2 + $0x148] sm:$0xff] %vm266_vm2, %v8784_v52 }
  0x41   : > { %309 = vst.msk [vmem:[#allocation2 + $0x150] sm:$0xff] %vm266_vm2, %v8784_v52 }
  0x42   : > { %310 = vst.msk [vmem:[#allocation2 + $0x158] sm:$0xff] %vm266_vm2, %v8784_v52 }
  0x43   : > { %311 = vst.msk [vmem:[#allocation2 + $0x160] sm:$0xff] %vm266_vm2, %v8784_v52 }
  0x44   : > { %8364 = vmatmul.msk.f32.gmra.mxu2 %vm1807_vm1, %v1552_v24  ;;  %8492 = vmatmul.msk.f32.gmra.mxu3 %vm1807_vm1, %v1680_v25  ;;  %312 = vst.msk [vmem:[#allocation2 + $0x168] sm:$0xff] %vm266_vm2, %v8784_v52  ;;  %v1308_v25 = vld [vmem:[%s8863_s8 + $0x88] sm:$0xff] }
  0x45   : > { %313 = vst.msk [vmem:[#allocation2 + $0x170] sm:$0xff] %vm266_vm2, %v8784_v52 }
  0x46   : > { %8108 = vmatmul.msk.f32.gmra.mxu0 %vm1807_vm1, %v1296_v26  ;;  %8236 = vmatmul.msk.f32.gmra.mxu1 %vm1807_vm1, %v1424_v27  ;;  %314 = vst.msk [vmem:[#allocation2 + $0x178] sm:$0xff] %vm266_vm2, %v8784_v52  ;;  %v1436_v26 = vld [vmem:[%s8863_s8 + $0x488] sm:$0xff]  ;;  %v1565_v27 = vld [vmem:[%s8863_s8 + $0x890] sm:$0xff] }
  0x47   : > { %315 = vst.msk [vmem:[#allocation2 + $0x180] sm:$0xff] %vm266_vm2, %v8784_v52 }
  0x48   : > { %316 = vst.msk [vmem:[#allocation2 + $0x188] sm:$0xff] %vm266_vm2, %v8784_v52 }
  0x49   : > { %317 = vst.msk [vmem:[#allocation2 + $0x190] sm:$0xff] %vm266_vm2, %v8784_v52 }
  0x4a   : > { %318 = vst.msk [vmem:[#allocation2 + $0x198] sm:$0xff] %vm266_vm2, %v8784_v52 }
  0x4b   : > { %319 = vst.msk [vmem:[#allocation2 + $0x1a0] sm:$0xff] %vm266_vm2, %v8784_v52 }
  0x4c   : > { %8365 = vmatmul.msk.f32.gmra.mxu2 %vm1807_vm1, %v1553_v28  ;;  %8493 = vmatmul.msk.f32.gmra.mxu3 %vm1807_vm1, %v1681_v29  ;;  %320 = vst.msk [vmem:[#allocation2 + $0x1a8] sm:$0xff] %vm266_vm2, %v8784_v52  ;;  %v1693_v28 = vld [vmem:[%s8863_s8 + $0xc90] sm:$0xff] }
  0x4d   : > { %321 = vst.msk [vmem:[#allocation2 + $0x1b0] sm:$0xff] %vm266_vm2, %v8784_v52 }
  0x4e   : > { %8109 = vmatmul.msk.f32.gmra.mxu0 %vm1807_vm1, %v1297_v30  ;;  %8237 = vmatmul.msk.f32.gmra.mxu1 %vm1807_vm1, %v1425_v31  ;;  %322 = vst.msk [vmem:[#allocation2 + $0x1b8] sm:$0xff] %vm266_vm2, %v8784_v52 }
  0x4f   : > { %323 = vst.msk [vmem:[#allocation2 + $0x1c0] sm:$0xff] %vm266_vm2, %v8784_v52 }
  0x50   : > { %324 = vst.msk [vmem:[#allocation2 + $0x1c8] sm:$0xff] %vm266_vm2, %v8784_v52 }
  0x51   : > { %325 = vst.msk [vmem:[#allocation2 + $0x1d0] sm:$0xff] %vm266_vm2, %v8784_v52 }
  0x52   : > { %326 = vst.msk [vmem:[#allocation2 + $0x1d8] sm:$0xff] %vm266_vm2, %v8784_v52 }
  0x53   : > { %327 = vst.msk [vmem:[#allocation2 + $0x1e0] sm:$0xff] %vm266_vm2, %v8784_v52 }
  0x54   : > { %8366 = vmatmul.msk.f32.gmra.mxu2 %vm1807_vm1, %v1554_v32  ;;  %8494 = vmatmul.msk.f32.gmra.mxu3 %vm1807_vm1, %v1682_v33  ;;  %328 = vst.msk [vmem:[#allocation2 + $0x1e8] sm:$0xff] %vm266_vm2, %v8784_v52  ;;  %v1309_v33 = vld [vmem:[%s8863_s8 + $0x90] sm:$0xff] }
  0x55   : > { %329 = vst.msk [vmem:[#allocation2 + $0x1f0] sm:$0xff] %vm266_vm2, %v8784_v52 }
  0x56   : > { %8110 = vmatmul.msk.f32.gmra.mxu0 %vm1807_vm1, %v1298_v34  ;;  %8238 = vmatmul.msk.f32.gmra.mxu1 %vm1807_vm1, %v1426_v35  ;;  %330 = vst.msk [vmem:[#allocation2 + $0x1f8] sm:$0xff] %vm266_vm2, %v8784_v52  ;;  %v1437_v34 = vld [vmem:[%s8863_s8 + $0x490] sm:$0xff]  ;;  %v1566_v35 = vld [vmem:[%s8863_s8 + $0x898] sm:$0xff] }
  0x57   : > { %331 = vst.msk [vmem:[#allocation2 + $0x200] sm:$0xff] %vm266_vm2, %v8784_v52 }
  0x58   : > { %332 = vst.msk [vmem:[#allocation2 + $0x208] sm:$0xff] %vm266_vm2, %v8784_v52 }
  0x59   : > { %333 = vst.msk [vmem:[#allocation2 + $0x210] sm:$0xff] %vm266_vm2, %v8784_v52 }
  0x5a   : > { %334 = vst.msk [vmem:[#allocation2 + $0x218] sm:$0xff] %vm266_vm2, %v8784_v52 }
  0x5b   : > { %335 = vst.msk [vmem:[#allocation2 + $0x220] sm:$0xff] %vm266_vm2, %v8784_v52 }
  0x5c   : > { %8367 = vmatmul.msk.f32.gmra.mxu2 %vm1807_vm1, %v1555_v36  ;;  %8495 = vmatmul.msk.f32.gmra.mxu3 %vm1807_vm1, %v1683_v37  ;;  %336 = vst.msk [vmem:[#allocation2 + $0x228] sm:$0xff] %vm266_vm2, %v8784_v52  ;;  %v1694_v36 = vld [vmem:[%s8863_s8 + $0xc98] sm:$0xff] }
  0x5d   : > { %337 = vst.msk [vmem:[#allocation2 + $0x230] sm:$0xff] %vm266_vm2, %v8784_v52 }
  0x5e   : > { %8111 = vmatmul.msk.f32.gmra.mxu0 %vm1807_vm1, %v1299_v38  ;;  %8239 = vmatmul.msk.f32.gmra.mxu1 %vm1807_vm1, %v1427_v39  ;;  %338 = vst.msk [vmem:[#allocation2 + $0x238] sm:$0xff] %vm266_vm2, %v8784_v52 }
  0x5f   : > { %339 = vst.msk [vmem:[#allocation2 + $0x240] sm:$0xff] %vm266_vm2, %v8784_v52 }
  0x60   : > { %340 = vst.msk [vmem:[#allocation2 + $0x248] sm:$0xff] %vm266_vm2, %v8784_v52 }
  0x61   : > { %341 = vst.msk [vmem:[#allocation2 + $0x250] sm:$0xff] %vm266_vm2, %v8784_v52 }
  0x62   : > { %342 = vst.msk [vmem:[#allocation2 + $0x258] sm:$0xff] %vm266_vm2, %v8784_v52 }
  0x63   : > { %343 = vst.msk [vmem:[#allocation2 + $0x260] sm:$0xff] %vm266_vm2, %v8784_v52 }
  0x64   : > { %8368 = vmatmul.msk.f32.gmra.mxu2 %vm1807_vm1, %v1556_v40  ;;  %8496 = vmatmul.msk.f32.gmra.mxu3 %vm1807_vm1, %v1684_v41  ;;  %344 = vst.msk [vmem:[#allocation2 + $0x268] sm:$0xff] %vm266_vm2, %v8784_v52 }
  0x65   : > { %345 = vst.msk [vmem:[#allocation2 + $0x270] sm:$0xff] %vm266_vm2, %v8784_v52 }
  0x66   : > { %8112 = vmatmul.msk.f32.gmra.mxu0 %vm1807_vm1, %v1300_v42  ;;  %8240 = vmatmul.msk.f32.gmra.mxu1 %vm1807_vm1, %v1428_v43  ;;  %346 = vst.msk [vmem:[#allocation2 + $0x278] sm:$0xff] %vm266_vm2, %v8784_v52  ;;  %v1310_v42 = vld [vmem:[%s8863_s8 + $0x98] sm:$0xff] }
  0x67   : > { %347 = vst.msk [vmem:[#allocation2 + $0x280] sm:$0xff] %vm266_vm2, %v8784_v52  ;;  %v1438_v43 = vld [vmem:[%s8863_s8 + $0x498] sm:$0xff] }
  0x68   : > { %348 = vst.msk [vmem:[#allocation2 + $0x288] sm:$0xff] %vm266_vm2, %v8784_v52 }
  0x69   : > { %349 = vst.msk [vmem:[#allocation2 + $0x290] sm:$0xff] %vm266_vm2, %v8784_v52 }
  0x6a   : > { %350 = vst.msk [vmem:[#allocation2 + $0x298] sm:$0xff] %vm266_vm2, %v8784_v52 }
  0x6b   : > { %351 = vst.msk [vmem:[#allocation2 + $0x2a0] sm:$0xff] %vm266_vm2, %v8784_v52 }
  0x6c   : > { %8369 = vmatmul.msk.f32.gmra.mxu2 %vm1807_vm1, %v1557_v44  ;;  %8497 = vmatmul.msk.f32.gmra.mxu3 %vm1807_vm1, %v1685_v45  ;;  %352 = vst.msk [vmem:[#allocation2 + $0x2a8] sm:$0xff] %vm266_vm2, %v8784_v52 }
  0x6d   : > { %353 = vst.msk [vmem:[#allocation2 + $0x2b0] sm:$0xff] %vm266_vm2, %v8784_v52 }
  0x6e   : > { %8113 = vmatmul.msk.f32.gmra.mxu0 %vm1807_vm1, %v1301_v46  ;;  %8241 = vmatmul.msk.f32.gmra.mxu1 %vm1807_vm1, %v1429_v47  ;;  %354 = vst.msk [vmem:[#allocation2 + $0x2b8] sm:$0xff] %vm266_vm2, %v8784_v52  ;;  %v1567_v46 = vld [vmem:[%s8863_s8 + $0x8a0] sm:$0xff] }
  0x6f   : > { %355 = vst.msk [vmem:[#allocation2 + $0x2c0] sm:$0xff] %vm266_vm2, %v8784_v52  ;;  %v1695_v47 = vld [vmem:[%s8863_s8 + $0xca0] sm:$0xff] }
  0x70   : > { %356 = vst.msk [vmem:[#allocation2 + $0x2c8] sm:$0xff] %vm266_vm2, %v8784_v52 }
  0x71   : > { %357 = vst.msk [vmem:[#allocation2 + $0x2d0] sm:$0xff] %vm266_vm2, %v8784_v52 }
  0x72   : > { %358 = vst.msk [vmem:[#allocation2 + $0x2d8] sm:$0xff] %vm266_vm2, %v8784_v52 }
  0x73   : > { %359 = vst.msk [vmem:[#allocation2 + $0x2e0] sm:$0xff] %vm266_vm2, %v8784_v52 }
  0x74   : > { %8370 = vmatmul.msk.f32.gmra.mxu2 %vm1807_vm1, %v1558_v48  ;;  %8498 = vmatmul.msk.f32.gmra.mxu3 %vm1807_vm1, %v1686_v49  ;;  %360 = vst.msk [vmem:[#allocation2 + $0x2e8] sm:$0xff] %vm266_vm2, %v8784_v52  ;;  %v780_v49 = vld [vmem:[#allocation2 + $0x8] sm:$0xff] }
  0x75   : > { %361 = vst.msk [vmem:[#allocation2 + $0x2f0] sm:$0xff] %vm266_vm2, %v8784_v52 }
  0x76   : > { %8114 = vmatmul.msk.f32.gmra.mxu0 %vm1807_vm1, %v1302_v50  ;;  %8242 = vmatmul.msk.f32.gmra.mxu1 %vm1807_vm1, %v1430_v51  ;;  %362 = vst.msk [vmem:[#allocation2 + $0x2f8] sm:$0xff] %vm266_vm2, %v8784_v52 }
  0x77   : > { %363 = vst.msk [vmem:[#allocation2 + $0x300] sm:$0xff] %vm266_vm2, %v8784_v52 }
  0x78   : > { %364 = vst.msk [vmem:[#allocation2 + $0x308] sm:$0xff] %vm266_vm2, %v8784_v52 }
  0x79   : > { %365 = vst.msk [vmem:[#allocation2 + $0x310] sm:$0xff] %vm266_vm2, %v8784_v52 }
  0x7a   : > { %366 = vst.msk [vmem:[#allocation2 + $0x318] sm:$0xff] %vm266_vm2, %v8784_v52 }
  0x7b   : > { %367 = vst.msk [vmem:[#allocation2 + $0x320] sm:$0xff] %vm266_vm2, %v8784_v52 }
  0x7c   : > { %8371 = vmatmul.msk.f32.gmra.mxu2 %vm1807_vm1, %v1559_v53  ;;  %8499 = vmatmul.msk.f32.gmra.mxu3 %vm1807_vm1, %v1687_v54  ;;  %368 = vst.msk [vmem:[#allocation2 + $0x328] sm:$0xff] %vm266_vm2, %v8784_v52 }
  0x7d   : > { %369 = vst.msk [vmem:[#allocation2 + $0x330] sm:$0xff] %vm266_vm2, %v8784_v52 }
  0x7e   : > { %8115 = vmatmul.msk.f32.gmra.mxu0 %vm1807_vm1, %v1303_v55  ;;  %8243 = vmatmul.msk.f32.gmra.mxu1 %vm1807_vm1, %v1431_v56  ;;  %370 = vst.msk [vmem:[#allocation2 + $0x338] sm:$0xff] %vm266_vm2, %v8784_v52 }
  0x7f   : > { %371 = vst.msk [vmem:[#allocation2 + $0x340] sm:$0xff] %vm266_vm2, %v8784_v52 }
  0x80   : > { %372 = vst.msk [vmem:[#allocation2 + $0x348] sm:$0xff] %vm266_vm2, %v8784_v52 }
  0x81   : > { %373 = vst.msk [vmem:[#allocation2 + $0x350] sm:$0xff] %vm266_vm2, %v8784_v52 }
  0x82   : > { %374 = vst.msk [vmem:[#allocation2 + $0x358] sm:$0xff] %vm266_vm2, %v8784_v52 }
  0x83   : > { %375 = vst.msk [vmem:[#allocation2 + $0x360] sm:$0xff] %vm266_vm2, %v8784_v52 }
  0x84   : > { %8372 = vmatmul.msk.f32.gmra.mxu2 %vm1807_vm1, %v1560_v57  ;;  %8500 = vmatmul.msk.f32.gmra.mxu3 %vm1807_vm1, %v1688_v58  ;;  %376 = vst.msk [vmem:[#allocation2 + $0x368] sm:$0xff] %vm266_vm2, %v8784_v52 }
  0x85   : > { %377 = vst.msk [vmem:[#allocation2 + $0x370] sm:$0xff] %vm266_vm2, %v8784_v52 }
  0x86   : > { %8116 = vmatmul.msk.f32.gmra.mxu0 %vm1807_vm1, %v1304_v59  ;;  %8244 = vmatmul.msk.f32.gmra.mxu1 %vm1807_vm1, %v1432_v60  ;;  %378 = vst.msk [vmem:[#allocation2 + $0x378] sm:$0xff] %vm266_vm2, %v8784_v52  ;;  %v781_v60 = vld [vmem:[#allocation2 + $0x10] sm:$0xff] }
  0x87   : > { %379 = vst.msk [vmem:[#allocation2 + $0x380] sm:$0xff] %vm266_vm2, %v8784_v52 }
  0x88   : > { %380 = vst.msk [vmem:[#allocation2 + $0x388] sm:$0xff] %vm266_vm2, %v8784_v52 }
  0x89   : > { %381 = vst.msk [vmem:[#allocation2 + $0x390] sm:$0xff] %vm266_vm2, %v8784_v52 }
  0x8a   : > { %382 = vst.msk [vmem:[#allocation2 + $0x398] sm:$0xff] %vm266_vm2, %v8784_v52 }
  0x8b   : > { %383 = vst.msk [vmem:[#allocation2 + $0x3a0] sm:$0xff] %vm266_vm2, %v8784_v52 }
  0x8c   : > { %8373 = vmatmul.msk.f32.gmra.mxu2 %vm1807_vm1, %v1561_v61  ;;  %8501 = vmatmul.msk.f32.gmra.mxu3 %vm1807_vm1, %v1689_v62  ;;  %384 = vst.msk [vmem:[#allocation2 + $0x3a8] sm:$0xff] %vm266_vm2, %v8784_v52 }
  0x8d   : > { %385 = vst.msk [vmem:[#allocation2 + $0x3b0] sm:$0xff] %vm266_vm2, %v8784_v52 }
  0x8e   : > { %8117 = vmatmul.msk.f32.gmra.mxu0 %vm1807_vm1, %v1305_v63  ;;  %8245 = vmatmul.msk.f32.gmra.mxu1 %vm1807_vm1, %v1433_v0  ;;  %386 = vst.msk [vmem:[#allocation2 + $0x3b8] sm:$0xff] %vm266_vm2, %v8784_v52  ;;  %v1311_v0 = vld [vmem:[%s8863_s8 + $0xa0] sm:$0xff] }
  0x8f   : > { %387 = vst.msk [vmem:[#allocation2 + $0x3c0] sm:$0xff] %vm266_vm2, %v8784_v52 }
  0x90   : > { %388 = vst.msk [vmem:[#allocation2 + $0x3c8] sm:$0xff] %vm266_vm2, %v8784_v52 }
  0x91   : > { %389 = vst.msk [vmem:[#allocation2 + $0x3d0] sm:$0xff] %vm266_vm2, %v8784_v52 }
  0x92   : > { %390 = vst.msk [vmem:[#allocation2 + $0x3d8] sm:$0xff] %vm266_vm2, %v8784_v52 }
  0x93   : > { %391 = vst.msk [vmem:[#allocation2 + $0x3e0] sm:$0xff] %vm266_vm2, %v8784_v52 }
  0x94   : > { %8374 = vmatmul.msk.f32.gmra.mxu2 %vm1807_vm1, %v1562_v1  ;;  %8502 = vmatmul.msk.f32.gmra.mxu3 %vm1807_vm1, %v1690_v2  ;;  %392 = vst.msk [vmem:[#allocation2 + $0x3e8] sm:$0xff] %vm266_vm2, %v8784_v52  ;;  %v1439_v1 = vld [vmem:[%s8863_s8 + $0x4a0] sm:$0xff] }
  0x95   : > { %393 = vst.msk [vmem:[#allocation2 + $0x3f0] sm:$0xff] %vm266_vm2, %v8784_v52 }
  0x96   : > { %8118 = vmatmul.msk.f32.gmra.mxu0 %vm1807_vm1, %v1306_v3  ;;  %8246 = vmatmul.msk.f32.gmra.mxu1 %vm1807_vm1, %v1434_v4  ;;  %394 = vst.msk [vmem:[#allocation2 + $0x3f8] sm:$0xff] %vm266_vm2, %v8784_v52 }
  0x97   : > { %395 = vst.msk [vmem:[#allocation2 + $0x400] sm:$0xff] %vm266_vm2, %v8784_v52 }
  0x98   : > { %396 = vst.msk [vmem:[#allocation2 + $0x408] sm:$0xff] %vm266_vm2, %v8784_v52 }
  0x99   : > { %397 = vst.msk [vmem:[#allocation2 + $0x410] sm:$0xff] %vm266_vm2, %v8784_v52 }
  0x9a   : > { %398 = vst.msk [vmem:[#allocation2 + $0x418] sm:$0xff] %vm266_vm2, %v8784_v52 }
  0x9b   : > { %v3365_v8 = vpop.f32.mrf.mxu0  ;;  %399 = vst.msk [vmem:[#allocation2 + $0x420] sm:$0xff] %vm266_vm2, %v8784_v52  ;;  %v9963_v14 = vpop.f32.mrf.mxu1 }
  0x9c   : > { %8375 = vmatmul.msk.f32.gmra.mxu2 %vm1807_vm1, %v1563_v5  ;;  %8503 = vmatmul.msk.f32.gmra.mxu3 %vm1807_vm1, %v1691_v6  ;;  %v4901_v9 = vadd.f32 %v3365_v8, %v779_v7  ;;  %400 = vst.msk [vmem:[#allocation2 + $0x428] sm:$0xff] %vm266_vm2, %v8784_v52  ;;  %v1568_v6 = vld [vmem:[%s8863_s8 + $0x8a8] sm:$0xff] }
  0x9d   : > { %401 = vst.msk [vmem:[#allocation2 + $0x430] sm:$0xff] %vm266_vm2, %v8784_v52  ;;  %v1696_v7 = vld [vmem:[%s8863_s8 + $0xca8] sm:$0xff] }
  0x9e   : > { %5414 = vst.msk [vmem:[#allocation2] sm:$0xff] %vm266_vm2, %v4901_v9  ;;  %8119 = vmatmul.msk.f32.gmra.mxu0 %vm1807_vm1, %v1307_v17  ;;  %8247 = vmatmul.msk.f32.gmra.mxu1 %vm1807_vm1, %v1435_v18  ;;  %v907_v41 = vld [vmem:[#allocation2 + $0x400] sm:$0xff]  ;;  %v782_v9 = vld [vmem:[#allocation2 + $0x18] sm:$0xff] }
  0x9f   : > { %402 = vst.msk [vmem:[#allocation2 + $0x438] sm:$0xff] %vm266_vm2, %v8784_v52  ;;  %v9967_v15 = vpop.f32.mrf.mxu2  ;;  %v9969_v16 = vpop.f32.mrf.mxu3  ;;  %v5029_v48 = vadd.f32 %v9963_v14, %v907_v41  ;;  %v908_v51 = vld [vmem:[#allocation2 + $0x408] sm:$0xff] }
  0xa0   : > { %403 = vst.msk [vmem:[#allocation2 + $0x440] sm:$0xff] %vm266_vm2, %v8784_v52  ;;  %v909_v63 = vld [vmem:[#allocation2 + $0x410] sm:$0xff] }
  0xa1   : > { %404 = vst.msk [vmem:[#allocation2 + $0x448] sm:$0xff] %vm266_vm2, %v8784_v52 }
  0xa2   : > { %405 = vst.msk [vmem:[#allocation2 + $0x450] sm:$0xff] %vm266_vm2, %v8784_v52 }
  0xa3   : > { %406 = vst.msk [vmem:[#allocation2 + $0x458] sm:$0xff] %vm266_vm2, %v8784_v52  ;;  %v9997_v21 = vpop.f32.mrf.mxu0  ;;  %v9999_v22 = vpop.f32.mrf.mxu1 }
  0xa4   : > { %407 = vst.msk [vmem:[#allocation2 + $0x460] sm:$0xff] %vm266_vm2, %v8784_v52  ;;  %8376 = vmatmul.msk.f32.gmra.mxu2 %vm1807_vm1, %v1564_v19  ;;  %8504 = vmatmul.msk.f32.gmra.mxu3 %vm1807_vm1, %v1692_v20  ;;  %v4902_v55 = vadd.f32 %v9997_v21, %v780_v49  ;;  %v5030_v59 = vadd.f32 %v9999_v22, %v908_v51 }
  0xa5   : > { %v5929_v11 = vld [vmem:[#allocation2] sm:$0xff]  ;;  %408 = vst.msk [vmem:[#allocation2 + $0x468] sm:$0xff] %vm266_vm2, %v8784_v52 }
  0xa6   : > { %v6445_v12 = vadd.f32 %v8677_v10, %v5929_v11  ;;  %409 = vst.msk [vmem:[#allocation2 + $0x470] sm:$0xff] %vm266_vm2, %v8784_v52  ;;  %8120 = vmatmul.msk.f32.gmra.mxu0 %vm1807_vm1, %v1308_v25  ;;  %8248 = vmatmul.msk.f32.gmra.mxu1 %vm1807_vm1, %v1436_v26 }
  0xa7   : > { %410 = vst.msk [vmem:[#allocation2 + $0x478] sm:$0xff] %vm266_vm2, %v8784_v52  ;;  %v10003_v23 = vpop.f32.mrf.mxu2  ;;  %v10005_v24 = vpop.f32.mrf.mxu3 }
  0xa8   : > { %v6957_v13 = vmax.f32 %v6445_v12, 0.0  ;;  %411 = vst.msk [vmem:[#allocation2 + $0x480] sm:$0xff] %vm266_vm2, %v8784_v52 }
  0xa9   : > { %412 = vst.msk [vmem:[#allocation2 + $0x488] sm:$0xff] %vm266_vm2, %v8784_v52 }
  0xaa   : > { %7469 = vst.msk [vmem:[%s9095_s11] sm:$0xff] %vm266_vm2, %v6957_v13 }
  0xab   : > { %413 = vst.msk [vmem:[#allocation2 + $0x490] sm:$0xff] %vm266_vm2, %v8784_v52  ;;  %v10029_v29 = vpop.f32.mrf.mxu0  ;;  %v10031_v30 = vpop.f32.mrf.mxu1 }
  0xac   : > { %414 = vst.msk [vmem:[#allocation2 + $0x498] sm:$0xff] %vm266_vm2, %v8784_v52  ;;  %8377 = vmatmul.msk.f32.gmra.mxu2 %vm1807_vm1, %v1565_v27  ;;  %8505 = vmatmul.msk.f32.gmra.mxu3 %vm1807_vm1, %v1693_v28  ;;  %v4903_v4 = vadd.f32 %v10029_v29, %v781_v60  ;;  %v5031_v8 = vadd.f32 %v10031_v30, %v909_v63  ;;  %v1313_v63 = vld [vmem:[%s8863_s8 + $0xb0] sm:$0xff] }
  0xad   : > { %415 = vst.msk [vmem:[#allocation2 + $0x4a0] sm:$0xff] %vm266_vm2, %v8784_v52 }
  0xae   : > { %416 = vst.msk [vmem:[#allocation2 + $0x4a8] sm:$0xff] %vm266_vm2, %v8784_v52  ;;  %8121 = vmatmul.msk.f32.gmra.mxu0 %vm1807_vm1, %v1309_v33  ;;  %8249 = vmatmul.msk.f32.gmra.mxu1 %vm1807_vm1, %v1437_v34 }
  0xaf   : > { %417 = vst.msk [vmem:[#allocation2 + $0x4b0] sm:$0xff] %vm266_vm2, %v8784_v52  ;;  %v10035_v31 = vpop.f32.mrf.mxu2  ;;  %v10037_v32 = vpop.f32.mrf.mxu3 }
  0xb0   : > { %418 = vst.msk [vmem:[#allocation2 + $0x4b8] sm:$0xff] %vm266_vm2, %v8784_v52 }
  0xb1   : > { %419 = vst.msk [vmem:[#allocation2 + $0x4c0] sm:$0xff] %vm266_vm2, %v8784_v52 }
  0xb2   : > { %420 = vst.msk [vmem:[#allocation2 + $0x4c8] sm:$0xff] %vm266_vm2, %v8784_v52 }
  0xb3   : > { %421 = vst.msk [vmem:[#allocation2 + $0x4d0] sm:$0xff] %vm266_vm2, %v8784_v52  ;;  %v10061_v37 = vpop.f32.mrf.mxu0  ;;  %v10063_v38 = vpop.f32.mrf.mxu1 }
  0xb4   : > { %422 = vst.msk [vmem:[#allocation2 + $0x4d8] sm:$0xff] %vm266_vm2, %v8784_v52  ;;  %8378 = vmatmul.msk.f32.gmra.mxu2 %vm1807_vm1, %v1566_v35  ;;  %8506 = vmatmul.msk.f32.gmra.mxu3 %vm1807_vm1, %v1694_v36  ;;  %v4904_v13 = vadd.f32 %v10061_v37, %v782_v9  ;;  %v1698_v9 = vld [vmem:[%s8863_s8 + $0xcb8] sm:$0xff] }
  0xb5   : > { %423 = vst.msk [vmem:[#allocation2 + $0x4e0] sm:$0xff] %vm266_vm2, %v8784_v52 }
  0xb6   : > { %424 = vst.msk [vmem:[#allocation2 + $0x4e8] sm:$0xff] %vm266_vm2, %v8784_v52  ;;  %8122 = vmatmul.msk.f32.gmra.mxu0 %vm1807_vm1, %v1310_v42  ;;  %8250 = vmatmul.msk.f32.gmra.mxu1 %vm1807_vm1, %v1438_v43 }
  0xb7   : > { %425 = vst.msk [vmem:[#allocation2 + $0x4f0] sm:$0xff] %vm266_vm2, %v8784_v52  ;;  %v10067_v39 = vpop.f32.mrf.mxu2  ;;  %v10069_v40 = vpop.f32.mrf.mxu3 }
  0xb8   : > { %426 = vst.msk [vmem:[#allocation2 + $0x4f8] sm:$0xff] %vm266_vm2, %v8784_v52 }
  0xb9   : > { %427 = vst.msk [vmem:[#allocation2 + $0x500] sm:$0xff] %vm266_vm2, %v8784_v52 }
  0xba   : > { %428 = vst.msk [vmem:[#allocation2 + $0x508] sm:$0xff] %vm266_vm2, %v8784_v52 }
  0xbb   : > { %429 = vst.msk [vmem:[#allocation2 + $0x510] sm:$0xff] %vm266_vm2, %v8784_v52  ;;  %v10097_v57 = vpop.f32.mrf.mxu0  ;;  %v10099_v58 = vpop.f32.mrf.mxu1 }
  0xbc   : > { %430 = vst.msk [vmem:[#allocation2 + $0x518] sm:$0xff] %vm266_vm2, %v8784_v52  ;;  %8379 = vmatmul.msk.f32.gmra.mxu2 %vm1807_vm1, %v1567_v46  ;;  %8507 = vmatmul.msk.f32.gmra.mxu3 %vm1807_vm1, %v1695_v47 }
  0xbd   : > { %431 = vst.msk [vmem:[#allocation2 + $0x520] sm:$0xff] %vm266_vm2, %v8784_v52 }
  0xbe   : > { %432 = vst.msk [vmem:[#allocation2 + $0x528] sm:$0xff] %vm266_vm2, %v8784_v52  ;;  %8123 = vmatmul.msk.f32.gmra.mxu0 %vm1807_vm1, %v1311_v0  ;;  %8251 = vmatmul.msk.f32.gmra.mxu1 %vm1807_vm1, %v1439_v1  ;;  %v1441_v0 = vld [vmem:[%s8863_s8 + $0x4b0] sm:$0xff] }
  0xbf   : > { %433 = vst.msk [vmem:[#allocation2 + $0x530] sm:$0xff] %vm266_vm2, %v8784_v52  ;;  %v10103_v61 = vpop.f32.mrf.mxu2  ;;  %v10105_v62 = vpop.f32.mrf.mxu3 }
  0xc0   : > { %434 = vst.msk [vmem:[#allocation2 + $0x538] sm:$0xff] %vm266_vm2, %v8784_v52 }
  0xc1   : > { %435 = vst.msk [vmem:[#allocation2 + $0x540] sm:$0xff] %vm266_vm2, %v8784_v52 }
  0xc2   : > { %436 = vst.msk [vmem:[#allocation2 + $0x548] sm:$0xff] %vm266_vm2, %v8784_v52 }
  0xc3   : > { %437 = vst.msk [vmem:[#allocation2 + $0x550] sm:$0xff] %vm266_vm2, %v8784_v52  ;;  %v10129_v14 = vpop.f32.mrf.mxu0 }
  0xc4   : > { %438 = vst.msk [vmem:[#allocation2 + $0x558] sm:$0xff] %vm266_vm2, %v8784_v52  ;;  %8380 = vmatmul.msk.f32.gmra.mxu2 %vm1807_vm1, %v1568_v6  ;;  %8508 = vmatmul.msk.f32.gmra.mxu3 %vm1807_vm1, %v1696_v7 }
  0xc5   : > { %439 = vst.msk [vmem:[#allocation2 + $0x560] sm:$0xff] %vm266_vm2, %v8784_v52 }
  0xc6   : > { %440 = vst.msk [vmem:[#allocation2 + $0x568] sm:$0xff] %vm266_vm2, %v8784_v52 }
  0xc7   : > { %441 = vst.msk [vmem:[#allocation2 + $0x570] sm:$0xff] %vm266_vm2, %v8784_v52  ;;  %v10137_v19 = vpop.f32.mrf.mxu2  ;;  %v10139_v20 = vpop.f32.mrf.mxu3 }
  0xc8   : > { %442 = vst.msk [vmem:[#allocation2 + $0x578] sm:$0xff] %vm266_vm2, %v8784_v52 }
  0xc9   : > { %443 = vst.msk [vmem:[#allocation2 + $0x580] sm:$0xff] %vm266_vm2, %v8784_v52 }
  0xca   : > { %444 = vst.msk [vmem:[#allocation2 + $0x588] sm:$0xff] %vm266_vm2, %v8784_v52 }
  0xcb   : > { %445 = vst.msk [vmem:[#allocation2 + $0x590] sm:$0xff] %vm266_vm2, %v8784_v52 }
  0xcc   : > { %446 = vst.msk [vmem:[#allocation2 + $0x598] sm:$0xff] %vm266_vm2, %v8784_v52 }
  0xcd   : > { %447 = vst.msk [vmem:[#allocation2 + $0x5a0] sm:$0xff] %vm266_vm2, %v8784_v52 }
  0xce   : > { %448 = vst.msk [vmem:[#allocation2 + $0x5a8] sm:$0xff] %vm266_vm2, %v8784_v52 }
  0xcf   : > { %449 = vst.msk [vmem:[#allocation2 + $0x5b0] sm:$0xff] %vm266_vm2, %v8784_v52 }
  0xd0   : > { %450 = vst.msk [vmem:[#allocation2 + $0x5b8] sm:$0xff] %vm266_vm2, %v8784_v52 }
  0xd1   : > { %451 = vst.msk [vmem:[#allocation2 + $0x5c0] sm:$0xff] %vm266_vm2, %v8784_v52 }
  0xd2   : > { %452 = vst.msk [vmem:[#allocation2 + $0x5c8] sm:$0xff] %vm266_vm2, %v8784_v52 }
  0xd3   : > { %453 = vst.msk [vmem:[#allocation2 + $0x5d0] sm:$0xff] %vm266_vm2, %v8784_v52 }
  0xd4   : > { %454 = vst.msk [vmem:[#allocation2 + $0x5d8] sm:$0xff] %vm266_vm2, %v8784_v52 }
  0xd5   : > { %455 = vst.msk [vmem:[#allocation2 + $0x5e0] sm:$0xff] %vm266_vm2, %v8784_v52 }
  0xd6   : > { %456 = vst.msk [vmem:[#allocation2 + $0x5e8] sm:$0xff] %vm266_vm2, %v8784_v52 }
  0xd7   : > { %457 = vst.msk [vmem:[#allocation2 + $0x5f0] sm:$0xff] %vm266_vm2, %v8784_v52 }
  0xd8   : > { %458 = vst.msk [vmem:[#allocation2 + $0x5f8] sm:$0xff] %vm266_vm2, %v8784_v52 }
  0xd9   : > { %459 = vst.msk [vmem:[#allocation2 + $0x600] sm:$0xff] %vm266_vm2, %v8784_v52 }
  0xda   : > { %460 = vst.msk [vmem:[#allocation2 + $0x608] sm:$0xff] %vm266_vm2, %v8784_v52 }
  0xdb   : > { %461 = vst.msk [vmem:[#allocation2 + $0x610] sm:$0xff] %vm266_vm2, %v8784_v52 }
  0xdc   : > { %462 = vst.msk [vmem:[#allocation2 + $0x618] sm:$0xff] %vm266_vm2, %v8784_v52 }
  0xdd   : > { %463 = vst.msk [vmem:[#allocation2 + $0x620] sm:$0xff] %vm266_vm2, %v8784_v52 }
  0xde   : > { %464 = vst.msk [vmem:[#allocation2 + $0x628] sm:$0xff] %vm266_vm2, %v8784_v52 }
  0xdf   : > { %465 = vst.msk [vmem:[#allocation2 + $0x630] sm:$0xff] %vm266_vm2, %v8784_v52 }
  0xe0   : > { %466 = vst.msk [vmem:[#allocation2 + $0x638] sm:$0xff] %vm266_vm2, %v8784_v52 }
  0xe1   : > { %467 = vst.msk [vmem:[#allocation2 + $0x640] sm:$0xff] %vm266_vm2, %v8784_v52 }
  0xe2   : > { %468 = vst.msk [vmem:[#allocation2 + $0x648] sm:$0xff] %vm266_vm2, %v8784_v52 }
  0xe3   : > { %469 = vst.msk [vmem:[#allocation2 + $0x650] sm:$0xff] %vm266_vm2, %v8784_v52 }
  0xe4   : > { %470 = vst.msk [vmem:[#allocation2 + $0x658] sm:$0xff] %vm266_vm2, %v8784_v52 }
  0xe5   : > { %471 = vst.msk [vmem:[#allocation2 + $0x660] sm:$0xff] %vm266_vm2, %v8784_v52 }
  0xe6   : > { %472 = vst.msk [vmem:[#allocation2 + $0x668] sm:$0xff] %vm266_vm2, %v8784_v52 }
  0xe7   : > { %473 = vst.msk [vmem:[#allocation2 + $0x670] sm:$0xff] %vm266_vm2, %v8784_v52 }
  0xe8   : > { %474 = vst.msk [vmem:[#allocation2 + $0x678] sm:$0xff] %vm266_vm2, %v8784_v52 }
  0xe9   : > { %475 = vst.msk [vmem:[#allocation2 + $0x680] sm:$0xff] %vm266_vm2, %v8784_v52 }
  0xea   : > { %476 = vst.msk [vmem:[#allocation2 + $0x688] sm:$0xff] %vm266_vm2, %v8784_v52 }
  0xeb   : > { %477 = vst.msk [vmem:[#allocation2 + $0x690] sm:$0xff] %vm266_vm2, %v8784_v52 }
  0xec   : > { %478 = vst.msk [vmem:[#allocation2 + $0x698] sm:$0xff] %vm266_vm2, %v8784_v52 }
  0xed   : > { %479 = vst.msk [vmem:[#allocation2 + $0x6a0] sm:$0xff] %vm266_vm2, %v8784_v52 }
  0xee   : > { %480 = vst.msk [vmem:[#allocation2 + $0x6a8] sm:$0xff] %vm266_vm2, %v8784_v52 }
  0xef   : > { %481 = vst.msk [vmem:[#allocation2 + $0x6b0] sm:$0xff] %vm266_vm2, %v8784_v52 }
  0xf0   : > { %482 = vst.msk [vmem:[#allocation2 + $0x6b8] sm:$0xff] %vm266_vm2, %v8784_v52 }
  0xf1   : > { %483 = vst.msk [vmem:[#allocation2 + $0x6c0] sm:$0xff] %vm266_vm2, %v8784_v52 }
  0xf2   : > { %484 = vst.msk [vmem:[#allocation2 + $0x6c8] sm:$0xff] %vm266_vm2, %v8784_v52 }
  0xf3   : > { %485 = vst.msk [vmem:[#allocation2 + $0x6d0] sm:$0xff] %vm266_vm2, %v8784_v52 }
  0xf4   : > { %486 = vst.msk [vmem:[#allocation2 + $0x6d8] sm:$0xff] %vm266_vm2, %v8784_v52 }
  0xf5   : > { %487 = vst.msk [vmem:[#allocation2 + $0x6e0] sm:$0xff] %vm266_vm2, %v8784_v52 }
  0xf6   : > { %488 = vst.msk [vmem:[#allocation2 + $0x6e8] sm:$0xff] %vm266_vm2, %v8784_v52 }
  0xf7   : > { %489 = vst.msk [vmem:[#allocation2 + $0x6f0] sm:$0xff] %vm266_vm2, %v8784_v52 }
  0xf8   : > { %490 = vst.msk [vmem:[#allocation2 + $0x6f8] sm:$0xff] %vm266_vm2, %v8784_v52 }
  0xf9   : > { %491 = vst.msk [vmem:[#allocation2 + $0x700] sm:$0xff] %vm266_vm2, %v8784_v52 }
  0xfa   : > { %492 = vst.msk [vmem:[#allocation2 + $0x708] sm:$0xff] %vm266_vm2, %v8784_v52 }
  0xfb   : > { %493 = vst.msk [vmem:[#allocation2 + $0x710] sm:$0xff] %vm266_vm2, %v8784_v52 }
  0xfc   : > { %494 = vst.msk [vmem:[#allocation2 + $0x718] sm:$0xff] %vm266_vm2, %v8784_v52 }
  0xfd   : > { %495 = vst.msk [vmem:[#allocation2 + $0x720] sm:$0xff] %vm266_vm2, %v8784_v52 }
  0xfe   : > { %496 = vst.msk [vmem:[#allocation2 + $0x728] sm:$0xff] %vm266_vm2, %v8784_v52 }
  0xff   : > { %497 = vst.msk [vmem:[#allocation2 + $0x730] sm:$0xff] %vm266_vm2, %v8784_v52 }
 0x100   : > { %498 = vst.msk [vmem:[#allocation2 + $0x738] sm:$0xff] %vm266_vm2, %v8784_v52 }
 0x101   : > { %499 = vst.msk [vmem:[#allocation2 + $0x740] sm:$0xff] %vm266_vm2, %v8784_v52 }
 0x102   : > { %500 = vst.msk [vmem:[#allocation2 + $0x748] sm:$0xff] %vm266_vm2, %v8784_v52 }
 0x103   : > { %501 = vst.msk [vmem:[#allocation2 + $0x750] sm:$0xff] %vm266_vm2, %v8784_v52 }
 0x104   : > { %502 = vst.msk [vmem:[#allocation2 + $0x758] sm:$0xff] %vm266_vm2, %v8784_v52 }
 0x105   : > { %503 = vst.msk [vmem:[#allocation2 + $0x760] sm:$0xff] %vm266_vm2, %v8784_v52 }
 0x106   : > { %504 = vst.msk [vmem:[#allocation2 + $0x768] sm:$0xff] %vm266_vm2, %v8784_v52 }
 0x107   : > { %505 = vst.msk [vmem:[#allocation2 + $0x770] sm:$0xff] %vm266_vm2, %v8784_v52 }
 0x108   : > { %506 = vst.msk [vmem:[#allocation2 + $0x778] sm:$0xff] %vm266_vm2, %v8784_v52 }
 0x109   : > { %507 = vst.msk [vmem:[#allocation2 + $0x780] sm:$0xff] %vm266_vm2, %v8784_v52 }
 0x10a   : > { %508 = vst.msk [vmem:[#allocation2 + $0x788] sm:$0xff] %vm266_vm2, %v8784_v52 }
 0x10b   : > { %509 = vst.msk [vmem:[#allocation2 + $0x790] sm:$0xff] %vm266_vm2, %v8784_v52 }
 0x10c   : > { %510 = vst.msk [vmem:[#allocation2 + $0x798] sm:$0xff] %vm266_vm2, %v8784_v52 }
 0x10d   : > { %511 = vst.msk [vmem:[#allocation2 + $0x7a0] sm:$0xff] %vm266_vm2, %v8784_v52 }
 0x10e   : > { %512 = vst.msk [vmem:[#allocation2 + $0x7a8] sm:$0xff] %vm266_vm2, %v8784_v52 }
 0x10f   : > { %513 = vst.msk [vmem:[#allocation2 + $0x7b0] sm:$0xff] %vm266_vm2, %v8784_v52 }
 0x110   : > { %514 = vst.msk [vmem:[#allocation2 + $0x7b8] sm:$0xff] %vm266_vm2, %v8784_v52 }
 0x111   : > { %515 = vst.msk [vmem:[#allocation2 + $0x7c0] sm:$0xff] %vm266_vm2, %v8784_v52 }
 0x112   : > { %516 = vst.msk [vmem:[#allocation2 + $0x7c8] sm:$0xff] %vm266_vm2, %v8784_v52 }
 0x113   : > { %517 = vst.msk [vmem:[#allocation2 + $0x7d0] sm:$0xff] %vm266_vm2, %v8784_v52 }
 0x114   : > { %518 = vst.msk [vmem:[#allocation2 + $0x7d8] sm:$0xff] %vm266_vm2, %v8784_v52 }
 0x115   : > { %519 = vst.msk [vmem:[#allocation2 + $0x7e0] sm:$0xff] %vm266_vm2, %v8784_v52 }
 0x116   : > { %520 = vst.msk [vmem:[#allocation2 + $0x7e8] sm:$0xff] %vm266_vm2, %v8784_v52 }
 0x117   : > { %521 = vst.msk [vmem:[#allocation2 + $0x7f0] sm:$0xff] %vm266_vm2, %v8784_v52 }
 0x118   : > { %522 = vst.msk [vmem:[#allocation2 + $0x7f8] sm:$0xff] %vm266_vm2, %v8784_v52 }
 0x119   : > { %523 = vst.msk [vmem:[#allocation2 + $0x800] sm:$0xff] %vm266_vm2, %v8784_v52 }
 0x11a   : > { %524 = vst.msk [vmem:[#allocation2 + $0x808] sm:$0xff] %vm266_vm2, %v8784_v52 }
 0x11b   : > { %525 = vst.msk [vmem:[#allocation2 + $0x810] sm:$0xff] %vm266_vm2, %v8784_v52 }
 0x11c   : > { %526 = vst.msk [vmem:[#allocation2 + $0x818] sm:$0xff] %vm266_vm2, %v8784_v52 }
 0x11d   : > { %527 = vst.msk [vmem:[#allocation2 + $0x820] sm:$0xff] %vm266_vm2, %v8784_v52 }
 0x11e   : > { %528 = vst.msk [vmem:[#allocation2 + $0x828] sm:$0xff] %vm266_vm2, %v8784_v52 }
 0x11f   : > { %529 = vst.msk [vmem:[#allocation2 + $0x830] sm:$0xff] %vm266_vm2, %v8784_v52 }
 0x120   : > { %530 = vst.msk [vmem:[#allocation2 + $0x838] sm:$0xff] %vm266_vm2, %v8784_v52  ;;  %v1035_v44 = vld [vmem:[#allocation2 + $0x800] sm:$0xff] }
 0x121   : > { %531 = vst.msk [vmem:[#allocation2 + $0x840] sm:$0xff] %vm266_vm2, %v8784_v52  ;;  %v5157_v50 = vadd.f32 %v9967_v15, %v1035_v44  ;;  %v1036_v54 = vld [vmem:[#allocation2 + $0x808] sm:$0xff]  ;;  %v10131_v15 = vpop.f32.mrf.mxu1 }
 0x122   : > { %532 = vst.msk [vmem:[#allocation2 + $0x848] sm:$0xff] %vm266_vm2, %v8784_v52  ;;  %v1037_v3 = vld [vmem:[#allocation2 + $0x810] sm:$0xff] }
 0x123   : > { %533 = vst.msk [vmem:[#allocation2 + $0x850] sm:$0xff] %vm266_vm2, %v8784_v52  ;;  %v5159_v10 = vadd.f32 %v10035_v31, %v1037_v3  ;;  %v1569_v31 = vld [vmem:[%s8863_s8 + $0x8b0] sm:$0xff] }
 0x124   : > { %534 = vst.msk [vmem:[#allocation2 + $0x858] sm:$0xff] %vm266_vm2, %v8784_v52  ;;  %8381 = vmatmul.msk.f32.gmra.mxu2 %vm1807_vm1, %v1569_v31 }
 0x125   : > { %535 = vst.msk [vmem:[#allocation2 + $0x860] sm:$0xff] %vm266_vm2, %v8784_v52 }
 0x126   : > { %536 = vst.msk [vmem:[#allocation2 + $0x868] sm:$0xff] %vm266_vm2, %v8784_v52 }
 0x127   : > { %537 = vst.msk [vmem:[#allocation2 + $0x870] sm:$0xff] %vm266_vm2, %v8784_v52 }
 0x128   : > { %538 = vst.msk [vmem:[#allocation2 + $0x878] sm:$0xff] %vm266_vm2, %v8784_v52 }
 0x129   : > { %539 = vst.msk [vmem:[#allocation2 + $0x880] sm:$0xff] %vm266_vm2, %v8784_v52  ;;  %v10169_v49 = vpop.f32.mrf.mxu1 }
 0x12a   : > { %540 = vst.msk [vmem:[#allocation2 + $0x888] sm:$0xff] %vm266_vm2, %v8784_v52 }
 0x12b   : > { %541 = vst.msk [vmem:[#allocation2 + $0x890] sm:$0xff] %vm266_vm2, %v8784_v52 }
 0x12c   : > { %542 = vst.msk [vmem:[#allocation2 + $0x898] sm:$0xff] %vm266_vm2, %v8784_v52 }
 0x12d   : > { %543 = vst.msk [vmem:[#allocation2 + $0x8a0] sm:$0xff] %vm266_vm2, %v8784_v52 }
 0x12e   : > { %544 = vst.msk [vmem:[#allocation2 + $0x8a8] sm:$0xff] %vm266_vm2, %v8784_v52 }
 0x12f   : > { %545 = vst.msk [vmem:[#allocation2 + $0x8b0] sm:$0xff] %vm266_vm2, %v8784_v52 }
 0x130   : > { %546 = vst.msk [vmem:[#allocation2 + $0x8b8] sm:$0xff] %vm266_vm2, %v8784_v52 }
 0x131   : > { %547 = vst.msk [vmem:[#allocation2 + $0x8c0] sm:$0xff] %vm266_vm2, %v8784_v52 }
 0x132   : > { %548 = vst.msk [vmem:[#allocation2 + $0x8c8] sm:$0xff] %vm266_vm2, %v8784_v52 }
 0x133   : > { %549 = vst.msk [vmem:[#allocation2 + $0x8d0] sm:$0xff] %vm266_vm2, %v8784_v52 }
 0x134   : > { %550 = vst.msk [vmem:[#allocation2 + $0x8d8] sm:$0xff] %vm266_vm2, %v8784_v52 }
 0x135   : > { %551 = vst.msk [vmem:[#allocation2 + $0x8e0] sm:$0xff] %vm266_vm2, %v8784_v52 }
 0x136   : > { %552 = vst.msk [vmem:[#allocation2 + $0x8e8] sm:$0xff] %vm266_vm2, %v8784_v52 }
 0x137   : > { %553 = vst.msk [vmem:[#allocation2 + $0x8f0] sm:$0xff] %vm266_vm2, %v8784_v52 }
 0x138   : > { %554 = vst.msk [vmem:[#allocation2 + $0x8f8] sm:$0xff] %vm266_vm2, %v8784_v52 }
 0x139   : > { %555 = vst.msk [vmem:[#allocation2 + $0x900] sm:$0xff] %vm266_vm2, %v8784_v52 }
 0x13a   : > { %556 = vst.msk [vmem:[#allocation2 + $0x908] sm:$0xff] %vm266_vm2, %v8784_v52 }
 0x13b   : > { %557 = vst.msk [vmem:[#allocation2 + $0x910] sm:$0xff] %vm266_vm2, %v8784_v52 }
 0x13c   : > { %558 = vst.msk [vmem:[#allocation2 + $0x918] sm:$0xff] %vm266_vm2, %v8784_v52 }
 0x13d   : > { %559 = vst.msk [vmem:[#allocation2 + $0x920] sm:$0xff] %vm266_vm2, %v8784_v52 }
 0x13e   : > { %560 = vst.msk [vmem:[#allocation2 + $0x928] sm:$0xff] %vm266_vm2, %v8784_v52 }
 0x13f   : > { %561 = vst.msk [vmem:[#allocation2 + $0x930] sm:$0xff] %vm266_vm2, %v8784_v52 }
 0x140   : > { %562 = vst.msk [vmem:[#allocation2 + $0x938] sm:$0xff] %vm266_vm2, %v8784_v52 }
 0x141   : > { %563 = vst.msk [vmem:[#allocation2 + $0x940] sm:$0xff] %vm266_vm2, %v8784_v52 }
 0x142   : > { %564 = vst.msk [vmem:[#allocation2 + $0x948] sm:$0xff] %vm266_vm2, %v8784_v52 }
 0x143   : > { %565 = vst.msk [vmem:[#allocation2 + $0x950] sm:$0xff] %vm266_vm2, %v8784_v52 }
 0x144   : > { %566 = vst.msk [vmem:[#allocation2 + $0x958] sm:$0xff] %vm266_vm2, %v8784_v52 }
 0x145   : > { %567 = vst.msk [vmem:[#allocation2 + $0x960] sm:$0xff] %vm266_vm2, %v8784_v52 }
 0x146   : > { %568 = vst.msk [vmem:[#allocation2 + $0x968] sm:$0xff] %vm266_vm2, %v8784_v52 }
 0x147   : > { %569 = vst.msk [vmem:[#allocation2 + $0x970] sm:$0xff] %vm266_vm2, %v8784_v52 }
 0x148   : > { %570 = vst.msk [vmem:[#allocation2 + $0x978] sm:$0xff] %vm266_vm2, %v8784_v52 }
 0x149   : > { %571 = vst.msk [vmem:[#allocation2 + $0x980] sm:$0xff] %vm266_vm2, %v8784_v52 }
 0x14a   : > { %572 = vst.msk [vmem:[#allocation2 + $0x988] sm:$0xff] %vm266_vm2, %v8784_v52 }
 0x14b   : > { %573 = vst.msk [vmem:[#allocation2 + $0x990] sm:$0xff] %vm266_vm2, %v8784_v52 }
 0x14c   : > { %574 = vst.msk [vmem:[#allocation2 + $0x998] sm:$0xff] %vm266_vm2, %v8784_v52 }
 0x14d   : > { %575 = vst.msk [vmem:[#allocation2 + $0x9a0] sm:$0xff] %vm266_vm2, %v8784_v52 }
 0x14e   : > { %576 = vst.msk [vmem:[#allocation2 + $0x9a8] sm:$0xff] %vm266_vm2, %v8784_v52 }
 0x14f   : > { %577 = vst.msk [vmem:[#allocation2 + $0x9b0] sm:$0xff] %vm266_vm2, %v8784_v52 }
 0x150   : > { %578 = vst.msk [vmem:[#allocation2 + $0x9b8] sm:$0xff] %vm266_vm2, %v8784_v52 }
 0x151   : > { %579 = vst.msk [vmem:[#allocation2 + $0x9c0] sm:$0xff] %vm266_vm2, %v8784_v52 }
 0x152   : > { %580 = vst.msk [vmem:[#allocation2 + $0x9c8] sm:$0xff] %vm266_vm2, %v8784_v52 }
 0x153   : > { %581 = vst.msk [vmem:[#allocation2 + $0x9d0] sm:$0xff] %vm266_vm2, %v8784_v52 }
 0x154   : > { %582 = vst.msk [vmem:[#allocation2 + $0x9d8] sm:$0xff] %vm266_vm2, %v8784_v52 }
 0x155   : > { %583 = vst.msk [vmem:[#allocation2 + $0x9e0] sm:$0xff] %vm266_vm2, %v8784_v52 }
 0x156   : > { %584 = vst.msk [vmem:[#allocation2 + $0x9e8] sm:$0xff] %vm266_vm2, %v8784_v52 }
 0x157   : > { %585 = vst.msk [vmem:[#allocation2 + $0x9f0] sm:$0xff] %vm266_vm2, %v8784_v52 }
 0x158   : > { %586 = vst.msk [vmem:[#allocation2 + $0x9f8] sm:$0xff] %vm266_vm2, %v8784_v52 }
 0x159   : > { %587 = vst.msk [vmem:[#allocation2 + $0xa00] sm:$0xff] %vm266_vm2, %v8784_v52 }
 0x15a   : > { %588 = vst.msk [vmem:[#allocation2 + $0xa08] sm:$0xff] %vm266_vm2, %v8784_v52 }
 0x15b   : > { %589 = vst.msk [vmem:[#allocation2 + $0xa10] sm:$0xff] %vm266_vm2, %v8784_v52 }
 0x15c   : > { %590 = vst.msk [vmem:[#allocation2 + $0xa18] sm:$0xff] %vm266_vm2, %v8784_v52 }
 0x15d   : > { %591 = vst.msk [vmem:[#allocation2 + $0xa20] sm:$0xff] %vm266_vm2, %v8784_v52 }
 0x15e   : > { %592 = vst.msk [vmem:[#allocation2 + $0xa28] sm:$0xff] %vm266_vm2, %v8784_v52 }
 0x15f   : > { %593 = vst.msk [vmem:[#allocation2 + $0xa30] sm:$0xff] %vm266_vm2, %v8784_v52 }
 0x160   : > { %594 = vst.msk [vmem:[#allocation2 + $0xa38] sm:$0xff] %vm266_vm2, %v8784_v52 }
 0x161   : > { %595 = vst.msk [vmem:[#allocation2 + $0xa40] sm:$0xff] %vm266_vm2, %v8784_v52 }
 0x162   : > { %596 = vst.msk [vmem:[#allocation2 + $0xa48] sm:$0xff] %vm266_vm2, %v8784_v52 }
 0x163   : > { %597 = vst.msk [vmem:[#allocation2 + $0xa50] sm:$0xff] %vm266_vm2, %v8784_v52 }
 0x164   : > { %598 = vst.msk [vmem:[#allocation2 + $0xa58] sm:$0xff] %vm266_vm2, %v8784_v52 }
 0x165   : > { %599 = vst.msk [vmem:[#allocation2 + $0xa60] sm:$0xff] %vm266_vm2, %v8784_v52 }
 0x166   : > { %600 = vst.msk [vmem:[#allocation2 + $0xa68] sm:$0xff] %vm266_vm2, %v8784_v52 }
 0x167   : > { %601 = vst.msk [vmem:[#allocation2 + $0xa70] sm:$0xff] %vm266_vm2, %v8784_v52 }
 0x168   : > { %602 = vst.msk [vmem:[#allocation2 + $0xa78] sm:$0xff] %vm266_vm2, %v8784_v52 }
 0x169   : > { %603 = vst.msk [vmem:[#allocation2 + $0xa80] sm:$0xff] %vm266_vm2, %v8784_v52 }
 0x16a   : > { %604 = vst.msk [vmem:[#allocation2 + $0xa88] sm:$0xff] %vm266_vm2, %v8784_v52 }
 0x16b   : > { %605 = vst.msk [vmem:[#allocation2 + $0xa90] sm:$0xff] %vm266_vm2, %v8784_v52 }
 0x16c   : > { %606 = vst.msk [vmem:[#allocation2 + $0xa98] sm:$0xff] %vm266_vm2, %v8784_v52 }
 0x16d   : > { %607 = vst.msk [vmem:[#allocation2 + $0xaa0] sm:$0xff] %vm266_vm2, %v8784_v52 }
 0x16e   : > { %608 = vst.msk [vmem:[#allocation2 + $0xaa8] sm:$0xff] %vm266_vm2, %v8784_v52 }
 0x16f   : > { %609 = vst.msk [vmem:[#allocation2 + $0xab0] sm:$0xff] %vm266_vm2, %v8784_v52 }
 0x170   : > { %610 = vst.msk [vmem:[#allocation2 + $0xab8] sm:$0xff] %vm266_vm2, %v8784_v52 }
 0x171   : > { %611 = vst.msk [vmem:[#allocation2 + $0xac0] sm:$0xff] %vm266_vm2, %v8784_v52 }
 0x172   : > { %612 = vst.msk [vmem:[#allocation2 + $0xac8] sm:$0xff] %vm266_vm2, %v8784_v52 }
 0x173   : > { %613 = vst.msk [vmem:[#allocation2 + $0xad0] sm:$0xff] %vm266_vm2, %v8784_v52 }
 0x174   : > { %614 = vst.msk [vmem:[#allocation2 + $0xad8] sm:$0xff] %vm266_vm2, %v8784_v52 }
 0x175   : > { %615 = vst.msk [vmem:[#allocation2 + $0xae0] sm:$0xff] %vm266_vm2, %v8784_v52 }
 0x176   : > { %616 = vst.msk [vmem:[#allocation2 + $0xae8] sm:$0xff] %vm266_vm2, %v8784_v52 }
 0x177   : > { %617 = vst.msk [vmem:[#allocation2 + $0xaf0] sm:$0xff] %vm266_vm2, %v8784_v52 }
 0x178   : > { %618 = vst.msk [vmem:[#allocation2 + $0xaf8] sm:$0xff] %vm266_vm2, %v8784_v52 }
 0x179   : > { %619 = vst.msk [vmem:[#allocation2 + $0xb00] sm:$0xff] %vm266_vm2, %v8784_v52 }
 0x17a   : > { %620 = vst.msk [vmem:[#allocation2 + $0xb08] sm:$0xff] %vm266_vm2, %v8784_v52 }
 0x17b   : > { %621 = vst.msk [vmem:[#allocation2 + $0xb10] sm:$0xff] %vm266_vm2, %v8784_v52 }
 0x17c   : > { %622 = vst.msk [vmem:[#allocation2 + $0xb18] sm:$0xff] %vm266_vm2, %v8784_v52 }
 0x17d   : > { %623 = vst.msk [vmem:[#allocation2 + $0xb20] sm:$0xff] %vm266_vm2, %v8784_v52 }
 0x17e   : > { %624 = vst.msk [vmem:[#allocation2 + $0xb28] sm:$0xff] %vm266_vm2, %v8784_v52 }
 0x17f   : > { %625 = vst.msk [vmem:[#allocation2 + $0xb30] sm:$0xff] %vm266_vm2, %v8784_v52 }
 0x180   : > { %626 = vst.msk [vmem:[#allocation2 + $0xb38] sm:$0xff] %vm266_vm2, %v8784_v52 }
 0x181   : > { %627 = vst.msk [vmem:[#allocation2 + $0xb40] sm:$0xff] %vm266_vm2, %v8784_v52 }
 0x182   : > { %628 = vst.msk [vmem:[#allocation2 + $0xb48] sm:$0xff] %vm266_vm2, %v8784_v52 }
 0x183   : > { %629 = vst.msk [vmem:[#allocation2 + $0xb50] sm:$0xff] %vm266_vm2, %v8784_v52 }
 0x184   : > { %630 = vst.msk [vmem:[#allocation2 + $0xb58] sm:$0xff] %vm266_vm2, %v8784_v52 }
 0x185   : > { %631 = vst.msk [vmem:[#allocation2 + $0xb60] sm:$0xff] %vm266_vm2, %v8784_v52 }
 0x186   : > { %632 = vst.msk [vmem:[#allocation2 + $0xb68] sm:$0xff] %vm266_vm2, %v8784_v52 }
 0x187   : > { %633 = vst.msk [vmem:[#allocation2 + $0xb70] sm:$0xff] %vm266_vm2, %v8784_v52 }
 0x188   : > { %634 = vst.msk [vmem:[#allocation2 + $0xb78] sm:$0xff] %vm266_vm2, %v8784_v52 }
 0x189   : > { %635 = vst.msk [vmem:[#allocation2 + $0xb80] sm:$0xff] %vm266_vm2, %v8784_v52 }
 0x18a   : > { %636 = vst.msk [vmem:[#allocation2 + $0xb88] sm:$0xff] %vm266_vm2, %v8784_v52 }
 0x18b   : > { %637 = vst.msk [vmem:[#allocation2 + $0xb90] sm:$0xff] %vm266_vm2, %v8784_v52 }
 0x18c   : > { %638 = vst.msk [vmem:[#allocation2 + $0xb98] sm:$0xff] %vm266_vm2, %v8784_v52 }
 0x18d   : > { %639 = vst.msk [vmem:[#allocation2 + $0xba0] sm:$0xff] %vm266_vm2, %v8784_v52 }
 0x18e   : > { %640 = vst.msk [vmem:[#allocation2 + $0xba8] sm:$0xff] %vm266_vm2, %v8784_v52 }
 0x18f   : > { %641 = vst.msk [vmem:[#allocation2 + $0xbb0] sm:$0xff] %vm266_vm2, %v8784_v52 }
 0x190   : > { %642 = vst.msk [vmem:[#allocation2 + $0xbb8] sm:$0xff] %vm266_vm2, %v8784_v52 }
 0x191   : > { %643 = vst.msk [vmem:[#allocation2 + $0xbc0] sm:$0xff] %vm266_vm2, %v8784_v52 }
 0x192   : > { %644 = vst.msk [vmem:[#allocation2 + $0xbc8] sm:$0xff] %vm266_vm2, %v8784_v52 }
 0x193   : > { %645 = vst.msk [vmem:[#allocation2 + $0xbd0] sm:$0xff] %vm266_vm2, %v8784_v52 }
 0x194   : > { %646 = vst.msk [vmem:[#allocation2 + $0xbd8] sm:$0xff] %vm266_vm2, %v8784_v52 }
 0x195   : > { %647 = vst.msk [vmem:[#allocation2 + $0xbe0] sm:$0xff] %vm266_vm2, %v8784_v52 }
 0x196   : > { %648 = vst.msk [vmem:[#allocation2 + $0xbe8] sm:$0xff] %vm266_vm2, %v8784_v52 }
 0x197   : > { %649 = vst.msk [vmem:[#allocation2 + $0xbf0] sm:$0xff] %vm266_vm2, %v8784_v52 }
 0x198   : > { %650 = vst.msk [vmem:[#allocation2 + $0xbf8] sm:$0xff] %vm266_vm2, %v8784_v52 }
 0x199   : > { %651 = vst.msk [vmem:[#allocation2 + $0xc00] sm:$0xff] %vm266_vm2, %v8784_v52 }
 0x19a   : > { %652 = vst.msk [vmem:[#allocation2 + $0xc08] sm:$0xff] %vm266_vm2, %v8784_v52 }
 0x19b   : > { %653 = vst.msk [vmem:[#allocation2 + $0xc10] sm:$0xff] %vm266_vm2, %v8784_v52 }
 0x19c   : > { %654 = vst.msk [vmem:[#allocation2 + $0xc18] sm:$0xff] %vm266_vm2, %v8784_v52 }
 0x19d   : > { %655 = vst.msk [vmem:[#allocation2 + $0xc20] sm:$0xff] %vm266_vm2, %v8784_v52 }
 0x19e   : > { %656 = vst.msk [vmem:[#allocation2 + $0xc28] sm:$0xff] %vm266_vm2, %v8784_v52 }
 0x19f   : > { %657 = vst.msk [vmem:[#allocation2 + $0xc30] sm:$0xff] %vm266_vm2, %v8784_v52 }
 0x1a0   : > { %658 = vst.msk [vmem:[#allocation2 + $0xc38] sm:$0xff] %vm266_vm2, %v8784_v52  ;;  %v1163_v45 = vld [vmem:[#allocation2 + $0xc00] sm:$0xff] }
 0x1a1   : > { %659 = vst.msk [vmem:[#allocation2 + $0xc40] sm:$0xff] %vm266_vm2, %v8784_v52  ;;  %v5285_v53 = vadd.f32 %v9969_v16, %v1163_v45  ;;  %v1164_v56 = vld [vmem:[#allocation2 + $0xc08] sm:$0xff]  ;;  %v10133_v16 = vld [vmem:[#allocation5] ss:$0 sm:$0xff] }
 0x1a2   : > { %660 = vst.msk [vmem:[#allocation2 + $0xc48] sm:$0xff] %vm266_vm2, %v8784_v52  ;;  %v5286_v2 = vadd.f32 %v10005_v24, %v1164_v56  ;;  %v1165_v5 = vld [vmem:[#allocation2 + $0xc10] sm:$0xff]  ;;  %v1440_v24 = vld [vmem:[%s8863_s8 + $0x4a8] sm:$0xff]  ;;  %v10176_v56 = vpop.f32.mrf.mxu3 }
 0x1a3   : > { %661 = vst.msk [vmem:[#allocation2 + $0xc50] sm:$0xff] %vm266_vm2, %v8784_v52  ;;  %v5287_v11 = vadd.f32 %v10037_v32, %v1165_v5  ;;  %8252 = vmatmul.msk.f32.gmra.mxu1 %vm1807_vm1, %v1440_v24  ;;  %v1697_v32 = vld [vmem:[%s8863_s8 + $0xcb0] sm:$0xff]  ;;  %v1166_v7 = vld [vmem:[#allocation2 + $0xc18] sm:$0xff] }
 0x1a4   : > { %662 = vst.msk [vmem:[#allocation2 + $0xc58] sm:$0xff] %vm266_vm2, %v8784_v52  ;;  %8509 = vmatmul.msk.f32.gmra.mxu3 %vm1807_vm1, %v1697_v32  ;;  %v1040_v32 = vld [vmem:[#allocation2 + $0x828] sm:$0xff] }
 0x1a5   : > { %663 = vst.msk [vmem:[#allocation2 + $0xc60] sm:$0xff] %vm266_vm2, %v8784_v52 }
 0x1a6   : > { %664 = vst.msk [vmem:[#allocation2 + $0xc68] sm:$0xff] %vm266_vm2, %v8784_v52 }
 0x1a7   : > { %665 = vst.msk [vmem:[#allocation2 + $0xc70] sm:$0xff] %vm266_vm2, %v8784_v52 }
 0x1a8   : > { %666 = vst.msk [vmem:[#allocation2 + $0xc78] sm:$0xff] %vm266_vm2, %v8784_v52 }
 0x1a9   : > { %667 = vst.msk [vmem:[#allocation2 + $0xc80] sm:$0xff] %vm266_vm2, %v8784_v52 }
 0x1aa   : > { %668 = vst.msk [vmem:[#allocation2 + $0xc88] sm:$0xff] %vm266_vm2, %v8784_v52 }
 0x1ab   : > { %669 = vst.msk [vmem:[#allocation2 + $0xc90] sm:$0xff] %vm266_vm2, %v8784_v52  ;;  %8253 = vmatmul.msk.f32.gmra.mxu1 %vm1807_vm1, %v1441_v0 }
 0x1ac   : > { %670 = vst.msk [vmem:[#allocation2 + $0xc98] sm:$0xff] %vm266_vm2, %v8784_v52  ;;  %8510 = vmatmul.msk.f32.gmra.mxu3 %vm1807_vm1, %v1698_v9 }
 0x1ad   : > { %671 = vst.msk [vmem:[#allocation2 + $0xca0] sm:$0xff] %vm266_vm2, %v8784_v52 }
 0x1ae   : > { %672 = vst.msk [vmem:[#allocation2 + $0xca8] sm:$0xff] %vm266_vm2, %v8784_v52 }
 0x1af   : > { %673 = vst.msk [vmem:[#allocation2 + $0xcb0] sm:$0xff] %vm266_vm2, %v8784_v52 }
 0x1b0   : > { %674 = vst.msk [vmem:[#allocation2 + $0xcb8] sm:$0xff] %vm266_vm2, %v8784_v52 }
 0x1b1   : > { %675 = vst.msk [vmem:[#allocation2 + $0xcc0] sm:$0xff] %vm266_vm2, %v8784_v52 }
 0x1b2   : > { %676 = vst.msk [vmem:[#allocation2 + $0xcc8] sm:$0xff] %vm266_vm2, %v8784_v52 }
 0x1b3   : > { %677 = vst.msk [vmem:[#allocation2 + $0xcd0] sm:$0xff] %vm266_vm2, %v8784_v52 }
 0x1b4   : > { %678 = vst.msk [vmem:[#allocation2 + $0xcd8] sm:$0xff] %vm266_vm2, %v8784_v52 }
 0x1b5   : > { %679 = vst.msk [vmem:[#allocation2 + $0xce0] sm:$0xff] %vm266_vm2, %v8784_v52 }
 0x1b6   : > { %680 = vst.msk [vmem:[#allocation2 + $0xce8] sm:$0xff] %vm266_vm2, %v8784_v52 }
 0x1b7   : > { %681 = vst.msk [vmem:[#allocation2 + $0xcf0] sm:$0xff] %vm266_vm2, %v8784_v52 }
 0x1b8   : > { %682 = vst.msk [vmem:[#allocation2 + $0xcf8] sm:$0xff] %vm266_vm2, %v8784_v52 }
 0x1b9   : > { %683 = vst.msk [vmem:[#allocation2 + $0xd00] sm:$0xff] %vm266_vm2, %v8784_v52 }
 0x1ba   : > { %684 = vst.msk [vmem:[#allocation2 + $0xd08] sm:$0xff] %vm266_vm2, %v8784_v52 }
 0x1bb   : > { %685 = vst.msk [vmem:[#allocation2 + $0xd10] sm:$0xff] %vm266_vm2, %v8784_v52 }
 0x1bc   : > { %686 = vst.msk [vmem:[#allocation2 + $0xd18] sm:$0xff] %vm266_vm2, %v8784_v52 }
 0x1bd   : > { %687 = vst.msk [vmem:[#allocation2 + $0xd20] sm:$0xff] %vm266_vm2, %v8784_v52 }
 0x1be   : > { %688 = vst.msk [vmem:[#allocation2 + $0xd28] sm:$0xff] %vm266_vm2, %v8784_v52 }
 0x1bf   : > { %689 = vst.msk [vmem:[#allocation2 + $0xd30] sm:$0xff] %vm266_vm2, %v8784_v52 }
 0x1c0   : > { %690 = vst.msk [vmem:[#allocation2 + $0xd38] sm:$0xff] %vm266_vm2, %v8784_v52 }
 0x1c1   : > { %691 = vst.msk [vmem:[#allocation2 + $0xd40] sm:$0xff] %vm266_vm2, %v8784_v52 }
 0x1c2   : > { %692 = vst.msk [vmem:[#allocation2 + $0xd48] sm:$0xff] %vm266_vm2, %v8784_v52 }
 0x1c3   : > { %693 = vst.msk [vmem:[#allocation2 + $0xd50] sm:$0xff] %vm266_vm2, %v8784_v52 }
 0x1c4   : > { %694 = vst.msk [vmem:[#allocation2 + $0xd58] sm:$0xff] %vm266_vm2, %v8784_v52 }
 0x1c5   : > { %695 = vst.msk [vmem:[#allocation2 + $0xd60] sm:$0xff] %vm266_vm2, %v8784_v52 }
 0x1c6   : > { %696 = vst.msk [vmem:[#allocation2 + $0xd68] sm:$0xff] %vm266_vm2, %v8784_v52 }
 0x1c7   : > { %697 = vst.msk [vmem:[#allocation2 + $0xd70] sm:$0xff] %vm266_vm2, %v8784_v52 }
 0x1c8   : > { %698 = vst.msk [vmem:[#allocation2 + $0xd78] sm:$0xff] %vm266_vm2, %v8784_v52 }
 0x1c9   : > { %699 = vst.msk [vmem:[#allocation2 + $0xd80] sm:$0xff] %vm266_vm2, %v8784_v52 }
 0x1ca   : > { %700 = vst.msk [vmem:[#allocation2 + $0xd88] sm:$0xff] %vm266_vm2, %v8784_v52 }
 0x1cb   : > { %701 = vst.msk [vmem:[#allocation2 + $0xd90] sm:$0xff] %vm266_vm2, %v8784_v52 }
 0x1cc   : > { %702 = vst.msk [vmem:[#allocation2 + $0xd98] sm:$0xff] %vm266_vm2, %v8784_v52 }
 0x1cd   : > { %703 = vst.msk [vmem:[#allocation2 + $0xda0] sm:$0xff] %vm266_vm2, %v8784_v52 }
 0x1ce   : > { %704 = vst.msk [vmem:[#allocation2 + $0xda8] sm:$0xff] %vm266_vm2, %v8784_v52 }
 0x1cf   : > { %705 = vst.msk [vmem:[#allocation2 + $0xdb0] sm:$0xff] %vm266_vm2, %v8784_v52 }
 0x1d0   : > { %706 = vst.msk [vmem:[#allocation2 + $0xdb8] sm:$0xff] %vm266_vm2, %v8784_v52 }
 0x1d1   : > { %707 = vst.msk [vmem:[#allocation2 + $0xdc0] sm:$0xff] %vm266_vm2, %v8784_v52 }
 0x1d2   : > { %708 = vst.msk [vmem:[#allocation2 + $0xdc8] sm:$0xff] %vm266_vm2, %v8784_v52 }
 0x1d3   : > { %709 = vst.msk [vmem:[#allocation2 + $0xdd0] sm:$0xff] %vm266_vm2, %v8784_v52 }
 0x1d4   : > { %710 = vst.msk [vmem:[#allocation2 + $0xdd8] sm:$0xff] %vm266_vm2, %v8784_v52 }
 0x1d5   : > { %711 = vst.msk [vmem:[#allocation2 + $0xde0] sm:$0xff] %vm266_vm2, %v8784_v52 }
 0x1d6   : > { %712 = vst.msk [vmem:[#allocation2 + $0xde8] sm:$0xff] %vm266_vm2, %v8784_v52 }
 0x1d7   : > { %713 = vst.msk [vmem:[#allocation2 + $0xdf0] sm:$0xff] %vm266_vm2, %v8784_v52 }
 0x1d8   : > { %714 = vst.msk [vmem:[#allocation2 + $0xdf8] sm:$0xff] %vm266_vm2, %v8784_v52 }
 0x1d9   : > { %715 = vst.msk [vmem:[#allocation2 + $0xe00] sm:$0xff] %vm266_vm2, %v8784_v52 }
 0x1da   : > { %716 = vst.msk [vmem:[#allocation2 + $0xe08] sm:$0xff] %vm266_vm2, %v8784_v52 }
 0x1db   : > { %717 = vst.msk [vmem:[#allocation2 + $0xe10] sm:$0xff] %vm266_vm2, %v8784_v52 }
 0x1dc   : > { %718 = vst.msk [vmem:[#allocation2 + $0xe18] sm:$0xff] %vm266_vm2, %v8784_v52 }
 0x1dd   : > { %719 = vst.msk [vmem:[#allocation2 + $0xe20] sm:$0xff] %vm266_vm2, %v8784_v52 }
 0x1de   : > { %720 = vst.msk [vmem:[#allocation2 + $0xe28] sm:$0xff] %vm266_vm2, %v8784_v52 }
 0x1df   : > { %721 = vst.msk [vmem:[#allocation2 + $0xe30] sm:$0xff] %vm266_vm2, %v8784_v52 }
 0x1e0   : > { %722 = vst.msk [vmem:[#allocation2 + $0xe38] sm:$0xff] %vm266_vm2, %v8784_v52 }
 0x1e1   : > { %723 = vst.msk [vmem:[#allocation2 + $0xe40] sm:$0xff] %vm266_vm2, %v8784_v52 }
 0x1e2   : > { %724 = vst.msk [vmem:[#allocation2 + $0xe48] sm:$0xff] %vm266_vm2, %v8784_v52 }
 0x1e3   : > { %725 = vst.msk [vmem:[#allocation2 + $0xe50] sm:$0xff] %vm266_vm2, %v8784_v52 }
 0x1e4   : > { %726 = vst.msk [vmem:[#allocation2 + $0xe58] sm:$0xff] %vm266_vm2, %v8784_v52 }
 0x1e5   : > { %727 = vst.msk [vmem:[#allocation2 + $0xe60] sm:$0xff] %vm266_vm2, %v8784_v52 }
 0x1e6   : > { %728 = vst.msk [vmem:[#allocation2 + $0xe68] sm:$0xff] %vm266_vm2, %v8784_v52 }
 0x1e7   : > { %729 = vst.msk [vmem:[#allocation2 + $0xe70] sm:$0xff] %vm266_vm2, %v8784_v52 }
 0x1e8   : > { %730 = vst.msk [vmem:[#allocation2 + $0xe78] sm:$0xff] %vm266_vm2, %v8784_v52 }
 0x1e9   : > { %731 = vst.msk [vmem:[#allocation2 + $0xe80] sm:$0xff] %vm266_vm2, %v8784_v52 }
 0x1ea   : > { %732 = vst.msk [vmem:[#allocation2 + $0xe88] sm:$0xff] %vm266_vm2, %v8784_v52 }
 0x1eb   : > { %733 = vst.msk [vmem:[#allocation2 + $0xe90] sm:$0xff] %vm266_vm2, %v8784_v52 }
 0x1ec   : > { %734 = vst.msk [vmem:[#allocation2 + $0xe98] sm:$0xff] %vm266_vm2, %v8784_v52 }
 0x1ed   : > { %735 = vst.msk [vmem:[#allocation2 + $0xea0] sm:$0xff] %vm266_vm2, %v8784_v52 }
 0x1ee   : > { %736 = vst.msk [vmem:[#allocation2 + $0xea8] sm:$0xff] %vm266_vm2, %v8784_v52 }
 0x1ef   : > { %737 = vst.msk [vmem:[#allocation2 + $0xeb0] sm:$0xff] %vm266_vm2, %v8784_v52 }
 0x1f0   : > { %738 = vst.msk [vmem:[#allocation2 + $0xeb8] sm:$0xff] %vm266_vm2, %v8784_v52 }
 0x1f1   : > { %739 = vst.msk [vmem:[#allocation2 + $0xec0] sm:$0xff] %vm266_vm2, %v8784_v52 }
 0x1f2   : > { %740 = vst.msk [vmem:[#allocation2 + $0xec8] sm:$0xff] %vm266_vm2, %v8784_v52 }
 0x1f3   : > { %741 = vst.msk [vmem:[#allocation2 + $0xed0] sm:$0xff] %vm266_vm2, %v8784_v52 }
 0x1f4   : > { %742 = vst.msk [vmem:[#allocation2 + $0xed8] sm:$0xff] %vm266_vm2, %v8784_v52 }
 0x1f5   : > { %743 = vst.msk [vmem:[#allocation2 + $0xee0] sm:$0xff] %vm266_vm2, %v8784_v52 }
 0x1f6   : > { %744 = vst.msk [vmem:[#allocation2 + $0xee8] sm:$0xff] %vm266_vm2, %v8784_v52 }
 0x1f7   : > { %745 = vst.msk [vmem:[#allocation2 + $0xef0] sm:$0xff] %vm266_vm2, %v8784_v52 }
 0x1f8   : > { %746 = vst.msk [vmem:[#allocation2 + $0xef8] sm:$0xff] %vm266_vm2, %v8784_v52 }
 0x1f9   : > { %747 = vst.msk [vmem:[#allocation2 + $0xf00] sm:$0xff] %vm266_vm2, %v8784_v52 }
 0x1fa   : > { %748 = vst.msk [vmem:[#allocation2 + $0xf08] sm:$0xff] %vm266_vm2, %v8784_v52 }
 0x1fb   : > { %749 = vst.msk [vmem:[#allocation2 + $0xf10] sm:$0xff] %vm266_vm2, %v8784_v52 }
 0x1fc   : > { %750 = vst.msk [vmem:[#allocation2 + $0xf18] sm:$0xff] %vm266_vm2, %v8784_v52 }
 0x1fd   : > { %751 = vst.msk [vmem:[#allocation2 + $0xf20] sm:$0xff] %vm266_vm2, %v8784_v52 }
 0x1fe   : > { %752 = vst.msk [vmem:[#allocation2 + $0xf28] sm:$0xff] %vm266_vm2, %v8784_v52 }
 0x1ff   : > { %753 = vst.msk [vmem:[#allocation2 + $0xf30] sm:$0xff] %vm266_vm2, %v8784_v52 }
 0x200   : > { %754 = vst.msk [vmem:[#allocation2 + $0xf38] sm:$0xff] %vm266_vm2, %v8784_v52 }
 0x201   : > { %755 = vst.msk [vmem:[#allocation2 + $0xf40] sm:$0xff] %vm266_vm2, %v8784_v52 }
 0x202   : > { %756 = vst.msk [vmem:[#allocation2 + $0xf48] sm:$0xff] %vm266_vm2, %v8784_v52 }
 0x203   : > { %757 = vst.msk [vmem:[#allocation2 + $0xf50] sm:$0xff] %vm266_vm2, %v8784_v52 }
 0x204   : > { %758 = vst.msk [vmem:[#allocation2 + $0xf58] sm:$0xff] %vm266_vm2, %v8784_v52 }
 0x205   : > { %759 = vst.msk [vmem:[#allocation2 + $0xf60] sm:$0xff] %vm266_vm2, %v8784_v52 }
 0x206   : > { %760 = vst.msk [vmem:[#allocation2 + $0xf68] sm:$0xff] %vm266_vm2, %v8784_v52 }
 0x207   : > { %761 = vst.msk [vmem:[#allocation2 + $0xf70] sm:$0xff] %vm266_vm2, %v8784_v52 }
 0x208   : > { %762 = vst.msk [vmem:[#allocation2 + $0xf78] sm:$0xff] %vm266_vm2, %v8784_v52 }
 0x209   : > { %763 = vst.msk [vmem:[#allocation2 + $0xf80] sm:$0xff] %vm266_vm2, %v8784_v52 }
 0x20a   : > { %764 = vst.msk [vmem:[#allocation2 + $0xf88] sm:$0xff] %vm266_vm2, %v8784_v52 }
 0x20b   : > { %765 = vst.msk [vmem:[#allocation2 + $0xf90] sm:$0xff] %vm266_vm2, %v8784_v52 }
 0x20c   : > { %766 = vst.msk [vmem:[#allocation2 + $0xf98] sm:$0xff] %vm266_vm2, %v8784_v52 }
 0x20d   : > { %767 = vst.msk [vmem:[#allocation2 + $0xfa0] sm:$0xff] %vm266_vm2, %v8784_v52 }
 0x20e   : > { %768 = vst.msk [vmem:[#allocation2 + $0xfa8] sm:$0xff] %vm266_vm2, %v8784_v52 }
 0x20f   : > { %769 = vst.msk [vmem:[#allocation2 + $0xfb0] sm:$0xff] %vm266_vm2, %v8784_v52 }
 0x210   : > { %770 = vst.msk [vmem:[#allocation2 + $0xfb8] sm:$0xff] %vm266_vm2, %v8784_v52 }
 0x211   : > { %771 = vst.msk [vmem:[#allocation2 + $0xfc0] sm:$0xff] %vm266_vm2, %v8784_v52 }
 0x212   : > { %772 = vst.msk [vmem:[#allocation2 + $0xfc8] sm:$0xff] %vm266_vm2, %v8784_v52 }
 0x213   : > { %773 = vst.msk [vmem:[#allocation2 + $0xfd0] sm:$0xff] %vm266_vm2, %v8784_v52 }
 0x214   : > { %774 = vst.msk [vmem:[#allocation2 + $0xfd8] sm:$0xff] %vm266_vm2, %v8784_v52 }
 0x215   : > { %775 = vst.msk [vmem:[#allocation2 + $0xfe0] sm:$0xff] %vm266_vm2, %v8784_v52 }
 0x216   : > { %776 = vst.msk [vmem:[#allocation2 + $0xfe8] sm:$0xff] %vm266_vm2, %v8784_v52 }
 0x217   : > { %777 = vst.msk [vmem:[#allocation2 + $0xff0] sm:$0xff] %vm266_vm2, %v8784_v52 }
 0x218   : > { %778 = vst.msk [vmem:[#allocation2 + $0xff8] sm:$0xff] %vm266_vm2, %v8784_v52  ;;  %v5158_v52 = vadd.f32 %v10003_v23, %v1036_v54  ;;  %v1312_v23 = vld [vmem:[%s8863_s8 + $0xa8] sm:$0xff]  ;;  %v910_v54 = vld [vmem:[#allocation2 + $0x418] sm:$0xff] }
 0x219   : > { %5542 = vst.msk [vmem:[#allocation2 + $0x400] sm:$0xff] %vm266_vm2, %v5029_v48  ;;  %8124 = vmatmul.msk.f32.gmra.mxu0 %vm1807_vm1, %v1312_v23  ;;  %v10167_v48 = vpop.f32.mrf.mxu0  ;;  %v1167_v23 = vld [vmem:[#allocation2 + $0xc20] sm:$0xff] }
 0x21a   : > { %5670 = vst.msk [vmem:[#allocation2 + $0x800] sm:$0xff] %vm266_vm2, %v5157_v50  ;;  %v5289_v31 = vadd.f32 %v10105_v62, %v1167_v23  ;;  %v5162_v62 = vadd.f32 %v10137_v19, %v1040_v32 }
 0x21b   : > { %5798 = vst.msk [vmem:[#allocation2 + $0xc00] sm:$0xff] %vm266_vm2, %v5285_v53 }
 0x21c   : > { %5415 = vst.msk [vmem:[#allocation2 + $0x8] sm:$0xff] %vm266_vm2, %v4902_v55  ;;  %v10174_v55 = vpop.f32.mrf.mxu2 }
 0x21d   : > { %5543 = vst.msk [vmem:[#allocation2 + $0x408] sm:$0xff] %vm266_vm2, %v5030_v59 }
 0x21e   : > { %5671 = vst.msk [vmem:[#allocation2 + $0x808] sm:$0xff] %vm266_vm2, %v5158_v52 }
 0x21f   : > { %5799 = vst.msk [vmem:[#allocation2 + $0xc08] sm:$0xff] %vm266_vm2, %v5286_v2 }
 0x220   : > { %v6057_v12 = vld [vmem:[#allocation2 + $0x400] sm:$0xff]  ;;  %5416 = vst.msk [vmem:[#allocation2 + $0x10] sm:$0xff] %vm266_vm2, %v4903_v4  ;;  %v1038_v4 = vld [vmem:[#allocation2 + $0x818] sm:$0xff] }
 0x221   : > { %v6573_v17 = vadd.f32 %v10133_v16, %v6057_v12  ;;  %v6185_v18 = vld [vmem:[#allocation2 + $0x800] sm:$0xff]  ;;  %5544 = vst.msk [vmem:[#allocation2 + $0x410] sm:$0xff] %vm266_vm2, %v5031_v8  ;;  %8125 = vmatmul.msk.f32.gmra.mxu0 %vm1807_vm1, %v1313_v63  ;;  %v1570_v8 = vld [vmem:[%s8863_s8 + $0x8b8] sm:$0xff]  ;;  %v10207_v24 = vpop.f32.mrf.mxu0  ;;  %v1700_v63 = vld [vmem:[%s8863_s8 + $0xcc8] sm:$0xff] }
 0x222   : > { %v6701_v21 = vadd.f32 %v10133_v16, %v6185_v18  ;;  %v6313_v22 = vld [vmem:[#allocation2 + $0xc00] sm:$0xff]  ;;  %5672 = vst.msk [vmem:[#allocation2 + $0x810] sm:$0xff] %vm266_vm2, %v5159_v10  ;;  %8382 = vmatmul.msk.f32.gmra.mxu2 %vm1807_vm1, %v1570_v8 }
 0x223   : > { %v7085_v25 = vmax.f32 %v6573_v17, 0.0  ;;  %v6829_v26 = vadd.f32 %v10133_v16, %v6313_v22  ;;  %v5930_v27 = vld [vmem:[#allocation2 + $0x8] sm:$0xff]  ;;  %5800 = vst.msk [vmem:[#allocation2 + $0xc10] sm:$0xff] %vm266_vm2, %v5287_v11  ;;  %v5032_v11 = vadd.f32 %v10063_v38, %v910_v54  ;;  %v783_v12 = vld [vmem:[#allocation2 + $0x20] sm:$0xff]  ;;  %v5160_v17 = vadd.f32 %v10067_v39, %v1038_v4 }
 0x224   : > { %v7213_v28 = vmax.f32 %v6701_v21, 0.0  ;;  %v6446_v29 = vadd.f32 %v10133_v16, %v5930_v27  ;;  %v6058_v30 = vld [vmem:[#allocation2 + $0x408] sm:$0xff]  ;;  %5417 = vst.msk [vmem:[#allocation2 + $0x18] sm:$0xff] %vm266_vm2, %v4904_v13  ;;  %v911_v18 = vld [vmem:[#allocation2 + $0x420] sm:$0xff]  ;;  %v5288_v21 = vadd.f32 %v10069_v40, %v1166_v7  ;;  %v4905_v38 = vadd.f32 %v10097_v57, %v783_v12  ;;  %v10213_v27 = vpop.f32.mrf.mxu2  ;;  %v10215_v40 = vpop.f32.mrf.mxu3 }
 0x225   : > { %7597 = vst.msk [vmem:[%s9095_s11 + $0x400] sm:$0xff] %vm266_vm2, %v7085_v25  ;;  %v7341_v33 = vmax.f32 %v6829_v26, 0.0  ;;  %v6574_v34 = vadd.f32 %v10133_v16, %v6058_v30  ;;  %v6186_v35 = vld [vmem:[#allocation2 + $0x808] sm:$0xff]  ;;  %v1039_v22 = vld [vmem:[#allocation2 + $0x820] sm:$0xff]  ;;  %v10209_v25 = vpop.f32.mrf.mxu1  ;;  %v5033_v39 = vadd.f32 %v10099_v58, %v911_v18  ;;  %v1442_v30 = vld [vmem:[%s8863_s8 + $0x4b8] sm:$0xff] }
 0x226   : > { %7725 = vst.msk [vmem:[%s9095_s11 + $0x800] sm:$0xff] %vm266_vm2, %v7213_v28  ;;  %v6958_v36 = vmax.f32 %v6446_v29, 0.0  ;;  %v6702_v37 = vadd.f32 %v10133_v16, %v6186_v35  ;;  %v6314_v41 = vld [vmem:[#allocation2 + $0xc08] sm:$0xff]  ;;  %v5161_v57 = vadd.f32 %v10103_v61, %v1039_v22  ;;  %v1314_v29 = vld [vmem:[%s8863_s8 + $0xb8] sm:$0xff]  ;;  %8254 = vmatmul.msk.f32.gmra.mxu1 %vm1807_vm1, %v1442_v30  ;;  %v1699_v35 = vld [vmem:[%s8863_s8 + $0xcc0] sm:$0xff] }
 0x227   : > { %7853 = vst.msk [vmem:[%s9095_s11 + $0xc00] sm:$0xff] %vm266_vm2, %v7341_v33  ;;  %v7086_v42 = vmax.f32 %v6574_v34, 0.0  ;;  %v6830_v43 = vadd.f32 %v10133_v16, %v6314_v41  ;;  %v5931_v44 = vld [vmem:[#allocation2 + $0x10] sm:$0xff]  ;;  %v784_v26 = vld [vmem:[#allocation2 + $0x28] sm:$0xff]  ;;  %v1571_v34 = vld [vmem:[%s8863_s8 + $0x8c0] sm:$0xff]  ;;  %8511 = vmatmul.msk.f32.gmra.mxu3 %vm1807_vm1, %v1699_v35 }
 0x228   : > { %7470 = vst.msk [vmem:[%s9095_s11 + $0x8] sm:$0xff] %vm266_vm2, %v6958_v36  ;;  %v7214_v45 = vmax.f32 %v6702_v37, 0.0  ;;  %v6447_v46 = vadd.f32 %v10133_v16, %v5931_v44  ;;  %v6059_v47 = vld [vmem:[#allocation2 + $0x410] sm:$0xff]  ;;  %v912_v28 = vld [vmem:[#allocation2 + $0x428] sm:$0xff]  ;;  %v4906_v58 = vadd.f32 %v10129_v14, %v784_v26 }
 0x229   : > { %7598 = vst.msk [vmem:[%s9095_s11 + $0x408] sm:$0xff] %vm266_vm2, %v7086_v42  ;;  %v7342_v50 = vmax.f32 %v6830_v43, 0.0  ;;  %v6575_v51 = vadd.f32 %v10133_v16, %v6059_v47  ;;  %v6187_v53 = vld [vmem:[#allocation2 + $0x810] sm:$0xff]  ;;  %8126 = vmatmul.msk.f32.gmra.mxu0 %vm1807_vm1, %v1314_v29  ;;  %v1168_v33 = vld [vmem:[#allocation2 + $0xc28] sm:$0xff]  ;;  %v5034_v61 = vadd.f32 %v10131_v15, %v912_v28  ;;  %v10239_v41 = vpop.f32.mrf.mxu0  ;;  %v1315_v47 = vld [vmem:[%s8863_s8 + $0xc0] sm:$0xff] }
 0x22a   : > { %7726 = vst.msk [vmem:[%s9095_s11 + $0x808] sm:$0xff] %vm266_vm2, %v7214_v45  ;;  %v6959_v59 = vmax.f32 %v6447_v46, 0.0  ;;  %v6703_v60 = vadd.f32 %v10133_v16, %v6187_v53  ;;  %v6315_v52 = vld [vmem:[#allocation2 + $0xc10] sm:$0xff]  ;;  %8383 = vmatmul.msk.f32.gmra.mxu2 %vm1807_vm1, %v1571_v34  ;;  %v5290_v14 = vadd.f32 %v10139_v20, %v1168_v33  ;;  %v1316_v28 = vld [vmem:[%s8863_s8 + $0xc8] sm:$0xff] }
 0x22b   : > { %7854 = vst.msk [vmem:[%s9095_s11 + $0xc08] sm:$0xff] %vm266_vm2, %v7342_v50  ;;  %v7087_v1 = vmax.f32 %v6575_v51, 0.0  ;;  %v6831_v2 = vadd.f32 %v10133_v16, %v6315_v52  ;;  %v5932_v3 = vld [vmem:[#allocation2 + $0x18] sm:$0xff]  ;;  %v785_v36 = vld [vmem:[#allocation2 + $0x30] sm:$0xff]  ;;  %v1572_v52 = vld [vmem:[%s8863_s8 + $0x8c8] sm:$0xff] }
 0x22c   : > { %7471 = vst.msk [vmem:[%s9095_s11 + $0x10] sm:$0xff] %vm266_vm2, %v6959_v59  ;;  %v7215_v5 = vmax.f32 %v6703_v60, 0.0  ;;  %v6448_v6 = vadd.f32 %v10133_v16, %v5932_v3  ;;  %v4907_v15 = vadd.f32 %v10167_v48, %v785_v36  ;;  %v10245_v19 = vpop.f32.mrf.mxu2  ;;  %v10247_v45 = vpop.f32.mrf.mxu3  ;;  %v1443_v48 = vld [vmem:[%s8863_s8 + $0x4c0] sm:$0xff]  ;;  %v913_v22 = vld [vmem:[#allocation2 + $0x430] sm:$0xff]  ;;  %v1444_v29 = vld [vmem:[%s8863_s8 + $0x4c8] sm:$0xff] }
 0x22d   : > { %7599 = vst.msk [vmem:[%s9095_s11 + $0x410] sm:$0xff] %vm266_vm2, %v7087_v1  ;;  %v7343_v10 = vmax.f32 %v6831_v2, 0.0  ;;  %v10241_v42 = vpop.f32.mrf.mxu1  ;;  %v1169_v35 = vld [vmem:[#allocation2 + $0xc30] sm:$0xff] }
 0x22e   : > { %7727 = vst.msk [vmem:[%s9095_s11 + $0x810] sm:$0xff] %vm266_vm2, %v7215_v5  ;;  %v6960_v13 = vmax.f32 %v6448_v6, 0.0  ;;  %8255 = vmatmul.msk.f32.gmra.mxu1 %vm1807_vm1, %v1443_v48  ;;  %v1701_v36 = vld [vmem:[%s8863_s8 + $0xcd0] sm:$0xff] }
 0x22f   : > { %7855 = vst.msk [vmem:[%s9095_s11 + $0xc10] sm:$0xff] %vm266_vm2, %v7343_v10  ;;  %8512 = vmatmul.msk.f32.gmra.mxu3 %vm1807_vm1, %v1700_v63  ;;  %v1043_v63 = vld [vmem:[#allocation2 + $0x840] sm:$0xff] }
 0x230   : > { %7472 = vst.msk [vmem:[%s9095_s11 + $0x18] sm:$0xff] %vm266_vm2, %v6960_v13 }
 0x231   : > { %5545 = vst.msk [vmem:[#allocation2 + $0x418] sm:$0xff] %vm266_vm2, %v5032_v11  ;;  %8127 = vmatmul.msk.f32.gmra.mxu0 %vm1807_vm1, %v1315_v47  ;;  %v10275_v12 = vpop.f32.mrf.mxu0  ;;  %v1170_v47 = vld [vmem:[#allocation2 + $0xc38] sm:$0xff] }
 0x232   : > { %5673 = vst.msk [vmem:[#allocation2 + $0x818] sm:$0xff] %vm266_vm2, %v5160_v17  ;;  %8384 = vmatmul.msk.f32.gmra.mxu2 %vm1807_vm1, %v1572_v52  ;;  %v5292_v52 = vadd.f32 %v10215_v40, %v1170_v47  ;;  %v5165_v40 = vadd.f32 %v10245_v19, %v1043_v63 }
 0x233   : > { %5801 = vst.msk [vmem:[#allocation2 + $0xc18] sm:$0xff] %vm266_vm2, %v5288_v21 }
 0x234   : > { %5418 = vst.msk [vmem:[#allocation2 + $0x20] sm:$0xff] %vm266_vm2, %v4905_v38  ;;  %v10282_v38 = vpop.f32.mrf.mxu2  ;;  %v10284_v23 = vpop.f32.mrf.mxu3 }
 0x235   : > { %5546 = vst.msk [vmem:[#allocation2 + $0x420] sm:$0xff] %vm266_vm2, %v5033_v39  ;;  %v10277_v13 = vpop.f32.mrf.mxu1 }
 0x236   : > { %5674 = vst.msk [vmem:[#allocation2 + $0x820] sm:$0xff] %vm266_vm2, %v5161_v57  ;;  %8256 = vmatmul.msk.f32.gmra.mxu1 %vm1807_vm1, %v1444_v29 }
 0x237   : > { %5802 = vst.msk [vmem:[#allocation2 + $0xc20] sm:$0xff] %vm266_vm2, %v5289_v31  ;;  %8513 = vmatmul.msk.f32.gmra.mxu3 %vm1807_vm1, %v1701_v36 }
 0x238   : > { %v6060_v37 = vld [vmem:[#allocation2 + $0x418] sm:$0xff]  ;;  %5419 = vst.msk [vmem:[#allocation2 + $0x28] sm:$0xff] %vm266_vm2, %v4906_v58  ;;  %v1041_v58 = vld [vmem:[#allocation2 + $0x830] sm:$0xff] }
 0x239   : > { %v6576_v43 = vadd.f32 %v10133_v16, %v6060_v37  ;;  %v6188_v44 = vld [vmem:[#allocation2 + $0x818] sm:$0xff]  ;;  %5547 = vst.msk [vmem:[#allocation2 + $0x428] sm:$0xff] %vm266_vm2, %v5034_v61  ;;  %8128 = vmatmul.msk.f32.gmra.mxu0 %vm1807_vm1, %v1316_v28  ;;  %v1573_v61 = vld [vmem:[%s8863_s8 + $0x8d0] sm:$0xff]  ;;  %v10315_v48 = vpop.f32.mrf.mxu0  ;;  %v1703_v28 = vld [vmem:[%s8863_s8 + $0xce0] sm:$0xff] }
 0x23a   : > { %v6704_v20 = vadd.f32 %v10133_v16, %v6188_v44  ;;  %v6316_v46 = vld [vmem:[#allocation2 + $0xc18] sm:$0xff]  ;;  %5675 = vst.msk [vmem:[#allocation2 + $0x828] sm:$0xff] %vm266_vm2, %v5162_v62  ;;  %8385 = vmatmul.msk.f32.gmra.mxu2 %vm1807_vm1, %v1573_v61 }
 0x23b   : > { %v7088_v50 = vmax.f32 %v6576_v43, 0.0  ;;  %v6832_v51 = vadd.f32 %v10133_v16, %v6316_v46  ;;  %v5933_v53 = vld [vmem:[#allocation2 + $0x20] sm:$0xff]  ;;  %5803 = vst.msk [vmem:[#allocation2 + $0xc28] sm:$0xff] %vm266_vm2, %v5290_v14  ;;  %v5035_v14 = vadd.f32 %v10169_v49, %v913_v22  ;;  %v786_v37 = vld [vmem:[#allocation2 + $0x38] sm:$0xff]  ;;  %v5163_v43 = vadd.f32 %v10174_v55, %v1041_v58 }
 0x23c   : > { %v7216_v54 = vmax.f32 %v6704_v20, 0.0  ;;  %v6449_v59 = vadd.f32 %v10133_v16, %v5933_v53  ;;  %v6061_v60 = vld [vmem:[#allocation2 + $0x420] sm:$0xff]  ;;  %5420 = vst.msk [vmem:[#allocation2 + $0x30] sm:$0xff] %vm266_vm2, %v4907_v15  ;;  %v914_v44 = vld [vmem:[#allocation2 + $0x438] sm:$0xff]  ;;  %v5291_v20 = vadd.f32 %v10176_v56, %v1169_v35  ;;  %v4908_v49 = vadd.f32 %v10207_v24, %v786_v37  ;;  %v10321_v53 = vpop.f32.mrf.mxu2  ;;  %v10323_v56 = vpop.f32.mrf.mxu3 }
 0x23d   : > { %7600 = vst.msk [vmem:[%s9095_s11 + $0x418] sm:$0xff] %vm266_vm2, %v7088_v50  ;;  %v7344_v0 = vmax.f32 %v6832_v51, 0.0  ;;  %v6577_v1 = vadd.f32 %v10133_v16, %v6061_v60  ;;  %v6189_v2 = vld [vmem:[#allocation2 + $0x820] sm:$0xff]  ;;  %v1042_v46 = vld [vmem:[#allocation2 + $0x838] sm:$0xff]  ;;  %v10317_v50 = vpop.f32.mrf.mxu1  ;;  %v5036_v55 = vadd.f32 %v10209_v25, %v914_v44  ;;  %v1445_v60 = vld [vmem:[%s8863_s8 + $0x4d0] sm:$0xff] }
 0x23e   : > { %7728 = vst.msk [vmem:[%s9095_s11 + $0x818] sm:$0xff] %vm266_vm2, %v7216_v54  ;;  %v6961_v3 = vmax.f32 %v6449_v59, 0.0  ;;  %v6705_v4 = vadd.f32 %v10133_v16, %v6189_v2  ;;  %v6317_v5 = vld [vmem:[#allocation2 + $0xc20] sm:$0xff]  ;;  %v5164_v24 = vadd.f32 %v10213_v27, %v1042_v46  ;;  %v1317_v59 = vld [vmem:[%s8863_s8 + $0xd0] sm:$0xff]  ;;  %8257 = vmatmul.msk.f32.gmra.mxu1 %vm1807_vm1, %v1445_v60  ;;  %v1702_v2 = vld [vmem:[%s8863_s8 + $0xcd8] sm:$0xff] }
 0x23f   : > { %7856 = vst.msk [vmem:[%s9095_s11 + $0xc18] sm:$0xff] %vm266_vm2, %v7344_v0  ;;  %v7089_v6 = vmax.f32 %v6577_v1, 0.0  ;;  %v6833_v7 = vadd.f32 %v10133_v16, %v6317_v5  ;;  %v5934_v8 = vld [vmem:[#allocation2 + $0x28] sm:$0xff]  ;;  %v787_v51 = vld [vmem:[#allocation2 + $0x40] sm:$0xff]  ;;  %v1574_v1 = vld [vmem:[%s8863_s8 + $0x8d8] sm:$0xff]  ;;  %8514 = vmatmul.msk.f32.gmra.mxu3 %vm1807_vm1, %v1702_v2 }
 0x240   : > { %7473 = vst.msk [vmem:[%s9095_s11 + $0x20] sm:$0xff] %vm266_vm2, %v6961_v3  ;;  %v7217_v9 = vmax.f32 %v6705_v4, 0.0  ;;  %v6450_v10 = vadd.f32 %v10133_v16, %v5934_v8  ;;  %v6062_v11 = vld [vmem:[#allocation2 + $0x428] sm:$0xff]  ;;  %v915_v54 = vld [vmem:[#allocation2 + $0x440] sm:$0xff]  ;;  %v4909_v25 = vadd.f32 %v10239_v41, %v787_v51 }
 0x241   : > { %7601 = vst.msk [vmem:[%s9095_s11 + $0x420] sm:$0xff] %vm266_vm2, %v7089_v6  ;;  %v7345_v17 = vmax.f32 %v6833_v7, 0.0  ;;  %v6578_v18 = vadd.f32 %v10133_v16, %v6062_v11  ;;  %v6190_v21 = vld [vmem:[#allocation2 + $0x828] sm:$0xff]  ;;  %8129 = vmatmul.msk.f32.gmra.mxu0 %vm1807_vm1, %v1317_v59  ;;  %v1171_v0 = vld [vmem:[#allocation2 + $0xc40] sm:$0xff]  ;;  %v5037_v27 = vadd.f32 %v10241_v42, %v915_v54  ;;  %v10347_v5 = vpop.f32.mrf.mxu0  ;;  %v1318_v11 = vld [vmem:[%s8863_s8 + $0xd8] sm:$0xff] }
 0x242   : > { %7729 = vst.msk [vmem:[%s9095_s11 + $0x820] sm:$0xff] %vm266_vm2, %v7217_v9  ;;  %v6962_v39 = vmax.f32 %v6450_v10, 0.0  ;;  %v6706_v26 = vadd.f32 %v10133_v16, %v6190_v21  ;;  %v6318_v57 = vld [vmem:[#allocation2 + $0xc28] sm:$0xff]  ;;  %8386 = vmatmul.msk.f32.gmra.mxu2 %vm1807_vm1, %v1574_v1  ;;  %v5293_v41 = vadd.f32 %v10247_v45, %v1171_v0  ;;  %v1319_v54 = vld [vmem:[%s8863_s8 + $0xe0] sm:$0xff] }
 0x243   : > { %7857 = vst.msk [vmem:[%s9095_s11 + $0xc20] sm:$0xff] %vm266_vm2, %v7345_v17  ;;  %v7090_v30 = vmax.f32 %v6578_v18, 0.0  ;;  %v6834_v31 = vadd.f32 %v10133_v16, %v6318_v57  ;;  %v5935_v32 = vld [vmem:[#allocation2 + $0x30] sm:$0xff]  ;;  %v788_v3 = vld [vmem:[#allocation2 + $0x48] sm:$0xff]  ;;  %v1575_v57 = vld [vmem:[%s8863_s8 + $0x8e0] sm:$0xff] }
 0x244   : > { %7474 = vst.msk [vmem:[%s9095_s11 + $0x28] sm:$0xff] %vm266_vm2, %v6962_v39  ;;  %v7218_v33 = vmax.f32 %v6706_v26, 0.0  ;;  %v6451_v34 = vadd.f32 %v10133_v16, %v5935_v32  ;;  %v4910_v42 = vadd.f32 %v10275_v12, %v788_v3  ;;  %v10353_v19 = vpop.f32.mrf.mxu2  ;;  %v10355_v9 = vpop.f32.mrf.mxu3  ;;  %v1446_v12 = vld [vmem:[%s8863_s8 + $0x4d8] sm:$0xff]  ;;  %v916_v46 = vld [vmem:[#allocation2 + $0x448] sm:$0xff]  ;;  %v1447_v59 = vld [vmem:[%s8863_s8 + $0x4e0] sm:$0xff] }
 0x245   : > { %7602 = vst.msk [vmem:[%s9095_s11 + $0x428] sm:$0xff] %vm266_vm2, %v7090_v30  ;;  %v7346_v62 = vmax.f32 %v6834_v31, 0.0  ;;  %v10349_v6 = vpop.f32.mrf.mxu1  ;;  %v1172_v2 = vld [vmem:[#allocation2 + $0xc48] sm:$0xff] }
 0x246   : > { %7730 = vst.msk [vmem:[%s9095_s11 + $0x828] sm:$0xff] %vm266_vm2, %v7218_v33  ;;  %v6963_v15 = vmax.f32 %v6451_v34, 0.0  ;;  %8258 = vmatmul.msk.f32.gmra.mxu1 %vm1807_vm1, %v1446_v12  ;;  %v1704_v3 = vld [vmem:[%s8863_s8 + $0xce8] sm:$0xff] }
 0x247   : > { %7858 = vst.msk [vmem:[%s9095_s11 + $0xc28] sm:$0xff] %vm266_vm2, %v7346_v62  ;;  %8515 = vmatmul.msk.f32.gmra.mxu3 %vm1807_vm1, %v1703_v28  ;;  %v1046_v28 = vld [vmem:[#allocation2 + $0x858] sm:$0xff] }
 0x248   : > { %7475 = vst.msk [vmem:[%s9095_s11 + $0x30] sm:$0xff] %vm266_vm2, %v6963_v15 }
 0x249   : > { %5548 = vst.msk [vmem:[#allocation2 + $0x430] sm:$0xff] %vm266_vm2, %v5035_v14  ;;  %8130 = vmatmul.msk.f32.gmra.mxu0 %vm1807_vm1, %v1318_v11  ;;  %v10383_v37 = vpop.f32.mrf.mxu0  ;;  %v1173_v11 = vld [vmem:[#allocation2 + $0xc50] sm:$0xff] }
 0x24a   : > { %5676 = vst.msk [vmem:[#allocation2 + $0x830] sm:$0xff] %vm266_vm2, %v5163_v43  ;;  %8387 = vmatmul.msk.f32.gmra.mxu2 %vm1807_vm1, %v1575_v57  ;;  %v5295_v57 = vadd.f32 %v10323_v56, %v1173_v11  ;;  %v5168_v56 = vadd.f32 %v10353_v19, %v1046_v28 }
 0x24b   : > { %5804 = vst.msk [vmem:[#allocation2 + $0xc30] sm:$0xff] %vm266_vm2, %v5291_v20 }
 0x24c   : > { %5421 = vst.msk [vmem:[#allocation2 + $0x38] sm:$0xff] %vm266_vm2, %v4908_v49  ;;  %v10390_v49 = vpop.f32.mrf.mxu2  ;;  %v10392_v47 = vpop.f32.mrf.mxu3 }
 0x24d   : > { %5549 = vst.msk [vmem:[#allocation2 + $0x438] sm:$0xff] %vm266_vm2, %v5036_v55  ;;  %v10385_v15 = vpop.f32.mrf.mxu1 }
 0x24e   : > { %5677 = vst.msk [vmem:[#allocation2 + $0x838] sm:$0xff] %vm266_vm2, %v5164_v24  ;;  %8259 = vmatmul.msk.f32.gmra.mxu1 %vm1807_vm1, %v1447_v59 }
 0x24f   : > { %5805 = vst.msk [vmem:[#allocation2 + $0xc38] sm:$0xff] %vm266_vm2, %v5292_v52  ;;  %8516 = vmatmul.msk.f32.gmra.mxu3 %vm1807_vm1, %v1704_v3 }
 0x250   : > { %v6063_v4 = vld [vmem:[#allocation2 + $0x430] sm:$0xff]  ;;  %5422 = vst.msk [vmem:[#allocation2 + $0x40] sm:$0xff] %vm266_vm2, %v4909_v25  ;;  %v1044_v25 = vld [vmem:[#allocation2 + $0x848] sm:$0xff] }
 0x251   : > { %v6579_v7 = vadd.f32 %v10133_v16, %v6063_v4  ;;  %v6191_v8 = vld [vmem:[#allocation2 + $0x830] sm:$0xff]  ;;  %5550 = vst.msk [vmem:[#allocation2 + $0x440] sm:$0xff] %vm266_vm2, %v5037_v27  ;;  %8131 = vmatmul.msk.f32.gmra.mxu0 %vm1807_vm1, %v1319_v54  ;;  %v1576_v27 = vld [vmem:[%s8863_s8 + $0x8e8] sm:$0xff]  ;;  %v10423_v12 = vpop.f32.mrf.mxu0  ;;  %v1706_v54 = vld [vmem:[%s8863_s8 + $0xcf8] sm:$0xff] }
 0x252   : > { %v6707_v45 = vadd.f32 %v10133_v16, %v6191_v8  ;;  %v6319_v10 = vld [vmem:[#allocation2 + $0xc30] sm:$0xff]  ;;  %5678 = vst.msk [vmem:[#allocation2 + $0x840] sm:$0xff] %vm266_vm2, %v5165_v40  ;;  %8388 = vmatmul.msk.f32.gmra.mxu2 %vm1807_vm1, %v1576_v27 }
 0x253   : > { %v7091_v17 = vmax.f32 %v6579_v7, 0.0  ;;  %v6835_v18 = vadd.f32 %v10133_v16, %v6319_v10  ;;  %v5936_v21 = vld [vmem:[#allocation2 + $0x38] sm:$0xff]  ;;  %5806 = vst.msk [vmem:[#allocation2 + $0xc40] sm:$0xff] %vm266_vm2, %v5293_v41  ;;  %v5038_v41 = vadd.f32 %v10277_v13, %v916_v46  ;;  %v789_v4 = vld [vmem:[#allocation2 + $0x50] sm:$0xff]  ;;  %v5166_v7 = vadd.f32 %v10282_v38, %v1044_v25 }
 0x254   : > { %v7219_v22 = vmax.f32 %v6707_v45, 0.0  ;;  %v6452_v39 = vadd.f32 %v10133_v16, %v5936_v21  ;;  %v6064_v26 = vld [vmem:[#allocation2 + $0x438] sm:$0xff]  ;;  %5423 = vst.msk [vmem:[#allocation2 + $0x48] sm:$0xff] %vm266_vm2, %v4910_v42  ;;  %v917_v8 = vld [vmem:[#allocation2 + $0x450] sm:$0xff]  ;;  %v5294_v45 = vadd.f32 %v10284_v23, %v1172_v2  ;;  %v4911_v13 = vadd.f32 %v10315_v48, %v789_v4  ;;  %v10429_v21 = vpop.f32.mrf.mxu2  ;;  %v10431_v23 = vpop.f32.mrf.mxu3 }
 0x255   : > { %7603 = vst.msk [vmem:[%s9095_s11 + $0x430] sm:$0xff] %vm266_vm2, %v7091_v17  ;;  %v7347_v29 = vmax.f32 %v6835_v18, 0.0  ;;  %v6580_v30 = vadd.f32 %v10133_v16, %v6064_v26  ;;  %v6192_v31 = vld [vmem:[#allocation2 + $0x838] sm:$0xff]  ;;  %v1045_v10 = vld [vmem:[#allocation2 + $0x850] sm:$0xff]  ;;  %v10425_v17 = vpop.f32.mrf.mxu1  ;;  %v5039_v38 = vadd.f32 %v10317_v50, %v917_v8  ;;  %v1448_v26 = vld [vmem:[%s8863_s8 + $0x4e8] sm:$0xff] }
 0x256   : > { %7731 = vst.msk [vmem:[%s9095_s11 + $0x830] sm:$0xff] %vm266_vm2, %v7219_v22  ;;  %v6964_v32 = vmax.f32 %v6452_v39, 0.0  ;;  %v6708_v58 = vadd.f32 %v10133_v16, %v6192_v31  ;;  %v6320_v33 = vld [vmem:[#allocation2 + $0xc38] sm:$0xff]  ;;  %v5167_v48 = vadd.f32 %v10321_v53, %v1045_v10  ;;  %v1320_v39 = vld [vmem:[%s8863_s8 + $0xe8] sm:$0xff]  ;;  %8260 = vmatmul.msk.f32.gmra.mxu1 %vm1807_vm1, %v1448_v26  ;;  %v1705_v31 = vld [vmem:[%s8863_s8 + $0xcf0] sm:$0xff] }
 0x257   : > { %7859 = vst.msk [vmem:[%s9095_s11 + $0xc30] sm:$0xff] %vm266_vm2, %v7347_v29  ;;  %v7092_v34 = vmax.f32 %v6580_v30, 0.0  ;;  %v6836_v35 = vadd.f32 %v10133_v16, %v6320_v33  ;;  %v5937_v61 = vld [vmem:[#allocation2 + $0x40] sm:$0xff]  ;;  %v790_v18 = vld [vmem:[#allocation2 + $0x58] sm:$0xff]  ;;  %v1577_v30 = vld [vmem:[%s8863_s8 + $0x8f0] sm:$0xff]  ;;  %8517 = vmatmul.msk.f32.gmra.mxu3 %vm1807_vm1, %v1705_v31 }
 0x258   : > { %7476 = vst.msk [vmem:[%s9095_s11 + $0x38] sm:$0xff] %vm266_vm2, %v6964_v32  ;;  %v7220_v36 = vmax.f32 %v6708_v58, 0.0  ;;  %v6453_v62 = vadd.f32 %v10133_v16, %v5937_v61  ;;  %v6065_v14 = vld [vmem:[#allocation2 + $0x440] sm:$0xff]  ;;  %v918_v22 = vld [vmem:[#allocation2 + $0x458] sm:$0xff]  ;;  %v4912_v50 = vadd.f32 %v10347_v5, %v790_v18 }
 0x259   : > { %7604 = vst.msk [vmem:[%s9095_s11 + $0x438] sm:$0xff] %vm266_vm2, %v7092_v34  ;;  %v7348_v43 = vmax.f32 %v6836_v35, 0.0  ;;  %v6581_v44 = vadd.f32 %v10133_v16, %v6065_v14  ;;  %v6193_v20 = vld [vmem:[#allocation2 + $0x840] sm:$0xff]  ;;  %8132 = vmatmul.msk.f32.gmra.mxu0 %vm1807_vm1, %v1320_v39  ;;  %v1174_v29 = vld [vmem:[#allocation2 + $0xc58] sm:$0xff]  ;;  %v5040_v53 = vadd.f32 %v10349_v6, %v918_v22  ;;  %v10455_v33 = vpop.f32.mrf.mxu0  ;;  %v1321_v14 = vld [vmem:[%s8863_s8 + $0xf0] sm:$0xff] }
 0x25a   : > { %7732 = vst.msk [vmem:[%s9095_s11 + $0x838] sm:$0xff] %vm266_vm2, %v7220_v36  ;;  %v6965_v55 = vmax.f32 %v6453_v62, 0.0  ;;  %v6709_v51 = vadd.f32 %v10133_v16, %v6193_v20  ;;  %v6321_v24 = vld [vmem:[#allocation2 + $0xc40] sm:$0xff]  ;;  %8389 = vmatmul.msk.f32.gmra.mxu2 %vm1807_vm1, %v1577_v30  ;;  %v5296_v5 = vadd.f32 %v10355_v9, %v1174_v29  ;;  %v1322_v22 = vld [vmem:[%s8863_s8 + $0xf8] sm:$0xff] }
 0x25b   : > { %7860 = vst.msk [vmem:[%s9095_s11 + $0xc38] sm:$0xff] %vm266_vm2, %v7348_v43  ;;  %v7093_v60 = vmax.f32 %v6581_v44, 0.0  ;;  %v6837_v52 = vadd.f32 %v10133_v16, %v6321_v24  ;;  %v5938_v63 = vld [vmem:[#allocation2 + $0x48] sm:$0xff]  ;;  %v791_v32 = vld [vmem:[#allocation2 + $0x60] sm:$0xff]  ;;  %v1578_v24 = vld [vmem:[%s8863_s8 + $0x8f8] sm:$0xff] }
 0x25c   : > { %7477 = vst.msk [vmem:[%s9095_s11 + $0x40] sm:$0xff] %vm266_vm2, %v6965_v55  ;;  %v7221_v0 = vmax.f32 %v6709_v51, 0.0  ;;  %v6454_v1 = vadd.f32 %v10133_v16, %v5938_v63  ;;  %v4913_v6 = vadd.f32 %v10383_v37, %v791_v32  ;;  %v10461_v19 = vpop.f32.mrf.mxu2  ;;  %v10463_v36 = vpop.f32.mrf.mxu3  ;;  %v1449_v37 = vld [vmem:[%s8863_s8 + $0x4f0] sm:$0xff]  ;;  %v919_v10 = vld [vmem:[#allocation2 + $0x460] sm:$0xff]  ;;  %v1450_v39 = vld [vmem:[%s8863_s8 + $0x4f8] sm:$0xff] }
 0x25d   : > { %7605 = vst.msk [vmem:[%s9095_s11 + $0x440] sm:$0xff] %vm266_vm2, %v7093_v60  ;;  %v7349_v40 = vmax.f32 %v6837_v52, 0.0  ;;  %v10457_v34 = vpop.f32.mrf.mxu1  ;;  %v1175_v31 = vld [vmem:[#allocation2 + $0xc60] sm:$0xff] }
 0x25e   : > { %7733 = vst.msk [vmem:[%s9095_s11 + $0x840] sm:$0xff] %vm266_vm2, %v7221_v0  ;;  %v6966_v42 = vmax.f32 %v6454_v1, 0.0  ;;  %8261 = vmatmul.msk.f32.gmra.mxu1 %vm1807_vm1, %v1449_v37  ;;  %v1707_v32 = vld [vmem:[%s8863_s8 + $0xd00] sm:$0xff] }
 0x25f   : > { %7861 = vst.msk [vmem:[%s9095_s11 + $0xc40] sm:$0xff] %vm266_vm2, %v7349_v40  ;;  %8518 = vmatmul.msk.f32.gmra.mxu3 %vm1807_vm1, %v1706_v54  ;;  %v1049_v54 = vld [vmem:[#allocation2 + $0x870] sm:$0xff] }
 0x260   : > { %7478 = vst.msk [vmem:[%s9095_s11 + $0x48] sm:$0xff] %vm266_vm2, %v6966_v42 }
 0x261   : > { %5551 = vst.msk [vmem:[#allocation2 + $0x448] sm:$0xff] %vm266_vm2, %v5038_v41  ;;  %8133 = vmatmul.msk.f32.gmra.mxu0 %vm1807_vm1, %v1321_v14  ;;  %v10491_v4 = vpop.f32.mrf.mxu0  ;;  %v1176_v14 = vld [vmem:[#allocation2 + $0xc68] sm:$0xff] }
 0x262   : > { %5679 = vst.msk [vmem:[#allocation2 + $0x848] sm:$0xff] %vm266_vm2, %v5166_v7  ;;  %8390 = vmatmul.msk.f32.gmra.mxu2 %vm1807_vm1, %v1578_v24  ;;  %v5298_v24 = vadd.f32 %v10431_v23, %v1176_v14  ;;  %v5171_v23 = vadd.f32 %v10461_v19, %v1049_v54 }
 0x263   : > { %5807 = vst.msk [vmem:[#allocation2 + $0xc48] sm:$0xff] %vm266_vm2, %v5294_v45 }
 0x264   : > { %5424 = vst.msk [vmem:[#allocation2 + $0x50] sm:$0xff] %vm266_vm2, %v4911_v13  ;;  %v10498_v13 = vpop.f32.mrf.mxu2  ;;  %v10500_v11 = vpop.f32.mrf.mxu3 }
 0x265   : > { %5552 = vst.msk [vmem:[#allocation2 + $0x450] sm:$0xff] %vm266_vm2, %v5039_v38  ;;  %v10493_v42 = vpop.f32.mrf.mxu1 }
 0x266   : > { %5680 = vst.msk [vmem:[#allocation2 + $0x850] sm:$0xff] %vm266_vm2, %v5167_v48  ;;  %8262 = vmatmul.msk.f32.gmra.mxu1 %vm1807_vm1, %v1450_v39 }
 0x267   : > { %5808 = vst.msk [vmem:[#allocation2 + $0xc50] sm:$0xff] %vm266_vm2, %v5295_v57  ;;  %8519 = vmatmul.msk.f32.gmra.mxu3 %vm1807_vm1, %v1707_v32 }
 0x268   : > { %v6066_v58 = vld [vmem:[#allocation2 + $0x448] sm:$0xff]  ;;  %5425 = vst.msk [vmem:[#allocation2 + $0x58] sm:$0xff] %vm266_vm2, %v4912_v50  ;;  %v1047_v50 = vld [vmem:[#allocation2 + $0x860] sm:$0xff] }
 0x269   : > { %v6582_v35 = vadd.f32 %v10133_v16, %v6066_v58  ;;  %v6194_v61 = vld [vmem:[#allocation2 + $0x848] sm:$0xff]  ;;  %5553 = vst.msk [vmem:[#allocation2 + $0x458] sm:$0xff] %vm266_vm2, %v5040_v53  ;;  %8134 = vmatmul.msk.f32.gmra.mxu0 %vm1807_vm1, %v1322_v22  ;;  %v1579_v53 = vld [vmem:[%s8863_s8 + $0x900] sm:$0xff]  ;;  %v10531_v37 = vpop.f32.mrf.mxu0  ;;  %v1709_v22 = vld [vmem:[%s8863_s8 + $0xd10] sm:$0xff] }
 0x26a   : > { %v6710_v9 = vadd.f32 %v10133_v16, %v6194_v61  ;;  %v6322_v62 = vld [vmem:[#allocation2 + $0xc48] sm:$0xff]  ;;  %5681 = vst.msk [vmem:[#allocation2 + $0x858] sm:$0xff] %vm266_vm2, %v5168_v56  ;;  %8391 = vmatmul.msk.f32.gmra.mxu2 %vm1807_vm1, %v1579_v53 }
 0x26b   : > { %v7094_v43 = vmax.f32 %v6582_v35, 0.0  ;;  %v6838_v44 = vadd.f32 %v10133_v16, %v6322_v62  ;;  %v5939_v20 = vld [vmem:[#allocation2 + $0x50] sm:$0xff]  ;;  %5809 = vst.msk [vmem:[#allocation2 + $0xc58] sm:$0xff] %vm266_vm2, %v5296_v5  ;;  %v5041_v5 = vadd.f32 %v10385_v15, %v919_v10  ;;  %v792_v58 = vld [vmem:[#allocation2 + $0x68] sm:$0xff]  ;;  %v5169_v35 = vadd.f32 %v10390_v49, %v1047_v50 }
 0x26c   : > { %v7222_v46 = vmax.f32 %v6710_v9, 0.0  ;;  %v6455_v55 = vadd.f32 %v10133_v16, %v5939_v20  ;;  %v6067_v51 = vld [vmem:[#allocation2 + $0x450] sm:$0xff]  ;;  %5426 = vst.msk [vmem:[#allocation2 + $0x60] sm:$0xff] %vm266_vm2, %v4913_v6  ;;  %v920_v61 = vld [vmem:[#allocation2 + $0x468] sm:$0xff]  ;;  %v5297_v9 = vadd.f32 %v10392_v47, %v1175_v31  ;;  %v4914_v15 = vadd.f32 %v10423_v12, %v792_v58  ;;  %v10537_v20 = vpop.f32.mrf.mxu2  ;;  %v10539_v47 = vpop.f32.mrf.mxu3  ;;  %v10595_v31 = vld [vmem:[#allocation5] ss:$0 sm:$0xff] }
 0x26d   : > { %7606 = vst.msk [vmem:[%s9095_s11 + $0x448] sm:$0xff] %vm266_vm2, %v7094_v43  ;;  %v7350_v59 = vmax.f32 %v6838_v44, 0.0  ;;  %v6583_v60 = vadd.f32 %v10133_v16, %v6067_v51  ;;  %v6195_v52 = vld [vmem:[#allocation2 + $0x850] sm:$0xff]  ;;  %v1048_v62 = vld [vmem:[#allocation2 + $0x868] sm:$0xff]  ;;  %v10533_v43 = vpop.f32.mrf.mxu1  ;;  %v5042_v49 = vadd.f32 %v10425_v17, %v920_v61  ;;  %v1451_v51 = vld [vmem:[%s8863_s8 + $0x500] sm:$0xff] }
 0x26e   : > { %7734 = vst.msk [vmem:[%s9095_s11 + $0x848] sm:$0xff] %vm266_vm2, %v7222_v46  ;;  %v6967_v63 = vmax.f32 %v6455_v55, 0.0  ;;  %v6711_v25 = vadd.f32 %v10133_v16, %v6195_v52  ;;  %v6323_v0 = vld [vmem:[#allocation2 + $0xc50] sm:$0xff]  ;;  %v5170_v12 = vadd.f32 %v10429_v21, %v1048_v62  ;;  %v1323_v55 = vld [vmem:[%s8863_s8 + $0x100] sm:$0xff]  ;;  %8263 = vmatmul.msk.f32.gmra.mxu1 %vm1807_vm1, %v1451_v51  ;;  %v1708_v52 = vld [vmem:[%s8863_s8 + $0xd08] sm:$0xff] }
 0x26f   : > { %7862 = vst.msk [vmem:[%s9095_s11 + $0xc48] sm:$0xff] %vm266_vm2, %v7350_v59  ;;  %v7095_v1 = vmax.f32 %v6583_v60, 0.0  ;;  %v6839_v2 = vadd.f32 %v10133_v16, %v6323_v0  ;;  %v5940_v27 = vld [vmem:[#allocation2 + $0x58] sm:$0xff]  ;;  %v793_v44 = vld [vmem:[#allocation2 + $0x70] sm:$0xff]  ;;  %v1580_v60 = vld [vmem:[%s8863_s8 + $0x908] sm:$0xff]  ;;  %8520 = vmatmul.msk.f32.gmra.mxu3 %vm1807_vm1, %v1708_v52 }
 0x270   : > { %7479 = vst.msk [vmem:[%s9095_s11 + $0x50] sm:$0xff] %vm266_vm2, %v6967_v63  ;;  %v7223_v3 = vmax.f32 %v6711_v25, 0.0  ;;  %v6456_v40 = vadd.f32 %v10133_v16, %v5940_v27  ;;  %v6068_v41 = vld [vmem:[#allocation2 + $0x458] sm:$0xff]  ;;  %v921_v46 = vld [vmem:[#allocation2 + $0x470] sm:$0xff]  ;;  %v4915_v17 = vadd.f32 %v10455_v33, %v793_v44 }
 0x271   : > { %7607 = vst.msk [vmem:[%s9095_s11 + $0x450] sm:$0xff] %vm266_vm2, %v7095_v1  ;;  %v7351_v7 = vmax.f32 %v6839_v2, 0.0  ;;  %v6584_v8 = vadd.f32 %v10133_v16, %v6068_v41  ;;  %v6196_v45 = vld [vmem:[#allocation2 + $0x858] sm:$0xff]  ;;  %8135 = vmatmul.msk.f32.gmra.mxu0 %vm1807_vm1, %v1323_v55  ;;  %v1177_v59 = vld [vmem:[#allocation2 + $0xc70] sm:$0xff]  ;;  %v5043_v21 = vadd.f32 %v10457_v34, %v921_v46  ;;  %v10563_v0 = vpop.f32.mrf.mxu0  ;;  %v1324_v41 = vld [vmem:[%s8863_s8 + $0x108] sm:$0xff] }
 0x272   : > { %7735 = vst.msk [vmem:[%s9095_s11 + $0x850] sm:$0xff] %vm266_vm2, %v7223_v3  ;;  %v6968_v38 = vmax.f32 %v6456_v40, 0.0  ;;  %v6712_v18 = vadd.f32 %v10133_v16, %v6196_v45  ;;  %v6324_v48 = vld [vmem:[#allocation2 + $0xc58] sm:$0xff]  ;;  %8392 = vmatmul.msk.f32.gmra.mxu2 %vm1807_vm1, %v1580_v60  ;;  %v5299_v33 = vadd.f32 %v10463_v36, %v1177_v59  ;;  %v1325_v46 = vld [vmem:[%s8863_s8 + $0x110] sm:$0xff] }
 0x273   : > { %7863 = vst.msk [vmem:[%s9095_s11 + $0xc50] sm:$0xff] %vm266_vm2, %v7351_v7  ;;  %v7096_v26 = vmax.f32 %v6584_v8, 0.0  ;;  %v6840_v57 = vadd.f32 %v10133_v16, %v6324_v48  ;;  %v5941_v28 = vld [vmem:[#allocation2 + $0x60] sm:$0xff]  ;;  %v794_v63 = vld [vmem:[#allocation2 + $0x78] sm:$0xff]  ;;  %v1581_v48 = vld [vmem:[%s8863_s8 + $0x910] sm:$0xff] }
 0x274   : > { %7480 = vst.msk [vmem:[%s9095_s11 + $0x58] sm:$0xff] %vm266_vm2, %v6968_v38  ;;  %v7224_v29 = vmax.f32 %v6712_v18, 0.0  ;;  %v6457_v30 = vadd.f32 %v10133_v16, %v5941_v28  ;;  %v4916_v34 = vadd.f32 %v10491_v4, %v794_v63  ;;  %v10569_v19 = vpop.f32.mrf.mxu2  ;;  %v10571_v3 = vpop.f32.mrf.mxu3  ;;  %v1452_v4 = vld [vmem:[%s8863_s8 + $0x508] sm:$0xff]  ;;  %v922_v62 = vld [vmem:[#allocation2 + $0x478] sm:$0xff]  ;;  %v1453_v55 = vld [vmem:[%s8863_s8 + $0x510] sm:$0xff] }
 0x275   : > { %7608 = vst.msk [vmem:[%s9095_s11 + $0x458] sm:$0xff] %vm266_vm2, %v7096_v26  ;;  %v7352_v56 = vmax.f32 %v6840_v57, 0.0  ;;  %v10565_v1 = vpop.f32.mrf.mxu1  ;;  %v1178_v52 = vld [vmem:[#allocation2 + $0xc78] sm:$0xff] }
 0x276   : > { %7736 = vst.msk [vmem:[%s9095_s11 + $0x858] sm:$0xff] %vm266_vm2, %v7224_v29  ;;  %v6969_v6 = vmax.f32 %v6457_v30, 0.0  ;;  %8264 = vmatmul.msk.f32.gmra.mxu1 %vm1807_vm1, %v1452_v4  ;;  %v1710_v63 = vld [vmem:[%s8863_s8 + $0xd18] sm:$0xff] }
 0x277   : > { %7864 = vst.msk [vmem:[%s9095_s11 + $0xc58] sm:$0xff] %vm266_vm2, %v7352_v56  ;;  %8521 = vmatmul.msk.f32.gmra.mxu3 %vm1807_vm1, %v1709_v22  ;;  %v1052_v22 = vld [vmem:[#allocation2 + $0x888] sm:$0xff] }
 0x278   : > { %7481 = vst.msk [vmem:[%s9095_s11 + $0x60] sm:$0xff] %vm266_vm2, %v6969_v6 }
 0x279   : > { %5554 = vst.msk [vmem:[#allocation2 + $0x460] sm:$0xff] %vm266_vm2, %v5041_v5  ;;  %8136 = vmatmul.msk.f32.gmra.mxu0 %vm1807_vm1, %v1324_v41  ;;  %v1179_v41 = vld [vmem:[#allocation2 + $0xc80] sm:$0xff] }
 0x27a   : > { %5682 = vst.msk [vmem:[#allocation2 + $0x860] sm:$0xff] %vm266_vm2, %v5169_v35  ;;  %8393 = vmatmul.msk.f32.gmra.mxu2 %vm1807_vm1, %v1581_v48  ;;  %v5301_v48 = vadd.f32 %v10539_v47, %v1179_v41  ;;  %v5174_v47 = vadd.f32 %v10569_v19, %v1052_v22 }
 0x27b   : > { %5810 = vst.msk [vmem:[#allocation2 + $0xc60] sm:$0xff] %vm266_vm2, %v5297_v9 }
 0x27c   : > { %5427 = vst.msk [vmem:[#allocation2 + $0x68] sm:$0xff] %vm266_vm2, %v4914_v15  ;;  %v10608_v15 = vpop.f32.mrf.mxu2  ;;  %v10610_v14 = vpop.f32.mrf.mxu3 }
 0x27d   : > { %5555 = vst.msk [vmem:[#allocation2 + $0x468] sm:$0xff] %vm266_vm2, %v5042_v49  ;;  %v10603_v6 = vpop.f32.mrf.mxu1 }
 0x27e   : > { %5683 = vst.msk [vmem:[#allocation2 + $0x868] sm:$0xff] %vm266_vm2, %v5170_v12  ;;  %8265 = vmatmul.msk.f32.gmra.mxu1 %vm1807_vm1, %v1453_v55 }
 0x27f   : > { %5811 = vst.msk [vmem:[#allocation2 + $0xc68] sm:$0xff] %vm266_vm2, %v5298_v24  ;;  %8522 = vmatmul.msk.f32.gmra.mxu3 %vm1807_vm1, %v1710_v63 }
 0x280   : > { %v6069_v25 = vld [vmem:[#allocation2 + $0x460] sm:$0xff]  ;;  %5428 = vst.msk [vmem:[#allocation2 + $0x70] sm:$0xff] %vm266_vm2, %v4915_v17  ;;  %v1050_v17 = vld [vmem:[#allocation2 + $0x878] sm:$0xff] }
 0x281   : > { %v6585_v2 = vadd.f32 %v10133_v16, %v6069_v25  ;;  %v6197_v27 = vld [vmem:[#allocation2 + $0x860] sm:$0xff]  ;;  %5556 = vst.msk [vmem:[#allocation2 + $0x470] sm:$0xff] %vm266_vm2, %v5043_v21  ;;  %8137 = vmatmul.msk.f32.gmra.mxu0 %vm1807_vm1, %v1325_v46  ;;  %v1582_v21 = vld [vmem:[%s8863_s8 + $0x918] sm:$0xff]  ;;  %v1712_v46 = vld [vmem:[%s8863_s8 + $0xd28] sm:$0xff] }
 0x282   : > { %v6713_v36 = vadd.f32 %v10133_v16, %v6197_v27  ;;  %v6325_v40 = vld [vmem:[#allocation2 + $0xc60] sm:$0xff]  ;;  %5684 = vst.msk [vmem:[#allocation2 + $0x870] sm:$0xff] %vm266_vm2, %v5171_v23  ;;  %8394 = vmatmul.msk.f32.gmra.mxu2 %vm1807_vm1, %v1582_v21 }
 0x283   : > { %v7097_v7 = vmax.f32 %v6585_v2, 0.0  ;;  %v6841_v8 = vadd.f32 %v10133_v16, %v6325_v40  ;;  %v5942_v45 = vld [vmem:[#allocation2 + $0x68] sm:$0xff]  ;;  %5812 = vst.msk [vmem:[#allocation2 + $0xc70] sm:$0xff] %vm266_vm2, %v5299_v33  ;;  %v5044_v33 = vadd.f32 %v10493_v42, %v922_v62  ;;  %v795_v25 = vld [vmem:[#allocation2 + $0x80] sm:$0xff]  ;;  %v5172_v2 = vadd.f32 %v10498_v13, %v1050_v17 }
 0x284   : > { %v7225_v10 = vmax.f32 %v6713_v36, 0.0  ;;  %v6458_v38 = vadd.f32 %v10133_v16, %v5942_v45  ;;  %v6070_v18 = vld [vmem:[#allocation2 + $0x468] sm:$0xff]  ;;  %5429 = vst.msk [vmem:[#allocation2 + $0x78] sm:$0xff] %vm266_vm2, %v4916_v34  ;;  %v923_v27 = vld [vmem:[#allocation2 + $0x480] sm:$0xff]  ;;  %v5300_v36 = vadd.f32 %v10500_v11, %v1178_v52  ;;  %v4917_v42 = vadd.f32 %v10531_v37, %v795_v25  ;;  %v10647_v45 = vpop.f32.mrf.mxu2  ;;  %v10649_v11 = vpop.f32.mrf.mxu3 }
 0x285   : > { %7609 = vst.msk [vmem:[%s9095_s11 + $0x460] sm:$0xff] %vm266_vm2, %v7097_v7  ;;  %v7353_v39 = vmax.f32 %v6841_v8, 0.0  ;;  %v6586_v26 = vadd.f32 %v10133_v16, %v6070_v18  ;;  %v6198_v57 = vld [vmem:[#allocation2 + $0x868] sm:$0xff]  ;;  %v1051_v40 = vld [vmem:[#allocation2 + $0x880] sm:$0xff]  ;;  %v10643_v7 = vpop.f32.mrf.mxu1  ;;  %v5045_v13 = vadd.f32 %v10533_v43, %v923_v27  ;;  %v1454_v18 = vld [vmem:[%s8863_s8 + $0x518] sm:$0xff] }
 0x286   : > { %7737 = vst.msk [vmem:[%s9095_s11 + $0x860] sm:$0xff] %vm266_vm2, %v7225_v10  ;;  %v6970_v28 = vmax.f32 %v6458_v38, 0.0  ;;  %v6714_v50 = vadd.f32 %v10133_v16, %v6198_v57  ;;  %v6326_v29 = vld [vmem:[#allocation2 + $0xc68] sm:$0xff]  ;;  %v10601_v16 = vpop.f32.mrf.mxu0  ;;  %v5173_v37 = vadd.f32 %v10537_v20, %v1051_v40  ;;  %v1326_v38 = vld [vmem:[%s8863_s8 + $0x118] sm:$0xff]  ;;  %8266 = vmatmul.msk.f32.gmra.mxu1 %vm1807_vm1, %v1454_v18  ;;  %v1711_v57 = vld [vmem:[%s8863_s8 + $0xd20] sm:$0xff] }
 0x287   : > { %7865 = vst.msk [vmem:[%s9095_s11 + $0xc60] sm:$0xff] %vm266_vm2, %v7353_v39  ;;  %v7098_v30 = vmax.f32 %v6586_v26, 0.0  ;;  %v6842_v53 = vadd.f32 %v10595_v31, %v6326_v29  ;;  %v5943_v32 = vld [vmem:[#allocation2 + $0x70] sm:$0xff]  ;;  %v796_v8 = vld [vmem:[#allocation2 + $0x88] sm:$0xff]  ;;  %v1583_v26 = vld [vmem:[%s8863_s8 + $0x920] sm:$0xff]  ;;  %8523 = vmatmul.msk.f32.gmra.mxu3 %vm1807_vm1, %v1711_v57 }
 0x288   : > { %7482 = vst.msk [vmem:[%s9095_s11 + $0x68] sm:$0xff] %vm266_vm2, %v6970_v28  ;;  %v7226_v56 = vmax.f32 %v6714_v50, 0.0  ;;  %v6459_v5 = vadd.f32 %v10595_v31, %v5943_v32  ;;  %v6071_v58 = vld [vmem:[#allocation2 + $0x470] sm:$0xff]  ;;  %v924_v10 = vld [vmem:[#allocation2 + $0x488] sm:$0xff]  ;;  %v4918_v43 = vadd.f32 %v10563_v0, %v796_v8 }
 0x289   : > { %7610 = vst.msk [vmem:[%s9095_s11 + $0x468] sm:$0xff] %vm266_vm2, %v7098_v30  ;;  %v7354_v35 = vmax.f32 %v6842_v53, 0.0  ;;  %v6587_v61 = vadd.f32 %v10595_v31, %v6071_v58  ;;  %v6199_v9 = vld [vmem:[#allocation2 + $0x870] sm:$0xff]  ;;  %8138 = vmatmul.msk.f32.gmra.mxu0 %vm1807_vm1, %v1326_v38  ;;  %v1180_v39 = vld [vmem:[#allocation2 + $0xc88] sm:$0xff]  ;;  %v5046_v20 = vadd.f32 %v10565_v1, %v924_v10  ;;  %v1327_v58 = vld [vmem:[%s8863_s8 + $0x120] sm:$0xff] }
 0x28a   : > { %7738 = vst.msk [vmem:[%s9095_s11 + $0x868] sm:$0xff] %vm266_vm2, %v7226_v56  ;;  %v6971_v49 = vmax.f32 %v6459_v5, 0.0  ;;  %v6715_v44 = vadd.f32 %v10595_v31, %v6199_v9  ;;  %v6327_v12 = vld [vmem:[#allocation2 + $0xc70] sm:$0xff]  ;;  %8395 = vmatmul.msk.f32.gmra.mxu2 %vm1807_vm1, %v1583_v26  ;;  %v5302_v0 = vadd.f32 %v10571_v3, %v1180_v39  ;;  %v1328_v10 = vld [vmem:[%s8863_s8 + $0x128] sm:$0xff] }
 0x28b   : > { %7866 = vst.msk [vmem:[%s9095_s11 + $0xc68] sm:$0xff] %vm266_vm2, %v7354_v35  ;;  %v7099_v51 = vmax.f32 %v6587_v61, 0.0  ;;  %v6843_v24 = vadd.f32 %v10595_v31, %v6327_v12  ;;  %v5944_v54 = vld [vmem:[#allocation2 + $0x78] sm:$0xff]  ;;  %v797_v28 = vld [vmem:[#allocation2 + $0x90] sm:$0xff]  ;;  %v1584_v12 = vld [vmem:[%s8863_s8 + $0x928] sm:$0xff] }
 0x28c   : > { %7483 = vst.msk [vmem:[%s9095_s11 + $0x70] sm:$0xff] %vm266_vm2, %v6971_v49  ;;  %v7227_v59 = vmax.f32 %v6715_v44, 0.0  ;;  %v6460_v60 = vadd.f32 %v10595_v31, %v5944_v54  ;;  %v4919_v1 = vadd.f32 %v10601_v16, %v797_v28  ;;  %v10679_v19 = vpop.f32.mrf.mxu2  ;;  %v10681_v56 = vpop.f32.mrf.mxu3  ;;  %v1455_v16 = vld [vmem:[%s8863_s8 + $0x520] sm:$0xff]  ;;  %v925_v40 = vld [vmem:[#allocation2 + $0x490] sm:$0xff]  ;;  %v1456_v38 = vld [vmem:[%s8863_s8 + $0x528] sm:$0xff] }
 0x28d   : > { %7611 = vst.msk [vmem:[%s9095_s11 + $0x470] sm:$0xff] %vm266_vm2, %v7099_v51  ;;  %v7355_v23 = vmax.f32 %v6843_v24, 0.0  ;;  %v10675_v30 = vpop.f32.mrf.mxu1  ;;  %v1181_v57 = vld [vmem:[#allocation2 + $0xc90] sm:$0xff] }
 0x28e   : > { %7739 = vst.msk [vmem:[%s9095_s11 + $0x870] sm:$0xff] %vm266_vm2, %v7227_v59  ;;  %v6972_v34 = vmax.f32 %v6460_v60, 0.0  ;;  %v10641_v4 = vpop.f32.mrf.mxu0  ;;  %8267 = vmatmul.msk.f32.gmra.mxu1 %vm1807_vm1, %v1455_v16  ;;  %v1713_v28 = vld [vmem:[%s8863_s8 + $0xd30] sm:$0xff] }
 0x28f   : > { %7867 = vst.msk [vmem:[%s9095_s11 + $0xc70] sm:$0xff] %vm266_vm2, %v7355_v23  ;;  %8524 = vmatmul.msk.f32.gmra.mxu3 %vm1807_vm1, %v1712_v46  ;;  %v1055_v46 = vld [vmem:[#allocation2 + $0x8a0] sm:$0xff] }
 0x290   : > { %7484 = vst.msk [vmem:[%s9095_s11 + $0x78] sm:$0xff] %vm266_vm2, %v6972_v34 }
 0x291   : > { %5557 = vst.msk [vmem:[#allocation2 + $0x478] sm:$0xff] %vm266_vm2, %v5044_v33  ;;  %8139 = vmatmul.msk.f32.gmra.mxu0 %vm1807_vm1, %v1327_v58  ;;  %v1182_v58 = vld [vmem:[#allocation2 + $0xc98] sm:$0xff] }
 0x292   : > { %5685 = vst.msk [vmem:[#allocation2 + $0x878] sm:$0xff] %vm266_vm2, %v5172_v2  ;;  %8396 = vmatmul.msk.f32.gmra.mxu2 %vm1807_vm1, %v1584_v12  ;;  %v5304_v12 = vadd.f32 %v10649_v11, %v1182_v58  ;;  %v5177_v11 = vadd.f32 %v10679_v19, %v1055_v46 }
 0x293   : > { %5813 = vst.msk [vmem:[#allocation2 + $0xc78] sm:$0xff] %vm266_vm2, %v5300_v36 }
 0x294   : > { %5430 = vst.msk [vmem:[#allocation2 + $0x80] sm:$0xff] %vm266_vm2, %v4917_v42  ;;  %v10716_v42 = vpop.f32.mrf.mxu2  ;;  %v10718_v41 = vpop.f32.mrf.mxu3 }
 0x295   : > { %5558 = vst.msk [vmem:[#allocation2 + $0x480] sm:$0xff] %vm266_vm2, %v5045_v13  ;;  %v10711_v34 = vpop.f32.mrf.mxu1 }
 0x296   : > { %5686 = vst.msk [vmem:[#allocation2 + $0x880] sm:$0xff] %vm266_vm2, %v5173_v37  ;;  %v10673_v29 = vpop.f32.mrf.mxu0  ;;  %8268 = vmatmul.msk.f32.gmra.mxu1 %vm1807_vm1, %v1456_v38 }
 0x297   : > { %5814 = vst.msk [vmem:[#allocation2 + $0xc80] sm:$0xff] %vm266_vm2, %v5301_v48  ;;  %8525 = vmatmul.msk.f32.gmra.mxu3 %vm1807_vm1, %v1713_v28 }
 0x298   : > { %v6072_v50 = vld [vmem:[#allocation2 + $0x478] sm:$0xff]  ;;  %5431 = vst.msk [vmem:[#allocation2 + $0x88] sm:$0xff] %vm266_vm2, %v4918_v43  ;;  %v1053_v43 = vld [vmem:[#allocation2 + $0x890] sm:$0xff] }
 0x299   : > { %v6588_v53 = vadd.f32 %v10595_v31, %v6072_v50  ;;  %v6200_v32 = vld [vmem:[#allocation2 + $0x878] sm:$0xff]  ;;  %5559 = vst.msk [vmem:[#allocation2 + $0x488] sm:$0xff] %vm266_vm2, %v5046_v20  ;;  %8140 = vmatmul.msk.f32.gmra.mxu0 %vm1807_vm1, %v1328_v10  ;;  %v1585_v20 = vld [vmem:[%s8863_s8 + $0x930] sm:$0xff]  ;;  %v1715_v10 = vld [vmem:[%s8863_s8 + $0xd40] sm:$0xff] }
 0x29a   : > { %v6716_v3 = vadd.f32 %v10595_v31, %v6200_v32  ;;  %v6328_v5 = vld [vmem:[#allocation2 + $0xc78] sm:$0xff]  ;;  %5687 = vst.msk [vmem:[#allocation2 + $0x888] sm:$0xff] %vm266_vm2, %v5174_v47  ;;  %8397 = vmatmul.msk.f32.gmra.mxu2 %vm1807_vm1, %v1585_v20 }
 0x29b   : > { %v7100_v35 = vmax.f32 %v6588_v53, 0.0  ;;  %v6844_v61 = vadd.f32 %v10595_v31, %v6328_v5  ;;  %v5945_v9 = vld [vmem:[#allocation2 + $0x80] sm:$0xff]  ;;  %5815 = vst.msk [vmem:[#allocation2 + $0xc88] sm:$0xff] %vm266_vm2, %v5302_v0  ;;  %v5047_v0 = vadd.f32 %v10603_v6, %v925_v40  ;;  %v798_v50 = vld [vmem:[#allocation2 + $0x98] sm:$0xff]  ;;  %v5175_v53 = vadd.f32 %v10608_v15, %v1053_v43 }
 0x29c   : > { %v7228_v62 = vmax.f32 %v6716_v3, 0.0  ;;  %v6461_v49 = vadd.f32 %v10595_v31, %v5945_v9  ;;  %v6073_v44 = vld [vmem:[#allocation2 + $0x480] sm:$0xff]  ;;  %5432 = vst.msk [vmem:[#allocation2 + $0x90] sm:$0xff] %vm266_vm2, %v4919_v1  ;;  %v926_v32 = vld [vmem:[#allocation2 + $0x498] sm:$0xff]  ;;  %v5303_v3 = vadd.f32 %v10610_v14, %v1181_v57  ;;  %v4920_v6 = vadd.f32 %v10641_v4, %v798_v50  ;;  %v10755_v9 = vpop.f32.mrf.mxu2  ;;  %v10757_v14 = vpop.f32.mrf.mxu3 }
 0x29d   : > { %7612 = vst.msk [vmem:[%s9095_s11 + $0x478] sm:$0xff] %vm266_vm2, %v7100_v35  ;;  %v7356_v55 = vmax.f32 %v6844_v61, 0.0  ;;  %v6589_v51 = vadd.f32 %v10595_v31, %v6073_v44  ;;  %v6201_v24 = vld [vmem:[#allocation2 + $0x880] sm:$0xff]  ;;  %v1054_v5 = vld [vmem:[#allocation2 + $0x898] sm:$0xff]  ;;  %v10751_v35 = vpop.f32.mrf.mxu1  ;;  %v5048_v15 = vadd.f32 %v10643_v7, %v926_v32  ;;  %v1457_v44 = vld [vmem:[%s8863_s8 + $0x530] sm:$0xff] }
 0x29e   : > { %7740 = vst.msk [vmem:[%s9095_s11 + $0x878] sm:$0xff] %vm266_vm2, %v7228_v62  ;;  %v6973_v54 = vmax.f32 %v6461_v49, 0.0  ;;  %v6717_v17 = vadd.f32 %v10595_v31, %v6201_v24  ;;  %v6329_v59 = vld [vmem:[#allocation2 + $0xc80] sm:$0xff]  ;;  %v10709_v25 = vpop.f32.mrf.mxu0  ;;  %v5176_v4 = vadd.f32 %v10647_v45, %v1054_v5  ;;  %v1329_v49 = vld [vmem:[%s8863_s8 + $0x130] sm:$0xff]  ;;  %8269 = vmatmul.msk.f32.gmra.mxu1 %vm1807_vm1, %v1457_v44  ;;  %v1714_v24 = vld [vmem:[%s8863_s8 + $0xd38] sm:$0xff] }
 0x29f   : > { %7868 = vst.msk [vmem:[%s9095_s11 + $0xc78] sm:$0xff] %vm266_vm2, %v7356_v55  ;;  %v7101_v60 = vmax.f32 %v6589_v51, 0.0  ;;  %v6845_v52 = vadd.f32 %v10595_v31, %v6329_v59  ;;  %v5946_v21 = vld [vmem:[#allocation2 + $0x88] sm:$0xff]  ;;  %v799_v61 = vld [vmem:[#allocation2 + $0xa0] sm:$0xff]  ;;  %v1586_v51 = vld [vmem:[%s8863_s8 + $0x938] sm:$0xff]  ;;  %8526 = vmatmul.msk.f32.gmra.mxu3 %vm1807_vm1, %v1714_v24 }
 0x2a0   : > { %7485 = vst.msk [vmem:[%s9095_s11 + $0x80] sm:$0xff] %vm266_vm2, %v6973_v54  ;;  %v7229_v63 = vmax.f32 %v6717_v17, 0.0  ;;  %v6462_v23 = vadd.f32 %v10595_v31, %v5946_v21  ;;  %v6074_v33 = vld [vmem:[#allocation2 + $0x488] sm:$0xff]  ;;  %v927_v62 = vld [vmem:[#allocation2 + $0x4a0] sm:$0xff]  ;;  %v4921_v7 = vadd.f32 %v10673_v29, %v799_v61 }
 0x2a1   : > { %7613 = vst.msk [vmem:[%s9095_s11 + $0x480] sm:$0xff] %vm266_vm2, %v7101_v60  ;;  %v7357_v2 = vmax.f32 %v6845_v52, 0.0  ;;  %v6590_v27 = vadd.f32 %v10595_v31, %v6074_v33  ;;  %v6202_v36 = vld [vmem:[#allocation2 + $0x888] sm:$0xff]  ;;  %8141 = vmatmul.msk.f32.gmra.mxu0 %vm1807_vm1, %v1329_v49  ;;  %v1183_v55 = vld [vmem:[#allocation2 + $0xca0] sm:$0xff]  ;;  %v5049_v45 = vadd.f32 %v10675_v30, %v927_v62  ;;  %v1330_v33 = vld [vmem:[%s8863_s8 + $0x138] sm:$0xff] }
 0x2a2   : > { %7741 = vst.msk [vmem:[%s9095_s11 + $0x880] sm:$0xff] %vm266_vm2, %v7229_v63  ;;  %v6974_v13 = vmax.f32 %v6462_v23, 0.0  ;;  %v6718_v8 = vadd.f32 %v10595_v31, %v6202_v36  ;;  %v6330_v37 = vld [vmem:[#allocation2 + $0xc88] sm:$0xff]  ;;  %8398 = vmatmul.msk.f32.gmra.mxu2 %vm1807_vm1, %v1586_v51  ;;  %v5305_v29 = vadd.f32 %v10681_v56, %v1183_v55  ;;  %v1331_v62 = vld [vmem:[%s8863_s8 + $0x140] sm:$0xff] }
 0x2a3   : > { %7869 = vst.msk [vmem:[%s9095_s11 + $0xc80] sm:$0xff] %vm266_vm2, %v7357_v2  ;;  %v7102_v18 = vmax.f32 %v6590_v27, 0.0  ;;  %v6846_v48 = vadd.f32 %v10595_v31, %v6330_v37  ;;  %v5947_v22 = vld [vmem:[#allocation2 + $0x90] sm:$0xff]  ;;  %v800_v54 = vld [vmem:[#allocation2 + $0xa8] sm:$0xff]  ;;  %v1587_v37 = vld [vmem:[%s8863_s8 + $0x940] sm:$0xff] }
 0x2a4   : > { %7486 = vst.msk [vmem:[%s9095_s11 + $0x88] sm:$0xff] %vm266_vm2, %v6974_v13  ;;  %v7230_v39 = vmax.f32 %v6718_v8, 0.0  ;;  %v6463_v26 = vadd.f32 %v10595_v31, %v5947_v22  ;;  %v4922_v30 = vadd.f32 %v10709_v25, %v800_v54  ;;  %v10789_v63 = vpop.f32.mrf.mxu3  ;;  %v1458_v25 = vld [vmem:[%s8863_s8 + $0x538] sm:$0xff]  ;;  %v928_v5 = vld [vmem:[#allocation2 + $0x4a8] sm:$0xff]  ;;  %v1459_v49 = vld [vmem:[%s8863_s8 + $0x540] sm:$0xff] }
 0x2a5   : > { %7614 = vst.msk [vmem:[%s9095_s11 + $0x488] sm:$0xff] %vm266_vm2, %v7102_v18  ;;  %v7358_v47 = vmax.f32 %v6846_v48, 0.0  ;;  %v10783_v60 = vpop.f32.mrf.mxu1  ;;  %v10787_v19 = vpop.f32.mrf.mxu2  ;;  %v1184_v24 = vld [vmem:[#allocation2 + $0xca8] sm:$0xff] }
 0x2a6   : > { %7742 = vst.msk [vmem:[%s9095_s11 + $0x888] sm:$0xff] %vm266_vm2, %v7230_v39  ;;  %v6975_v1 = vmax.f32 %v6463_v26, 0.0  ;;  %v10749_v16 = vpop.f32.mrf.mxu0  ;;  %8270 = vmatmul.msk.f32.gmra.mxu1 %vm1807_vm1, %v1458_v25  ;;  %v1716_v54 = vld [vmem:[%s8863_s8 + $0xd48] sm:$0xff] }
 0x2a7   : > { %7870 = vst.msk [vmem:[%s9095_s11 + $0xc88] sm:$0xff] %vm266_vm2, %v7358_v47  ;;  %8527 = vmatmul.msk.f32.gmra.mxu3 %vm1807_vm1, %v1715_v10  ;;  %v1058_v10 = vld [vmem:[#allocation2 + $0x8b8] sm:$0xff] }
 0x2a8   : > { %7487 = vst.msk [vmem:[%s9095_s11 + $0x90] sm:$0xff] %vm266_vm2, %v6975_v1 }
 0x2a9   : > { %5560 = vst.msk [vmem:[#allocation2 + $0x490] sm:$0xff] %vm266_vm2, %v5047_v0  ;;  %8142 = vmatmul.msk.f32.gmra.mxu0 %vm1807_vm1, %v1330_v33  ;;  %v1185_v33 = vld [vmem:[#allocation2 + $0xcb0] sm:$0xff] }
 0x2aa   : > { %5688 = vst.msk [vmem:[#allocation2 + $0x890] sm:$0xff] %vm266_vm2, %v5175_v53  ;;  %8399 = vmatmul.msk.f32.gmra.mxu2 %vm1807_vm1, %v1587_v37  ;;  %v5307_v37 = vadd.f32 %v10757_v14, %v1185_v33  ;;  %v5180_v14 = vadd.f32 %v10787_v19, %v1058_v10 }
 0x2ab   : > { %5816 = vst.msk [vmem:[#allocation2 + $0xc90] sm:$0xff] %vm266_vm2, %v5303_v3 }
 0x2ac   : > { %5433 = vst.msk [vmem:[#allocation2 + $0x98] sm:$0xff] %vm266_vm2, %v4920_v6  ;;  %v10826_v58 = vpop.f32.mrf.mxu3 }
 0x2ad   : > { %5561 = vst.msk [vmem:[#allocation2 + $0x498] sm:$0xff] %vm266_vm2, %v5048_v15  ;;  %v10819_v1 = vpop.f32.mrf.mxu1  ;;  %v10824_v6 = vpop.f32.mrf.mxu2 }
 0x2ae   : > { %5689 = vst.msk [vmem:[#allocation2 + $0x898] sm:$0xff] %vm266_vm2, %v5176_v4  ;;  %v10781_v59 = vpop.f32.mrf.mxu0  ;;  %8271 = vmatmul.msk.f32.gmra.mxu1 %vm1807_vm1, %v1459_v49 }
 0x2af   : > { %5817 = vst.msk [vmem:[#allocation2 + $0xc98] sm:$0xff] %vm266_vm2, %v5304_v12  ;;  %8528 = vmatmul.msk.f32.gmra.mxu3 %vm1807_vm1, %v1716_v54 }
 0x2b0   : > { %v6075_v17 = vld [vmem:[#allocation2 + $0x490] sm:$0xff]  ;;  %5434 = vst.msk [vmem:[#allocation2 + $0xa0] sm:$0xff] %vm266_vm2, %v4921_v7  ;;  %v1056_v7 = vld [vmem:[#allocation2 + $0x8a8] sm:$0xff] }
 0x2b1   : > { %v6591_v52 = vadd.f32 %v10595_v31, %v6075_v17  ;;  %v6203_v21 = vld [vmem:[#allocation2 + $0x890] sm:$0xff]  ;;  %5562 = vst.msk [vmem:[#allocation2 + $0x4a0] sm:$0xff] %vm266_vm2, %v5049_v45  ;;  %8143 = vmatmul.msk.f32.gmra.mxu0 %vm1807_vm1, %v1331_v62  ;;  %v1588_v45 = vld [vmem:[%s8863_s8 + $0x948] sm:$0xff]  ;;  %v1718_v62 = vld [vmem:[%s8863_s8 + $0xd58] sm:$0xff] }
 0x2b2   : > { %v6719_v56 = vadd.f32 %v10595_v31, %v6203_v21  ;;  %v6331_v23 = vld [vmem:[#allocation2 + $0xc90] sm:$0xff]  ;;  %5690 = vst.msk [vmem:[#allocation2 + $0x8a0] sm:$0xff] %vm266_vm2, %v5177_v11  ;;  %8400 = vmatmul.msk.f32.gmra.mxu2 %vm1807_vm1, %v1588_v45 }
 0x2b3   : > { %v7103_v2 = vmax.f32 %v6591_v52, 0.0  ;;  %v6847_v27 = vadd.f32 %v10595_v31, %v6331_v23  ;;  %v5948_v36 = vld [vmem:[#allocation2 + $0x98] sm:$0xff]  ;;  %5818 = vst.msk [vmem:[#allocation2 + $0xca0] sm:$0xff] %vm266_vm2, %v5305_v29  ;;  %v5050_v29 = vadd.f32 %v10711_v34, %v928_v5  ;;  %v801_v17 = vld [vmem:[#allocation2 + $0xb0] sm:$0xff]  ;;  %v5178_v52 = vadd.f32 %v10716_v42, %v1056_v7 }
 0x2b4   : > { %v7231_v40 = vmax.f32 %v6719_v56, 0.0  ;;  %v6464_v13 = vadd.f32 %v10595_v31, %v5948_v36  ;;  %v6076_v8 = vld [vmem:[#allocation2 + $0x498] sm:$0xff]  ;;  %5435 = vst.msk [vmem:[#allocation2 + $0xa8] sm:$0xff] %vm266_vm2, %v4922_v30  ;;  %v929_v21 = vld [vmem:[#allocation2 + $0x4b0] sm:$0xff]  ;;  %v5306_v56 = vadd.f32 %v10718_v41, %v1184_v24  ;;  %v4923_v34 = vadd.f32 %v10749_v16, %v801_v17  ;;  %v10865_v41 = vpop.f32.mrf.mxu3 }
 0x2b5   : > { %7615 = vst.msk [vmem:[%s9095_s11 + $0x490] sm:$0xff] %vm266_vm2, %v7103_v2  ;;  %v7359_v38 = vmax.f32 %v6847_v27, 0.0  ;;  %v6592_v18 = vadd.f32 %v10595_v31, %v6076_v8  ;;  %v6204_v48 = vld [vmem:[#allocation2 + $0x898] sm:$0xff]  ;;  %v1057_v23 = vld [vmem:[#allocation2 + $0x8b0] sm:$0xff]  ;;  %v10859_v2 = vpop.f32.mrf.mxu1  ;;  %v5051_v42 = vadd.f32 %v10751_v35, %v929_v21  ;;  %v10863_v36 = vpop.f32.mrf.mxu2  ;;  %v1460_v8 = vld [vmem:[%s8863_s8 + $0x548] sm:$0xff] }
 0x2b6   : > { %7743 = vst.msk [vmem:[%s9095_s11 + $0x890] sm:$0xff] %vm266_vm2, %v7231_v40  ;;  %v6976_v22 = vmax.f32 %v6464_v13, 0.0  ;;  %v6720_v43 = vadd.f32 %v10595_v31, %v6204_v48  ;;  %v6332_v39 = vld [vmem:[#allocation2 + $0xc98] sm:$0xff]  ;;  %v10817_v50 = vpop.f32.mrf.mxu0  ;;  %v5179_v16 = vadd.f32 %v10755_v9, %v1057_v23  ;;  %v1332_v13 = vld [vmem:[%s8863_s8 + $0x148] sm:$0xff]  ;;  %8272 = vmatmul.msk.f32.gmra.mxu1 %vm1807_vm1, %v1460_v8  ;;  %v1717_v48 = vld [vmem:[%s8863_s8 + $0xd50] sm:$0xff] }
 0x2b7   : > { %7871 = vst.msk [vmem:[%s9095_s11 + $0xc90] sm:$0xff] %vm266_vm2, %v7359_v38  ;;  %v7104_v26 = vmax.f32 %v6592_v18, 0.0  ;;  %v6848_v57 = vadd.f32 %v10595_v31, %v6332_v39  ;;  %v5949_v20 = vld [vmem:[#allocation2 + $0xa0] sm:$0xff]  ;;  %v802_v27 = vld [vmem:[#allocation2 + $0xb8] sm:$0xff]  ;;  %v1589_v18 = vld [vmem:[%s8863_s8 + $0x950] sm:$0xff]  ;;  %8529 = vmatmul.msk.f32.gmra.mxu3 %vm1807_vm1, %v1717_v48 }
 0x2b8   : > { %7488 = vst.msk [vmem:[%s9095_s11 + $0x98] sm:$0xff] %vm266_vm2, %v6976_v22  ;;  %v7232_v28 = vmax.f32 %v6720_v43, 0.0  ;;  %v6465_v47 = vadd.f32 %v10595_v31, %v5949_v20  ;;  %v6077_v0 = vld [vmem:[#allocation2 + $0x4a0] sm:$0xff]  ;;  %v930_v40 = vld [vmem:[#allocation2 + $0x4b8] sm:$0xff]  ;;  %v4924_v35 = vadd.f32 %v10781_v59, %v802_v27 }
 0x2b9   : > { %7616 = vst.msk [vmem:[%s9095_s11 + $0x498] sm:$0xff] %vm266_vm2, %v7104_v26  ;;  %v7360_v53 = vmax.f32 %v6848_v57, 0.0  ;;  %v6593_v32 = vadd.f32 %v10595_v31, %v6077_v0  ;;  %v6205_v3 = vld [vmem:[#allocation2 + $0x8a0] sm:$0xff]  ;;  %8144 = vmatmul.msk.f32.gmra.mxu0 %vm1807_vm1, %v1332_v13  ;;  %v1186_v38 = vld [vmem:[#allocation2 + $0xcb8] sm:$0xff]  ;;  %v5052_v9 = vadd.f32 %v10783_v60, %v930_v40  ;;  %v1333_v0 = vld [vmem:[%s8863_s8 + $0x150] sm:$0xff] }
 0x2ba   : > { %7744 = vst.msk [vmem:[%s9095_s11 + $0x898] sm:$0xff] %vm266_vm2, %v7232_v28  ;;  %v6977_v15 = vmax.f32 %v6465_v47, 0.0  ;;  %v6721_v61 = vadd.f32 %v10595_v31, %v6205_v3  ;;  %v6333_v4 = vld [vmem:[#allocation2 + $0xca0] sm:$0xff]  ;;  %8401 = vmatmul.msk.f32.gmra.mxu2 %vm1807_vm1, %v1589_v18  ;;  %v5308_v59 = vadd.f32 %v10789_v63, %v1186_v38  ;;  %v1334_v40 = vld [vmem:[%s8863_s8 + $0x158] sm:$0xff] }
 0x2bb   : > { %7872 = vst.msk [vmem:[%s9095_s11 + $0xc98] sm:$0xff] %vm266_vm2, %v7360_v53  ;;  %v7105_v44 = vmax.f32 %v6593_v32, 0.0  ;;  %v6849_v12 = vadd.f32 %v10595_v31, %v6333_v4  ;;  %v5950_v46 = vld [vmem:[#allocation2 + $0xa8] sm:$0xff]  ;;  %v803_v22 = vld [vmem:[#allocation2 + $0xc0] sm:$0xff]  ;;  %v1590_v4 = vld [vmem:[%s8863_s8 + $0x958] sm:$0xff] }
 0x2bc   : > { %7489 = vst.msk [vmem:[%s9095_s11 + $0xa0] sm:$0xff] %vm266_vm2, %v6977_v15  ;;  %v7233_v55 = vmax.f32 %v6721_v61, 0.0  ;;  %v6466_v51 = vadd.f32 %v10595_v31, %v5950_v46  ;;  %v4925_v60 = vadd.f32 %v10817_v50, %v803_v22  ;;  %v10897_v28 = vpop.f32.mrf.mxu3  ;;  %v1461_v50 = vld [vmem:[%s8863_s8 + $0x550] sm:$0xff]  ;;  %v931_v23 = vld [vmem:[#allocation2 + $0x4c0] sm:$0xff]  ;;  %v1462_v13 = vld [vmem:[%s8863_s8 + $0x558] sm:$0xff] }
 0x2bd   : > { %7617 = vst.msk [vmem:[%s9095_s11 + $0x4a0] sm:$0xff] %vm266_vm2, %v7105_v44  ;;  %v7361_v11 = vmax.f32 %v6849_v12, 0.0  ;;  %v10891_v26 = vpop.f32.mrf.mxu1  ;;  %v10895_v19 = vpop.f32.mrf.mxu2  ;;  %v1187_v48 = vld [vmem:[#allocation2 + $0xcc0] sm:$0xff] }
 0x2be   : > { %7745 = vst.msk [vmem:[%s9095_s11 + $0x8a0] sm:$0xff] %vm266_vm2, %v7233_v55  ;;  %v6978_v30 = vmax.f32 %v6466_v51, 0.0  ;;  %v10857_v25 = vpop.f32.mrf.mxu0  ;;  %8273 = vmatmul.msk.f32.gmra.mxu1 %vm1807_vm1, %v1461_v50  ;;  %v1719_v22 = vld [vmem:[%s8863_s8 + $0xd60] sm:$0xff] }
 0x2bf   : > { %7873 = vst.msk [vmem:[%s9095_s11 + $0xca0] sm:$0xff] %vm266_vm2, %v7361_v11  ;;  %8530 = vmatmul.msk.f32.gmra.mxu3 %vm1807_vm1, %v1718_v62  ;;  %v1061_v62 = vld [vmem:[#allocation2 + $0x8d0] sm:$0xff] }
 0x2c0   : > { %7490 = vst.msk [vmem:[%s9095_s11 + $0xa8] sm:$0xff] %vm266_vm2, %v6978_v30 }
 0x2c1   : > { %5563 = vst.msk [vmem:[#allocation2 + $0x4a8] sm:$0xff] %vm266_vm2, %v5050_v29  ;;  %8145 = vmatmul.msk.f32.gmra.mxu0 %vm1807_vm1, %v1333_v0  ;;  %v1188_v0 = vld [vmem:[#allocation2 + $0xcc8] sm:$0xff] }
 0x2c2   : > { %5691 = vst.msk [vmem:[#allocation2 + $0x8a8] sm:$0xff] %vm266_vm2, %v5178_v52  ;;  %8402 = vmatmul.msk.f32.gmra.mxu2 %vm1807_vm1, %v1590_v4  ;;  %v5310_v4 = vadd.f32 %v10865_v41, %v1188_v0  ;;  %v5183_v41 = vadd.f32 %v10895_v19, %v1061_v62 }
 0x2c3   : > { %5819 = vst.msk [vmem:[#allocation2 + $0xca8] sm:$0xff] %vm266_vm2, %v5306_v56 }
 0x2c4   : > { %5436 = vst.msk [vmem:[#allocation2 + $0xb0] sm:$0xff] %vm266_vm2, %v4923_v34  ;;  %v10934_v33 = vpop.f32.mrf.mxu3 }
 0x2c5   : > { %5564 = vst.msk [vmem:[#allocation2 + $0x4b0] sm:$0xff] %vm266_vm2, %v5051_v42  ;;  %v10927_v30 = vpop.f32.mrf.mxu1  ;;  %v10932_v34 = vpop.f32.mrf.mxu2 }
 0x2c6   : > { %5692 = vst.msk [vmem:[#allocation2 + $0x8b0] sm:$0xff] %vm266_vm2, %v5179_v16  ;;  %v10889_v39 = vpop.f32.mrf.mxu0  ;;  %8274 = vmatmul.msk.f32.gmra.mxu1 %vm1807_vm1, %v1462_v13 }
 0x2c7   : > { %5820 = vst.msk [vmem:[#allocation2 + $0xcb0] sm:$0xff] %vm266_vm2, %v5307_v37  ;;  %8531 = vmatmul.msk.f32.gmra.mxu3 %vm1807_vm1, %v1719_v22 }
 0x2c8   : > { %v6078_v43 = vld [vmem:[#allocation2 + $0x4a8] sm:$0xff]  ;;  %5437 = vst.msk [vmem:[#allocation2 + $0xb8] sm:$0xff] %vm266_vm2, %v4924_v35  ;;  %v1059_v35 = vld [vmem:[#allocation2 + $0x8c0] sm:$0xff] }
 0x2c9   : > { %v6594_v57 = vadd.f32 %v10595_v31, %v6078_v43  ;;  %v6206_v20 = vld [vmem:[#allocation2 + $0x8a8] sm:$0xff]  ;;  %5565 = vst.msk [vmem:[#allocation2 + $0x4b8] sm:$0xff] %vm266_vm2, %v5052_v9  ;;  %8146 = vmatmul.msk.f32.gmra.mxu0 %vm1807_vm1, %v1334_v40  ;;  %v1591_v9 = vld [vmem:[%s8863_s8 + $0x960] sm:$0xff]  ;;  %v1721_v40 = vld [vmem:[%s8863_s8 + $0xd70] sm:$0xff] }
 0x2ca   : > { %v6722_v63 = vadd.f32 %v10595_v31, %v6206_v20  ;;  %v6334_v47 = vld [vmem:[#allocation2 + $0xca8] sm:$0xff]  ;;  %5693 = vst.msk [vmem:[#allocation2 + $0x8b8] sm:$0xff] %vm266_vm2, %v5180_v14  ;;  %8403 = vmatmul.msk.f32.gmra.mxu2 %vm1807_vm1, %v1591_v9 }
 0x2cb   : > { %v7106_v53 = vmax.f32 %v6594_v57, 0.0  ;;  %v6850_v32 = vadd.f32 %v10595_v31, %v6334_v47  ;;  %v5951_v3 = vld [vmem:[#allocation2 + $0xb0] sm:$0xff]  ;;  %5821 = vst.msk [vmem:[#allocation2 + $0xcb8] sm:$0xff] %vm266_vm2, %v5308_v59  ;;  %v5053_v59 = vadd.f32 %v10819_v1, %v931_v23  ;;  %v804_v43 = vld [vmem:[#allocation2 + $0xc8] sm:$0xff]  ;;  %v5181_v57 = vadd.f32 %v10824_v6, %v1059_v35 }
 0x2cc   : > { %v7234_v5 = vmax.f32 %v6722_v63, 0.0  ;;  %v6467_v15 = vadd.f32 %v10595_v31, %v5951_v3  ;;  %v6079_v61 = vld [vmem:[#allocation2 + $0x4b0] sm:$0xff]  ;;  %5438 = vst.msk [vmem:[#allocation2 + $0xc0] sm:$0xff] %vm266_vm2, %v4925_v60  ;;  %v932_v20 = vld [vmem:[#allocation2 + $0x4c8] sm:$0xff]  ;;  %v5309_v63 = vadd.f32 %v10826_v58, %v1187_v48  ;;  %v4926_v1 = vadd.f32 %v10857_v25, %v804_v43  ;;  %v10973_v58 = vpop.f32.mrf.mxu3 }
 0x2cd   : > { %7618 = vst.msk [vmem:[%s9095_s11 + $0x4a8] sm:$0xff] %vm266_vm2, %v7106_v53  ;;  %v7362_v49 = vmax.f32 %v6850_v32, 0.0  ;;  %v6595_v44 = vadd.f32 %v10595_v31, %v6079_v61  ;;  %v6207_v12 = vld [vmem:[#allocation2 + $0x8b0] sm:$0xff]  ;;  %v1060_v47 = vld [vmem:[#allocation2 + $0x8c8] sm:$0xff]  ;;  %v10967_v53 = vpop.f32.mrf.mxu1  ;;  %v5054_v6 = vadd.f32 %v10859_v2, %v932_v20  ;;  %v10971_v3 = vpop.f32.mrf.mxu2  ;;  %v1463_v61 = vld [vmem:[%s8863_s8 + $0x560] sm:$0xff] }
 0x2ce   : > { %7746 = vst.msk [vmem:[%s9095_s11 + $0x8a8] sm:$0xff] %vm266_vm2, %v7234_v5  ;;  %v6979_v46 = vmax.f32 %v6467_v15, 0.0  ;;  %v6723_v7 = vadd.f32 %v10595_v31, %v6207_v12  ;;  %v6335_v55 = vld [vmem:[#allocation2 + $0xcb0] sm:$0xff]  ;;  %v10925_v17 = vpop.f32.mrf.mxu0  ;;  %v5182_v25 = vadd.f32 %v10863_v36, %v1060_v47  ;;  %v1335_v15 = vld [vmem:[%s8863_s8 + $0x160] sm:$0xff]  ;;  %8275 = vmatmul.msk.f32.gmra.mxu1 %vm1807_vm1, %v1463_v61  ;;  %v1720_v12 = vld [vmem:[%s8863_s8 + $0xd68] sm:$0xff] }
 0x2cf   : > { %7874 = vst.msk [vmem:[%s9095_s11 + $0xca8] sm:$0xff] %vm266_vm2, %v7362_v49  ;;  %v7107_v51 = vmax.f32 %v6595_v44, 0.0  ;;  %v6851_v24 = vadd.f32 %v10595_v31, %v6335_v55  ;;  %v5952_v45 = vld [vmem:[#allocation2 + $0xb8] sm:$0xff]  ;;  %v805_v32 = vld [vmem:[#allocation2 + $0xd0] sm:$0xff]  ;;  %v1592_v44 = vld [vmem:[%s8863_s8 + $0x968] sm:$0xff]  ;;  %8532 = vmatmul.msk.f32.gmra.mxu3 %vm1807_vm1, %v1720_v12 }
 0x2d0   : > { %7491 = vst.msk [vmem:[%s9095_s11 + $0xb0] sm:$0xff] %vm266_vm2, %v6979_v46  ;;  %v7235_v54 = vmax.f32 %v6723_v7, 0.0  ;;  %v6468_v11 = vadd.f32 %v10595_v31, %v5952_v45  ;;  %v6080_v29 = vld [vmem:[#allocation2 + $0x4b8] sm:$0xff]  ;;  %v933_v5 = vld [vmem:[#allocation2 + $0x4d0] sm:$0xff]  ;;  %v4927_v2 = vadd.f32 %v10889_v39, %v805_v32 }
 0x2d1   : > { %7619 = vst.msk [vmem:[%s9095_s11 + $0x4b0] sm:$0xff] %vm266_vm2, %v7107_v51  ;;  %v7363_v52 = vmax.f32 %v6851_v24, 0.0  ;;  %v6596_v21 = vadd.f32 %v10595_v31, %v6080_v29  ;;  %v6208_v56 = vld [vmem:[#allocation2 + $0x8b8] sm:$0xff]  ;;  %8147 = vmatmul.msk.f32.gmra.mxu0 %vm1807_vm1, %v1335_v15  ;;  %v1189_v49 = vld [vmem:[#allocation2 + $0xcd0] sm:$0xff]  ;;  %v5055_v36 = vadd.f32 %v10891_v26, %v933_v5  ;;  %v1336_v29 = vld [vmem:[%s8863_s8 + $0x168] sm:$0xff] }
 0x2d2   : > { %7747 = vst.msk [vmem:[%s9095_s11 + $0x8b0] sm:$0xff] %vm266_vm2, %v7235_v54  ;;  %v6980_v42 = vmax.f32 %v6468_v11, 0.0  ;;  %v6724_v27 = vadd.f32 %v10595_v31, %v6208_v56  ;;  %v6336_v16 = vld [vmem:[#allocation2 + $0xcb8] sm:$0xff]  ;;  %8404 = vmatmul.msk.f32.gmra.mxu2 %vm1807_vm1, %v1592_v44  ;;  %v5311_v39 = vadd.f32 %v10897_v28, %v1189_v49  ;;  %v1337_v5 = vld [vmem:[%s8863_s8 + $0x170] sm:$0xff] }
 0x2d3   : > { %7875 = vst.msk [vmem:[%s9095_s11 + $0xcb0] sm:$0xff] %vm266_vm2, %v7363_v52  ;;  %v7108_v8 = vmax.f32 %v6596_v21, 0.0  ;;  %v6852_v37 = vadd.f32 %v10595_v31, %v6336_v16  ;;  %v5953_v10 = vld [vmem:[#allocation2 + $0xc0] sm:$0xff]  ;;  %v806_v46 = vld [vmem:[#allocation2 + $0xd8] sm:$0xff]  ;;  %v1593_v16 = vld [vmem:[%s8863_s8 + $0x970] sm:$0xff] }
 0x2d4   : > { %7492 = vst.msk [vmem:[%s9095_s11 + $0xb8] sm:$0xff] %vm266_vm2, %v6980_v42  ;;  %v7236_v38 = vmax.f32 %v6724_v27, 0.0  ;;  %v6469_v18 = vadd.f32 %v10595_v31, %v5953_v10  ;;  %v4928_v26 = vadd.f32 %v10925_v17, %v806_v46  ;;  %v11005_v54 = vpop.f32.mrf.mxu3  ;;  %v1464_v17 = vld [vmem:[%s8863_s8 + $0x568] sm:$0xff]  ;;  %v934_v47 = vld [vmem:[#allocation2 + $0x4d8] sm:$0xff]  ;;  %v1465_v15 = vld [vmem:[%s8863_s8 + $0x570] sm:$0xff] }
 0x2d5   : > { %7620 = vst.msk [vmem:[%s9095_s11 + $0x4b8] sm:$0xff] %vm266_vm2, %v7108_v8  ;;  %v7364_v14 = vmax.f32 %v6852_v37, 0.0  ;;  %v10999_v51 = vpop.f32.mrf.mxu1  ;;  %v11003_v19 = vpop.f32.mrf.mxu2  ;;  %v1190_v12 = vld [vmem:[#allocation2 + $0xcd8] sm:$0xff] }
 0x2d6   : > { %7748 = vst.msk [vmem:[%s9095_s11 + $0x8b8] sm:$0xff] %vm266_vm2, %v7236_v38  ;;  %v6981_v60 = vmax.f32 %v6469_v18, 0.0  ;;  %v10965_v50 = vpop.f32.mrf.mxu0  ;;  %8276 = vmatmul.msk.f32.gmra.mxu1 %vm1807_vm1, %v1464_v17  ;;  %v1722_v46 = vld [vmem:[%s8863_s8 + $0xd78] sm:$0xff] }
 0x2d7   : > { %7876 = vst.msk [vmem:[%s9095_s11 + $0xcb8] sm:$0xff] %vm266_vm2, %v7364_v14  ;;  %8533 = vmatmul.msk.f32.gmra.mxu3 %vm1807_vm1, %v1721_v40  ;;  %v1192_v40 = vld [vmem:[#allocation2 + $0xce8] sm:$0xff] }
 0x2d8   : > { %7493 = vst.msk [vmem:[%s9095_s11 + $0xc0] sm:$0xff] %vm266_vm2, %v6981_v60 }
 0x2d9   : > { %5566 = vst.msk [vmem:[#allocation2 + $0x4c0] sm:$0xff] %vm266_vm2, %v5053_v59  ;;  %8148 = vmatmul.msk.f32.gmra.mxu0 %vm1807_vm1, %v1336_v29 }
 0x2da   : > { %5694 = vst.msk [vmem:[#allocation2 + $0x8c0] sm:$0xff] %vm266_vm2, %v5181_v57  ;;  %8405 = vmatmul.msk.f32.gmra.mxu2 %vm1807_vm1, %v1593_v16  ;;  %v1064_v16 = vld [vmem:[#allocation2 + $0x8e8] sm:$0xff] }
 0x2db   : > { %5822 = vst.msk [vmem:[#allocation2 + $0xcc0] sm:$0xff] %vm266_vm2, %v5309_v63 }
 0x2dc   : > { %5439 = vst.msk [vmem:[#allocation2 + $0xc8] sm:$0xff] %vm266_vm2, %v4926_v1  ;;  %v11042_v0 = vpop.f32.mrf.mxu3 }
 0x2dd   : > { %5567 = vst.msk [vmem:[#allocation2 + $0x4c8] sm:$0xff] %vm266_vm2, %v5054_v6  ;;  %v11035_v60 = vpop.f32.mrf.mxu1  ;;  %v11040_v1 = vpop.f32.mrf.mxu2 }
 0x2de   : > { %5695 = vst.msk [vmem:[#allocation2 + $0x8c8] sm:$0xff] %vm266_vm2, %v5182_v25  ;;  %v10997_v55 = vpop.f32.mrf.mxu0  ;;  %8277 = vmatmul.msk.f32.gmra.mxu1 %vm1807_vm1, %v1465_v15 }
 0x2df   : > { %5823 = vst.msk [vmem:[#allocation2 + $0xcc8] sm:$0xff] %vm266_vm2, %v5310_v4  ;;  %8534 = vmatmul.msk.f32.gmra.mxu3 %vm1807_vm1, %v1722_v46 }
 0x2e0   : > { %v6081_v7 = vld [vmem:[#allocation2 + $0x4c0] sm:$0xff]  ;;  %5440 = vst.msk [vmem:[#allocation2 + $0xd0] sm:$0xff] %vm266_vm2, %v4927_v2  ;;  %v1062_v2 = vld [vmem:[#allocation2 + $0x8d8] sm:$0xff] }
 0x2e1   : > { %v6597_v24 = vadd.f32 %v10595_v31, %v6081_v7  ;;  %v6209_v45 = vld [vmem:[#allocation2 + $0x8c0] sm:$0xff]  ;;  %5568 = vst.msk [vmem:[#allocation2 + $0x4d0] sm:$0xff] %vm266_vm2, %v5055_v36  ;;  %8149 = vmatmul.msk.f32.gmra.mxu0 %vm1807_vm1, %v1337_v5  ;;  %v1594_v36 = vld [vmem:[%s8863_s8 + $0x978] sm:$0xff]  ;;  %v1724_v5 = vld [vmem:[%s8863_s8 + $0xd88] sm:$0xff] }
 0x2e2   : > { %v6725_v28 = vadd.f32 %v10595_v31, %v6209_v45  ;;  %v6337_v11 = vld [vmem:[#allocation2 + $0xcc0] sm:$0xff]  ;;  %5696 = vst.msk [vmem:[#allocation2 + $0x8d0] sm:$0xff] %vm266_vm2, %v5183_v41  ;;  %8406 = vmatmul.msk.f32.gmra.mxu2 %vm1807_vm1, %v1594_v36  ;;  %v5312_v45 = vadd.f32 %v10934_v33, %v1190_v12 }
 0x2e3   : > { %v7109_v52 = vmax.f32 %v6597_v24, 0.0  ;;  %v6853_v21 = vadd.f32 %v10595_v31, %v6337_v11  ;;  %v5954_v56 = vld [vmem:[#allocation2 + $0xc8] sm:$0xff]  ;;  %5824 = vst.msk [vmem:[#allocation2 + $0xcd0] sm:$0xff] %vm266_vm2, %v5311_v39  ;;  %v5056_v39 = vadd.f32 %v10927_v30, %v934_v47  ;;  %v807_v7 = vld [vmem:[#allocation2 + $0xe0] sm:$0xff]  ;;  %v5184_v24 = vadd.f32 %v10932_v34, %v1062_v2 }
 0x2e4   : > { %v7237_v23 = vmax.f32 %v6725_v28, 0.0  ;;  %v6470_v42 = vadd.f32 %v10595_v31, %v5954_v56  ;;  %v6082_v27 = vld [vmem:[#allocation2 + $0x4c8] sm:$0xff]  ;;  %5441 = vst.msk [vmem:[#allocation2 + $0xd8] sm:$0xff] %vm266_vm2, %v4928_v26  ;;  %v1063_v28 = vld [vmem:[#allocation2 + $0x8e0] sm:$0xff]  ;;  %v4929_v30 = vadd.f32 %v10965_v50, %v807_v7  ;;  %v11081_v33 = vpop.f32.mrf.mxu3 }
 0x2e5   : > { %7621 = vst.msk [vmem:[%s9095_s11 + $0x4c0] sm:$0xff] %vm266_vm2, %v7109_v52  ;;  %v7365_v13 = vmax.f32 %v6853_v21, 0.0  ;;  %v6598_v8 = vadd.f32 %v10595_v31, %v6082_v27  ;;  %v6210_v37 = vld [vmem:[#allocation2 + $0x8c8] sm:$0xff]  ;;  %v1191_v11 = vld [vmem:[#allocation2 + $0xce0] sm:$0xff]  ;;  %v11075_v17 = vpop.f32.mrf.mxu1  ;;  %v11079_v21 = vpop.f32.mrf.mxu2  ;;  %v5185_v50 = vadd.f32 %v10971_v3, %v1063_v28  ;;  %v937_v28 = vld [vmem:[#allocation2 + $0x4f0] sm:$0xff] }
 0x2e6   : > { %7749 = vst.msk [vmem:[%s9095_s11 + $0x8c0] sm:$0xff] %vm266_vm2, %v7237_v23  ;;  %v6982_v10 = vmax.f32 %v6470_v42, 0.0  ;;  %v6726_v35 = vadd.f32 %v10595_v31, %v6210_v37  ;;  %v6338_v38 = vld [vmem:[#allocation2 + $0xcc8] sm:$0xff]  ;;  %v11033_v43 = vpop.f32.mrf.mxu0  ;;  %v1338_v23 = vld [vmem:[%s8863_s8 + $0x178] sm:$0xff]  ;;  %v5313_v27 = vadd.f32 %v10973_v58, %v1191_v11  ;;  %v809_v37 = vld [vmem:[#allocation2 + $0xf0] sm:$0xff]  ;;  %v5186_v58 = vadd.f32 %v11003_v19, %v1064_v16 }
 0x2e7   : > { %7877 = vst.msk [vmem:[%s9095_s11 + $0xcc0] sm:$0xff] %vm266_vm2, %v7365_v13  ;;  %v7110_v18 = vmax.f32 %v6598_v8, 0.0  ;;  %v6854_v48 = vadd.f32 %v10595_v31, %v6338_v38  ;;  %v5955_v9 = vld [vmem:[#allocation2 + $0xd0] sm:$0xff]  ;;  %v808_v52 = vld [vmem:[#allocation2 + $0xe8] sm:$0xff]  ;;  %v1466_v42 = vld [vmem:[%s8863_s8 + $0x578] sm:$0xff] }
 0x2e8   : > { %7494 = vst.msk [vmem:[%s9095_s11 + $0xc8] sm:$0xff] %vm266_vm2, %v6982_v10  ;;  %v7238_v22 = vmax.f32 %v6726_v35, 0.0  ;;  %v6471_v14 = vadd.f32 %v10595_v31, %v5955_v9  ;;  %v6083_v59 = vld [vmem:[#allocation2 + $0x4d0] sm:$0xff]  ;;  %v936_v56 = vld [vmem:[#allocation2 + $0x4e8] sm:$0xff]  ;;  %8278 = vmatmul.msk.f32.gmra.mxu1 %vm1807_vm1, %v1466_v42  ;;  %v1595_v13 = vld [vmem:[%s8863_s8 + $0x980] sm:$0xff] }
 0x2e9   : > { %7622 = vst.msk [vmem:[%s9095_s11 + $0x4c8] sm:$0xff] %vm266_vm2, %v7110_v18  ;;  %v7366_v57 = vmax.f32 %v6854_v48, 0.0  ;;  %v6599_v20 = vadd.f32 %v10595_v31, %v6083_v59  ;;  %v6211_v63 = vld [vmem:[#allocation2 + $0x8d0] sm:$0xff]  ;;  %8150 = vmatmul.msk.f32.gmra.mxu0 %vm1807_vm1, %v1338_v23  ;;  %v1723_v8 = vld [vmem:[%s8863_s8 + $0xd80] sm:$0xff]  ;;  %v5058_v3 = vadd.f32 %v10999_v51, %v936_v56  ;;  %v4931_v51 = vadd.f32 %v11033_v43, %v809_v37  ;;  %v1340_v56 = vld [vmem:[%s8863_s8 + $0x188] sm:$0xff] }
 0x2ea   : > { %7750 = vst.msk [vmem:[%s9095_s11 + $0x8c8] sm:$0xff] %vm266_vm2, %v7238_v22  ;;  %v6983_v6 = vmax.f32 %v6471_v14, 0.0  ;;  %v6727_v32 = vadd.f32 %v10595_v31, %v6211_v63  ;;  %v6339_v25 = vld [vmem:[#allocation2 + $0xcd0] sm:$0xff]  ;;  %8407 = vmatmul.msk.f32.gmra.mxu2 %vm1807_vm1, %v1595_v13  ;;  %8535 = vmatmul.msk.f32.gmra.mxu3 %vm1807_vm1, %v1723_v8  ;;  %v11109_v18 = vld [vmem:[#allocation5] ss:$0 sm:$0xff]  ;;  %v1468_v23 = vld [vmem:[%s8863_s8 + $0x588] sm:$0xff] }
 0x2eb   : > { %7878 = vst.msk [vmem:[%s9095_s11 + $0xcc8] sm:$0xff] %vm266_vm2, %v7366_v57  ;;  %v7111_v61 = vmax.f32 %v6599_v20, 0.0  ;;  %v6855_v4 = vadd.f32 %v10595_v31, %v6339_v25  ;;  %v5956_v62 = vld [vmem:[#allocation2 + $0xd8] sm:$0xff]  ;;  %v1339_v59 = vld [vmem:[%s8863_s8 + $0x180] sm:$0xff]  ;;  %v1596_v25 = vld [vmem:[%s8863_s8 + $0x988] sm:$0xff] }
 0x2ec   : > { %7495 = vst.msk [vmem:[%s9095_s11 + $0xd0] sm:$0xff] %vm266_vm2, %v6983_v6  ;;  %v7239_v49 = vmax.f32 %v6727_v32, 0.0  ;;  %v6472_v44 = vadd.f32 %v10595_v31, %v5956_v62  ;;  %v935_v31 = vld [vmem:[#allocation2 + $0x4e0] sm:$0xff]  ;;  %v1193_v8 = vld [vmem:[#allocation2 + $0xcf0] sm:$0xff] }
 0x2ed   : > { %7623 = vst.msk [vmem:[%s9095_s11 + $0x4d0] sm:$0xff] %vm266_vm2, %v7111_v61  ;;  %v7367_v41 = vmax.f32 %v6855_v4, 0.0  ;;  %v5057_v34 = vadd.f32 %v10967_v53, %v935_v31  ;;  %v4930_v53 = vadd.f32 %v10997_v55, %v808_v52  ;;  %v5314_v55 = vadd.f32 %v11005_v54, %v1192_v40  ;;  %v11107_v38 = vpop.f32.mrf.mxu1  ;;  %v11113_v9 = vpop.f32.mrf.mxu2  ;;  %v1467_v43 = vld [vmem:[%s8863_s8 + $0x580] sm:$0xff]  ;;  %v1725_v37 = vld [vmem:[%s8863_s8 + $0xd90] sm:$0xff] }
 0x2ee   : > { %7751 = vst.msk [vmem:[%s9095_s11 + $0x8d0] sm:$0xff] %vm266_vm2, %v7239_v49  ;;  %v6984_v26 = vmax.f32 %v6472_v44, 0.0  ;;  %v11073_v29 = vpop.f32.mrf.mxu0  ;;  %v11115_v54 = vpop.f32.mrf.mxu3 }
 0x2ef   : > { %7879 = vst.msk [vmem:[%s9095_s11 + $0xcd0] sm:$0xff] %vm266_vm2, %v7367_v41 }
 0x2f0   : > { %7496 = vst.msk [vmem:[%s9095_s11 + $0xd8] sm:$0xff] %vm266_vm2, %v6984_v26  ;;  %8279 = vmatmul.msk.f32.gmra.mxu1 %vm1807_vm1, %v1467_v43 }
 0x2f1   : > { %5569 = vst.msk [vmem:[#allocation2 + $0x4d8] sm:$0xff] %vm266_vm2, %v5056_v39  ;;  %8151 = vmatmul.msk.f32.gmra.mxu0 %vm1807_vm1, %v1339_v59  ;;  %v1194_v59 = vld [vmem:[#allocation2 + $0xcf8] sm:$0xff] }
 0x2f2   : > { %5697 = vst.msk [vmem:[#allocation2 + $0x8d8] sm:$0xff] %vm266_vm2, %v5184_v24  ;;  %8408 = vmatmul.msk.f32.gmra.mxu2 %vm1807_vm1, %v1596_v25  ;;  %8536 = vmatmul.msk.f32.gmra.mxu3 %vm1807_vm1, %v1724_v5  ;;  %v5316_v25 = vadd.f32 %v11081_v33, %v1194_v59  ;;  %v1067_v5 = vld [vmem:[#allocation2 + $0x900] sm:$0xff] }
 0x2f3   : > { %5825 = vst.msk [vmem:[#allocation2 + $0xcd8] sm:$0xff] %vm266_vm2, %v5312_v45  ;;  %v5189_v33 = vadd.f32 %v11113_v9, %v1067_v5 }
 0x2f4   : > { %5442 = vst.msk [vmem:[#allocation2 + $0xe0] sm:$0xff] %vm266_vm2, %v4929_v30 }
 0x2f5   : > { %5570 = vst.msk [vmem:[#allocation2 + $0x4e0] sm:$0xff] %vm266_vm2, %v5057_v34  ;;  %v11145_v26 = vpop.f32.mrf.mxu1  ;;  %v11150_v30 = vpop.f32.mrf.mxu2 }
 0x2f6   : > { %5698 = vst.msk [vmem:[#allocation2 + $0x8e0] sm:$0xff] %vm266_vm2, %v5185_v50  ;;  %v11105_v35 = vpop.f32.mrf.mxu0  ;;  %v11152_v11 = vpop.f32.mrf.mxu3 }
 0x2f7   : > { %5826 = vst.msk [vmem:[#allocation2 + $0xce0] sm:$0xff] %vm266_vm2, %v5313_v27 }
 0x2f8   : > { %v6084_v10 = vld [vmem:[#allocation2 + $0x4d8] sm:$0xff]  ;;  %5443 = vst.msk [vmem:[#allocation2 + $0xe8] sm:$0xff] %vm266_vm2, %v4930_v53  ;;  %v1065_v53 = vld [vmem:[#allocation2 + $0x8f0] sm:$0xff]  ;;  %8280 = vmatmul.msk.f32.gmra.mxu1 %vm1807_vm1, %v1468_v23 }
 0x2f9   : > { %v6600_v48 = vadd.f32 %v11109_v18, %v6084_v10  ;;  %v6212_v19 = vld [vmem:[#allocation2 + $0x8d8] sm:$0xff]  ;;  %5571 = vst.msk [vmem:[#allocation2 + $0x4e8] sm:$0xff] %vm266_vm2, %v5058_v3  ;;  %8152 = vmatmul.msk.f32.gmra.mxu0 %vm1807_vm1, %v1340_v56  ;;  %v1597_v3 = vld [vmem:[%s8863_s8 + $0x990] sm:$0xff]  ;;  %v1727_v56 = vld [vmem:[%s8863_s8 + $0xda0] sm:$0xff] }
 0x2fa   : > { %v6728_v22 = vadd.f32 %v11109_v18, %v6212_v19  ;;  %v6340_v14 = vld [vmem:[#allocation2 + $0xcd8] sm:$0xff]  ;;  %5699 = vst.msk [vmem:[#allocation2 + $0x8e8] sm:$0xff] %vm266_vm2, %v5186_v58  ;;  %8409 = vmatmul.msk.f32.gmra.mxu2 %vm1807_vm1, %v1597_v3  ;;  %8537 = vmatmul.msk.f32.gmra.mxu3 %vm1807_vm1, %v1725_v37 }
 0x2fb   : > { %v7112_v57 = vmax.f32 %v6600_v48, 0.0  ;;  %v6856_v20 = vadd.f32 %v11109_v18, %v6340_v14  ;;  %v5957_v63 = vld [vmem:[#allocation2 + $0xe0] sm:$0xff]  ;;  %5827 = vst.msk [vmem:[#allocation2 + $0xce8] sm:$0xff] %vm266_vm2, %v5314_v55  ;;  %v5059_v55 = vadd.f32 %v11035_v60, %v937_v28  ;;  %v810_v10 = vld [vmem:[#allocation2 + $0xf8] sm:$0xff]  ;;  %v5187_v48 = vadd.f32 %v11040_v1, %v1065_v53 }
 0x2fc   : > { %v7240_v47 = vmax.f32 %v6728_v22, 0.0  ;;  %v6473_v6 = vadd.f32 %v11109_v18, %v5957_v63  ;;  %v6085_v32 = vld [vmem:[#allocation2 + $0x4e0] sm:$0xff]  ;;  %5444 = vst.msk [vmem:[#allocation2 + $0xf0] sm:$0xff] %vm266_vm2, %v4931_v51  ;;  %v938_v19 = vld [vmem:[#allocation2 + $0x4f8] sm:$0xff]  ;;  %v5315_v22 = vadd.f32 %v11042_v0, %v1193_v8  ;;  %v4932_v60 = vadd.f32 %v11073_v29, %v810_v10 }
 0x2fd   : > { %7624 = vst.msk [vmem:[%s9095_s11 + $0x4d8] sm:$0xff] %vm266_vm2, %v7112_v57  ;;  %v7368_v15 = vmax.f32 %v6856_v20, 0.0  ;;  %v6601_v61 = vadd.f32 %v11109_v18, %v6085_v32  ;;  %v6213_v4 = vld [vmem:[#allocation2 + $0x8e0] sm:$0xff]  ;;  %v1066_v14 = vld [vmem:[#allocation2 + $0x8f8] sm:$0xff]  ;;  %v11185_v57 = vpop.f32.mrf.mxu1  ;;  %v5060_v1 = vadd.f32 %v11075_v17, %v938_v19  ;;  %v11189_v63 = vpop.f32.mrf.mxu2  ;;  %v1469_v32 = vld [vmem:[%s8863_s8 + $0x590] sm:$0xff] }
 0x2fe   : > { %7752 = vst.msk [vmem:[%s9095_s11 + $0x8d8] sm:$0xff] %vm266_vm2, %v7240_v47  ;;  %v6985_v62 = vmax.f32 %v6473_v6, 0.0  ;;  %v6729_v2 = vadd.f32 %v11109_v18, %v6213_v4  ;;  %v6341_v49 = vld [vmem:[#allocation2 + $0xce0] sm:$0xff]  ;;  %v11143_v7 = vpop.f32.mrf.mxu0  ;;  %v11191_v0 = vpop.f32.mrf.mxu3  ;;  %v5188_v29 = vadd.f32 %v11079_v21, %v1066_v14  ;;  %v1341_v6 = vld [vmem:[%s8863_s8 + $0x190] sm:$0xff]  ;;  %v1726_v4 = vld [vmem:[%s8863_s8 + $0xd98] sm:$0xff] }
 0x2ff   : > { %7880 = vst.msk [vmem:[%s9095_s11 + $0xcd8] sm:$0xff] %vm266_vm2, %v7368_v15  ;;  %v7113_v44 = vmax.f32 %v6601_v61, 0.0  ;;  %v6857_v12 = vadd.f32 %v11109_v18, %v6341_v49  ;;  %v5958_v36 = vld [vmem:[#allocation2 + $0xe8] sm:$0xff]  ;;  %v811_v20 = vld [vmem:[#allocation2 + $0x100] sm:$0xff]  ;;  %v1598_v61 = vld [vmem:[%s8863_s8 + $0x998] sm:$0xff] }
 0x300   : > { %7497 = vst.msk [vmem:[%s9095_s11 + $0xe0] sm:$0xff] %vm266_vm2, %v6985_v62  ;;  %v7241_v46 = vmax.f32 %v6729_v2, 0.0  ;;  %v6474_v41 = vadd.f32 %v11109_v18, %v5958_v36  ;;  %v6086_v39 = vld [vmem:[#allocation2 + $0x4e8] sm:$0xff]  ;;  %v939_v47 = vld [vmem:[#allocation2 + $0x500] sm:$0xff]  ;;  %8281 = vmatmul.msk.f32.gmra.mxu1 %vm1807_vm1, %v1469_v32  ;;  %v4933_v17 = vadd.f32 %v11105_v35, %v811_v20 }
 0x301   : > { %7625 = vst.msk [vmem:[%s9095_s11 + $0x4e0] sm:$0xff] %vm266_vm2, %v7113_v44  ;;  %v7369_v24 = vmax.f32 %v6857_v12, 0.0  ;;  %v6602_v31 = vadd.f32 %v11109_v18, %v6086_v39  ;;  %v6214_v45 = vld [vmem:[#allocation2 + $0x8e8] sm:$0xff]  ;;  %8153 = vmatmul.msk.f32.gmra.mxu0 %vm1807_vm1, %v1341_v6  ;;  %v1195_v15 = vld [vmem:[#allocation2 + $0xd00] sm:$0xff]  ;;  %v5061_v21 = vadd.f32 %v11107_v38, %v939_v47  ;;  %v1342_v39 = vld [vmem:[%s8863_s8 + $0x198] sm:$0xff] }
 0x302   : > { %7753 = vst.msk [vmem:[%s9095_s11 + $0x8e0] sm:$0xff] %vm266_vm2, %v7241_v46  ;;  %v6986_v34 = vmax.f32 %v6474_v41, 0.0  ;;  %v6730_v52 = vadd.f32 %v11109_v18, %v6214_v45  ;;  %v6342_v50 = vld [vmem:[#allocation2 + $0xce8] sm:$0xff]  ;;  %8410 = vmatmul.msk.f32.gmra.mxu2 %vm1807_vm1, %v1598_v61  ;;  %8538 = vmatmul.msk.f32.gmra.mxu3 %vm1807_vm1, %v1726_v4  ;;  %v5317_v35 = vadd.f32 %v11115_v54, %v1195_v15  ;;  %v1343_v47 = vld [vmem:[%s8863_s8 + $0x1a0] sm:$0xff] }
 0x303   : > { %7881 = vst.msk [vmem:[%s9095_s11 + $0xce0] sm:$0xff] %vm266_vm2, %v7369_v24  ;;  %v7114_v42 = vmax.f32 %v6602_v31, 0.0  ;;  %v6858_v27 = vadd.f32 %v11109_v18, %v6342_v50  ;;  %v5959_v16 = vld [vmem:[#allocation2 + $0xf0] sm:$0xff]  ;;  %v812_v62 = vld [vmem:[#allocation2 + $0x108] sm:$0xff]  ;;  %v1599_v50 = vld [vmem:[%s8863_s8 + $0x9a0] sm:$0xff] }
 0x304   : > { %7498 = vst.msk [vmem:[%s9095_s11 + $0xe8] sm:$0xff] %vm266_vm2, %v6986_v34  ;;  %v7242_v40 = vmax.f32 %v6730_v52, 0.0  ;;  %v6475_v13 = vadd.f32 %v11109_v18, %v5959_v16  ;;  %v4934_v38 = vadd.f32 %v11143_v7, %v812_v62  ;;  %v1470_v7 = vld [vmem:[%s8863_s8 + $0x598] sm:$0xff]  ;;  %v940_v14 = vld [vmem:[#allocation2 + $0x508] sm:$0xff]  ;;  %v1471_v6 = vld [vmem:[%s8863_s8 + $0x5a0] sm:$0xff] }
 0x305   : > { %7626 = vst.msk [vmem:[%s9095_s11 + $0x4e8] sm:$0xff] %vm266_vm2, %v7114_v42  ;;  %v7370_v58 = vmax.f32 %v6858_v27, 0.0  ;;  %v11217_v44 = vpop.f32.mrf.mxu1  ;;  %v11221_v9 = vpop.f32.mrf.mxu2  ;;  %v1196_v4 = vld [vmem:[#allocation2 + $0xd08] sm:$0xff] }
 0x306   : > { %7754 = vst.msk [vmem:[%s9095_s11 + $0x8e8] sm:$0xff] %vm266_vm2, %v7242_v40  ;;  %v6987_v51 = vmax.f32 %v6475_v13, 0.0  ;;  %v11183_v43 = vpop.f32.mrf.mxu0  ;;  %v11223_v46 = vpop.f32.mrf.mxu3  ;;  %v1728_v62 = vld [vmem:[%s8863_s8 + $0xda8] sm:$0xff] }
 0x307   : > { %7882 = vst.msk [vmem:[%s9095_s11 + $0xce8] sm:$0xff] %vm266_vm2, %v7370_v58 }
 0x308   : > { %7499 = vst.msk [vmem:[%s9095_s11 + $0xf0] sm:$0xff] %vm266_vm2, %v6987_v51  ;;  %8282 = vmatmul.msk.f32.gmra.mxu1 %vm1807_vm1, %v1470_v7 }
 0x309   : > { %5572 = vst.msk [vmem:[#allocation2 + $0x4f0] sm:$0xff] %vm266_vm2, %v5059_v55  ;;  %8154 = vmatmul.msk.f32.gmra.mxu0 %vm1807_vm1, %v1342_v39  ;;  %v1197_v39 = vld [vmem:[#allocation2 + $0xd10] sm:$0xff] }
 0x30a   : > { %5700 = vst.msk [vmem:[#allocation2 + $0x8f0] sm:$0xff] %vm266_vm2, %v5187_v48  ;;  %8411 = vmatmul.msk.f32.gmra.mxu2 %vm1807_vm1, %v1599_v50  ;;  %8539 = vmatmul.msk.f32.gmra.mxu3 %vm1807_vm1, %v1727_v56  ;;  %v5319_v50 = vadd.f32 %v11191_v0, %v1197_v39  ;;  %v1070_v56 = vld [vmem:[#allocation2 + $0x918] sm:$0xff] }
 0x30b   : > { %5828 = vst.msk [vmem:[#allocation2 + $0xcf0] sm:$0xff] %vm266_vm2, %v5315_v22  ;;  %v5192_v0 = vadd.f32 %v11221_v9, %v1070_v56 }
 0x30c   : > { %5445 = vst.msk [vmem:[#allocation2 + $0xf8] sm:$0xff] %vm266_vm2, %v4932_v60 }
 0x30d   : > { %5573 = vst.msk [vmem:[#allocation2 + $0x4f8] sm:$0xff] %vm266_vm2, %v5060_v1  ;;  %v11253_v51 = vpop.f32.mrf.mxu1  ;;  %v11258_v60 = vpop.f32.mrf.mxu2 }
 0x30e   : > { %5701 = vst.msk [vmem:[#allocation2 + $0x8f8] sm:$0xff] %vm266_vm2, %v5188_v29  ;;  %v11215_v49 = vpop.f32.mrf.mxu0  ;;  %v11260_v59 = vpop.f32.mrf.mxu3 }
 0x30f   : > { %5829 = vst.msk [vmem:[#allocation2 + $0xcf8] sm:$0xff] %vm266_vm2, %v5316_v25 }
 0x310   : > { %v6087_v2 = vld [vmem:[#allocation2 + $0x4f0] sm:$0xff]  ;;  %5446 = vst.msk [vmem:[#allocation2 + $0x100] sm:$0xff] %vm266_vm2, %v4933_v17  ;;  %v1068_v17 = vld [vmem:[#allocation2 + $0x908] sm:$0xff]  ;;  %8283 = vmatmul.msk.f32.gmra.mxu1 %vm1807_vm1, %v1471_v6 }
 0x311   : > { %v6603_v12 = vadd.f32 %v11109_v18, %v6087_v2  ;;  %v6215_v36 = vld [vmem:[#allocation2 + $0x8f0] sm:$0xff]  ;;  %5574 = vst.msk [vmem:[#allocation2 + $0x500] sm:$0xff] %vm266_vm2, %v5061_v21  ;;  %8155 = vmatmul.msk.f32.gmra.mxu0 %vm1807_vm1, %v1343_v47  ;;  %v1600_v21 = vld [vmem:[%s8863_s8 + $0x9a8] sm:$0xff]  ;;  %v1730_v47 = vld [vmem:[%s8863_s8 + $0xdb8] sm:$0xff] }
 0x312   : > { %v6731_v54 = vadd.f32 %v11109_v18, %v6215_v36  ;;  %v6343_v41 = vld [vmem:[#allocation2 + $0xcf0] sm:$0xff]  ;;  %5702 = vst.msk [vmem:[#allocation2 + $0x900] sm:$0xff] %vm266_vm2, %v5189_v33  ;;  %8412 = vmatmul.msk.f32.gmra.mxu2 %vm1807_vm1, %v1600_v21  ;;  %8540 = vmatmul.msk.f32.gmra.mxu3 %vm1807_vm1, %v1728_v62 }
 0x313   : > { %v7115_v24 = vmax.f32 %v6603_v12, 0.0  ;;  %v6859_v31 = vadd.f32 %v11109_v18, %v6343_v41  ;;  %v5960_v45 = vld [vmem:[#allocation2 + $0xf8] sm:$0xff]  ;;  %5830 = vst.msk [vmem:[#allocation2 + $0xd00] sm:$0xff] %vm266_vm2, %v5317_v35  ;;  %v5062_v35 = vadd.f32 %v11145_v26, %v940_v14  ;;  %v813_v2 = vld [vmem:[#allocation2 + $0x110] sm:$0xff]  ;;  %v5190_v12 = vadd.f32 %v11150_v30, %v1068_v17 }
 0x314   : > { %v7243_v28 = vmax.f32 %v6731_v54, 0.0  ;;  %v6476_v34 = vadd.f32 %v11109_v18, %v5960_v45  ;;  %v6088_v52 = vld [vmem:[#allocation2 + $0x4f8] sm:$0xff]  ;;  %5447 = vst.msk [vmem:[#allocation2 + $0x108] sm:$0xff] %vm266_vm2, %v4934_v38  ;;  %v941_v36 = vld [vmem:[#allocation2 + $0x510] sm:$0xff]  ;;  %v5318_v54 = vadd.f32 %v11152_v11, %v1196_v4  ;;  %v4935_v26 = vadd.f32 %v11183_v43, %v813_v2 }
 0x315   : > { %7627 = vst.msk [vmem:[%s9095_s11 + $0x4f0] sm:$0xff] %vm266_vm2, %v7115_v24  ;;  %v7371_v23 = vmax.f32 %v6859_v31, 0.0  ;;  %v6604_v42 = vadd.f32 %v11109_v18, %v6088_v52  ;;  %v6216_v27 = vld [vmem:[#allocation2 + $0x8f8] sm:$0xff]  ;;  %v1069_v41 = vld [vmem:[#allocation2 + $0x910] sm:$0xff]  ;;  %v11293_v24 = vpop.f32.mrf.mxu1  ;;  %v5063_v30 = vadd.f32 %v11185_v57, %v941_v36  ;;  %v11297_v45 = vpop.f32.mrf.mxu2  ;;  %v1472_v52 = vld [vmem:[%s8863_s8 + $0x5a8] sm:$0xff] }
 0x316   : > { %7755 = vst.msk [vmem:[%s9095_s11 + $0x8f0] sm:$0xff] %vm266_vm2, %v7243_v28  ;;  %v6988_v16 = vmax.f32 %v6476_v34, 0.0  ;;  %v6732_v53 = vadd.f32 %v11109_v18, %v6216_v27  ;;  %v6344_v40 = vld [vmem:[#allocation2 + $0xcf8] sm:$0xff]  ;;  %v11251_v10 = vpop.f32.mrf.mxu0  ;;  %v11299_v11 = vpop.f32.mrf.mxu3  ;;  %v5191_v43 = vadd.f32 %v11189_v63, %v1069_v41  ;;  %v1344_v34 = vld [vmem:[%s8863_s8 + $0x1a8] sm:$0xff]  ;;  %v1729_v27 = vld [vmem:[%s8863_s8 + $0xdb0] sm:$0xff] }
 0x317   : > { %7883 = vst.msk [vmem:[%s9095_s11 + $0xcf0] sm:$0xff] %vm266_vm2, %v7371_v23  ;;  %v7116_v13 = vmax.f32 %v6604_v42, 0.0  ;;  %v6860_v8 = vadd.f32 %v11109_v18, %v6344_v40  ;;  %v5961_v3 = vld [vmem:[#allocation2 + $0x100] sm:$0xff]  ;;  %v814_v31 = vld [vmem:[#allocation2 + $0x118] sm:$0xff]  ;;  %v1601_v42 = vld [vmem:[%s8863_s8 + $0x9b0] sm:$0xff] }
 0x318   : > { %7500 = vst.msk [vmem:[%s9095_s11 + $0xf8] sm:$0xff] %vm266_vm2, %v6988_v16  ;;  %v7244_v37 = vmax.f32 %v6732_v53, 0.0  ;;  %v6477_v58 = vadd.f32 %v11109_v18, %v5961_v3  ;;  %v6089_v55 = vld [vmem:[#allocation2 + $0x500] sm:$0xff]  ;;  %v942_v28 = vld [vmem:[#allocation2 + $0x518] sm:$0xff]  ;;  %8284 = vmatmul.msk.f32.gmra.mxu1 %vm1807_vm1, %v1472_v52  ;;  %v4936_v57 = vadd.f32 %v11215_v49, %v814_v31 }
 0x319   : > { %7628 = vst.msk [vmem:[%s9095_s11 + $0x4f8] sm:$0xff] %vm266_vm2, %v7116_v13  ;;  %v7372_v48 = vmax.f32 %v6860_v8, 0.0  ;;  %v6605_v19 = vadd.f32 %v11109_v18, %v6089_v55  ;;  %v6217_v22 = vld [vmem:[#allocation2 + $0x900] sm:$0xff]  ;;  %8156 = vmatmul.msk.f32.gmra.mxu0 %vm1807_vm1, %v1344_v34  ;;  %v1198_v23 = vld [vmem:[#allocation2 + $0xd18] sm:$0xff]  ;;  %v5064_v63 = vadd.f32 %v11217_v44, %v942_v28  ;;  %v1345_v55 = vld [vmem:[%s8863_s8 + $0x1b0] sm:$0xff] }
 0x31a   : > { %7756 = vst.msk [vmem:[%s9095_s11 + $0x8f8] sm:$0xff] %vm266_vm2, %v7244_v37  ;;  %v6989_v1 = vmax.f32 %v6477_v58, 0.0  ;;  %v6733_v20 = vadd.f32 %v11109_v18, %v6217_v22  ;;  %v6345_v29 = vld [vmem:[#allocation2 + $0xd00] sm:$0xff]  ;;  %8413 = vmatmul.msk.f32.gmra.mxu2 %vm1807_vm1, %v1601_v42  ;;  %8541 = vmatmul.msk.f32.gmra.mxu3 %vm1807_vm1, %v1729_v27  ;;  %v5320_v49 = vadd.f32 %v11223_v46, %v1198_v23  ;;  %v1346_v28 = vld [vmem:[%s8863_s8 + $0x1b8] sm:$0xff] }
 0x31b   : > { %7884 = vst.msk [vmem:[%s9095_s11 + $0xcf8] sm:$0xff] %vm266_vm2, %v7372_v48  ;;  %v7117_v32 = vmax.f32 %v6605_v19, 0.0  ;;  %v6861_v25 = vadd.f32 %v11109_v18, %v6345_v29  ;;  %v5962_v5 = vld [vmem:[#allocation2 + $0x108] sm:$0xff]  ;;  %v815_v16 = vld [vmem:[#allocation2 + $0x120] sm:$0xff]  ;;  %v1602_v29 = vld [vmem:[%s8863_s8 + $0x9b8] sm:$0xff] }
 0x31c   : > { %7501 = vst.msk [vmem:[%s9095_s11 + $0x100] sm:$0xff] %vm266_vm2, %v6989_v1  ;;  %v7245_v15 = vmax.f32 %v6733_v20, 0.0  ;;  %v6478_v61 = vadd.f32 %v11109_v18, %v5962_v5  ;;  %v4937_v44 = vadd.f32 %v11251_v10, %v815_v16  ;;  %v1473_v10 = vld [vmem:[%s8863_s8 + $0x5b0] sm:$0xff]  ;;  %v943_v41 = vld [vmem:[#allocation2 + $0x520] sm:$0xff]  ;;  %v1474_v34 = vld [vmem:[%s8863_s8 + $0x5b8] sm:$0xff] }
 0x31d   : > { %7629 = vst.msk [vmem:[%s9095_s11 + $0x500] sm:$0xff] %vm266_vm2, %v7117_v32  ;;  %v7373_v33 = vmax.f32 %v6861_v25, 0.0  ;;  %v11325_v13 = vpop.f32.mrf.mxu1  ;;  %v11329_v9 = vpop.f32.mrf.mxu2  ;;  %v1199_v27 = vld [vmem:[#allocation2 + $0xd20] sm:$0xff] }
 0x31e   : > { %7757 = vst.msk [vmem:[%s9095_s11 + $0x900] sm:$0xff] %vm266_vm2, %v7245_v15  ;;  %v6990_v38 = vmax.f32 %v6478_v61, 0.0  ;;  %v11291_v7 = vpop.f32.mrf.mxu0  ;;  %v11331_v37 = vpop.f32.mrf.mxu3  ;;  %v1731_v16 = vld [vmem:[%s8863_s8 + $0xdc0] sm:$0xff] }
 0x31f   : > { %7885 = vst.msk [vmem:[%s9095_s11 + $0xd00] sm:$0xff] %vm266_vm2, %v7373_v33 }
 0x320   : > { %7502 = vst.msk [vmem:[%s9095_s11 + $0x108] sm:$0xff] %vm266_vm2, %v6990_v38  ;;  %8285 = vmatmul.msk.f32.gmra.mxu1 %vm1807_vm1, %v1473_v10 }
 0x321   : > { %5575 = vst.msk [vmem:[#allocation2 + $0x508] sm:$0xff] %vm266_vm2, %v5062_v35  ;;  %8157 = vmatmul.msk.f32.gmra.mxu0 %vm1807_vm1, %v1345_v55  ;;  %v1200_v55 = vld [vmem:[#allocation2 + $0xd28] sm:$0xff] }
 0x322   : > { %5703 = vst.msk [vmem:[#allocation2 + $0x908] sm:$0xff] %vm266_vm2, %v5190_v12  ;;  %8414 = vmatmul.msk.f32.gmra.mxu2 %vm1807_vm1, %v1602_v29  ;;  %8542 = vmatmul.msk.f32.gmra.mxu3 %vm1807_vm1, %v1730_v47  ;;  %v5322_v29 = vadd.f32 %v11299_v11, %v1200_v55  ;;  %v1073_v47 = vld [vmem:[#allocation2 + $0x930] sm:$0xff] }
 0x323   : > { %5831 = vst.msk [vmem:[#allocation2 + $0xd08] sm:$0xff] %vm266_vm2, %v5318_v54  ;;  %v5195_v11 = vadd.f32 %v11329_v9, %v1073_v47 }
 0x324   : > { %5448 = vst.msk [vmem:[#allocation2 + $0x110] sm:$0xff] %vm266_vm2, %v4935_v26 }
 0x325   : > { %5576 = vst.msk [vmem:[#allocation2 + $0x510] sm:$0xff] %vm266_vm2, %v5063_v30  ;;  %v11361_v38 = vpop.f32.mrf.mxu1  ;;  %v11366_v26 = vpop.f32.mrf.mxu2 }
 0x326   : > { %5704 = vst.msk [vmem:[#allocation2 + $0x910] sm:$0xff] %vm266_vm2, %v5191_v43  ;;  %v11323_v40 = vpop.f32.mrf.mxu0  ;;  %v11368_v39 = vpop.f32.mrf.mxu3 }
 0x327   : > { %5832 = vst.msk [vmem:[#allocation2 + $0xd10] sm:$0xff] %vm266_vm2, %v5319_v50 }
 0x328   : > { %v6090_v53 = vld [vmem:[#allocation2 + $0x508] sm:$0xff]  ;;  %5449 = vst.msk [vmem:[#allocation2 + $0x118] sm:$0xff] %vm266_vm2, %v4936_v57  ;;  %v1071_v57 = vld [vmem:[#allocation2 + $0x920] sm:$0xff]  ;;  %8286 = vmatmul.msk.f32.gmra.mxu1 %vm1807_vm1, %v1474_v34 }
 0x329   : > { %v6606_v8 = vadd.f32 %v11109_v18, %v6090_v53  ;;  %v6218_v3 = vld [vmem:[#allocation2 + $0x908] sm:$0xff]  ;;  %5577 = vst.msk [vmem:[#allocation2 + $0x518] sm:$0xff] %vm266_vm2, %v5064_v63  ;;  %8158 = vmatmul.msk.f32.gmra.mxu0 %vm1807_vm1, %v1346_v28  ;;  %v1603_v63 = vld [vmem:[%s8863_s8 + $0x9c0] sm:$0xff]  ;;  %v1733_v28 = vld [vmem:[%s8863_s8 + $0xdd0] sm:$0xff] }
 0x32a   : > { %v6734_v46 = vadd.f32 %v11109_v18, %v6218_v3  ;;  %v6346_v58 = vld [vmem:[#allocation2 + $0xd08] sm:$0xff]  ;;  %5705 = vst.msk [vmem:[#allocation2 + $0x918] sm:$0xff] %vm266_vm2, %v5192_v0  ;;  %8415 = vmatmul.msk.f32.gmra.mxu2 %vm1807_vm1, %v1603_v63  ;;  %8543 = vmatmul.msk.f32.gmra.mxu3 %vm1807_vm1, %v1731_v16 }
 0x32b   : > { %v7118_v48 = vmax.f32 %v6606_v8, 0.0  ;;  %v6862_v19 = vadd.f32 %v11109_v18, %v6346_v58  ;;  %v5963_v22 = vld [vmem:[#allocation2 + $0x110] sm:$0xff]  ;;  %5833 = vst.msk [vmem:[#allocation2 + $0xd18] sm:$0xff] %vm266_vm2, %v5320_v49  ;;  %v5065_v49 = vadd.f32 %v11253_v51, %v943_v41  ;;  %v816_v53 = vld [vmem:[#allocation2 + $0x128] sm:$0xff]  ;;  %v5193_v8 = vadd.f32 %v11258_v60, %v1071_v57 }
 0x32c   : > { %v7246_v14 = vmax.f32 %v6734_v46, 0.0  ;;  %v6479_v1 = vadd.f32 %v11109_v18, %v5963_v22  ;;  %v6091_v20 = vld [vmem:[#allocation2 + $0x510] sm:$0xff]  ;;  %5450 = vst.msk [vmem:[#allocation2 + $0x120] sm:$0xff] %vm266_vm2, %v4937_v44  ;;  %v944_v3 = vld [vmem:[#allocation2 + $0x528] sm:$0xff]  ;;  %v5321_v46 = vadd.f32 %v11260_v59, %v1199_v27  ;;  %v4938_v51 = vadd.f32 %v11291_v7, %v816_v53 }
 0x32d   : > { %7630 = vst.msk [vmem:[%s9095_s11 + $0x508] sm:$0xff] %vm266_vm2, %v7118_v48  ;;  %v7374_v6 = vmax.f32 %v6862_v19, 0.0  ;;  %v6607_v32 = vadd.f32 %v11109_v18, %v6091_v20  ;;  %v6219_v25 = vld [vmem:[#allocation2 + $0x910] sm:$0xff]  ;;  %v1072_v58 = vld [vmem:[#allocation2 + $0x928] sm:$0xff]  ;;  %v11401_v48 = vpop.f32.mrf.mxu1  ;;  %v5066_v60 = vadd.f32 %v11293_v24, %v944_v3  ;;  %v11405_v22 = vpop.f32.mrf.mxu2  ;;  %v1475_v20 = vld [vmem:[%s8863_s8 + $0x5c0] sm:$0xff] }
 0x32e   : > { %7758 = vst.msk [vmem:[%s9095_s11 + $0x908] sm:$0xff] %vm266_vm2, %v7246_v14  ;;  %v6991_v5 = vmax.f32 %v6479_v1, 0.0  ;;  %v6735_v17 = vadd.f32 %v11109_v18, %v6219_v25  ;;  %v6347_v15 = vld [vmem:[#allocation2 + $0xd10] sm:$0xff]  ;;  %v11359_v2 = vpop.f32.mrf.mxu0  ;;  %v11407_v59 = vpop.f32.mrf.mxu3  ;;  %v5194_v7 = vadd.f32 %v11297_v45, %v1072_v58  ;;  %v1347_v1 = vld [vmem:[%s8863_s8 + $0x1c0] sm:$0xff]  ;;  %v1732_v25 = vld [vmem:[%s8863_s8 + $0xdc8] sm:$0xff] }
 0x32f   : > { %7886 = vst.msk [vmem:[%s9095_s11 + $0xd08] sm:$0xff] %vm266_vm2, %v7374_v6  ;;  %v7119_v61 = vmax.f32 %v6607_v32, 0.0  ;;  %v6863_v4 = vadd.f32 %v11109_v18, %v6347_v15  ;;  %v5964_v21 = vld [vmem:[#allocation2 + $0x118] sm:$0xff]  ;;  %v817_v19 = vld [vmem:[#allocation2 + $0x130] sm:$0xff]  ;;  %v1604_v32 = vld [vmem:[%s8863_s8 + $0x9c8] sm:$0xff] }
 0x330   : > { %7503 = vst.msk [vmem:[%s9095_s11 + $0x110] sm:$0xff] %vm266_vm2, %v6991_v5  ;;  %v7247_v62 = vmax.f32 %v6735_v17, 0.0  ;;  %v6480_v33 = vadd.f32 %v11109_v18, %v5964_v21  ;;  %v6092_v35 = vld [vmem:[#allocation2 + $0x518] sm:$0xff]  ;;  %v945_v14 = vld [vmem:[#allocation2 + $0x530] sm:$0xff]  ;;  %8287 = vmatmul.msk.f32.gmra.mxu1 %vm1807_vm1, %v1475_v20  ;;  %v4939_v24 = vadd.f32 %v11323_v40, %v817_v19 }
 0x331   : > { %7631 = vst.msk [vmem:[%s9095_s11 + $0x510] sm:$0xff] %vm266_vm2, %v7119_v61  ;;  %v7375_v12 = vmax.f32 %v6863_v4, 0.0  ;;  %v6608_v36 = vadd.f32 %v11109_v18, %v6092_v35  ;;  %v6220_v54 = vld [vmem:[#allocation2 + $0x918] sm:$0xff]  ;;  %8159 = vmatmul.msk.f32.gmra.mxu0 %vm1807_vm1, %v1347_v1  ;;  %v1201_v6 = vld [vmem:[#allocation2 + $0xd30] sm:$0xff]  ;;  %v5067_v45 = vadd.f32 %v11325_v13, %v945_v14  ;;  %v1348_v35 = vld [vmem:[%s8863_s8 + $0x1c8] sm:$0xff] }
 0x332   : > { %7759 = vst.msk [vmem:[%s9095_s11 + $0x910] sm:$0xff] %vm266_vm2, %v7247_v62  ;;  %v6992_v30 = vmax.f32 %v6480_v33, 0.0  ;;  %v6736_v31 = vadd.f32 %v11109_v18, %v6220_v54  ;;  %v6348_v43 = vld [vmem:[#allocation2 + $0xd18] sm:$0xff]  ;;  %8416 = vmatmul.msk.f32.gmra.mxu2 %vm1807_vm1, %v1604_v32  ;;  %8544 = vmatmul.msk.f32.gmra.mxu3 %vm1807_vm1, %v1732_v25  ;;  %v5323_v40 = vadd.f32 %v11331_v37, %v1201_v6  ;;  %v1349_v14 = vld [vmem:[%s8863_s8 + $0x1d0] sm:$0xff] }
 0x333   : > { %7887 = vst.msk [vmem:[%s9095_s11 + $0xd10] sm:$0xff] %vm266_vm2, %v7375_v12  ;;  %v7120_v52 = vmax.f32 %v6608_v36, 0.0  ;;  %v6864_v50 = vadd.f32 %v11109_v18, %v6348_v43  ;;  %v5965_v56 = vld [vmem:[#allocation2 + $0x120] sm:$0xff]  ;;  %v818_v5 = vld [vmem:[#allocation2 + $0x138] sm:$0xff]  ;;  %v1605_v43 = vld [vmem:[%s8863_s8 + $0x9d0] sm:$0xff] }
 0x334   : > { %7504 = vst.msk [vmem:[%s9095_s11 + $0x118] sm:$0xff] %vm266_vm2, %v6992_v30  ;;  %v7248_v23 = vmax.f32 %v6736_v31, 0.0  ;;  %v6481_v42 = vadd.f32 %v11109_v18, %v5965_v56  ;;  %v4940_v13 = vadd.f32 %v11359_v2, %v818_v5  ;;  %v1476_v2 = vld [vmem:[%s8863_s8 + $0x5c8] sm:$0xff]  ;;  %v946_v58 = vld [vmem:[#allocation2 + $0x538] sm:$0xff]  ;;  %v1477_v1 = vld [vmem:[%s8863_s8 + $0x5d0] sm:$0xff] }
 0x335   : > { %7632 = vst.msk [vmem:[%s9095_s11 + $0x518] sm:$0xff] %vm266_vm2, %v7120_v52  ;;  %v7376_v0 = vmax.f32 %v6864_v50, 0.0  ;;  %v11433_v61 = vpop.f32.mrf.mxu1  ;;  %v11437_v9 = vpop.f32.mrf.mxu2  ;;  %v1202_v25 = vld [vmem:[#allocation2 + $0xd38] sm:$0xff] }
 0x336   : > { %7760 = vst.msk [vmem:[%s9095_s11 + $0x918] sm:$0xff] %vm266_vm2, %v7248_v23  ;;  %v6993_v44 = vmax.f32 %v6481_v42, 0.0  ;;  %v11399_v10 = vpop.f32.mrf.mxu0  ;;  %v11439_v62 = vpop.f32.mrf.mxu3  ;;  %v1734_v5 = vld [vmem:[%s8863_s8 + $0xdd8] sm:$0xff] }
 0x337   : > { %7888 = vst.msk [vmem:[%s9095_s11 + $0xd18] sm:$0xff] %vm266_vm2, %v7376_v0 }
 0x338   : > { %7505 = vst.msk [vmem:[%s9095_s11 + $0x120] sm:$0xff] %vm266_vm2, %v6993_v44  ;;  %8288 = vmatmul.msk.f32.gmra.mxu1 %vm1807_vm1, %v1476_v2 }
 0x339   : > { %5578 = vst.msk [vmem:[#allocation2 + $0x520] sm:$0xff] %vm266_vm2, %v5065_v49  ;;  %8160 = vmatmul.msk.f32.gmra.mxu0 %vm1807_vm1, %v1348_v35  ;;  %v1203_v35 = vld [vmem:[#allocation2 + $0xd40] sm:$0xff] }
 0x33a   : > { %5706 = vst.msk [vmem:[#allocation2 + $0x920] sm:$0xff] %vm266_vm2, %v5193_v8  ;;  %8417 = vmatmul.msk.f32.gmra.mxu2 %vm1807_vm1, %v1605_v43  ;;  %8545 = vmatmul.msk.f32.gmra.mxu3 %vm1807_vm1, %v1733_v28  ;;  %v5325_v43 = vadd.f32 %v11407_v59, %v1203_v35  ;;  %v1076_v28 = vld [vmem:[#allocation2 + $0x948] sm:$0xff] }
 0x33b   : > { %5834 = vst.msk [vmem:[#allocation2 + $0xd20] sm:$0xff] %vm266_vm2, %v5321_v46  ;;  %v5198_v59 = vadd.f32 %v11437_v9, %v1076_v28 }
 0x33c   : > { %5451 = vst.msk [vmem:[#allocation2 + $0x128] sm:$0xff] %vm266_vm2, %v4938_v51 }
 0x33d   : > { %5579 = vst.msk [vmem:[#allocation2 + $0x528] sm:$0xff] %vm266_vm2, %v5066_v60  ;;  %v11469_v44 = vpop.f32.mrf.mxu1  ;;  %v11474_v51 = vpop.f32.mrf.mxu2 }
 0x33e   : > { %5707 = vst.msk [vmem:[#allocation2 + $0x928] sm:$0xff] %vm266_vm2, %v5194_v7  ;;  %v11431_v15 = vpop.f32.mrf.mxu0  ;;  %v11476_v55 = vpop.f32.mrf.mxu3 }
 0x33f   : > { %5835 = vst.msk [vmem:[#allocation2 + $0xd28] sm:$0xff] %vm266_vm2, %v5322_v29 }
 0x340   : > { %v6093_v17 = vld [vmem:[#allocation2 + $0x520] sm:$0xff]  ;;  %5452 = vst.msk [vmem:[#allocation2 + $0x130] sm:$0xff] %vm266_vm2, %v4939_v24  ;;  %v1074_v24 = vld [vmem:[#allocation2 + $0x938] sm:$0xff]  ;;  %8289 = vmatmul.msk.f32.gmra.mxu1 %vm1807_vm1, %v1477_v1 }
 0x341   : > { %v6609_v4 = vadd.f32 %v11109_v18, %v6093_v17  ;;  %v6221_v21 = vld [vmem:[#allocation2 + $0x920] sm:$0xff]  ;;  %5580 = vst.msk [vmem:[#allocation2 + $0x530] sm:$0xff] %vm266_vm2, %v5067_v45  ;;  %8161 = vmatmul.msk.f32.gmra.mxu0 %vm1807_vm1, %v1349_v14  ;;  %v1606_v45 = vld [vmem:[%s8863_s8 + $0x9d8] sm:$0xff]  ;;  %v1736_v14 = vld [vmem:[%s8863_s8 + $0xde8] sm:$0xff] }
 0x342   : > { %v6737_v37 = vadd.f32 %v11109_v18, %v6221_v21  ;;  %v6349_v33 = vld [vmem:[#allocation2 + $0xd20] sm:$0xff]  ;;  %5708 = vst.msk [vmem:[#allocation2 + $0x930] sm:$0xff] %vm266_vm2, %v5195_v11  ;;  %8418 = vmatmul.msk.f32.gmra.mxu2 %vm1807_vm1, %v1606_v45  ;;  %8546 = vmatmul.msk.f32.gmra.mxu3 %vm1807_vm1, %v1734_v5 }
 0x343   : > { %v7121_v12 = vmax.f32 %v6609_v4, 0.0  ;;  %v6865_v36 = vadd.f32 %v11109_v18, %v6349_v33  ;;  %v5966_v54 = vld [vmem:[#allocation2 + $0x128] sm:$0xff]  ;;  %5836 = vst.msk [vmem:[#allocation2 + $0xd30] sm:$0xff] %vm266_vm2, %v5323_v40  ;;  %v5068_v40 = vadd.f32 %v11361_v38, %v946_v58  ;;  %v819_v17 = vld [vmem:[#allocation2 + $0x140] sm:$0xff]  ;;  %v5196_v4 = vadd.f32 %v11366_v26, %v1074_v24 }
 0x344   : > { %v7249_v41 = vmax.f32 %v6737_v37, 0.0  ;;  %v6482_v30 = vadd.f32 %v11109_v18, %v5966_v54  ;;  %v6094_v31 = vld [vmem:[#allocation2 + $0x528] sm:$0xff]  ;;  %5453 = vst.msk [vmem:[#allocation2 + $0x138] sm:$0xff] %vm266_vm2, %v4940_v13  ;;  %v947_v21 = vld [vmem:[#allocation2 + $0x540] sm:$0xff]  ;;  %v5324_v37 = vadd.f32 %v11368_v39, %v1202_v25  ;;  %v4941_v38 = vadd.f32 %v11399_v10, %v819_v17 }
 0x345   : > { %7633 = vst.msk [vmem:[%s9095_s11 + $0x520] sm:$0xff] %vm266_vm2, %v7121_v12  ;;  %v7377_v34 = vmax.f32 %v6865_v36, 0.0  ;;  %v6610_v52 = vadd.f32 %v11109_v18, %v6094_v31  ;;  %v6222_v50 = vld [vmem:[#allocation2 + $0x928] sm:$0xff]  ;;  %v1075_v33 = vld [vmem:[#allocation2 + $0x940] sm:$0xff]  ;;  %v11509_v12 = vpop.f32.mrf.mxu1  ;;  %v5069_v26 = vadd.f32 %v11401_v48, %v947_v21  ;;  %v11513_v54 = vpop.f32.mrf.mxu2  ;;  %v1478_v31 = vld [vmem:[%s8863_s8 + $0x5d8] sm:$0xff] }
 0x346   : > { %7761 = vst.msk [vmem:[%s9095_s11 + $0x920] sm:$0xff] %vm266_vm2, %v7249_v41  ;;  %v6994_v56 = vmax.f32 %v6482_v30, 0.0  ;;  %v6738_v57 = vadd.f32 %v11109_v18, %v6222_v50  ;;  %v6350_v23 = vld [vmem:[#allocation2 + $0xd28] sm:$0xff]  ;;  %v11467_v53 = vpop.f32.mrf.mxu0  ;;  %v11515_v39 = vpop.f32.mrf.mxu3  ;;  %v5197_v10 = vadd.f32 %v11405_v22, %v1075_v33  ;;  %v1350_v30 = vld [vmem:[%s8863_s8 + $0x1d8] sm:$0xff]  ;;  %v1735_v50 = vld [vmem:[%s8863_s8 + $0xde0] sm:$0xff] }
 0x347   : > { %7889 = vst.msk [vmem:[%s9095_s11 + $0xd20] sm:$0xff] %vm266_vm2, %v7377_v34  ;;  %v7122_v42 = vmax.f32 %v6610_v52, 0.0  ;;  %v6866_v27 = vadd.f32 %v11109_v18, %v6350_v23  ;;  %v5967_v63 = vld [vmem:[#allocation2 + $0x130] sm:$0xff]  ;;  %v820_v36 = vld [vmem:[#allocation2 + $0x148] sm:$0xff]  ;;  %v1607_v52 = vld [vmem:[%s8863_s8 + $0x9e0] sm:$0xff] }
 0x348   : > { %7506 = vst.msk [vmem:[%s9095_s11 + $0x128] sm:$0xff] %vm266_vm2, %v6994_v56  ;;  %v7250_v16 = vmax.f32 %v6738_v57, 0.0  ;;  %v6483_v0 = vadd.f32 %v11109_v18, %v5967_v63  ;;  %v6095_v49 = vld [vmem:[#allocation2 + $0x530] sm:$0xff]  ;;  %v948_v41 = vld [vmem:[#allocation2 + $0x548] sm:$0xff]  ;;  %8290 = vmatmul.msk.f32.gmra.mxu1 %vm1807_vm1, %v1478_v31  ;;  %v4942_v48 = vadd.f32 %v11431_v15, %v820_v36  ;;  %v11571_v25 = vld [vmem:[#allocation5] ss:$0 sm:$0xff] }
 0x349   : > { %7634 = vst.msk [vmem:[%s9095_s11 + $0x528] sm:$0xff] %vm266_vm2, %v7122_v42  ;;  %v7378_v8 = vmax.f32 %v6866_v27, 0.0  ;;  %v6611_v3 = vadd.f32 %v11109_v18, %v6095_v49  ;;  %v6223_v46 = vld [vmem:[#allocation2 + $0x930] sm:$0xff]  ;;  %8162 = vmatmul.msk.f32.gmra.mxu0 %vm1807_vm1, %v1350_v30  ;;  %v1204_v34 = vld [vmem:[#allocation2 + $0xd48] sm:$0xff]  ;;  %v5070_v22 = vadd.f32 %v11433_v61, %v948_v41  ;;  %v1351_v49 = vld [vmem:[%s8863_s8 + $0x1e0] sm:$0xff] }
 0x34a   : > { %7762 = vst.msk [vmem:[%s9095_s11 + $0x928] sm:$0xff] %vm266_vm2, %v7250_v16  ;;  %v6995_v60 = vmax.f32 %v6483_v0, 0.0  ;;  %v6739_v19 = vadd.f32 %v11109_v18, %v6223_v46  ;;  %v6351_v7 = vld [vmem:[#allocation2 + $0xd30] sm:$0xff]  ;;  %8419 = vmatmul.msk.f32.gmra.mxu2 %vm1807_vm1, %v1607_v52  ;;  %8547 = vmatmul.msk.f32.gmra.mxu3 %vm1807_vm1, %v1735_v50  ;;  %v5326_v15 = vadd.f32 %v11439_v62, %v1204_v34  ;;  %v1352_v41 = vld [vmem:[%s8863_s8 + $0x1e8] sm:$0xff] }
 0x34b   : > { %7890 = vst.msk [vmem:[%s9095_s11 + $0xd28] sm:$0xff] %vm266_vm2, %v7378_v8  ;;  %v7123_v20 = vmax.f32 %v6611_v3, 0.0  ;;  %v6867_v29 = vadd.f32 %v11109_v18, %v6351_v7  ;;  %v5968_v47 = vld [vmem:[#allocation2 + $0x138] sm:$0xff]  ;;  %v821_v56 = vld [vmem:[#allocation2 + $0x150] sm:$0xff]  ;;  %v1608_v7 = vld [vmem:[%s8863_s8 + $0x9e8] sm:$0xff] }
 0x34c   : > { %7507 = vst.msk [vmem:[%s9095_s11 + $0x130] sm:$0xff] %vm266_vm2, %v6995_v60  ;;  %v7251_v6 = vmax.f32 %v6739_v19, 0.0  ;;  %v6484_v32 = vadd.f32 %v11109_v18, %v5968_v47  ;;  %v4943_v61 = vadd.f32 %v11467_v53, %v821_v56  ;;  %v1479_v53 = vld [vmem:[%s8863_s8 + $0x5e0] sm:$0xff]  ;;  %v949_v33 = vld [vmem:[#allocation2 + $0x550] sm:$0xff]  ;;  %v1480_v30 = vld [vmem:[%s8863_s8 + $0x5e8] sm:$0xff] }
 0x34d   : > { %7635 = vst.msk [vmem:[%s9095_s11 + $0x530] sm:$0xff] %vm266_vm2, %v7123_v20  ;;  %v7379_v11 = vmax.f32 %v6867_v29, 0.0  ;;  %v11541_v42 = vpop.f32.mrf.mxu1  ;;  %v11545_v9 = vpop.f32.mrf.mxu2  ;;  %v1205_v50 = vld [vmem:[#allocation2 + $0xd50] sm:$0xff] }
 0x34e   : > { %7763 = vst.msk [vmem:[%s9095_s11 + $0x930] sm:$0xff] %vm266_vm2, %v7251_v6  ;;  %v6996_v13 = vmax.f32 %v6484_v32, 0.0  ;;  %v11507_v2 = vpop.f32.mrf.mxu0  ;;  %v11547_v16 = vpop.f32.mrf.mxu3  ;;  %v1737_v56 = vld [vmem:[%s8863_s8 + $0xdf0] sm:$0xff] }
 0x34f   : > { %7891 = vst.msk [vmem:[%s9095_s11 + $0xd30] sm:$0xff] %vm266_vm2, %v7379_v11 }
 0x350   : > { %7508 = vst.msk [vmem:[%s9095_s11 + $0x138] sm:$0xff] %vm266_vm2, %v6996_v13  ;;  %8291 = vmatmul.msk.f32.gmra.mxu1 %vm1807_vm1, %v1479_v53 }
 0x351   : > { %5581 = vst.msk [vmem:[#allocation2 + $0x538] sm:$0xff] %vm266_vm2, %v5068_v40  ;;  %8163 = vmatmul.msk.f32.gmra.mxu0 %vm1807_vm1, %v1351_v49  ;;  %v1206_v49 = vld [vmem:[#allocation2 + $0xd58] sm:$0xff] }
 0x352   : > { %5709 = vst.msk [vmem:[#allocation2 + $0x938] sm:$0xff] %vm266_vm2, %v5196_v4  ;;  %8420 = vmatmul.msk.f32.gmra.mxu2 %vm1807_vm1, %v1608_v7  ;;  %8548 = vmatmul.msk.f32.gmra.mxu3 %vm1807_vm1, %v1736_v14  ;;  %v5328_v7 = vadd.f32 %v11515_v39, %v1206_v49  ;;  %v1079_v14 = vld [vmem:[#allocation2 + $0x960] sm:$0xff] }
 0x353   : > { %5837 = vst.msk [vmem:[#allocation2 + $0xd38] sm:$0xff] %vm266_vm2, %v5324_v37  ;;  %v5201_v39 = vadd.f32 %v11545_v9, %v1079_v14 }
 0x354   : > { %5454 = vst.msk [vmem:[#allocation2 + $0x140] sm:$0xff] %vm266_vm2, %v4941_v38 }
 0x355   : > { %5582 = vst.msk [vmem:[#allocation2 + $0x540] sm:$0xff] %vm266_vm2, %v5069_v26  ;;  %v11579_v13 = vpop.f32.mrf.mxu1  ;;  %v11584_v38 = vpop.f32.mrf.mxu2 }
 0x356   : > { %5710 = vst.msk [vmem:[#allocation2 + $0x940] sm:$0xff] %vm266_vm2, %v5197_v10  ;;  %v11539_v23 = vpop.f32.mrf.mxu0  ;;  %v11586_v35 = vpop.f32.mrf.mxu3 }
 0x357   : > { %5838 = vst.msk [vmem:[#allocation2 + $0xd40] sm:$0xff] %vm266_vm2, %v5325_v43 }
 0x358   : > { %v6096_v57 = vld [vmem:[#allocation2 + $0x538] sm:$0xff]  ;;  %5455 = vst.msk [vmem:[#allocation2 + $0x148] sm:$0xff] %vm266_vm2, %v4942_v48  ;;  %v1077_v48 = vld [vmem:[#allocation2 + $0x950] sm:$0xff]  ;;  %8292 = vmatmul.msk.f32.gmra.mxu1 %vm1807_vm1, %v1480_v30 }
 0x359   : > { %v6612_v27 = vadd.f32 %v11109_v18, %v6096_v57  ;;  %v6224_v63 = vld [vmem:[#allocation2 + $0x938] sm:$0xff]  ;;  %5583 = vst.msk [vmem:[#allocation2 + $0x548] sm:$0xff] %vm266_vm2, %v5070_v22  ;;  %8164 = vmatmul.msk.f32.gmra.mxu0 %vm1807_vm1, %v1352_v41  ;;  %v1609_v22 = vld [vmem:[%s8863_s8 + $0x9f0] sm:$0xff]  ;;  %v1739_v41 = vld [vmem:[%s8863_s8 + $0xe00] sm:$0xff] }
 0x35a   : > { %v6740_v62 = vadd.f32 %v11109_v18, %v6224_v63  ;;  %v6352_v0 = vld [vmem:[#allocation2 + $0xd38] sm:$0xff]  ;;  %5711 = vst.msk [vmem:[#allocation2 + $0x948] sm:$0xff] %vm266_vm2, %v5198_v59  ;;  %8421 = vmatmul.msk.f32.gmra.mxu2 %vm1807_vm1, %v1609_v22  ;;  %8549 = vmatmul.msk.f32.gmra.mxu3 %vm1807_vm1, %v1737_v56 }
 0x35b   : > { %v7124_v8 = vmax.f32 %v6612_v27, 0.0  ;;  %v6868_v3 = vadd.f32 %v11109_v18, %v6352_v0  ;;  %v5969_v46 = vld [vmem:[#allocation2 + $0x140] sm:$0xff]  ;;  %5839 = vst.msk [vmem:[#allocation2 + $0xd48] sm:$0xff] %vm266_vm2, %v5326_v15  ;;  %v5071_v15 = vadd.f32 %v11469_v44, %v949_v33  ;;  %v822_v57 = vld [vmem:[#allocation2 + $0x158] sm:$0xff]  ;;  %v5199_v27 = vadd.f32 %v11474_v51, %v1077_v48 }
 0x35c   : > { %v7252_v58 = vmax.f32 %v6740_v62, 0.0  ;;  %v6485_v60 = vadd.f32 %v11109_v18, %v5969_v46  ;;  %v6097_v19 = vld [vmem:[#allocation2 + $0x540] sm:$0xff]  ;;  %5456 = vst.msk [vmem:[#allocation2 + $0x150] sm:$0xff] %vm266_vm2, %v4943_v61  ;;  %v950_v63 = vld [vmem:[#allocation2 + $0x558] sm:$0xff]  ;;  %v5327_v62 = vadd.f32 %v11476_v55, %v1205_v50  ;;  %v4944_v44 = vadd.f32 %v11507_v2, %v822_v57 }
 0x35d   : > { %7636 = vst.msk [vmem:[%s9095_s11 + $0x538] sm:$0xff] %vm266_vm2, %v7124_v8  ;;  %v7380_v1 = vmax.f32 %v6868_v3, 0.0  ;;  %v6613_v20 = vadd.f32 %v11109_v18, %v6097_v19  ;;  %v6225_v29 = vld [vmem:[#allocation2 + $0x940] sm:$0xff]  ;;  %v1078_v0 = vld [vmem:[#allocation2 + $0x958] sm:$0xff]  ;;  %v11619_v8 = vpop.f32.mrf.mxu1  ;;  %v5072_v51 = vadd.f32 %v11509_v12, %v950_v63  ;;  %v11623_v46 = vpop.f32.mrf.mxu2  ;;  %v1481_v19 = vld [vmem:[%s8863_s8 + $0x5f0] sm:$0xff] }
 0x35e   : > { %7764 = vst.msk [vmem:[%s9095_s11 + $0x938] sm:$0xff] %vm266_vm2, %v7252_v58  ;;  %v6997_v47 = vmax.f32 %v6485_v60, 0.0  ;;  %v6741_v24 = vadd.f32 %v11109_v18, %v6225_v29  ;;  %v6353_v6 = vld [vmem:[#allocation2 + $0xd40] sm:$0xff]  ;;  %v11577_v18 = vpop.f32.mrf.mxu0  ;;  %v11625_v55 = vpop.f32.mrf.mxu3  ;;  %v5200_v2 = vadd.f32 %v11513_v54, %v1078_v0  ;;  %v1353_v60 = vld [vmem:[%s8863_s8 + $0x1f0] sm:$0xff]  ;;  %v1738_v29 = vld [vmem:[%s8863_s8 + $0xdf8] sm:$0xff] }
 0x35f   : > { %7892 = vst.msk [vmem:[%s9095_s11 + $0xd38] sm:$0xff] %vm266_vm2, %v7380_v1  ;;  %v7125_v32 = vmax.f32 %v6613_v20, 0.0  ;;  %v6869_v45 = vadd.f32 %v11571_v25, %v6353_v6  ;;  %v5970_v5 = vld [vmem:[#allocation2 + $0x148] sm:$0xff]  ;;  %v823_v3 = vld [vmem:[#allocation2 + $0x160] sm:$0xff]  ;;  %v1610_v20 = vld [vmem:[%s8863_s8 + $0x9f8] sm:$0xff] }
 0x360   : > { %7509 = vst.msk [vmem:[%s9095_s11 + $0x140] sm:$0xff] %vm266_vm2, %v6997_v47  ;;  %v7253_v11 = vmax.f32 %v6741_v24, 0.0  ;;  %v6486_v40 = vadd.f32 %v11571_v25, %v5970_v5  ;;  %v6098_v17 = vld [vmem:[#allocation2 + $0x548] sm:$0xff]  ;;  %v951_v58 = vld [vmem:[#allocation2 + $0x560] sm:$0xff]  ;;  %8293 = vmatmul.msk.f32.gmra.mxu1 %vm1807_vm1, %v1481_v19  ;;  %v4945_v12 = vadd.f32 %v11539_v23, %v823_v3 }
 0x361   : > { %7637 = vst.msk [vmem:[%s9095_s11 + $0x540] sm:$0xff] %vm266_vm2, %v7125_v32  ;;  %v7381_v4 = vmax.f32 %v6869_v45, 0.0  ;;  %v6614_v21 = vadd.f32 %v11571_v25, %v6098_v17  ;;  %v6226_v37 = vld [vmem:[#allocation2 + $0x948] sm:$0xff]  ;;  %8165 = vmatmul.msk.f32.gmra.mxu0 %vm1807_vm1, %v1353_v60  ;;  %v1207_v1 = vld [vmem:[#allocation2 + $0xd60] sm:$0xff]  ;;  %v5073_v54 = vadd.f32 %v11541_v42, %v951_v58  ;;  %v1354_v17 = vld [vmem:[%s8863_s8 + $0x1f8] sm:$0xff] }
 0x362   : > { %7765 = vst.msk [vmem:[%s9095_s11 + $0x940] sm:$0xff] %vm266_vm2, %v7253_v11  ;;  %v6998_v26 = vmax.f32 %v6486_v40, 0.0  ;;  %v6742_v36 = vadd.f32 %v11571_v25, %v6226_v37  ;;  %v6354_v10 = vld [vmem:[#allocation2 + $0xd48] sm:$0xff]  ;;  %8422 = vmatmul.msk.f32.gmra.mxu2 %vm1807_vm1, %v1610_v20  ;;  %8550 = vmatmul.msk.f32.gmra.mxu3 %vm1807_vm1, %v1738_v29  ;;  %v5329_v23 = vadd.f32 %v11547_v16, %v1207_v1  ;;  %v1355_v58 = vld [vmem:[%s8863_s8 + $0x200] sm:$0xff] }
 0x363   : > { %7893 = vst.msk [vmem:[%s9095_s11 + $0xd40] sm:$0xff] %vm266_vm2, %v7381_v4  ;;  %v7126_v31 = vmax.f32 %v6614_v21, 0.0  ;;  %v6870_v43 = vadd.f32 %v11571_v25, %v6354_v10  ;;  %v5971_v28 = vld [vmem:[#allocation2 + $0x150] sm:$0xff]  ;;  %v824_v47 = vld [vmem:[#allocation2 + $0x168] sm:$0xff]  ;;  %v1611_v10 = vld [vmem:[%s8863_s8 + $0xa00] sm:$0xff] }
 0x364   : > { %7510 = vst.msk [vmem:[%s9095_s11 + $0x148] sm:$0xff] %vm266_vm2, %v6998_v26  ;;  %v7254_v34 = vmax.f32 %v6742_v36, 0.0  ;;  %v6487_v52 = vadd.f32 %v11571_v25, %v5971_v28  ;;  %v4946_v42 = vadd.f32 %v11577_v18, %v824_v47  ;;  %v1482_v18 = vld [vmem:[%s8863_s8 + $0x5f8] sm:$0xff]  ;;  %v952_v0 = vld [vmem:[#allocation2 + $0x568] sm:$0xff]  ;;  %v1483_v60 = vld [vmem:[%s8863_s8 + $0x600] sm:$0xff] }
 0x365   : > { %7638 = vst.msk [vmem:[%s9095_s11 + $0x548] sm:$0xff] %vm266_vm2, %v7126_v31  ;;  %v7382_v59 = vmax.f32 %v6870_v43, 0.0  ;;  %v11651_v32 = vpop.f32.mrf.mxu1  ;;  %v11655_v9 = vpop.f32.mrf.mxu2  ;;  %v1208_v29 = vld [vmem:[#allocation2 + $0xd68] sm:$0xff] }
 0x366   : > { %7766 = vst.msk [vmem:[%s9095_s11 + $0x948] sm:$0xff] %vm266_vm2, %v7254_v34  ;;  %v6999_v61 = vmax.f32 %v6487_v52, 0.0  ;;  %v11617_v53 = vpop.f32.mrf.mxu0  ;;  %v11657_v11 = vpop.f32.mrf.mxu3  ;;  %v1740_v47 = vld [vmem:[%s8863_s8 + $0xe08] sm:$0xff] }
 0x367   : > { %7894 = vst.msk [vmem:[%s9095_s11 + $0xd48] sm:$0xff] %vm266_vm2, %v7382_v59 }
 0x368   : > { %7511 = vst.msk [vmem:[%s9095_s11 + $0x150] sm:$0xff] %vm266_vm2, %v6999_v61  ;;  %8294 = vmatmul.msk.f32.gmra.mxu1 %vm1807_vm1, %v1482_v18 }
 0x369   : > { %5584 = vst.msk [vmem:[#allocation2 + $0x550] sm:$0xff] %vm266_vm2, %v5071_v15  ;;  %8166 = vmatmul.msk.f32.gmra.mxu0 %vm1807_vm1, %v1354_v17  ;;  %v1209_v17 = vld [vmem:[#allocation2 + $0xd70] sm:$0xff] }
 0x36a   : > { %5712 = vst.msk [vmem:[#allocation2 + $0x950] sm:$0xff] %vm266_vm2, %v5199_v27  ;;  %8423 = vmatmul.msk.f32.gmra.mxu2 %vm1807_vm1, %v1611_v10  ;;  %8551 = vmatmul.msk.f32.gmra.mxu3 %vm1807_vm1, %v1739_v41  ;;  %v5331_v10 = vadd.f32 %v11625_v55, %v1209_v17  ;;  %v1082_v41 = vld [vmem:[#allocation2 + $0x978] sm:$0xff] }
 0x36b   : > { %5840 = vst.msk [vmem:[#allocation2 + $0xd50] sm:$0xff] %vm266_vm2, %v5327_v62  ;;  %v5204_v55 = vadd.f32 %v11655_v9, %v1082_v41 }
 0x36c   : > { %5457 = vst.msk [vmem:[#allocation2 + $0x158] sm:$0xff] %vm266_vm2, %v4944_v44 }
 0x36d   : > { %5585 = vst.msk [vmem:[#allocation2 + $0x558] sm:$0xff] %vm266_vm2, %v5072_v51  ;;  %v11687_v61 = vpop.f32.mrf.mxu1  ;;  %v11692_v44 = vpop.f32.mrf.mxu2 }
 0x36e   : > { %5713 = vst.msk [vmem:[#allocation2 + $0x958] sm:$0xff] %vm266_vm2, %v5200_v2  ;;  %v11649_v6 = vpop.f32.mrf.mxu0  ;;  %v11694_v49 = vpop.f32.mrf.mxu3 }
 0x36f   : > { %5841 = vst.msk [vmem:[#allocation2 + $0xd58] sm:$0xff] %vm266_vm2, %v5328_v7 }
 0x370   : > { %v6099_v24 = vld [vmem:[#allocation2 + $0x550] sm:$0xff]  ;;  %5458 = vst.msk [vmem:[#allocation2 + $0x160] sm:$0xff] %vm266_vm2, %v4945_v12  ;;  %v1080_v12 = vld [vmem:[#allocation2 + $0x968] sm:$0xff]  ;;  %8295 = vmatmul.msk.f32.gmra.mxu1 %vm1807_vm1, %v1483_v60 }
 0x371   : > { %v6615_v45 = vadd.f32 %v11571_v25, %v6099_v24  ;;  %v6227_v5 = vld [vmem:[#allocation2 + $0x950] sm:$0xff]  ;;  %5586 = vst.msk [vmem:[#allocation2 + $0x560] sm:$0xff] %vm266_vm2, %v5073_v54  ;;  %8167 = vmatmul.msk.f32.gmra.mxu0 %vm1807_vm1, %v1355_v58  ;;  %v1612_v54 = vld [vmem:[%s8863_s8 + $0xa08] sm:$0xff]  ;;  %v1742_v58 = vld [vmem:[%s8863_s8 + $0xe18] sm:$0xff] }
 0x372   : > { %v6743_v16 = vadd.f32 %v11571_v25, %v6227_v5  ;;  %v6355_v40 = vld [vmem:[#allocation2 + $0xd50] sm:$0xff]  ;;  %5714 = vst.msk [vmem:[#allocation2 + $0x960] sm:$0xff] %vm266_vm2, %v5201_v39  ;;  %8424 = vmatmul.msk.f32.gmra.mxu2 %vm1807_vm1, %v1612_v54  ;;  %8552 = vmatmul.msk.f32.gmra.mxu3 %vm1807_vm1, %v1740_v47 }
 0x373   : > { %v7127_v4 = vmax.f32 %v6615_v45, 0.0  ;;  %v6871_v21 = vadd.f32 %v11571_v25, %v6355_v40  ;;  %v5972_v37 = vld [vmem:[#allocation2 + $0x158] sm:$0xff]  ;;  %5842 = vst.msk [vmem:[#allocation2 + $0xd60] sm:$0xff] %vm266_vm2, %v5329_v23  ;;  %v5074_v23 = vadd.f32 %v11579_v13, %v952_v0  ;;  %v825_v24 = vld [vmem:[#allocation2 + $0x170] sm:$0xff]  ;;  %v5202_v45 = vadd.f32 %v11584_v38, %v1080_v12 }
 0x374   : > { %v7255_v33 = vmax.f32 %v6743_v16, 0.0  ;;  %v6488_v26 = vadd.f32 %v11571_v25, %v5972_v37  ;;  %v6100_v36 = vld [vmem:[#allocation2 + $0x558] sm:$0xff]  ;;  %5459 = vst.msk [vmem:[#allocation2 + $0x168] sm:$0xff] %vm266_vm2, %v4946_v42  ;;  %v953_v5 = vld [vmem:[#allocation2 + $0x570] sm:$0xff]  ;;  %v5330_v16 = vadd.f32 %v11586_v35, %v1208_v29  ;;  %v4947_v13 = vadd.f32 %v11617_v53, %v825_v24 }
 0x375   : > { %7639 = vst.msk [vmem:[%s9095_s11 + $0x550] sm:$0xff] %vm266_vm2, %v7127_v4  ;;  %v7383_v30 = vmax.f32 %v6871_v21, 0.0  ;;  %v6616_v31 = vadd.f32 %v11571_v25, %v6100_v36  ;;  %v6228_v43 = vld [vmem:[#allocation2 + $0x958] sm:$0xff]  ;;  %v1081_v40 = vld [vmem:[#allocation2 + $0x970] sm:$0xff]  ;;  %v11727_v4 = vpop.f32.mrf.mxu1  ;;  %v5075_v38 = vadd.f32 %v11619_v8, %v953_v5  ;;  %v11731_v37 = vpop.f32.mrf.mxu2  ;;  %v1484_v36 = vld [vmem:[%s8863_s8 + $0x608] sm:$0xff] }
 0x376   : > { %7767 = vst.msk [vmem:[%s9095_s11 + $0x950] sm:$0xff] %vm266_vm2, %v7255_v33  ;;  %v7000_v28 = vmax.f32 %v6488_v26, 0.0  ;;  %v6744_v48 = vadd.f32 %v11571_v25, %v6228_v43  ;;  %v6356_v34 = vld [vmem:[#allocation2 + $0xd58] sm:$0xff]  ;;  %v11685_v57 = vpop.f32.mrf.mxu0  ;;  %v11733_v35 = vpop.f32.mrf.mxu3  ;;  %v5203_v53 = vadd.f32 %v11623_v46, %v1081_v40  ;;  %v1356_v26 = vld [vmem:[%s8863_s8 + $0x208] sm:$0xff]  ;;  %v1741_v43 = vld [vmem:[%s8863_s8 + $0xe10] sm:$0xff] }
 0x377   : > { %7895 = vst.msk [vmem:[%s9095_s11 + $0xd50] sm:$0xff] %vm266_vm2, %v7383_v30  ;;  %v7128_v52 = vmax.f32 %v6616_v31, 0.0  ;;  %v6872_v50 = vadd.f32 %v11571_v25, %v6356_v34  ;;  %v5973_v22 = vld [vmem:[#allocation2 + $0x160] sm:$0xff]  ;;  %v826_v21 = vld [vmem:[#allocation2 + $0x178] sm:$0xff]  ;;  %v1613_v31 = vld [vmem:[%s8863_s8 + $0xa10] sm:$0xff] }
 0x378   : > { %7512 = vst.msk [vmem:[%s9095_s11 + $0x158] sm:$0xff] %vm266_vm2, %v7000_v28  ;;  %v7256_v56 = vmax.f32 %v6744_v48, 0.0  ;;  %v6489_v59 = vadd.f32 %v11571_v25, %v5973_v22  ;;  %v6101_v15 = vld [vmem:[#allocation2 + $0x560] sm:$0xff]  ;;  %v954_v33 = vld [vmem:[#allocation2 + $0x578] sm:$0xff]  ;;  %8296 = vmatmul.msk.f32.gmra.mxu1 %vm1807_vm1, %v1484_v36  ;;  %v4948_v8 = vadd.f32 %v11649_v6, %v826_v21 }
 0x379   : > { %7640 = vst.msk [vmem:[%s9095_s11 + $0x558] sm:$0xff] %vm266_vm2, %v7128_v52  ;;  %v7384_v27 = vmax.f32 %v6872_v50, 0.0  ;;  %v6617_v63 = vadd.f32 %v11571_v25, %v6101_v15  ;;  %v6229_v62 = vld [vmem:[#allocation2 + $0x960] sm:$0xff]  ;;  %8168 = vmatmul.msk.f32.gmra.mxu0 %vm1807_vm1, %v1356_v26  ;;  %v1210_v30 = vld [vmem:[#allocation2 + $0xd78] sm:$0xff]  ;;  %v5076_v46 = vadd.f32 %v11651_v32, %v954_v33  ;;  %v1357_v15 = vld [vmem:[%s8863_s8 + $0x210] sm:$0xff] }
 0x37a   : > { %7768 = vst.msk [vmem:[%s9095_s11 + $0x958] sm:$0xff] %vm266_vm2, %v7256_v56  ;;  %v7001_v51 = vmax.f32 %v6489_v59, 0.0  ;;  %v6745_v3 = vadd.f32 %v11571_v25, %v6229_v62  ;;  %v6357_v2 = vld [vmem:[#allocation2 + $0xd60] sm:$0xff]  ;;  %8425 = vmatmul.msk.f32.gmra.mxu2 %vm1807_vm1, %v1613_v31  ;;  %8553 = vmatmul.msk.f32.gmra.mxu3 %vm1807_vm1, %v1741_v43  ;;  %v5332_v6 = vadd.f32 %v11657_v11, %v1210_v30  ;;  %v1358_v33 = vld [vmem:[%s8863_s8 + $0x218] sm:$0xff] }
 0x37b   : > { %7896 = vst.msk [vmem:[%s9095_s11 + $0xd58] sm:$0xff] %vm266_vm2, %v7384_v27  ;;  %v7129_v19 = vmax.f32 %v6617_v63, 0.0  ;;  %v6873_v7 = vadd.f32 %v11571_v25, %v6357_v2  ;;  %v5974_v14 = vld [vmem:[#allocation2 + $0x168] sm:$0xff]  ;;  %v827_v28 = vld [vmem:[#allocation2 + $0x180] sm:$0xff]  ;;  %v1614_v2 = vld [vmem:[%s8863_s8 + $0xa18] sm:$0xff] }
 0x37c   : > { %7513 = vst.msk [vmem:[%s9095_s11 + $0x160] sm:$0xff] %vm266_vm2, %v7001_v51  ;;  %v7257_v1 = vmax.f32 %v6745_v3, 0.0  ;;  %v6490_v20 = vadd.f32 %v11571_v25, %v5974_v14  ;;  %v4949_v32 = vadd.f32 %v11685_v57, %v827_v28  ;;  %v1485_v57 = vld [vmem:[%s8863_s8 + $0x610] sm:$0xff]  ;;  %v955_v40 = vld [vmem:[#allocation2 + $0x580] sm:$0xff]  ;;  %v1486_v26 = vld [vmem:[%s8863_s8 + $0x618] sm:$0xff] }
 0x37d   : > { %7641 = vst.msk [vmem:[%s9095_s11 + $0x560] sm:$0xff] %vm266_vm2, %v7129_v19  ;;  %v7385_v39 = vmax.f32 %v6873_v7, 0.0  ;;  %v11759_v52 = vpop.f32.mrf.mxu1  ;;  %v11763_v9 = vpop.f32.mrf.mxu2  ;;  %v1211_v43 = vld [vmem:[#allocation2 + $0xd80] sm:$0xff] }
 0x37e   : > { %7769 = vst.msk [vmem:[%s9095_s11 + $0x960] sm:$0xff] %vm266_vm2, %v7257_v1  ;;  %v7002_v42 = vmax.f32 %v6490_v20, 0.0  ;;  %v11725_v18 = vpop.f32.mrf.mxu0  ;;  %v11765_v56 = vpop.f32.mrf.mxu3  ;;  %v1743_v28 = vld [vmem:[%s8863_s8 + $0xe20] sm:$0xff] }
 0x37f   : > { %7897 = vst.msk [vmem:[%s9095_s11 + $0xd60] sm:$0xff] %vm266_vm2, %v7385_v39 }
 0x380   : > { %7514 = vst.msk [vmem:[%s9095_s11 + $0x168] sm:$0xff] %vm266_vm2, %v7002_v42  ;;  %8297 = vmatmul.msk.f32.gmra.mxu1 %vm1807_vm1, %v1485_v57 }
 0x381   : > { %5587 = vst.msk [vmem:[#allocation2 + $0x568] sm:$0xff] %vm266_vm2, %v5074_v23  ;;  %8169 = vmatmul.msk.f32.gmra.mxu0 %vm1807_vm1, %v1357_v15  ;;  %v1212_v15 = vld [vmem:[#allocation2 + $0xd88] sm:$0xff] }
 0x382   : > { %5715 = vst.msk [vmem:[#allocation2 + $0x968] sm:$0xff] %vm266_vm2, %v5202_v45  ;;  %8426 = vmatmul.msk.f32.gmra.mxu2 %vm1807_vm1, %v1614_v2  ;;  %8554 = vmatmul.msk.f32.gmra.mxu3 %vm1807_vm1, %v1742_v58  ;;  %v5334_v2 = vadd.f32 %v11733_v35, %v1212_v15  ;;  %v1085_v58 = vld [vmem:[#allocation2 + $0x990] sm:$0xff] }
 0x383   : > { %5843 = vst.msk [vmem:[#allocation2 + $0xd68] sm:$0xff] %vm266_vm2, %v5330_v16  ;;  %v5207_v35 = vadd.f32 %v11763_v9, %v1085_v58 }
 0x384   : > { %5460 = vst.msk [vmem:[#allocation2 + $0x170] sm:$0xff] %vm266_vm2, %v4947_v13 }
 0x385   : > { %5588 = vst.msk [vmem:[#allocation2 + $0x570] sm:$0xff] %vm266_vm2, %v5075_v38  ;;  %v11795_v42 = vpop.f32.mrf.mxu1  ;;  %v11800_v13 = vpop.f32.mrf.mxu2 }
 0x386   : > { %5716 = vst.msk [vmem:[#allocation2 + $0x970] sm:$0xff] %vm266_vm2, %v5203_v53  ;;  %v11757_v34 = vpop.f32.mrf.mxu0  ;;  %v11802_v17 = vpop.f32.mrf.mxu3 }
 0x387   : > { %5844 = vst.msk [vmem:[#allocation2 + $0xd70] sm:$0xff] %vm266_vm2, %v5331_v10 }
 0x388   : > { %v6102_v48 = vld [vmem:[#allocation2 + $0x568] sm:$0xff]  ;;  %5461 = vst.msk [vmem:[#allocation2 + $0x178] sm:$0xff] %vm266_vm2, %v4948_v8  ;;  %v1083_v8 = vld [vmem:[#allocation2 + $0x980] sm:$0xff]  ;;  %8298 = vmatmul.msk.f32.gmra.mxu1 %vm1807_vm1, %v1486_v26 }
 0x389   : > { %v6618_v50 = vadd.f32 %v11571_v25, %v6102_v48  ;;  %v6230_v22 = vld [vmem:[#allocation2 + $0x968] sm:$0xff]  ;;  %5589 = vst.msk [vmem:[#allocation2 + $0x578] sm:$0xff] %vm266_vm2, %v5076_v46  ;;  %8170 = vmatmul.msk.f32.gmra.mxu0 %vm1807_vm1, %v1358_v33  ;;  %v1615_v46 = vld [vmem:[%s8863_s8 + $0xa20] sm:$0xff]  ;;  %v1745_v33 = vld [vmem:[%s8863_s8 + $0xe30] sm:$0xff] }
 0x38a   : > { %v6746_v11 = vadd.f32 %v11571_v25, %v6230_v22  ;;  %v6358_v59 = vld [vmem:[#allocation2 + $0xd68] sm:$0xff]  ;;  %5717 = vst.msk [vmem:[#allocation2 + $0x978] sm:$0xff] %vm266_vm2, %v5204_v55  ;;  %8427 = vmatmul.msk.f32.gmra.mxu2 %vm1807_vm1, %v1615_v46  ;;  %8555 = vmatmul.msk.f32.gmra.mxu3 %vm1807_vm1, %v1743_v28 }
 0x38b   : > { %v7130_v27 = vmax.f32 %v6618_v50, 0.0  ;;  %v6874_v63 = vadd.f32 %v11571_v25, %v6358_v59  ;;  %v5975_v62 = vld [vmem:[#allocation2 + $0x170] sm:$0xff]  ;;  %5845 = vst.msk [vmem:[#allocation2 + $0xd78] sm:$0xff] %vm266_vm2, %v5332_v6  ;;  %v5077_v6 = vadd.f32 %v11687_v61, %v955_v40  ;;  %v828_v48 = vld [vmem:[#allocation2 + $0x188] sm:$0xff]  ;;  %v5205_v50 = vadd.f32 %v11692_v44, %v1083_v8 }
 0x38c   : > { %v7258_v0 = vmax.f32 %v6746_v11, 0.0  ;;  %v6491_v51 = vadd.f32 %v11571_v25, %v5975_v62  ;;  %v6103_v3 = vld [vmem:[#allocation2 + $0x570] sm:$0xff]  ;;  %5462 = vst.msk [vmem:[#allocation2 + $0x180] sm:$0xff] %vm266_vm2, %v4949_v32  ;;  %v956_v22 = vld [vmem:[#allocation2 + $0x588] sm:$0xff]  ;;  %v5333_v11 = vadd.f32 %v11694_v49, %v1211_v43  ;;  %v4950_v61 = vadd.f32 %v11725_v18, %v828_v48 }
 0x38d   : > { %7642 = vst.msk [vmem:[%s9095_s11 + $0x568] sm:$0xff] %vm266_vm2, %v7130_v27  ;;  %v7386_v60 = vmax.f32 %v6874_v63, 0.0  ;;  %v6619_v19 = vadd.f32 %v11571_v25, %v6103_v3  ;;  %v6231_v7 = vld [vmem:[#allocation2 + $0x970] sm:$0xff]  ;;  %v1084_v59 = vld [vmem:[#allocation2 + $0x988] sm:$0xff]  ;;  %v11835_v27 = vpop.f32.mrf.mxu1  ;;  %v5078_v44 = vadd.f32 %v11727_v4, %v956_v22  ;;  %v11839_v62 = vpop.f32.mrf.mxu2  ;;  %v1487_v3 = vld [vmem:[%s8863_s8 + $0x620] sm:$0xff] }
 0x38e   : > { %7770 = vst.msk [vmem:[%s9095_s11 + $0x968] sm:$0xff] %vm266_vm2, %v7258_v0  ;;  %v7003_v14 = vmax.f32 %v6491_v51, 0.0  ;;  %v6747_v12 = vadd.f32 %v11571_v25, %v6231_v7  ;;  %v6359_v1 = vld [vmem:[#allocation2 + $0xd70] sm:$0xff]  ;;  %v11793_v24 = vpop.f32.mrf.mxu0  ;;  %v11841_v49 = vpop.f32.mrf.mxu3  ;;  %v5206_v18 = vadd.f32 %v11731_v37, %v1084_v59  ;;  %v1359_v51 = vld [vmem:[%s8863_s8 + $0x220] sm:$0xff]  ;;  %v1744_v7 = vld [vmem:[%s8863_s8 + $0xe28] sm:$0xff] }
 0x38f   : > { %7898 = vst.msk [vmem:[%s9095_s11 + $0xd68] sm:$0xff] %vm266_vm2, %v7386_v60  ;;  %v7131_v20 = vmax.f32 %v6619_v19, 0.0  ;;  %v6875_v29 = vadd.f32 %v11571_v25, %v6359_v1  ;;  %v5976_v54 = vld [vmem:[#allocation2 + $0x178] sm:$0xff]  ;;  %v829_v63 = vld [vmem:[#allocation2 + $0x190] sm:$0xff]  ;;  %v1616_v19 = vld [vmem:[%s8863_s8 + $0xa28] sm:$0xff] }
 0x390   : > { %7515 = vst.msk [vmem:[%s9095_s11 + $0x170] sm:$0xff] %vm266_vm2, %v7003_v14  ;;  %v7259_v47 = vmax.f32 %v6747_v12, 0.0  ;;  %v6492_v39 = vadd.f32 %v11571_v25, %v5976_v54  ;;  %v6104_v23 = vld [vmem:[#allocation2 + $0x578] sm:$0xff]  ;;  %v957_v0 = vld [vmem:[#allocation2 + $0x590] sm:$0xff]  ;;  %8299 = vmatmul.msk.f32.gmra.mxu1 %vm1807_vm1, %v1487_v3  ;;  %v4951_v4 = vadd.f32 %v11757_v34, %v829_v63 }
 0x391   : > { %7643 = vst.msk [vmem:[%s9095_s11 + $0x570] sm:$0xff] %vm266_vm2, %v7131_v20  ;;  %v7387_v45 = vmax.f32 %v6875_v29, 0.0  ;;  %v6620_v5 = vadd.f32 %v11571_v25, %v6104_v23  ;;  %v6232_v16 = vld [vmem:[#allocation2 + $0x978] sm:$0xff]  ;;  %8171 = vmatmul.msk.f32.gmra.mxu0 %vm1807_vm1, %v1359_v51  ;;  %v1213_v60 = vld [vmem:[#allocation2 + $0xd90] sm:$0xff]  ;;  %v5079_v37 = vadd.f32 %v11759_v52, %v957_v0  ;;  %v1360_v23 = vld [vmem:[%s8863_s8 + $0x228] sm:$0xff] }
 0x392   : > { %7771 = vst.msk [vmem:[%s9095_s11 + $0x970] sm:$0xff] %vm266_vm2, %v7259_v47  ;;  %v7004_v38 = vmax.f32 %v6492_v39, 0.0  ;;  %v6748_v21 = vadd.f32 %v11571_v25, %v6232_v16  ;;  %v6360_v53 = vld [vmem:[#allocation2 + $0xd78] sm:$0xff]  ;;  %8428 = vmatmul.msk.f32.gmra.mxu2 %vm1807_vm1, %v1616_v19  ;;  %8556 = vmatmul.msk.f32.gmra.mxu3 %vm1807_vm1, %v1744_v7  ;;  %v5335_v34 = vadd.f32 %v11765_v56, %v1213_v60  ;;  %v1361_v0 = vld [vmem:[%s8863_s8 + $0x230] sm:$0xff] }
 0x393   : > { %7899 = vst.msk [vmem:[%s9095_s11 + $0xd70] sm:$0xff] %vm266_vm2, %v7387_v45  ;;  %v7132_v36 = vmax.f32 %v6620_v5, 0.0  ;;  %v6876_v10 = vadd.f32 %v11571_v25, %v6360_v53  ;;  %v5977_v41 = vld [vmem:[#allocation2 + $0x180] sm:$0xff]  ;;  %v830_v14 = vld [vmem:[#allocation2 + $0x198] sm:$0xff]  ;;  %v1617_v53 = vld [vmem:[%s8863_s8 + $0xa30] sm:$0xff] }
 0x394   : > { %7516 = vst.msk [vmem:[%s9095_s11 + $0x178] sm:$0xff] %vm266_vm2, %v7004_v38  ;;  %v7260_v30 = vmax.f32 %v6748_v21, 0.0  ;;  %v6493_v31 = vadd.f32 %v11571_v25, %v5977_v41  ;;  %v4952_v52 = vadd.f32 %v11793_v24, %v830_v14  ;;  %v1488_v24 = vld [vmem:[%s8863_s8 + $0x628] sm:$0xff]  ;;  %v958_v59 = vld [vmem:[#allocation2 + $0x598] sm:$0xff]  ;;  %v1489_v51 = vld [vmem:[%s8863_s8 + $0x630] sm:$0xff] }
 0x395   : > { %7644 = vst.msk [vmem:[%s9095_s11 + $0x578] sm:$0xff] %vm266_vm2, %v7132_v36  ;;  %v7388_v55 = vmax.f32 %v6876_v10, 0.0  ;;  %v11867_v20 = vpop.f32.mrf.mxu1  ;;  %v11871_v9 = vpop.f32.mrf.mxu2  ;;  %v1214_v7 = vld [vmem:[#allocation2 + $0xd98] sm:$0xff] }
 0x396   : > { %7772 = vst.msk [vmem:[%s9095_s11 + $0x978] sm:$0xff] %vm266_vm2, %v7260_v30  ;;  %v7005_v32 = vmax.f32 %v6493_v31, 0.0  ;;  %v11833_v57 = vpop.f32.mrf.mxu0  ;;  %v11873_v47 = vpop.f32.mrf.mxu3  ;;  %v1746_v14 = vld [vmem:[%s8863_s8 + $0xe38] sm:$0xff] }
 0x397   : > { %7900 = vst.msk [vmem:[%s9095_s11 + $0xd78] sm:$0xff] %vm266_vm2, %v7388_v55 }
 0x398   : > { %7517 = vst.msk [vmem:[%s9095_s11 + $0x180] sm:$0xff] %vm266_vm2, %v7005_v32  ;;  %8300 = vmatmul.msk.f32.gmra.mxu1 %vm1807_vm1, %v1488_v24 }
 0x399   : > { %5590 = vst.msk [vmem:[#allocation2 + $0x580] sm:$0xff] %vm266_vm2, %v5077_v6  ;;  %8172 = vmatmul.msk.f32.gmra.mxu0 %vm1807_vm1, %v1360_v23  ;;  %v1215_v23 = vld [vmem:[#allocation2 + $0xda0] sm:$0xff] }
 0x39a   : > { %5718 = vst.msk [vmem:[#allocation2 + $0x980] sm:$0xff] %vm266_vm2, %v5205_v50  ;;  %8429 = vmatmul.msk.f32.gmra.mxu2 %vm1807_vm1, %v1617_v53  ;;  %8557 = vmatmul.msk.f32.gmra.mxu3 %vm1807_vm1, %v1745_v33  ;;  %v5337_v53 = vadd.f32 %v11841_v49, %v1215_v23  ;;  %v1088_v33 = vld [vmem:[#allocation2 + $0x9a8] sm:$0xff] }
 0x39b   : > { %5846 = vst.msk [vmem:[#allocation2 + $0xd80] sm:$0xff] %vm266_vm2, %v5333_v11  ;;  %v5210_v49 = vadd.f32 %v11871_v9, %v1088_v33 }
 0x39c   : > { %5463 = vst.msk [vmem:[#allocation2 + $0x188] sm:$0xff] %vm266_vm2, %v4950_v61 }
 0x39d   : > { %5591 = vst.msk [vmem:[#allocation2 + $0x588] sm:$0xff] %vm266_vm2, %v5078_v44  ;;  %v11903_v32 = vpop.f32.mrf.mxu1  ;;  %v11908_v61 = vpop.f32.mrf.mxu2 }
 0x39e   : > { %5719 = vst.msk [vmem:[#allocation2 + $0x988] sm:$0xff] %vm266_vm2, %v5206_v18  ;;  %v11865_v1 = vpop.f32.mrf.mxu0  ;;  %v11910_v15 = vpop.f32.mrf.mxu3 }
 0x39f   : > { %5847 = vst.msk [vmem:[#allocation2 + $0xd88] sm:$0xff] %vm266_vm2, %v5334_v2 }
 0x3a0   : > { %v6105_v12 = vld [vmem:[#allocation2 + $0x580] sm:$0xff]  ;;  %5464 = vst.msk [vmem:[#allocation2 + $0x190] sm:$0xff] %vm266_vm2, %v4951_v4  ;;  %v1086_v4 = vld [vmem:[#allocation2 + $0x998] sm:$0xff]  ;;  %8301 = vmatmul.msk.f32.gmra.mxu1 %vm1807_vm1, %v1489_v51 }
 0x3a1   : > { %v6621_v29 = vadd.f32 %v11571_v25, %v6105_v12  ;;  %v6233_v54 = vld [vmem:[#allocation2 + $0x980] sm:$0xff]  ;;  %5592 = vst.msk [vmem:[#allocation2 + $0x590] sm:$0xff] %vm266_vm2, %v5079_v37  ;;  %8173 = vmatmul.msk.f32.gmra.mxu0 %vm1807_vm1, %v1361_v0  ;;  %v1618_v37 = vld [vmem:[%s8863_s8 + $0xa38] sm:$0xff]  ;;  %v1748_v0 = vld [vmem:[%s8863_s8 + $0xe48] sm:$0xff] }
 0x3a2   : > { %v6749_v56 = vadd.f32 %v11571_v25, %v6233_v54  ;;  %v6361_v39 = vld [vmem:[#allocation2 + $0xd80] sm:$0xff]  ;;  %5720 = vst.msk [vmem:[#allocation2 + $0x990] sm:$0xff] %vm266_vm2, %v5207_v35  ;;  %8430 = vmatmul.msk.f32.gmra.mxu2 %vm1807_vm1, %v1618_v37  ;;  %8558 = vmatmul.msk.f32.gmra.mxu3 %vm1807_vm1, %v1746_v14 }
 0x3a3   : > { %v7133_v45 = vmax.f32 %v6621_v29, 0.0  ;;  %v6877_v5 = vadd.f32 %v11571_v25, %v6361_v39  ;;  %v5978_v16 = vld [vmem:[#allocation2 + $0x188] sm:$0xff]  ;;  %5848 = vst.msk [vmem:[#allocation2 + $0xd90] sm:$0xff] %vm266_vm2, %v5335_v34  ;;  %v5080_v34 = vadd.f32 %v11795_v42, %v958_v59  ;;  %v831_v12 = vld [vmem:[#allocation2 + $0x1a0] sm:$0xff]  ;;  %v5208_v29 = vadd.f32 %v11800_v13, %v1086_v4 }
 0x3a4   : > { %v7261_v40 = vmax.f32 %v6749_v56, 0.0  ;;  %v6494_v38 = vadd.f32 %v11571_v25, %v5978_v16  ;;  %v6106_v21 = vld [vmem:[#allocation2 + $0x588] sm:$0xff]  ;;  %5465 = vst.msk [vmem:[#allocation2 + $0x198] sm:$0xff] %vm266_vm2, %v4952_v52  ;;  %v959_v54 = vld [vmem:[#allocation2 + $0x5a0] sm:$0xff]  ;;  %v5336_v56 = vadd.f32 %v11802_v17, %v1214_v7  ;;  %v4953_v42 = vadd.f32 %v11833_v57, %v831_v12 }
 0x3a5   : > { %7645 = vst.msk [vmem:[%s9095_s11 + $0x580] sm:$0xff] %vm266_vm2, %v7133_v45  ;;  %v7389_v26 = vmax.f32 %v6877_v5, 0.0  ;;  %v6622_v36 = vadd.f32 %v11571_v25, %v6106_v21  ;;  %v6234_v10 = vld [vmem:[#allocation2 + $0x988] sm:$0xff]  ;;  %v1087_v39 = vld [vmem:[#allocation2 + $0x9a0] sm:$0xff]  ;;  %v11943_v45 = vpop.f32.mrf.mxu1  ;;  %v5081_v13 = vadd.f32 %v11835_v27, %v959_v54  ;;  %v11947_v16 = vpop.f32.mrf.mxu2  ;;  %v1490_v21 = vld [vmem:[%s8863_s8 + $0x638] sm:$0xff] }
 0x3a6   : > { %7773 = vst.msk [vmem:[%s9095_s11 + $0x980] sm:$0xff] %vm266_vm2, %v7261_v40  ;;  %v7006_v41 = vmax.f32 %v6494_v38, 0.0  ;;  %v6750_v8 = vadd.f32 %v11571_v25, %v6234_v10  ;;  %v6362_v30 = vld [vmem:[#allocation2 + $0xd88] sm:$0xff]  ;;  %v11901_v48 = vpop.f32.mrf.mxu0  ;;  %v11949_v17 = vpop.f32.mrf.mxu3  ;;  %v5209_v57 = vadd.f32 %v11839_v62, %v1087_v39  ;;  %v1362_v38 = vld [vmem:[%s8863_s8 + $0x238] sm:$0xff]  ;;  %v1747_v10 = vld [vmem:[%s8863_s8 + $0xe40] sm:$0xff] }
 0x3a7   : > { %7901 = vst.msk [vmem:[%s9095_s11 + $0xd80] sm:$0xff] %vm266_vm2, %v7389_v26  ;;  %v7134_v31 = vmax.f32 %v6622_v36, 0.0  ;;  %v6878_v43 = vadd.f32 %v11571_v25, %v6362_v30  ;;  %v5979_v46 = vld [vmem:[#allocation2 + $0x190] sm:$0xff]  ;;  %v832_v5 = vld [vmem:[#allocation2 + $0x1a8] sm:$0xff]  ;;  %v1619_v36 = vld [vmem:[%s8863_s8 + $0xa40] sm:$0xff] }
 0x3a8   : > { %7518 = vst.msk [vmem:[%s9095_s11 + $0x188] sm:$0xff] %vm266_vm2, %v7006_v41  ;;  %v7262_v28 = vmax.f32 %v6750_v8, 0.0  ;;  %v6495_v55 = vadd.f32 %v11571_v25, %v5979_v46  ;;  %v6107_v6 = vld [vmem:[#allocation2 + $0x590] sm:$0xff]  ;;  %v960_v40 = vld [vmem:[#allocation2 + $0x5a8] sm:$0xff]  ;;  %8302 = vmatmul.msk.f32.gmra.mxu1 %vm1807_vm1, %v1490_v21  ;;  %v4954_v27 = vadd.f32 %v11865_v1, %v832_v5 }
 0x3a9   : > { %7646 = vst.msk [vmem:[%s9095_s11 + $0x588] sm:$0xff] %vm266_vm2, %v7134_v31  ;;  %v7390_v50 = vmax.f32 %v6878_v43, 0.0  ;;  %v6623_v22 = vadd.f32 %v11571_v25, %v6107_v6  ;;  %v6235_v11 = vld [vmem:[#allocation2 + $0x990] sm:$0xff]  ;;  %8174 = vmatmul.msk.f32.gmra.mxu0 %vm1807_vm1, %v1362_v38  ;;  %v1216_v26 = vld [vmem:[#allocation2 + $0xda8] sm:$0xff]  ;;  %v5082_v62 = vadd.f32 %v11867_v20, %v960_v40  ;;  %v1363_v6 = vld [vmem:[%s8863_s8 + $0x240] sm:$0xff] }
 0x3aa   : > { %7774 = vst.msk [vmem:[%s9095_s11 + $0x988] sm:$0xff] %vm266_vm2, %v7262_v28  ;;  %v7007_v44 = vmax.f32 %v6495_v55, 0.0  ;;  %v6751_v63 = vadd.f32 %v11571_v25, %v6235_v11  ;;  %v6363_v18 = vld [vmem:[#allocation2 + $0xd90] sm:$0xff]  ;;  %8431 = vmatmul.msk.f32.gmra.mxu2 %vm1807_vm1, %v1619_v36  ;;  %8559 = vmatmul.msk.f32.gmra.mxu3 %vm1807_vm1, %v1747_v10  ;;  %v5338_v1 = vadd.f32 %v11873_v47, %v1216_v26  ;;  %v1364_v40 = vld [vmem:[%s8863_s8 + $0x248] sm:$0xff] }
 0x3ab   : > { %7902 = vst.msk [vmem:[%s9095_s11 + $0xd88] sm:$0xff] %vm266_vm2, %v7390_v50  ;;  %v7135_v3 = vmax.f32 %v6623_v22, 0.0  ;;  %v6879_v2 = vadd.f32 %v11571_v25, %v6363_v18  ;;  %v5980_v58 = vld [vmem:[#allocation2 + $0x198] sm:$0xff]  ;;  %v833_v41 = vld [vmem:[#allocation2 + $0x1b0] sm:$0xff]  ;;  %v1620_v18 = vld [vmem:[%s8863_s8 + $0xa48] sm:$0xff] }
 0x3ac   : > { %7519 = vst.msk [vmem:[%s9095_s11 + $0x190] sm:$0xff] %vm266_vm2, %v7007_v44  ;;  %v7263_v60 = vmax.f32 %v6751_v63, 0.0  ;;  %v6496_v19 = vadd.f32 %v11571_v25, %v5980_v58  ;;  %v4955_v20 = vadd.f32 %v11901_v48, %v833_v41  ;;  %v1491_v48 = vld [vmem:[%s8863_s8 + $0x640] sm:$0xff]  ;;  %v961_v39 = vld [vmem:[#allocation2 + $0x5b0] sm:$0xff]  ;;  %v1492_v38 = vld [vmem:[%s8863_s8 + $0x648] sm:$0xff] }
 0x3ad   : > { %7647 = vst.msk [vmem:[%s9095_s11 + $0x590] sm:$0xff] %vm266_vm2, %v7135_v3  ;;  %v7391_v35 = vmax.f32 %v6879_v2, 0.0  ;;  %v11975_v31 = vpop.f32.mrf.mxu1  ;;  %v11979_v9 = vpop.f32.mrf.mxu2  ;;  %v1217_v10 = vld [vmem:[#allocation2 + $0xdb0] sm:$0xff] }
 0x3ae   : > { %7775 = vst.msk [vmem:[%s9095_s11 + $0x990] sm:$0xff] %vm266_vm2, %v7263_v60  ;;  %v7008_v52 = vmax.f32 %v6496_v19, 0.0  ;;  %v11941_v24 = vpop.f32.mrf.mxu0  ;;  %v11981_v28 = vpop.f32.mrf.mxu3  ;;  %v1749_v41 = vld [vmem:[%s8863_s8 + $0xe50] sm:$0xff] }
 0x3af   : > { %7903 = vst.msk [vmem:[%s9095_s11 + $0xd90] sm:$0xff] %vm266_vm2, %v7391_v35 }
 0x3b0   : > { %7520 = vst.msk [vmem:[%s9095_s11 + $0x198] sm:$0xff] %vm266_vm2, %v7008_v52  ;;  %8303 = vmatmul.msk.f32.gmra.mxu1 %vm1807_vm1, %v1491_v48 }
 0x3b1   : > { %5593 = vst.msk [vmem:[#allocation2 + $0x598] sm:$0xff] %vm266_vm2, %v5080_v34  ;;  %8175 = vmatmul.msk.f32.gmra.mxu0 %vm1807_vm1, %v1363_v6 }
 0x3b2   : > { %5721 = vst.msk [vmem:[#allocation2 + $0x998] sm:$0xff] %vm266_vm2, %v5208_v29  ;;  %8432 = vmatmul.msk.f32.gmra.mxu2 %vm1807_vm1, %v1620_v18  ;;  %8560 = vmatmul.msk.f32.gmra.mxu3 %vm1807_vm1, %v1748_v0  ;;  %v1091_v18 = vld [vmem:[#allocation2 + $0x9c0] sm:$0xff] }
 0x3b3   : > { %5849 = vst.msk [vmem:[#allocation2 + $0xd98] sm:$0xff] %vm266_vm2, %v5336_v56  ;;  %v1219_v0 = vld [vmem:[#allocation2 + $0xdc0] sm:$0xff] }
 0x3b4   : > { %5466 = vst.msk [vmem:[#allocation2 + $0x1a0] sm:$0xff] %vm266_vm2, %v4953_v42 }
 0x3b5   : > { %5594 = vst.msk [vmem:[#allocation2 + $0x5a0] sm:$0xff] %vm266_vm2, %v5081_v13  ;;  %v12011_v52 = vpop.f32.mrf.mxu1  ;;  %v12016_v42 = vpop.f32.mrf.mxu2 }
 0x3b6   : > { %5722 = vst.msk [vmem:[#allocation2 + $0x9a0] sm:$0xff] %vm266_vm2, %v5209_v57  ;;  %v11973_v30 = vpop.f32.mrf.mxu0  ;;  %v12018_v23 = vpop.f32.mrf.mxu3 }
 0x3b7   : > { %5850 = vst.msk [vmem:[#allocation2 + $0xda0] sm:$0xff] %vm266_vm2, %v5337_v53 }
 0x3b8   : > { %v6108_v8 = vld [vmem:[#allocation2 + $0x598] sm:$0xff]  ;;  %5467 = vst.msk [vmem:[#allocation2 + $0x1a8] sm:$0xff] %vm266_vm2, %v4954_v27  ;;  %v1089_v27 = vld [vmem:[#allocation2 + $0x9b0] sm:$0xff]  ;;  %8304 = vmatmul.msk.f32.gmra.mxu1 %vm1807_vm1, %v1492_v38 }
 0x3b9   : > { %v6624_v43 = vadd.f32 %v11571_v25, %v6108_v8  ;;  %v6236_v46 = vld [vmem:[#allocation2 + $0x998] sm:$0xff]  ;;  %5595 = vst.msk [vmem:[#allocation2 + $0x5a8] sm:$0xff] %vm266_vm2, %v5082_v62  ;;  %8176 = vmatmul.msk.f32.gmra.mxu0 %vm1807_vm1, %v1364_v40  ;;  %v1621_v62 = vld [vmem:[%s8863_s8 + $0xa50] sm:$0xff]  ;;  %v1751_v40 = vld [vmem:[%s8863_s8 + $0xe60] sm:$0xff] }
 0x3ba   : > { %v6752_v47 = vadd.f32 %v11571_v25, %v6236_v46  ;;  %v6364_v55 = vld [vmem:[#allocation2 + $0xd98] sm:$0xff]  ;;  %5723 = vst.msk [vmem:[#allocation2 + $0x9a8] sm:$0xff] %vm266_vm2, %v5210_v49  ;;  %8433 = vmatmul.msk.f32.gmra.mxu2 %vm1807_vm1, %v1621_v62  ;;  %8561 = vmatmul.msk.f32.gmra.mxu3 %vm1807_vm1, %v1749_v41  ;;  %v5339_v46 = vadd.f32 %v11910_v15, %v1217_v10 }
 0x3bb   : > { %v7136_v50 = vmax.f32 %v6624_v43, 0.0  ;;  %v6880_v22 = vadd.f32 %v11571_v25, %v6364_v55  ;;  %v5981_v11 = vld [vmem:[#allocation2 + $0x1a0] sm:$0xff]  ;;  %5851 = vst.msk [vmem:[#allocation2 + $0xda8] sm:$0xff] %vm266_vm2, %v5338_v1  ;;  %v5083_v1 = vadd.f32 %v11903_v32, %v961_v39  ;;  %v834_v8 = vld [vmem:[#allocation2 + $0x1b8] sm:$0xff]  ;;  %v5211_v43 = vadd.f32 %v11908_v61, %v1089_v27 }
 0x3bc   : > { %v7264_v59 = vmax.f32 %v6752_v47, 0.0  ;;  %v6497_v44 = vadd.f32 %v11571_v25, %v5981_v11  ;;  %v6109_v63 = vld [vmem:[#allocation2 + $0x5a0] sm:$0xff]  ;;  %5468 = vst.msk [vmem:[#allocation2 + $0x1b0] sm:$0xff] %vm266_vm2, %v4955_v20  ;;  %v1090_v47 = vld [vmem:[#allocation2 + $0x9b8] sm:$0xff]  ;;  %v4956_v32 = vadd.f32 %v11941_v24, %v834_v8 }
 0x3bd   : > { %7648 = vst.msk [vmem:[%s9095_s11 + $0x598] sm:$0xff] %vm266_vm2, %v7136_v50  ;;  %v7392_v51 = vmax.f32 %v6880_v22, 0.0  ;;  %v6625_v3 = vadd.f32 %v11571_v25, %v6109_v63  ;;  %v6237_v2 = vld [vmem:[#allocation2 + $0x9a0] sm:$0xff]  ;;  %v1218_v55 = vld [vmem:[#allocation2 + $0xdb8] sm:$0xff]  ;;  %v12051_v48 = vpop.f32.mrf.mxu1  ;;  %v12055_v22 = vpop.f32.mrf.mxu2  ;;  %v5212_v24 = vadd.f32 %v11947_v16, %v1090_v47  ;;  %v964_v47 = vld [vmem:[#allocation2 + $0x5c8] sm:$0xff] }
 0x3be   : > { %7776 = vst.msk [vmem:[%s9095_s11 + $0x998] sm:$0xff] %vm266_vm2, %v7264_v59  ;;  %v7009_v58 = vmax.f32 %v6497_v44, 0.0  ;;  %v6753_v4 = vadd.f32 %v11571_v25, %v6237_v2  ;;  %v6365_v60 = vld [vmem:[#allocation2 + $0xda0] sm:$0xff]  ;;  %v12009_v12 = vpop.f32.mrf.mxu0  ;;  %v12057_v15 = vpop.f32.mrf.mxu3  ;;  %v1365_v59 = vld [vmem:[%s8863_s8 + $0x250] sm:$0xff]  ;;  %v5340_v63 = vadd.f32 %v11949_v17, %v1218_v55  ;;  %v836_v2 = vld [vmem:[#allocation2 + $0x1c8] sm:$0xff]  ;;  %v5213_v17 = vadd.f32 %v11979_v9, %v1091_v18 }
 0x3bf   : > { %7904 = vst.msk [vmem:[%s9095_s11 + $0xd98] sm:$0xff] %vm266_vm2, %v7392_v51  ;;  %v7137_v19 = vmax.f32 %v6625_v3, 0.0  ;;  %v6881_v7 = vadd.f32 %v11571_v25, %v6365_v60  ;;  %v5982_v37 = vld [vmem:[#allocation2 + $0x1a8] sm:$0xff]  ;;  %v835_v50 = vld [vmem:[#allocation2 + $0x1c0] sm:$0xff]  ;;  %v1493_v44 = vld [vmem:[%s8863_s8 + $0x650] sm:$0xff] }
 0x3c0   : > { %7521 = vst.msk [vmem:[%s9095_s11 + $0x1a0] sm:$0xff] %vm266_vm2, %v7009_v58  ;;  %v7265_v14 = vmax.f32 %v6753_v4, 0.0  ;;  %v6498_v35 = vadd.f32 %v11571_v25, %v5982_v37  ;;  %v6110_v34 = vld [vmem:[#allocation2 + $0x5a8] sm:$0xff]  ;;  %v963_v11 = vld [vmem:[#allocation2 + $0x5c0] sm:$0xff]  ;;  %8305 = vmatmul.msk.f32.gmra.mxu1 %vm1807_vm1, %v1493_v44  ;;  %v1622_v51 = vld [vmem:[%s8863_s8 + $0xa58] sm:$0xff] }
 0x3c1   : > { %7649 = vst.msk [vmem:[%s9095_s11 + $0x5a0] sm:$0xff] %vm266_vm2, %v7137_v19  ;;  %v7393_v29 = vmax.f32 %v6881_v7, 0.0  ;;  %v6626_v54 = vadd.f32 %v11571_v25, %v6110_v34  ;;  %v6238_v56 = vld [vmem:[#allocation2 + $0x9a8] sm:$0xff]  ;;  %8177 = vmatmul.msk.f32.gmra.mxu0 %vm1807_vm1, %v1365_v59  ;;  %v1750_v3 = vld [vmem:[%s8863_s8 + $0xe58] sm:$0xff]  ;;  %v5085_v16 = vadd.f32 %v11975_v31, %v963_v11  ;;  %v4958_v31 = vadd.f32 %v12009_v12, %v836_v2  ;;  %v12085_v19 = vld [vmem:[#allocation5] ss:$0 sm:$0xff] }
 0x3c2   : > { %7777 = vst.msk [vmem:[%s9095_s11 + $0x9a0] sm:$0xff] %vm266_vm2, %v7265_v14  ;;  %v7010_v13 = vmax.f32 %v6498_v35, 0.0  ;;  %v6754_v5 = vadd.f32 %v11571_v25, %v6238_v56  ;;  %v6366_v57 = vld [vmem:[#allocation2 + $0xda8] sm:$0xff]  ;;  %8434 = vmatmul.msk.f32.gmra.mxu2 %vm1807_vm1, %v1622_v51  ;;  %8562 = vmatmul.msk.f32.gmra.mxu3 %vm1807_vm1, %v1750_v3  ;;  %v1366_v34 = vld [vmem:[%s8863_s8 + $0x258] sm:$0xff]  ;;  %v1367_v11 = vld [vmem:[%s8863_s8 + $0x260] sm:$0xff] }
 0x3c3   : > { %7905 = vst.msk [vmem:[%s9095_s11 + $0xda0] sm:$0xff] %vm266_vm2, %v7393_v29  ;;  %v7138_v21 = vmax.f32 %v6626_v54, 0.0  ;;  %v6882_v53 = vadd.f32 %v11571_v25, %v6366_v57  ;;  %v5983_v33 = vld [vmem:[#allocation2 + $0x1b0] sm:$0xff]  ;;  %v1494_v12 = vld [vmem:[%s8863_s8 + $0x658] sm:$0xff]  ;;  %v1623_v57 = vld [vmem:[%s8863_s8 + $0xa60] sm:$0xff] }
 0x3c4   : > { %7522 = vst.msk [vmem:[%s9095_s11 + $0x1a8] sm:$0xff] %vm266_vm2, %v7010_v13  ;;  %v7266_v26 = vmax.f32 %v6754_v5, 0.0  ;;  %v6499_v36 = vadd.f32 %v11571_v25, %v5983_v33  ;;  %v962_v25 = vld [vmem:[#allocation2 + $0x5b8] sm:$0xff]  ;;  %v1495_v59 = vld [vmem:[%s8863_s8 + $0x660] sm:$0xff]  ;;  %v1220_v3 = vld [vmem:[#allocation2 + $0xdc8] sm:$0xff] }
 0x3c5   : > { %7650 = vst.msk [vmem:[%s9095_s11 + $0x5a8] sm:$0xff] %vm266_vm2, %v7138_v21  ;;  %v7394_v49 = vmax.f32 %v6882_v53, 0.0  ;;  %v5084_v61 = vadd.f32 %v11943_v45, %v962_v25  ;;  %v4957_v45 = vadd.f32 %v11973_v30, %v835_v50  ;;  %v5341_v30 = vadd.f32 %v11981_v28, %v1219_v0  ;;  %v12083_v60 = vpop.f32.mrf.mxu1  ;;  %v12089_v37 = vpop.f32.mrf.mxu2  ;;  %v1752_v2 = vld [vmem:[%s8863_s8 + $0xe68] sm:$0xff] }
 0x3c6   : > { %7778 = vst.msk [vmem:[%s9095_s11 + $0x9a8] sm:$0xff] %vm266_vm2, %v7266_v26  ;;  %v7011_v20 = vmax.f32 %v6499_v36, 0.0  ;;  %v12049_v6 = vpop.f32.mrf.mxu0  ;;  %v12091_v28 = vpop.f32.mrf.mxu3 }
 0x3c7   : > { %7906 = vst.msk [vmem:[%s9095_s11 + $0xda8] sm:$0xff] %vm266_vm2, %v7394_v49 }
 0x3c8   : > { %7523 = vst.msk [vmem:[%s9095_s11 + $0x1b0] sm:$0xff] %vm266_vm2, %v7011_v20  ;;  %8306 = vmatmul.msk.f32.gmra.mxu1 %vm1807_vm1, %v1494_v12 }
 0x3c9   : > { %5596 = vst.msk [vmem:[#allocation2 + $0x5b0] sm:$0xff] %vm266_vm2, %v5083_v1  ;;  %8178 = vmatmul.msk.f32.gmra.mxu0 %vm1807_vm1, %v1366_v34  ;;  %v1221_v34 = vld [vmem:[#allocation2 + $0xdd0] sm:$0xff] }
 0x3ca   : > { %5724 = vst.msk [vmem:[#allocation2 + $0x9b0] sm:$0xff] %vm266_vm2, %v5211_v43  ;;  %8435 = vmatmul.msk.f32.gmra.mxu2 %vm1807_vm1, %v1623_v57  ;;  %8563 = vmatmul.msk.f32.gmra.mxu3 %vm1807_vm1, %v1751_v40  ;;  %v5343_v57 = vadd.f32 %v12057_v15, %v1221_v34  ;;  %v1094_v40 = vld [vmem:[#allocation2 + $0x9d8] sm:$0xff] }
 0x3cb   : > { %5852 = vst.msk [vmem:[#allocation2 + $0xdb0] sm:$0xff] %vm266_vm2, %v5339_v46  ;;  %v5216_v15 = vadd.f32 %v12089_v37, %v1094_v40 }
 0x3cc   : > { %5469 = vst.msk [vmem:[#allocation2 + $0x1b8] sm:$0xff] %vm266_vm2, %v4956_v32 }
 0x3cd   : > { %5597 = vst.msk [vmem:[#allocation2 + $0x5b8] sm:$0xff] %vm266_vm2, %v5084_v61  ;;  %v12121_v20 = vpop.f32.mrf.mxu1  ;;  %v12126_v32 = vpop.f32.mrf.mxu2 }
 0x3ce   : > { %5725 = vst.msk [vmem:[#allocation2 + $0x9b8] sm:$0xff] %vm266_vm2, %v5212_v24  ;;  %v12081_v4 = vpop.f32.mrf.mxu0  ;;  %v12128_v55 = vpop.f32.mrf.mxu3 }
 0x3cf   : > { %5853 = vst.msk [vmem:[#allocation2 + $0xdb8] sm:$0xff] %vm266_vm2, %v5340_v63 }
 0x3d0   : > { %v6111_v58 = vld [vmem:[#allocation2 + $0x5b0] sm:$0xff]  ;;  %5470 = vst.msk [vmem:[#allocation2 + $0x1c0] sm:$0xff] %vm266_vm2, %v4957_v45  ;;  %v1092_v45 = vld [vmem:[#allocation2 + $0x9c8] sm:$0xff]  ;;  %8307 = vmatmul.msk.f32.gmra.mxu1 %vm1807_vm1, %v1495_v59 }
 0x3d1   : > { %v6627_v7 = vadd.f32 %v12085_v19, %v6111_v58  ;;  %v6239_v9 = vld [vmem:[#allocation2 + $0x9b0] sm:$0xff]  ;;  %5598 = vst.msk [vmem:[#allocation2 + $0x5c0] sm:$0xff] %vm266_vm2, %v5085_v16  ;;  %8179 = vmatmul.msk.f32.gmra.mxu0 %vm1807_vm1, %v1367_v11  ;;  %v1624_v16 = vld [vmem:[%s8863_s8 + $0xa68] sm:$0xff]  ;;  %v1754_v11 = vld [vmem:[%s8863_s8 + $0xe78] sm:$0xff] }
 0x3d2   : > { %v6755_v14 = vadd.f32 %v12085_v19, %v6239_v9  ;;  %v6367_v35 = vld [vmem:[#allocation2 + $0xdb0] sm:$0xff]  ;;  %5726 = vst.msk [vmem:[#allocation2 + $0x9c0] sm:$0xff] %vm266_vm2, %v5213_v17  ;;  %8436 = vmatmul.msk.f32.gmra.mxu2 %vm1807_vm1, %v1624_v16  ;;  %8564 = vmatmul.msk.f32.gmra.mxu3 %vm1807_vm1, %v1752_v2 }
 0x3d3   : > { %v7139_v29 = vmax.f32 %v6627_v7, 0.0  ;;  %v6883_v54 = vadd.f32 %v12085_v19, %v6367_v35  ;;  %v5984_v56 = vld [vmem:[#allocation2 + $0x1b8] sm:$0xff]  ;;  %5854 = vst.msk [vmem:[#allocation2 + $0xdc0] sm:$0xff] %vm266_vm2, %v5341_v30  ;;  %v5086_v30 = vadd.f32 %v12011_v52, %v964_v47  ;;  %v837_v58 = vld [vmem:[#allocation2 + $0x1d0] sm:$0xff]  ;;  %v5214_v7 = vadd.f32 %v12016_v42, %v1092_v45 }
 0x3d4   : > { %v7267_v39 = vmax.f32 %v6755_v14, 0.0  ;;  %v6500_v13 = vadd.f32 %v12085_v19, %v5984_v56  ;;  %v6112_v5 = vld [vmem:[#allocation2 + $0x5b8] sm:$0xff]  ;;  %5471 = vst.msk [vmem:[#allocation2 + $0x1c8] sm:$0xff] %vm266_vm2, %v4958_v31  ;;  %v965_v9 = vld [vmem:[#allocation2 + $0x5d0] sm:$0xff]  ;;  %v5342_v14 = vadd.f32 %v12018_v23, %v1220_v3  ;;  %v4959_v52 = vadd.f32 %v12049_v6, %v837_v58 }
 0x3d5   : > { %7651 = vst.msk [vmem:[%s9095_s11 + $0x5b0] sm:$0xff] %vm266_vm2, %v7139_v29  ;;  %v7395_v38 = vmax.f32 %v6883_v54, 0.0  ;;  %v6628_v21 = vadd.f32 %v12085_v19, %v6112_v5  ;;  %v6240_v53 = vld [vmem:[#allocation2 + $0x9b8] sm:$0xff]  ;;  %v1093_v35 = vld [vmem:[#allocation2 + $0x9d0] sm:$0xff]  ;;  %v12161_v29 = vpop.f32.mrf.mxu1  ;;  %v5087_v42 = vadd.f32 %v12051_v48, %v965_v9  ;;  %v12165_v56 = vpop.f32.mrf.mxu2  ;;  %v1496_v5 = vld [vmem:[%s8863_s8 + $0x668] sm:$0xff] }
 0x3d6   : > { %7779 = vst.msk [vmem:[%s9095_s11 + $0x9b0] sm:$0xff] %vm266_vm2, %v7267_v39  ;;  %v7012_v33 = vmax.f32 %v6500_v13, 0.0  ;;  %v6756_v27 = vadd.f32 %v12085_v19, %v6240_v53  ;;  %v6368_v26 = vld [vmem:[#allocation2 + $0xdb8] sm:$0xff]  ;;  %v12119_v8 = vpop.f32.mrf.mxu0  ;;  %v12167_v23 = vpop.f32.mrf.mxu3  ;;  %v5215_v6 = vadd.f32 %v12055_v22, %v1093_v35  ;;  %v1368_v13 = vld [vmem:[%s8863_s8 + $0x268] sm:$0xff]  ;;  %v1753_v53 = vld [vmem:[%s8863_s8 + $0xe70] sm:$0xff] }
 0x3d7   : > { %7907 = vst.msk [vmem:[%s9095_s11 + $0xdb0] sm:$0xff] %vm266_vm2, %v7395_v38  ;;  %v7140_v36 = vmax.f32 %v6628_v21, 0.0  ;;  %v6884_v10 = vadd.f32 %v12085_v19, %v6368_v26  ;;  %v5985_v62 = vld [vmem:[#allocation2 + $0x1c0] sm:$0xff]  ;;  %v838_v54 = vld [vmem:[#allocation2 + $0x1d8] sm:$0xff]  ;;  %v1625_v21 = vld [vmem:[%s8863_s8 + $0xa70] sm:$0xff] }
 0x3d8   : > { %7524 = vst.msk [vmem:[%s9095_s11 + $0x1b8] sm:$0xff] %vm266_vm2, %v7012_v33  ;;  %v7268_v41 = vmax.f32 %v6756_v27, 0.0  ;;  %v6501_v49 = vadd.f32 %v12085_v19, %v5985_v62  ;;  %v6113_v1 = vld [vmem:[#allocation2 + $0x5c0] sm:$0xff]  ;;  %v966_v39 = vld [vmem:[#allocation2 + $0x5d8] sm:$0xff]  ;;  %8308 = vmatmul.msk.f32.gmra.mxu1 %vm1807_vm1, %v1496_v5  ;;  %v4960_v48 = vadd.f32 %v12081_v4, %v838_v54 }
 0x3d9   : > { %7652 = vst.msk [vmem:[%s9095_s11 + $0x5b8] sm:$0xff] %vm266_vm2, %v7140_v36  ;;  %v7396_v43 = vmax.f32 %v6884_v10, 0.0  ;;  %v6629_v25 = vadd.f32 %v12085_v19, %v6113_v1  ;;  %v6241_v46 = vld [vmem:[#allocation2 + $0x9c0] sm:$0xff]  ;;  %8180 = vmatmul.msk.f32.gmra.mxu0 %vm1807_vm1, %v1368_v13  ;;  %v1222_v38 = vld [vmem:[#allocation2 + $0xdd8] sm:$0xff]  ;;  %v5088_v22 = vadd.f32 %v12083_v60, %v966_v39  ;;  %v1369_v1 = vld [vmem:[%s8863_s8 + $0x270] sm:$0xff] }
 0x3da   : > { %7780 = vst.msk [vmem:[%s9095_s11 + $0x9b8] sm:$0xff] %vm266_vm2, %v7268_v41  ;;  %v7013_v61 = vmax.f32 %v6501_v49, 0.0  ;;  %v6757_v50 = vadd.f32 %v12085_v19, %v6241_v46  ;;  %v6369_v24 = vld [vmem:[#allocation2 + $0xdc0] sm:$0xff]  ;;  %8437 = vmatmul.msk.f32.gmra.mxu2 %vm1807_vm1, %v1625_v21  ;;  %8565 = vmatmul.msk.f32.gmra.mxu3 %vm1807_vm1, %v1753_v53  ;;  %v5344_v4 = vadd.f32 %v12091_v28, %v1222_v38  ;;  %v1370_v39 = vld [vmem:[%s8863_s8 + $0x278] sm:$0xff] }
 0x3db   : > { %7908 = vst.msk [vmem:[%s9095_s11 + $0xdb8] sm:$0xff] %vm266_vm2, %v7396_v43  ;;  %v7141_v44 = vmax.f32 %v6629_v25, 0.0  ;;  %v6885_v63 = vadd.f32 %v12085_v19, %v6369_v24  ;;  %v5986_v18 = vld [vmem:[#allocation2 + $0x1c8] sm:$0xff]  ;;  %v839_v33 = vld [vmem:[#allocation2 + $0x1e0] sm:$0xff]  ;;  %v1626_v24 = vld [vmem:[%s8863_s8 + $0xa78] sm:$0xff] }
 0x3dc   : > { %7525 = vst.msk [vmem:[%s9095_s11 + $0x1c0] sm:$0xff] %vm266_vm2, %v7013_v61  ;;  %v7269_v0 = vmax.f32 %v6757_v50, 0.0  ;;  %v6502_v51 = vadd.f32 %v12085_v19, %v5986_v18  ;;  %v4961_v60 = vadd.f32 %v12119_v8, %v839_v33  ;;  %v1497_v8 = vld [vmem:[%s8863_s8 + $0x670] sm:$0xff]  ;;  %v967_v35 = vld [vmem:[#allocation2 + $0x5e0] sm:$0xff]  ;;  %v1498_v13 = vld [vmem:[%s8863_s8 + $0x678] sm:$0xff] }
 0x3dd   : > { %7653 = vst.msk [vmem:[%s9095_s11 + $0x5c0] sm:$0xff] %vm266_vm2, %v7141_v44  ;;  %v7397_v17 = vmax.f32 %v6885_v63, 0.0  ;;  %v12193_v36 = vpop.f32.mrf.mxu1  ;;  %v12197_v37 = vpop.f32.mrf.mxu2  ;;  %v1223_v53 = vld [vmem:[#allocation2 + $0xde0] sm:$0xff] }
 0x3de   : > { %7781 = vst.msk [vmem:[%s9095_s11 + $0x9c0] sm:$0xff] %vm266_vm2, %v7269_v0  ;;  %v7014_v31 = vmax.f32 %v6502_v51, 0.0  ;;  %v12159_v12 = vpop.f32.mrf.mxu0  ;;  %v12199_v41 = vpop.f32.mrf.mxu3  ;;  %v1755_v33 = vld [vmem:[%s8863_s8 + $0xe80] sm:$0xff] }
 0x3df   : > { %7909 = vst.msk [vmem:[%s9095_s11 + $0xdc0] sm:$0xff] %vm266_vm2, %v7397_v17 }
 0x3e0   : > { %7526 = vst.msk [vmem:[%s9095_s11 + $0x1c8] sm:$0xff] %vm266_vm2, %v7014_v31  ;;  %8309 = vmatmul.msk.f32.gmra.mxu1 %vm1807_vm1, %v1497_v8 }
 0x3e1   : > { %5599 = vst.msk [vmem:[#allocation2 + $0x5c8] sm:$0xff] %vm266_vm2, %v5086_v30  ;;  %8181 = vmatmul.msk.f32.gmra.mxu0 %vm1807_vm1, %v1369_v1  ;;  %v1224_v1 = vld [vmem:[#allocation2 + $0xde8] sm:$0xff] }
 0x3e2   : > { %5727 = vst.msk [vmem:[#allocation2 + $0x9c8] sm:$0xff] %vm266_vm2, %v5214_v7  ;;  %8438 = vmatmul.msk.f32.gmra.mxu2 %vm1807_vm1, %v1626_v24  ;;  %8566 = vmatmul.msk.f32.gmra.mxu3 %vm1807_vm1, %v1754_v11  ;;  %v5346_v24 = vadd.f32 %v12167_v23, %v1224_v1  ;;  %v1097_v11 = vld [vmem:[#allocation2 + $0x9f0] sm:$0xff] }
 0x3e3   : > { %5855 = vst.msk [vmem:[#allocation2 + $0xdc8] sm:$0xff] %vm266_vm2, %v5342_v14  ;;  %v5219_v23 = vadd.f32 %v12197_v37, %v1097_v11 }
 0x3e4   : > { %5472 = vst.msk [vmem:[#allocation2 + $0x1d0] sm:$0xff] %vm266_vm2, %v4959_v52 }
 0x3e5   : > { %5600 = vst.msk [vmem:[#allocation2 + $0x5d0] sm:$0xff] %vm266_vm2, %v5087_v42  ;;  %v12229_v31 = vpop.f32.mrf.mxu1  ;;  %v12234_v52 = vpop.f32.mrf.mxu2 }
 0x3e6   : > { %5728 = vst.msk [vmem:[#allocation2 + $0x9d0] sm:$0xff] %vm266_vm2, %v5215_v6  ;;  %v12191_v26 = vpop.f32.mrf.mxu0  ;;  %v12236_v34 = vpop.f32.mrf.mxu3 }
 0x3e7   : > { %5856 = vst.msk [vmem:[#allocation2 + $0xdd0] sm:$0xff] %vm266_vm2, %v5343_v57 }
 0x3e8   : > { %v6114_v27 = vld [vmem:[#allocation2 + $0x5c8] sm:$0xff]  ;;  %5473 = vst.msk [vmem:[#allocation2 + $0x1d8] sm:$0xff] %vm266_vm2, %v4960_v48  ;;  %v1095_v48 = vld [vmem:[#allocation2 + $0x9e0] sm:$0xff]  ;;  %8310 = vmatmul.msk.f32.gmra.mxu1 %vm1807_vm1, %v1498_v13 }
 0x3e9   : > { %v6630_v10 = vadd.f32 %v12085_v19, %v6114_v27  ;;  %v6242_v62 = vld [vmem:[#allocation2 + $0x9c8] sm:$0xff]  ;;  %5601 = vst.msk [vmem:[#allocation2 + $0x5d8] sm:$0xff] %vm266_vm2, %v5088_v22  ;;  %8182 = vmatmul.msk.f32.gmra.mxu0 %vm1807_vm1, %v1370_v39  ;;  %v1627_v22 = vld [vmem:[%s8863_s8 + $0xa80] sm:$0xff]  ;;  %v1757_v39 = vld [vmem:[%s8863_s8 + $0xe90] sm:$0xff] }
 0x3ea   : > { %v6758_v28 = vadd.f32 %v12085_v19, %v6242_v62  ;;  %v6370_v49 = vld [vmem:[#allocation2 + $0xdc8] sm:$0xff]  ;;  %5729 = vst.msk [vmem:[#allocation2 + $0x9d8] sm:$0xff] %vm266_vm2, %v5216_v15  ;;  %8439 = vmatmul.msk.f32.gmra.mxu2 %vm1807_vm1, %v1627_v22  ;;  %8567 = vmatmul.msk.f32.gmra.mxu3 %vm1807_vm1, %v1755_v33 }
 0x3eb   : > { %v7142_v43 = vmax.f32 %v6630_v10, 0.0  ;;  %v6886_v25 = vadd.f32 %v12085_v19, %v6370_v49  ;;  %v5987_v46 = vld [vmem:[#allocation2 + $0x1d0] sm:$0xff]  ;;  %5857 = vst.msk [vmem:[#allocation2 + $0xdd8] sm:$0xff] %vm266_vm2, %v5344_v4  ;;  %v5089_v4 = vadd.f32 %v12121_v20, %v967_v35  ;;  %v840_v27 = vld [vmem:[#allocation2 + $0x1e8] sm:$0xff]  ;;  %v5217_v10 = vadd.f32 %v12126_v32, %v1095_v48 }
 0x3ec   : > { %v7270_v47 = vmax.f32 %v6758_v28, 0.0  ;;  %v6503_v61 = vadd.f32 %v12085_v19, %v5987_v46  ;;  %v6115_v50 = vld [vmem:[#allocation2 + $0x5d0] sm:$0xff]  ;;  %5474 = vst.msk [vmem:[#allocation2 + $0x1e0] sm:$0xff] %vm266_vm2, %v4961_v60  ;;  %v968_v62 = vld [vmem:[#allocation2 + $0x5e8] sm:$0xff]  ;;  %v5345_v28 = vadd.f32 %v12128_v55, %v1223_v53  ;;  %v4962_v20 = vadd.f32 %v12159_v12, %v840_v27 }
 0x3ed   : > { %7654 = vst.msk [vmem:[%s9095_s11 + $0x5c8] sm:$0xff] %vm266_vm2, %v7142_v43  ;;  %v7398_v59 = vmax.f32 %v6886_v25, 0.0  ;;  %v6631_v44 = vadd.f32 %v12085_v19, %v6115_v50  ;;  %v6243_v63 = vld [vmem:[#allocation2 + $0x9d0] sm:$0xff]  ;;  %v1096_v49 = vld [vmem:[#allocation2 + $0x9e8] sm:$0xff]  ;;  %v12269_v43 = vpop.f32.mrf.mxu1  ;;  %v5090_v32 = vadd.f32 %v12161_v29, %v968_v62  ;;  %v12273_v46 = vpop.f32.mrf.mxu2  ;;  %v1499_v50 = vld [vmem:[%s8863_s8 + $0x680] sm:$0xff] }
 0x3ee   : > { %7782 = vst.msk [vmem:[%s9095_s11 + $0x9c8] sm:$0xff] %vm266_vm2, %v7270_v47  ;;  %v7015_v18 = vmax.f32 %v6503_v61, 0.0  ;;  %v6759_v45 = vadd.f32 %v12085_v19, %v6243_v63  ;;  %v6371_v0 = vld [vmem:[#allocation2 + $0xdd0] sm:$0xff]  ;;  %v12227_v58 = vpop.f32.mrf.mxu0  ;;  %v12275_v55 = vpop.f32.mrf.mxu3  ;;  %v5218_v12 = vadd.f32 %v12165_v56, %v1096_v49  ;;  %v1371_v61 = vld [vmem:[%s8863_s8 + $0x280] sm:$0xff]  ;;  %v1756_v63 = vld [vmem:[%s8863_s8 + $0xe88] sm:$0xff] }
 0x3ef   : > { %7910 = vst.msk [vmem:[%s9095_s11 + $0xdc8] sm:$0xff] %vm266_vm2, %v7398_v59  ;;  %v7143_v51 = vmax.f32 %v6631_v44, 0.0  ;;  %v6887_v3 = vadd.f32 %v12085_v19, %v6371_v0  ;;  %v5988_v16 = vld [vmem:[#allocation2 + $0x1d8] sm:$0xff]  ;;  %v841_v25 = vld [vmem:[#allocation2 + $0x1f0] sm:$0xff]  ;;  %v1628_v44 = vld [vmem:[%s8863_s8 + $0xa88] sm:$0xff] }
 0x3f0   : > { %7527 = vst.msk [vmem:[%s9095_s11 + $0x1d0] sm:$0xff] %vm266_vm2, %v7015_v18  ;;  %v7271_v2 = vmax.f32 %v6759_v45, 0.0  ;;  %v6504_v17 = vadd.f32 %v12085_v19, %v5988_v16  ;;  %v6116_v30 = vld [vmem:[#allocation2 + $0x5d8] sm:$0xff]  ;;  %v969_v47 = vld [vmem:[#allocation2 + $0x5f0] sm:$0xff]  ;;  %8311 = vmatmul.msk.f32.gmra.mxu1 %vm1807_vm1, %v1499_v50  ;;  %v4963_v29 = vadd.f32 %v12191_v26, %v841_v25 }
 0x3f1   : > { %7655 = vst.msk [vmem:[%s9095_s11 + $0x5d0] sm:$0xff] %vm266_vm2, %v7143_v51  ;;  %v7399_v7 = vmax.f32 %v6887_v3, 0.0  ;;  %v6632_v9 = vadd.f32 %v12085_v19, %v6116_v30  ;;  %v6244_v14 = vld [vmem:[#allocation2 + $0x9d8] sm:$0xff]  ;;  %8183 = vmatmul.msk.f32.gmra.mxu0 %vm1807_vm1, %v1371_v61  ;;  %v1225_v59 = vld [vmem:[#allocation2 + $0xdf0] sm:$0xff]  ;;  %v5091_v56 = vadd.f32 %v12193_v36, %v969_v47  ;;  %v1372_v30 = vld [vmem:[%s8863_s8 + $0x288] sm:$0xff] }
 0x3f2   : > { %7783 = vst.msk [vmem:[%s9095_s11 + $0x9d0] sm:$0xff] %vm266_vm2, %v7271_v2  ;;  %v7016_v42 = vmax.f32 %v6504_v17, 0.0  ;;  %v6760_v54 = vadd.f32 %v12085_v19, %v6244_v14  ;;  %v6372_v6 = vld [vmem:[#allocation2 + $0xdd8] sm:$0xff]  ;;  %8440 = vmatmul.msk.f32.gmra.mxu2 %vm1807_vm1, %v1628_v44  ;;  %8568 = vmatmul.msk.f32.gmra.mxu3 %vm1807_vm1, %v1756_v63  ;;  %v5347_v26 = vadd.f32 %v12199_v41, %v1225_v59  ;;  %v1373_v47 = vld [vmem:[%s8863_s8 + $0x290] sm:$0xff] }
 0x3f3   : > { %7911 = vst.msk [vmem:[%s9095_s11 + $0xdd0] sm:$0xff] %vm266_vm2, %v7399_v7  ;;  %v7144_v5 = vmax.f32 %v6632_v9, 0.0  ;;  %v6888_v57 = vadd.f32 %v12085_v19, %v6372_v6  ;;  %v5989_v40 = vld [vmem:[#allocation2 + $0x1e0] sm:$0xff]  ;;  %v842_v18 = vld [vmem:[#allocation2 + $0x1f8] sm:$0xff]  ;;  %v1629_v6 = vld [vmem:[%s8863_s8 + $0xa90] sm:$0xff] }
 0x3f4   : > { %7528 = vst.msk [vmem:[%s9095_s11 + $0x1d8] sm:$0xff] %vm266_vm2, %v7016_v42  ;;  %v7272_v38 = vmax.f32 %v6760_v54, 0.0  ;;  %v6505_v21 = vadd.f32 %v12085_v19, %v5989_v40  ;;  %v4964_v36 = vadd.f32 %v12227_v58, %v842_v18  ;;  %v1500_v58 = vld [vmem:[%s8863_s8 + $0x688] sm:$0xff]  ;;  %v970_v49 = vld [vmem:[#allocation2 + $0x5f8] sm:$0xff]  ;;  %v1501_v61 = vld [vmem:[%s8863_s8 + $0x690] sm:$0xff] }
 0x3f5   : > { %7656 = vst.msk [vmem:[%s9095_s11 + $0x5d8] sm:$0xff] %vm266_vm2, %v7144_v5  ;;  %v7400_v15 = vmax.f32 %v6888_v57, 0.0  ;;  %v12301_v51 = vpop.f32.mrf.mxu1  ;;  %v12305_v37 = vpop.f32.mrf.mxu2  ;;  %v1226_v63 = vld [vmem:[#allocation2 + $0xdf8] sm:$0xff] }
 0x3f6   : > { %7784 = vst.msk [vmem:[%s9095_s11 + $0x9d8] sm:$0xff] %vm266_vm2, %v7272_v38  ;;  %v7017_v60 = vmax.f32 %v6505_v21, 0.0  ;;  %v12267_v8 = vpop.f32.mrf.mxu0  ;;  %v12307_v2 = vpop.f32.mrf.mxu3  ;;  %v1758_v18 = vld [vmem:[%s8863_s8 + $0xe98] sm:$0xff] }
 0x3f7   : > { %7912 = vst.msk [vmem:[%s9095_s11 + $0xdd8] sm:$0xff] %vm266_vm2, %v7400_v15 }
 0x3f8   : > { %7529 = vst.msk [vmem:[%s9095_s11 + $0x1e0] sm:$0xff] %vm266_vm2, %v7017_v60  ;;  %8312 = vmatmul.msk.f32.gmra.mxu1 %vm1807_vm1, %v1500_v58 }
 0x3f9   : > { %5602 = vst.msk [vmem:[#allocation2 + $0x5e0] sm:$0xff] %vm266_vm2, %v5089_v4  ;;  %8184 = vmatmul.msk.f32.gmra.mxu0 %vm1807_vm1, %v1372_v30  ;;  %v1227_v30 = vld [vmem:[#allocation2 + $0xe00] sm:$0xff] }
 0x3fa   : > { %5730 = vst.msk [vmem:[#allocation2 + $0x9e0] sm:$0xff] %vm266_vm2, %v5217_v10  ;;  %8441 = vmatmul.msk.f32.gmra.mxu2 %vm1807_vm1, %v1629_v6  ;;  %8569 = vmatmul.msk.f32.gmra.mxu3 %vm1807_vm1, %v1757_v39  ;;  %v5349_v6 = vadd.f32 %v12275_v55, %v1227_v30  ;;  %v1100_v39 = vld [vmem:[#allocation2 + $0xa08] sm:$0xff] }
 0x3fb   : > { %5858 = vst.msk [vmem:[#allocation2 + $0xde0] sm:$0xff] %vm266_vm2, %v5345_v28  ;;  %v5222_v55 = vadd.f32 %v12305_v37, %v1100_v39 }
 0x3fc   : > { %5475 = vst.msk [vmem:[#allocation2 + $0x1e8] sm:$0xff] %vm266_vm2, %v4962_v20 }
 0x3fd   : > { %5603 = vst.msk [vmem:[#allocation2 + $0x5e8] sm:$0xff] %vm266_vm2, %v5090_v32  ;;  %v12337_v60 = vpop.f32.mrf.mxu1  ;;  %v12342_v20 = vpop.f32.mrf.mxu2 }
 0x3fe   : > { %5731 = vst.msk [vmem:[#allocation2 + $0x9e8] sm:$0xff] %vm266_vm2, %v5218_v12  ;;  %v12299_v0 = vpop.f32.mrf.mxu0  ;;  %v12344_v1 = vpop.f32.mrf.mxu3 }
 0x3ff   : > { %5859 = vst.msk [vmem:[#allocation2 + $0xde8] sm:$0xff] %vm266_vm2, %v5346_v24 }
 0x400   : > { %v6117_v45 = vld [vmem:[#allocation2 + $0x5e0] sm:$0xff]  ;;  %5476 = vst.msk [vmem:[#allocation2 + $0x1f0] sm:$0xff] %vm266_vm2, %v4963_v29  ;;  %v1098_v29 = vld [vmem:[#allocation2 + $0x9f8] sm:$0xff]  ;;  %8313 = vmatmul.msk.f32.gmra.mxu1 %vm1807_vm1, %v1501_v61 }
 0x401   : > { %v6633_v3 = vadd.f32 %v12085_v19, %v6117_v45  ;;  %v6245_v16 = vld [vmem:[#allocation2 + $0x9e0] sm:$0xff]  ;;  %5604 = vst.msk [vmem:[#allocation2 + $0x5f0] sm:$0xff] %vm266_vm2, %v5091_v56  ;;  %8185 = vmatmul.msk.f32.gmra.mxu0 %vm1807_vm1, %v1373_v47  ;;  %v1630_v56 = vld [vmem:[%s8863_s8 + $0xa98] sm:$0xff]  ;;  %v1760_v47 = vld [vmem:[%s8863_s8 + $0xea8] sm:$0xff] }
 0x402   : > { %v6761_v41 = vadd.f32 %v12085_v19, %v6245_v16  ;;  %v6373_v17 = vld [vmem:[#allocation2 + $0xde0] sm:$0xff]  ;;  %5732 = vst.msk [vmem:[#allocation2 + $0x9f0] sm:$0xff] %vm266_vm2, %v5219_v23  ;;  %8442 = vmatmul.msk.f32.gmra.mxu2 %vm1807_vm1, %v1630_v56  ;;  %8570 = vmatmul.msk.f32.gmra.mxu3 %vm1807_vm1, %v1758_v18 }
 0x403   : > { %v7145_v7 = vmax.f32 %v6633_v3, 0.0  ;;  %v6889_v9 = vadd.f32 %v12085_v19, %v6373_v17  ;;  %v5990_v14 = vld [vmem:[#allocation2 + $0x1e8] sm:$0xff]  ;;  %5860 = vst.msk [vmem:[#allocation2 + $0xdf0] sm:$0xff] %vm266_vm2, %v5347_v26  ;;  %v5092_v26 = vadd.f32 %v12229_v31, %v970_v49  ;;  %v843_v45 = vld [vmem:[#allocation2 + $0x200] sm:$0xff]  ;;  %v5220_v3 = vadd.f32 %v12234_v52, %v1098_v29 }
 0x404   : > { %v7273_v35 = vmax.f32 %v6761_v41, 0.0  ;;  %v6506_v42 = vadd.f32 %v12085_v19, %v5990_v14  ;;  %v6118_v54 = vld [vmem:[#allocation2 + $0x5e8] sm:$0xff]  ;;  %5477 = vst.msk [vmem:[#allocation2 + $0x1f8] sm:$0xff] %vm266_vm2, %v4964_v36  ;;  %v971_v16 = vld [vmem:[#allocation2 + $0x600] sm:$0xff]  ;;  %v5348_v41 = vadd.f32 %v12236_v34, %v1226_v63  ;;  %v4965_v31 = vadd.f32 %v12267_v8, %v843_v45 }
 0x405   : > { %7657 = vst.msk [vmem:[%s9095_s11 + $0x5e0] sm:$0xff] %vm266_vm2, %v7145_v7  ;;  %v7401_v13 = vmax.f32 %v6889_v9, 0.0  ;;  %v6634_v5 = vadd.f32 %v12085_v19, %v6118_v54  ;;  %v6246_v57 = vld [vmem:[#allocation2 + $0x9e8] sm:$0xff]  ;;  %v1099_v17 = vld [vmem:[#allocation2 + $0xa00] sm:$0xff]  ;;  %v12377_v7 = vpop.f32.mrf.mxu1  ;;  %v5093_v52 = vadd.f32 %v12269_v43, %v971_v16  ;;  %v12381_v14 = vpop.f32.mrf.mxu2  ;;  %v1502_v54 = vld [vmem:[%s8863_s8 + $0x698] sm:$0xff] }
 0x406   : > { %7785 = vst.msk [vmem:[%s9095_s11 + $0x9e0] sm:$0xff] %vm266_vm2, %v7273_v35  ;;  %v7018_v40 = vmax.f32 %v6506_v42, 0.0  ;;  %v6762_v48 = vadd.f32 %v12085_v19, %v6246_v57  ;;  %v6374_v38 = vld [vmem:[#allocation2 + $0xde8] sm:$0xff]  ;;  %v12335_v27 = vpop.f32.mrf.mxu0  ;;  %v12383_v34 = vpop.f32.mrf.mxu3  ;;  %v5221_v8 = vadd.f32 %v12273_v46, %v1099_v17  ;;  %v1374_v42 = vld [vmem:[%s8863_s8 + $0x298] sm:$0xff]  ;;  %v1759_v57 = vld [vmem:[%s8863_s8 + $0xea0] sm:$0xff] }
 0x407   : > { %7913 = vst.msk [vmem:[%s9095_s11 + $0xde0] sm:$0xff] %vm266_vm2, %v7401_v13  ;;  %v7146_v21 = vmax.f32 %v6634_v5, 0.0  ;;  %v6890_v53 = vadd.f32 %v12085_v19, %v6374_v38  ;;  %v5991_v22 = vld [vmem:[#allocation2 + $0x1f0] sm:$0xff]  ;;  %v844_v9 = vld [vmem:[#allocation2 + $0x208] sm:$0xff]  ;;  %v1631_v5 = vld [vmem:[%s8863_s8 + $0xaa0] sm:$0xff] }
 0x408   : > { %7530 = vst.msk [vmem:[%s9095_s11 + $0x1e8] sm:$0xff] %vm266_vm2, %v7018_v40  ;;  %v7274_v33 = vmax.f32 %v6762_v48, 0.0  ;;  %v6507_v15 = vadd.f32 %v12085_v19, %v5991_v22  ;;  %v6119_v4 = vld [vmem:[#allocation2 + $0x5f0] sm:$0xff]  ;;  %v972_v35 = vld [vmem:[#allocation2 + $0x608] sm:$0xff]  ;;  %8314 = vmatmul.msk.f32.gmra.mxu1 %vm1807_vm1, %v1502_v54  ;;  %v4966_v43 = vadd.f32 %v12299_v0, %v844_v9 }
 0x409   : > { %7658 = vst.msk [vmem:[%s9095_s11 + $0x5e8] sm:$0xff] %vm266_vm2, %v7146_v21  ;;  %v7402_v10 = vmax.f32 %v6890_v53, 0.0  ;;  %v6635_v62 = vadd.f32 %v12085_v19, %v6119_v4  ;;  %v6247_v28 = vld [vmem:[#allocation2 + $0x9f0] sm:$0xff]  ;;  %8186 = vmatmul.msk.f32.gmra.mxu0 %vm1807_vm1, %v1374_v42  ;;  %v1228_v13 = vld [vmem:[#allocation2 + $0xe08] sm:$0xff]  ;;  %v5094_v46 = vadd.f32 %v12301_v51, %v972_v35  ;;  %v1375_v4 = vld [vmem:[%s8863_s8 + $0x2a0] sm:$0xff] }
 0x40a   : > { %7786 = vst.msk [vmem:[%s9095_s11 + $0x9e8] sm:$0xff] %vm266_vm2, %v7274_v33  ;;  %v7019_v32 = vmax.f32 %v6507_v15, 0.0  ;;  %v6763_v25 = vadd.f32 %v12085_v19, %v6247_v28  ;;  %v6375_v12 = vld [vmem:[#allocation2 + $0xdf0] sm:$0xff]  ;;  %8443 = vmatmul.msk.f32.gmra.mxu2 %vm1807_vm1, %v1631_v5  ;;  %8571 = vmatmul.msk.f32.gmra.mxu3 %vm1807_vm1, %v1759_v57  ;;  %v5350_v0 = vadd.f32 %v12307_v2, %v1228_v13  ;;  %v1376_v35 = vld [vmem:[%s8863_s8 + $0x2a8] sm:$0xff] }
 0x40b   : > { %7914 = vst.msk [vmem:[%s9095_s11 + $0xde8] sm:$0xff] %vm266_vm2, %v7402_v10  ;;  %v7147_v50 = vmax.f32 %v6635_v62, 0.0  ;;  %v6891_v24 = vadd.f32 %v12085_v19, %v6375_v12  ;;  %v5992_v11 = vld [vmem:[#allocation2 + $0x1f8] sm:$0xff]  ;;  %v845_v40 = vld [vmem:[#allocation2 + $0x210] sm:$0xff]  ;;  %v1632_v12 = vld [vmem:[%s8863_s8 + $0xaa8] sm:$0xff] }
 0x40c   : > { %7531 = vst.msk [vmem:[%s9095_s11 + $0x1f0] sm:$0xff] %vm266_vm2, %v7019_v32  ;;  %v7275_v59 = vmax.f32 %v6763_v25, 0.0  ;;  %v6508_v44 = vadd.f32 %v12085_v19, %v5992_v11  ;;  %v4967_v51 = vadd.f32 %v12335_v27, %v845_v40  ;;  %v1503_v27 = vld [vmem:[%s8863_s8 + $0x6a0] sm:$0xff]  ;;  %v973_v17 = vld [vmem:[#allocation2 + $0x610] sm:$0xff]  ;;  %v1504_v42 = vld [vmem:[%s8863_s8 + $0x6a8] sm:$0xff] }
 0x40d   : > { %7659 = vst.msk [vmem:[%s9095_s11 + $0x5f0] sm:$0xff] %vm266_vm2, %v7147_v50  ;;  %v7403_v23 = vmax.f32 %v6891_v24, 0.0  ;;  %v12409_v21 = vpop.f32.mrf.mxu1  ;;  %v12413_v37 = vpop.f32.mrf.mxu2  ;;  %v1229_v57 = vld [vmem:[#allocation2 + $0xe10] sm:$0xff] }
 0x40e   : > { %7787 = vst.msk [vmem:[%s9095_s11 + $0x9f0] sm:$0xff] %vm266_vm2, %v7275_v59  ;;  %v7020_v36 = vmax.f32 %v6508_v44, 0.0  ;;  %v12375_v58 = vpop.f32.mrf.mxu0  ;;  %v12415_v33 = vpop.f32.mrf.mxu3  ;;  %v1761_v40 = vld [vmem:[%s8863_s8 + $0xeb0] sm:$0xff] }
 0x40f   : > { %7915 = vst.msk [vmem:[%s9095_s11 + $0xdf0] sm:$0xff] %vm266_vm2, %v7403_v23 }
 0x410   : > { %7532 = vst.msk [vmem:[%s9095_s11 + $0x1f8] sm:$0xff] %vm266_vm2, %v7020_v36  ;;  %8315 = vmatmul.msk.f32.gmra.mxu1 %vm1807_vm1, %v1503_v27 }
 0x411   : > { %5605 = vst.msk [vmem:[#allocation2 + $0x5f8] sm:$0xff] %vm266_vm2, %v5092_v26  ;;  %8187 = vmatmul.msk.f32.gmra.mxu0 %vm1807_vm1, %v1375_v4  ;;  %v1230_v4 = vld [vmem:[#allocation2 + $0xe18] sm:$0xff] }
 0x412   : > { %5733 = vst.msk [vmem:[#allocation2 + $0x9f8] sm:$0xff] %vm266_vm2, %v5220_v3  ;;  %8444 = vmatmul.msk.f32.gmra.mxu2 %vm1807_vm1, %v1632_v12  ;;  %8572 = vmatmul.msk.f32.gmra.mxu3 %vm1807_vm1, %v1760_v47  ;;  %v5352_v12 = vadd.f32 %v12383_v34, %v1230_v4  ;;  %v1103_v47 = vld [vmem:[#allocation2 + $0xa20] sm:$0xff] }
 0x413   : > { %5861 = vst.msk [vmem:[#allocation2 + $0xdf8] sm:$0xff] %vm266_vm2, %v5348_v41  ;;  %v5225_v34 = vadd.f32 %v12413_v37, %v1103_v47 }
 0x414   : > { %5478 = vst.msk [vmem:[#allocation2 + $0x200] sm:$0xff] %vm266_vm2, %v4965_v31 }
 0x415   : > { %5606 = vst.msk [vmem:[#allocation2 + $0x600] sm:$0xff] %vm266_vm2, %v5093_v52  ;;  %v12445_v36 = vpop.f32.mrf.mxu1  ;;  %v12450_v31 = vpop.f32.mrf.mxu2 }
 0x416   : > { %5734 = vst.msk [vmem:[#allocation2 + $0xa00] sm:$0xff] %vm266_vm2, %v5221_v8  ;;  %v12407_v38 = vpop.f32.mrf.mxu0  ;;  %v12452_v30 = vpop.f32.mrf.mxu3 }
 0x417   : > { %5862 = vst.msk [vmem:[#allocation2 + $0xe00] sm:$0xff] %vm266_vm2, %v5349_v6 }
 0x418   : > { %v6120_v48 = vld [vmem:[#allocation2 + $0x5f8] sm:$0xff]  ;;  %5479 = vst.msk [vmem:[#allocation2 + $0x208] sm:$0xff] %vm266_vm2, %v4966_v43  ;;  %v1101_v43 = vld [vmem:[#allocation2 + $0xa10] sm:$0xff]  ;;  %8316 = vmatmul.msk.f32.gmra.mxu1 %vm1807_vm1, %v1504_v42 }
 0x419   : > { %v6636_v53 = vadd.f32 %v12085_v19, %v6120_v48  ;;  %v6248_v22 = vld [vmem:[#allocation2 + $0x9f8] sm:$0xff]  ;;  %5607 = vst.msk [vmem:[#allocation2 + $0x608] sm:$0xff] %vm266_vm2, %v5094_v46  ;;  %8188 = vmatmul.msk.f32.gmra.mxu0 %vm1807_vm1, %v1376_v35  ;;  %v1633_v46 = vld [vmem:[%s8863_s8 + $0xab0] sm:$0xff]  ;;  %v1763_v35 = vld [vmem:[%s8863_s8 + $0xec0] sm:$0xff] }
 0x41a   : > { %v6764_v2 = vadd.f32 %v12085_v19, %v6248_v22  ;;  %v6376_v15 = vld [vmem:[#allocation2 + $0xdf8] sm:$0xff]  ;;  %5735 = vst.msk [vmem:[#allocation2 + $0xa08] sm:$0xff] %vm266_vm2, %v5222_v55  ;;  %8445 = vmatmul.msk.f32.gmra.mxu2 %vm1807_vm1, %v1633_v46  ;;  %8573 = vmatmul.msk.f32.gmra.mxu3 %vm1807_vm1, %v1761_v40 }
 0x41b   : > { %v7148_v10 = vmax.f32 %v6636_v53, 0.0  ;;  %v6892_v62 = vadd.f32 %v12085_v19, %v6376_v15  ;;  %v5993_v28 = vld [vmem:[#allocation2 + $0x200] sm:$0xff]  ;;  %5863 = vst.msk [vmem:[#allocation2 + $0xe08] sm:$0xff] %vm266_vm2, %v5350_v0  ;;  %v5095_v0 = vadd.f32 %v12337_v60, %v973_v17  ;;  %v846_v48 = vld [vmem:[#allocation2 + $0x218] sm:$0xff]  ;;  %v5223_v53 = vadd.f32 %v12342_v20, %v1101_v43 }
 0x41c   : > { %v7276_v49 = vmax.f32 %v6764_v2, 0.0  ;;  %v6509_v32 = vadd.f32 %v12085_v19, %v5993_v28  ;;  %v6121_v25 = vld [vmem:[#allocation2 + $0x600] sm:$0xff]  ;;  %5480 = vst.msk [vmem:[#allocation2 + $0x210] sm:$0xff] %vm266_vm2, %v4967_v51  ;;  %v974_v22 = vld [vmem:[#allocation2 + $0x618] sm:$0xff]  ;;  %v5351_v2 = vadd.f32 %v12344_v1, %v1229_v57  ;;  %v4968_v60 = vadd.f32 %v12375_v58, %v846_v48 }
 0x41d   : > { %7660 = vst.msk [vmem:[%s9095_s11 + $0x5f8] sm:$0xff] %vm266_vm2, %v7148_v10  ;;  %v7404_v61 = vmax.f32 %v6892_v62, 0.0  ;;  %v6637_v50 = vadd.f32 %v12085_v19, %v6121_v25  ;;  %v6249_v24 = vld [vmem:[#allocation2 + $0xa00] sm:$0xff]  ;;  %v1102_v15 = vld [vmem:[#allocation2 + $0xa18] sm:$0xff]  ;;  %v12485_v10 = vpop.f32.mrf.mxu1  ;;  %v5096_v20 = vadd.f32 %v12377_v7, %v974_v22  ;;  %v12489_v28 = vpop.f32.mrf.mxu2  ;;  %v1505_v25 = vld [vmem:[%s8863_s8 + $0x6b0] sm:$0xff] }
 0x41e   : > { %7788 = vst.msk [vmem:[%s9095_s11 + $0x9f8] sm:$0xff] %vm266_vm2, %v7276_v49  ;;  %v7021_v11 = vmax.f32 %v6509_v32, 0.0  ;;  %v6765_v29 = vadd.f32 %v12085_v19, %v6249_v24  ;;  %v6377_v59 = vld [vmem:[#allocation2 + $0xe00] sm:$0xff]  ;;  %v12443_v45 = vpop.f32.mrf.mxu0  ;;  %v12491_v1 = vpop.f32.mrf.mxu3  ;;  %v5224_v58 = vadd.f32 %v12381_v14, %v1102_v15  ;;  %v1377_v32 = vld [vmem:[%s8863_s8 + $0x2b0] sm:$0xff]  ;;  %v1762_v24 = vld [vmem:[%s8863_s8 + $0xeb8] sm:$0xff] }
 0x41f   : > { %7916 = vst.msk [vmem:[%s9095_s11 + $0xdf8] sm:$0xff] %vm266_vm2, %v7404_v61  ;;  %v7149_v44 = vmax.f32 %v6637_v50, 0.0  ;;  %v6893_v63 = vadd.f32 %v12085_v19, %v6377_v59  ;;  %v5994_v56 = vld [vmem:[#allocation2 + $0x208] sm:$0xff]  ;;  %v847_v62 = vld [vmem:[#allocation2 + $0x220] sm:$0xff]  ;;  %v1634_v50 = vld [vmem:[%s8863_s8 + $0xab8] sm:$0xff] }
 0x420   : > { %7533 = vst.msk [vmem:[%s9095_s11 + $0x200] sm:$0xff] %vm266_vm2, %v7021_v11  ;;  %v7277_v18 = vmax.f32 %v6765_v29, 0.0  ;;  %v6510_v23 = vadd.f32 %v12085_v19, %v5994_v56  ;;  %v6122_v26 = vld [vmem:[#allocation2 + $0x608] sm:$0xff]  ;;  %v975_v49 = vld [vmem:[#allocation2 + $0x620] sm:$0xff]  ;;  %8317 = vmatmul.msk.f32.gmra.mxu1 %vm1807_vm1, %v1505_v25  ;;  %v4969_v7 = vadd.f32 %v12407_v38, %v847_v62 }
 0x421   : > { %7661 = vst.msk [vmem:[%s9095_s11 + $0x600] sm:$0xff] %vm266_vm2, %v7149_v44  ;;  %v7405_v3 = vmax.f32 %v6893_v63, 0.0  ;;  %v6638_v16 = vadd.f32 %v12085_v19, %v6122_v26  ;;  %v6250_v41 = vld [vmem:[#allocation2 + $0xa08] sm:$0xff]  ;;  %8189 = vmatmul.msk.f32.gmra.mxu0 %vm1807_vm1, %v1377_v32  ;;  %v1231_v61 = vld [vmem:[#allocation2 + $0xe20] sm:$0xff]  ;;  %v5097_v14 = vadd.f32 %v12409_v21, %v975_v49  ;;  %v1378_v26 = vld [vmem:[%s8863_s8 + $0x2b8] sm:$0xff] }
 0x422   : > { %7789 = vst.msk [vmem:[%s9095_s11 + $0xa00] sm:$0xff] %vm266_vm2, %v7277_v18  ;;  %v7022_v52 = vmax.f32 %v6510_v23, 0.0  ;;  %v6766_v9 = vadd.f32 %v12085_v19, %v6250_v41  ;;  %v6378_v8 = vld [vmem:[#allocation2 + $0xe08] sm:$0xff]  ;;  %8446 = vmatmul.msk.f32.gmra.mxu2 %vm1807_vm1, %v1634_v50  ;;  %8574 = vmatmul.msk.f32.gmra.mxu3 %vm1807_vm1, %v1762_v24  ;;  %v5353_v38 = vadd.f32 %v12415_v33, %v1231_v61  ;;  %v12547_v57 = vld [vmem:[#allocation5] ss:$0 sm:$0xff] }
 0x423   : > { %7917 = vst.msk [vmem:[%s9095_s11 + $0xe00] sm:$0xff] %vm266_vm2, %v7405_v3  ;;  %v7150_v54 = vmax.f32 %v6638_v16, 0.0  ;;  %v6894_v6 = vadd.f32 %v12085_v19, %v6378_v8  ;;  %v5995_v39 = vld [vmem:[#allocation2 + $0x210] sm:$0xff]  ;;  %v848_v11 = vld [vmem:[#allocation2 + $0x228] sm:$0xff]  ;;  %v1635_v8 = vld [vmem:[%s8863_s8 + $0xac0] sm:$0xff] }
 0x424   : > { %7534 = vst.msk [vmem:[%s9095_s11 + $0x208] sm:$0xff] %vm266_vm2, %v7022_v52  ;;  %v7278_v13 = vmax.f32 %v6766_v9, 0.0  ;;  %v6511_v5 = vadd.f32 %v12085_v19, %v5995_v39  ;;  %v4970_v21 = vadd.f32 %v12443_v45, %v848_v11  ;;  %v1506_v45 = vld [vmem:[%s8863_s8 + $0x6b8] sm:$0xff]  ;;  %v976_v15 = vld [vmem:[#allocation2 + $0x628] sm:$0xff]  ;;  %v1379_v49 = vld [vmem:[%s8863_s8 + $0x2c0] sm:$0xff] }
 0x425   : > { %7662 = vst.msk [vmem:[%s9095_s11 + $0x608] sm:$0xff] %vm266_vm2, %v7150_v54  ;;  %v7406_v55 = vmax.f32 %v6894_v6, 0.0  ;;  %v12517_v44 = vpop.f32.mrf.mxu1  ;;  %v12521_v37 = vpop.f32.mrf.mxu2  ;;  %v1507_v32 = vld [vmem:[%s8863_s8 + $0x6c0] sm:$0xff]  ;;  %v1232_v24 = vld [vmem:[#allocation2 + $0xe28] sm:$0xff] }
 0x426   : > { %7790 = vst.msk [vmem:[%s9095_s11 + $0xa08] sm:$0xff] %vm266_vm2, %v7278_v13  ;;  %v7023_v51 = vmax.f32 %v6511_v5, 0.0  ;;  %v12483_v27 = vpop.f32.mrf.mxu0  ;;  %v12523_v18 = vpop.f32.mrf.mxu3  ;;  %v1764_v11 = vld [vmem:[%s8863_s8 + $0xec8] sm:$0xff] }
 0x427   : > { %7918 = vst.msk [vmem:[%s9095_s11 + $0xe08] sm:$0xff] %vm266_vm2, %v7406_v55 }
 0x428   : > { %7535 = vst.msk [vmem:[%s9095_s11 + $0x210] sm:$0xff] %vm266_vm2, %v7023_v51  ;;  %8318 = vmatmul.msk.f32.gmra.mxu1 %vm1807_vm1, %v1506_v45 }
 0x429   : > { %5608 = vst.msk [vmem:[#allocation2 + $0x610] sm:$0xff] %vm266_vm2, %v5095_v0  ;;  %8190 = vmatmul.msk.f32.gmra.mxu0 %vm1807_vm1, %v1378_v26  ;;  %v1233_v26 = vld [vmem:[#allocation2 + $0xe30] sm:$0xff] }
 0x42a   : > { %5736 = vst.msk [vmem:[#allocation2 + $0xa10] sm:$0xff] %vm266_vm2, %v5223_v53  ;;  %8447 = vmatmul.msk.f32.gmra.mxu2 %vm1807_vm1, %v1635_v8  ;;  %8575 = vmatmul.msk.f32.gmra.mxu3 %vm1807_vm1, %v1763_v35  ;;  %v5355_v8 = vadd.f32 %v12491_v1, %v1233_v26  ;;  %v1106_v35 = vld [vmem:[#allocation2 + $0xa38] sm:$0xff] }
 0x42b   : > { %5864 = vst.msk [vmem:[#allocation2 + $0xe10] sm:$0xff] %vm266_vm2, %v5351_v2  ;;  %v5228_v1 = vadd.f32 %v12521_v37, %v1106_v35 }
 0x42c   : > { %5481 = vst.msk [vmem:[#allocation2 + $0x218] sm:$0xff] %vm266_vm2, %v4968_v60 }
 0x42d   : > { %5609 = vst.msk [vmem:[#allocation2 + $0x618] sm:$0xff] %vm266_vm2, %v5096_v20  ;;  %v12555_v51 = vpop.f32.mrf.mxu1  ;;  %v12560_v60 = vpop.f32.mrf.mxu2 }
 0x42e   : > { %5737 = vst.msk [vmem:[#allocation2 + $0xa18] sm:$0xff] %vm266_vm2, %v5224_v58  ;;  %v12515_v59 = vpop.f32.mrf.mxu0  ;;  %v12562_v4 = vpop.f32.mrf.mxu3 }
 0x42f   : > { %5865 = vst.msk [vmem:[#allocation2 + $0xe18] sm:$0xff] %vm266_vm2, %v5352_v12 }
 0x430   : > { %v6123_v29 = vld [vmem:[#allocation2 + $0x610] sm:$0xff]  ;;  %5482 = vst.msk [vmem:[#allocation2 + $0x220] sm:$0xff] %vm266_vm2, %v4969_v7  ;;  %v1104_v7 = vld [vmem:[#allocation2 + $0xa28] sm:$0xff]  ;;  %8319 = vmatmul.msk.f32.gmra.mxu1 %vm1807_vm1, %v1507_v32 }
 0x431   : > { %v6639_v63 = vadd.f32 %v12085_v19, %v6123_v29  ;;  %v6251_v56 = vld [vmem:[#allocation2 + $0xa10] sm:$0xff]  ;;  %5610 = vst.msk [vmem:[#allocation2 + $0x620] sm:$0xff] %vm266_vm2, %v5097_v14  ;;  %8191 = vmatmul.msk.f32.gmra.mxu0 %vm1807_vm1, %v1379_v49  ;;  %v1636_v14 = vld [vmem:[%s8863_s8 + $0xac8] sm:$0xff]  ;;  %v1766_v49 = vld [vmem:[%s8863_s8 + $0xed8] sm:$0xff] }
 0x432   : > { %v6767_v33 = vadd.f32 %v12085_v19, %v6251_v56  ;;  %v6379_v23 = vld [vmem:[#allocation2 + $0xe10] sm:$0xff]  ;;  %5738 = vst.msk [vmem:[#allocation2 + $0xa20] sm:$0xff] %vm266_vm2, %v5225_v34  ;;  %8448 = vmatmul.msk.f32.gmra.mxu2 %vm1807_vm1, %v1636_v14  ;;  %8576 = vmatmul.msk.f32.gmra.mxu3 %vm1807_vm1, %v1764_v11 }
 0x433   : > { %v7151_v3 = vmax.f32 %v6639_v63, 0.0  ;;  %v6895_v16 = vadd.f32 %v12085_v19, %v6379_v23  ;;  %v5996_v41 = vld [vmem:[#allocation2 + $0x218] sm:$0xff]  ;;  %5866 = vst.msk [vmem:[#allocation2 + $0xe20] sm:$0xff] %vm266_vm2, %v5353_v38  ;;  %v5098_v38 = vadd.f32 %v12445_v36, %v976_v15  ;;  %v849_v29 = vld [vmem:[#allocation2 + $0x230] sm:$0xff]  ;;  %v5226_v63 = vadd.f32 %v12450_v31, %v1104_v7 }
 0x434   : > { %v7279_v17 = vmax.f32 %v6767_v33, 0.0  ;;  %v6512_v52 = vadd.f32 %v12085_v19, %v5996_v41  ;;  %v6124_v9 = vld [vmem:[#allocation2 + $0x618] sm:$0xff]  ;;  %5483 = vst.msk [vmem:[#allocation2 + $0x228] sm:$0xff] %vm266_vm2, %v4970_v21  ;;  %v977_v56 = vld [vmem:[#allocation2 + $0x630] sm:$0xff]  ;;  %v5354_v33 = vadd.f32 %v12452_v30, %v1232_v24  ;;  %v4971_v36 = vadd.f32 %v12483_v27, %v849_v29 }
 0x435   : > { %7663 = vst.msk [vmem:[%s9095_s11 + $0x610] sm:$0xff] %vm266_vm2, %v7151_v3  ;;  %v7407_v42 = vmax.f32 %v6895_v16, 0.0  ;;  %v6640_v54 = vadd.f32 %v12085_v19, %v6124_v9  ;;  %v6252_v6 = vld [vmem:[#allocation2 + $0xa18] sm:$0xff]  ;;  %v1105_v23 = vld [vmem:[#allocation2 + $0xa30] sm:$0xff]  ;;  %v12595_v3 = vpop.f32.mrf.mxu1  ;;  %v5099_v31 = vadd.f32 %v12485_v10, %v977_v56  ;;  %v12599_v41 = vpop.f32.mrf.mxu2  ;;  %v1508_v9 = vld [vmem:[%s8863_s8 + $0x6c8] sm:$0xff] }
 0x436   : > { %7791 = vst.msk [vmem:[%s9095_s11 + $0xa10] sm:$0xff] %vm266_vm2, %v7279_v17  ;;  %v7024_v39 = vmax.f32 %v6512_v52, 0.0  ;;  %v6768_v43 = vadd.f32 %v12085_v19, %v6252_v6  ;;  %v6380_v13 = vld [vmem:[#allocation2 + $0xe18] sm:$0xff]  ;;  %v12553_v19 = vpop.f32.mrf.mxu0  ;;  %v12601_v30 = vpop.f32.mrf.mxu3  ;;  %v5227_v27 = vadd.f32 %v12489_v28, %v1105_v23  ;;  %v1380_v52 = vld [vmem:[%s8863_s8 + $0x2c8] sm:$0xff]  ;;  %v1765_v6 = vld [vmem:[%s8863_s8 + $0xed0] sm:$0xff] }
 0x437   : > { %7919 = vst.msk [vmem:[%s9095_s11 + $0xe10] sm:$0xff] %vm266_vm2, %v7407_v42  ;;  %v7152_v5 = vmax.f32 %v6640_v54, 0.0  ;;  %v6896_v46 = vadd.f32 %v12547_v57, %v6380_v13  ;;  %v5997_v40 = vld [vmem:[#allocation2 + $0x220] sm:$0xff]  ;;  %v850_v16 = vld [vmem:[#allocation2 + $0x238] sm:$0xff]  ;;  %v1637_v54 = vld [vmem:[%s8863_s8 + $0xad0] sm:$0xff] }
 0x438   : > { %7536 = vst.msk [vmem:[%s9095_s11 + $0x218] sm:$0xff] %vm266_vm2, %v7024_v39  ;;  %v7280_v55 = vmax.f32 %v6768_v43, 0.0  ;;  %v6513_v0 = vadd.f32 %v12547_v57, %v5997_v40  ;;  %v6125_v48 = vld [vmem:[#allocation2 + $0x620] sm:$0xff]  ;;  %v978_v17 = vld [vmem:[#allocation2 + $0x638] sm:$0xff]  ;;  %8320 = vmatmul.msk.f32.gmra.mxu1 %vm1807_vm1, %v1508_v9  ;;  %v4972_v10 = vadd.f32 %v12515_v59, %v850_v16 }
 0x439   : > { %7664 = vst.msk [vmem:[%s9095_s11 + $0x618] sm:$0xff] %vm266_vm2, %v7152_v5  ;;  %v7408_v53 = vmax.f32 %v6896_v46, 0.0  ;;  %v6641_v22 = vadd.f32 %v12547_v57, %v6125_v48  ;;  %v6253_v2 = vld [vmem:[#allocation2 + $0xa20] sm:$0xff]  ;;  %8192 = vmatmul.msk.f32.gmra.mxu0 %vm1807_vm1, %v1380_v52  ;;  %v1234_v42 = vld [vmem:[#allocation2 + $0xe38] sm:$0xff]  ;;  %v5100_v28 = vadd.f32 %v12517_v44, %v978_v17  ;;  %v1381_v48 = vld [vmem:[%s8863_s8 + $0x2d0] sm:$0xff] }
 0x43a   : > { %7792 = vst.msk [vmem:[%s9095_s11 + $0xa18] sm:$0xff] %vm266_vm2, %v7280_v55  ;;  %v7025_v20 = vmax.f32 %v6513_v0, 0.0  ;;  %v6769_v62 = vadd.f32 %v12547_v57, %v6253_v2  ;;  %v6381_v58 = vld [vmem:[#allocation2 + $0xe20] sm:$0xff]  ;;  %8449 = vmatmul.msk.f32.gmra.mxu2 %vm1807_vm1, %v1637_v54  ;;  %8577 = vmatmul.msk.f32.gmra.mxu3 %vm1807_vm1, %v1765_v6  ;;  %v5356_v59 = vadd.f32 %v12523_v18, %v1234_v42  ;;  %v1382_v17 = vld [vmem:[%s8863_s8 + $0x2d8] sm:$0xff] }
 0x43b   : > { %7920 = vst.msk [vmem:[%s9095_s11 + $0xe18] sm:$0xff] %vm266_vm2, %v7408_v53  ;;  %v7153_v25 = vmax.f32 %v6641_v22, 0.0  ;;  %v6897_v12 = vadd.f32 %v12547_v57, %v6381_v58  ;;  %v5998_v47 = vld [vmem:[#allocation2 + $0x228] sm:$0xff]  ;;  %v851_v39 = vld [vmem:[#allocation2 + $0x240] sm:$0xff]  ;;  %v1638_v58 = vld [vmem:[%s8863_s8 + $0xad8] sm:$0xff] }
 0x43c   : > { %7537 = vst.msk [vmem:[%s9095_s11 + $0x220] sm:$0xff] %vm266_vm2, %v7025_v20  ;;  %v7281_v61 = vmax.f32 %v6769_v62, 0.0  ;;  %v6514_v50 = vadd.f32 %v12547_v57, %v5998_v47  ;;  %v4973_v44 = vadd.f32 %v12553_v19, %v851_v39  ;;  %v1509_v19 = vld [vmem:[%s8863_s8 + $0x6d0] sm:$0xff]  ;;  %v979_v23 = vld [vmem:[#allocation2 + $0x640] sm:$0xff]  ;;  %v1510_v52 = vld [vmem:[%s8863_s8 + $0x6d8] sm:$0xff] }
 0x43d   : > { %7665 = vst.msk [vmem:[%s9095_s11 + $0x620] sm:$0xff] %vm266_vm2, %v7153_v25  ;;  %v7409_v34 = vmax.f32 %v6897_v12, 0.0  ;;  %v12627_v5 = vpop.f32.mrf.mxu1  ;;  %v12631_v37 = vpop.f32.mrf.mxu2  ;;  %v1235_v6 = vld [vmem:[#allocation2 + $0xe40] sm:$0xff] }
 0x43e   : > { %7793 = vst.msk [vmem:[%s9095_s11 + $0xa20] sm:$0xff] %vm266_vm2, %v7281_v61  ;;  %v7026_v21 = vmax.f32 %v6514_v50, 0.0  ;;  %v12593_v45 = vpop.f32.mrf.mxu0  ;;  %v12633_v55 = vpop.f32.mrf.mxu3  ;;  %v1767_v39 = vld [vmem:[%s8863_s8 + $0xee0] sm:$0xff] }
 0x43f   : > { %7921 = vst.msk [vmem:[%s9095_s11 + $0xe20] sm:$0xff] %vm266_vm2, %v7409_v34 }
 0x440   : > { %7538 = vst.msk [vmem:[%s9095_s11 + $0x228] sm:$0xff] %vm266_vm2, %v7026_v21  ;;  %8321 = vmatmul.msk.f32.gmra.mxu1 %vm1807_vm1, %v1509_v19 }
 0x441   : > { %5611 = vst.msk [vmem:[#allocation2 + $0x628] sm:$0xff] %vm266_vm2, %v5098_v38  ;;  %8193 = vmatmul.msk.f32.gmra.mxu0 %vm1807_vm1, %v1381_v48  ;;  %v1236_v48 = vld [vmem:[#allocation2 + $0xe48] sm:$0xff] }
 0x442   : > { %5739 = vst.msk [vmem:[#allocation2 + $0xa28] sm:$0xff] %vm266_vm2, %v5226_v63  ;;  %8450 = vmatmul.msk.f32.gmra.mxu2 %vm1807_vm1, %v1638_v58  ;;  %8578 = vmatmul.msk.f32.gmra.mxu3 %vm1807_vm1, %v1766_v49  ;;  %v5358_v58 = vadd.f32 %v12601_v30, %v1236_v48  ;;  %v1109_v49 = vld [vmem:[#allocation2 + $0xa50] sm:$0xff] }
 0x443   : > { %5867 = vst.msk [vmem:[#allocation2 + $0xe28] sm:$0xff] %vm266_vm2, %v5354_v33  ;;  %v5231_v30 = vadd.f32 %v12631_v37, %v1109_v49 }
 0x444   : > { %5484 = vst.msk [vmem:[#allocation2 + $0x230] sm:$0xff] %vm266_vm2, %v4971_v36 }
 0x445   : > { %5612 = vst.msk [vmem:[#allocation2 + $0x630] sm:$0xff] %vm266_vm2, %v5099_v31  ;;  %v12663_v21 = vpop.f32.mrf.mxu1  ;;  %v12668_v36 = vpop.f32.mrf.mxu2 }
 0x446   : > { %5740 = vst.msk [vmem:[#allocation2 + $0xa30] sm:$0xff] %vm266_vm2, %v5227_v27  ;;  %v12625_v13 = vpop.f32.mrf.mxu0  ;;  %v12670_v26 = vpop.f32.mrf.mxu3 }
 0x447   : > { %5868 = vst.msk [vmem:[#allocation2 + $0xe30] sm:$0xff] %vm266_vm2, %v5355_v8 }
 0x448   : > { %v6126_v43 = vld [vmem:[#allocation2 + $0x628] sm:$0xff]  ;;  %5485 = vst.msk [vmem:[#allocation2 + $0x238] sm:$0xff] %vm266_vm2, %v4972_v10  ;;  %v1107_v10 = vld [vmem:[#allocation2 + $0xa40] sm:$0xff]  ;;  %8322 = vmatmul.msk.f32.gmra.mxu1 %vm1807_vm1, %v1510_v52 }
 0x449   : > { %v6642_v46 = vadd.f32 %v12547_v57, %v6126_v43  ;;  %v6254_v40 = vld [vmem:[#allocation2 + $0xa28] sm:$0xff]  ;;  %5613 = vst.msk [vmem:[#allocation2 + $0x638] sm:$0xff] %vm266_vm2, %v5100_v28  ;;  %8194 = vmatmul.msk.f32.gmra.mxu0 %vm1807_vm1, %v1382_v17  ;;  %v1639_v28 = vld [vmem:[%s8863_s8 + $0xae0] sm:$0xff]  ;;  %v1769_v17 = vld [vmem:[%s8863_s8 + $0xef0] sm:$0xff] }
 0x44a   : > { %v6770_v18 = vadd.f32 %v12547_v57, %v6254_v40  ;;  %v6382_v0 = vld [vmem:[#allocation2 + $0xe28] sm:$0xff]  ;;  %5741 = vst.msk [vmem:[#allocation2 + $0xa38] sm:$0xff] %vm266_vm2, %v5228_v1  ;;  %8451 = vmatmul.msk.f32.gmra.mxu2 %vm1807_vm1, %v1639_v28  ;;  %8579 = vmatmul.msk.f32.gmra.mxu3 %vm1807_vm1, %v1767_v39 }
 0x44b   : > { %v7154_v53 = vmax.f32 %v6642_v46, 0.0  ;;  %v6898_v22 = vadd.f32 %v12547_v57, %v6382_v0  ;;  %v5999_v2 = vld [vmem:[#allocation2 + $0x230] sm:$0xff]  ;;  %5869 = vst.msk [vmem:[#allocation2 + $0xe38] sm:$0xff] %vm266_vm2, %v5356_v59  ;;  %v5101_v59 = vadd.f32 %v12555_v51, %v979_v23  ;;  %v852_v43 = vld [vmem:[#allocation2 + $0x248] sm:$0xff]  ;;  %v5229_v46 = vadd.f32 %v12560_v60, %v1107_v10 }
 0x44c   : > { %v7282_v15 = vmax.f32 %v6770_v18, 0.0  ;;  %v6515_v20 = vadd.f32 %v12547_v57, %v5999_v2  ;;  %v6127_v62 = vld [vmem:[#allocation2 + $0x630] sm:$0xff]  ;;  %5486 = vst.msk [vmem:[#allocation2 + $0x240] sm:$0xff] %vm266_vm2, %v4973_v44  ;;  %v980_v40 = vld [vmem:[#allocation2 + $0x648] sm:$0xff]  ;;  %v5357_v18 = vadd.f32 %v12562_v4, %v1235_v6  ;;  %v4974_v51 = vadd.f32 %v12593_v45, %v852_v43 }
 0x44d   : > { %7666 = vst.msk [vmem:[%s9095_s11 + $0x628] sm:$0xff] %vm266_vm2, %v7154_v53  ;;  %v7410_v32 = vmax.f32 %v6898_v22, 0.0  ;;  %v6643_v25 = vadd.f32 %v12547_v57, %v6127_v62  ;;  %v6255_v12 = vld [vmem:[#allocation2 + $0xa30] sm:$0xff]  ;;  %v1108_v0 = vld [vmem:[#allocation2 + $0xa48] sm:$0xff]  ;;  %v12703_v53 = vpop.f32.mrf.mxu1  ;;  %v5102_v60 = vadd.f32 %v12595_v3, %v980_v40  ;;  %v12707_v2 = vpop.f32.mrf.mxu2  ;;  %v1511_v62 = vld [vmem:[%s8863_s8 + $0x6e0] sm:$0xff] }
 0x44e   : > { %7794 = vst.msk [vmem:[%s9095_s11 + $0xa28] sm:$0xff] %vm266_vm2, %v7282_v15  ;;  %v7027_v47 = vmax.f32 %v6515_v20, 0.0  ;;  %v6771_v7 = vadd.f32 %v12547_v57, %v6255_v12  ;;  %v6383_v61 = vld [vmem:[#allocation2 + $0xe30] sm:$0xff]  ;;  %v12661_v29 = vpop.f32.mrf.mxu0  ;;  %v12709_v4 = vpop.f32.mrf.mxu3  ;;  %v5230_v45 = vadd.f32 %v12599_v41, %v1108_v0  ;;  %v1383_v20 = vld [vmem:[%s8863_s8 + $0x2e0] sm:$0xff]  ;;  %v1768_v12 = vld [vmem:[%s8863_s8 + $0xee8] sm:$0xff] }
 0x44f   : > { %7922 = vst.msk [vmem:[%s9095_s11 + $0xe28] sm:$0xff] %vm266_vm2, %v7410_v32  ;;  %v7155_v50 = vmax.f32 %v6643_v25, 0.0  ;;  %v6899_v24 = vadd.f32 %v12547_v57, %v6383_v61  ;;  %v6000_v14 = vld [vmem:[#allocation2 + $0x238] sm:$0xff]  ;;  %v853_v22 = vld [vmem:[#allocation2 + $0x250] sm:$0xff]  ;;  %v1640_v25 = vld [vmem:[%s8863_s8 + $0xae8] sm:$0xff] }
 0x450   : > { %7539 = vst.msk [vmem:[%s9095_s11 + $0x230] sm:$0xff] %vm266_vm2, %v7027_v47  ;;  %v7283_v11 = vmax.f32 %v6771_v7, 0.0  ;;  %v6516_v34 = vadd.f32 %v12547_v57, %v6000_v14  ;;  %v6128_v38 = vld [vmem:[#allocation2 + $0x638] sm:$0xff]  ;;  %v981_v15 = vld [vmem:[#allocation2 + $0x650] sm:$0xff]  ;;  %8323 = vmatmul.msk.f32.gmra.mxu1 %vm1807_vm1, %v1511_v62  ;;  %v4975_v3 = vadd.f32 %v12625_v13, %v853_v22 }
 0x451   : > { %7667 = vst.msk [vmem:[%s9095_s11 + $0x630] sm:$0xff] %vm266_vm2, %v7155_v50  ;;  %v7411_v63 = vmax.f32 %v6899_v24, 0.0  ;;  %v6644_v56 = vadd.f32 %v12547_v57, %v6128_v38  ;;  %v6256_v33 = vld [vmem:[#allocation2 + $0xa38] sm:$0xff]  ;;  %8195 = vmatmul.msk.f32.gmra.mxu0 %vm1807_vm1, %v1383_v20  ;;  %v1237_v32 = vld [vmem:[#allocation2 + $0xe50] sm:$0xff]  ;;  %v5103_v41 = vadd.f32 %v12627_v5, %v981_v15  ;;  %v1384_v38 = vld [vmem:[%s8863_s8 + $0x2e8] sm:$0xff] }
 0x452   : > { %7795 = vst.msk [vmem:[%s9095_s11 + $0xa30] sm:$0xff] %vm266_vm2, %v7283_v11  ;;  %v7028_v31 = vmax.f32 %v6516_v34, 0.0  ;;  %v6772_v16 = vadd.f32 %v12547_v57, %v6256_v33  ;;  %v6384_v27 = vld [vmem:[#allocation2 + $0xe38] sm:$0xff]  ;;  %8452 = vmatmul.msk.f32.gmra.mxu2 %vm1807_vm1, %v1640_v25  ;;  %8580 = vmatmul.msk.f32.gmra.mxu3 %vm1807_vm1, %v1768_v12  ;;  %v5359_v13 = vadd.f32 %v12633_v55, %v1237_v32  ;;  %v1385_v15 = vld [vmem:[%s8863_s8 + $0x2f0] sm:$0xff] }
 0x453   : > { %7923 = vst.msk [vmem:[%s9095_s11 + $0xe30] sm:$0xff] %vm266_vm2, %v7411_v63  ;;  %v7156_v9 = vmax.f32 %v6644_v56, 0.0  ;;  %v6900_v8 = vadd.f32 %v12547_v57, %v6384_v27  ;;  %v6001_v35 = vld [vmem:[#allocation2 + $0x240] sm:$0xff]  ;;  %v854_v47 = vld [vmem:[#allocation2 + $0x258] sm:$0xff]  ;;  %v1641_v27 = vld [vmem:[%s8863_s8 + $0xaf0] sm:$0xff] }
 0x454   : > { %7540 = vst.msk [vmem:[%s9095_s11 + $0x238] sm:$0xff] %vm266_vm2, %v7028_v31  ;;  %v7284_v42 = vmax.f32 %v6772_v16, 0.0  ;;  %v6517_v54 = vadd.f32 %v12547_v57, %v6001_v35  ;;  %v4976_v5 = vadd.f32 %v12661_v29, %v854_v47  ;;  %v1512_v29 = vld [vmem:[%s8863_s8 + $0x6e8] sm:$0xff]  ;;  %v982_v0 = vld [vmem:[#allocation2 + $0x658] sm:$0xff]  ;;  %v1513_v20 = vld [vmem:[%s8863_s8 + $0x6f0] sm:$0xff] }
 0x455   : > { %7668 = vst.msk [vmem:[%s9095_s11 + $0x638] sm:$0xff] %vm266_vm2, %v7156_v9  ;;  %v7412_v1 = vmax.f32 %v6900_v8, 0.0  ;;  %v12735_v50 = vpop.f32.mrf.mxu1  ;;  %v12739_v37 = vpop.f32.mrf.mxu2  ;;  %v1238_v12 = vld [vmem:[#allocation2 + $0xe58] sm:$0xff] }
 0x456   : > { %7796 = vst.msk [vmem:[%s9095_s11 + $0xa38] sm:$0xff] %vm266_vm2, %v7284_v42  ;;  %v7029_v44 = vmax.f32 %v6517_v54, 0.0  ;;  %v12701_v19 = vpop.f32.mrf.mxu0  ;;  %v12741_v11 = vpop.f32.mrf.mxu3  ;;  %v1770_v47 = vld [vmem:[%s8863_s8 + $0xef8] sm:$0xff] }
 0x457   : > { %7924 = vst.msk [vmem:[%s9095_s11 + $0xe38] sm:$0xff] %vm266_vm2, %v7412_v1 }
 0x458   : > { %7541 = vst.msk [vmem:[%s9095_s11 + $0x240] sm:$0xff] %vm266_vm2, %v7029_v44  ;;  %8324 = vmatmul.msk.f32.gmra.mxu1 %vm1807_vm1, %v1512_v29 }
 0x459   : > { %5614 = vst.msk [vmem:[#allocation2 + $0x640] sm:$0xff] %vm266_vm2, %v5101_v59  ;;  %8196 = vmatmul.msk.f32.gmra.mxu0 %vm1807_vm1, %v1384_v38  ;;  %v1239_v38 = vld [vmem:[#allocation2 + $0xe60] sm:$0xff] }
 0x45a   : > { %5742 = vst.msk [vmem:[#allocation2 + $0xa40] sm:$0xff] %vm266_vm2, %v5229_v46  ;;  %8453 = vmatmul.msk.f32.gmra.mxu2 %vm1807_vm1, %v1641_v27  ;;  %8581 = vmatmul.msk.f32.gmra.mxu3 %vm1807_vm1, %v1769_v17  ;;  %v5361_v27 = vadd.f32 %v12709_v4, %v1239_v38  ;;  %v1112_v17 = vld [vmem:[#allocation2 + $0xa68] sm:$0xff] }
 0x45b   : > { %5870 = vst.msk [vmem:[#allocation2 + $0xe40] sm:$0xff] %vm266_vm2, %v5357_v18  ;;  %v5234_v4 = vadd.f32 %v12739_v37, %v1112_v17 }
 0x45c   : > { %5487 = vst.msk [vmem:[#allocation2 + $0x248] sm:$0xff] %vm266_vm2, %v4974_v51 }
 0x45d   : > { %5615 = vst.msk [vmem:[#allocation2 + $0x648] sm:$0xff] %vm266_vm2, %v5102_v60  ;;  %v12771_v44 = vpop.f32.mrf.mxu1  ;;  %v12776_v51 = vpop.f32.mrf.mxu2 }
 0x45e   : > { %5743 = vst.msk [vmem:[#allocation2 + $0xa48] sm:$0xff] %vm266_vm2, %v5230_v45  ;;  %v12733_v61 = vpop.f32.mrf.mxu0  ;;  %v12778_v48 = vpop.f32.mrf.mxu3 }
 0x45f   : > { %5871 = vst.msk [vmem:[#allocation2 + $0xe48] sm:$0xff] %vm266_vm2, %v5358_v58 }
 0x460   : > { %v6129_v7 = vld [vmem:[#allocation2 + $0x640] sm:$0xff]  ;;  %5488 = vst.msk [vmem:[#allocation2 + $0x250] sm:$0xff] %vm266_vm2, %v4975_v3  ;;  %v1110_v3 = vld [vmem:[#allocation2 + $0xa58] sm:$0xff]  ;;  %8325 = vmatmul.msk.f32.gmra.mxu1 %vm1807_vm1, %v1513_v20 }
 0x461   : > { %v6645_v24 = vadd.f32 %v12547_v57, %v6129_v7  ;;  %v6257_v14 = vld [vmem:[#allocation2 + $0xa40] sm:$0xff]  ;;  %5616 = vst.msk [vmem:[#allocation2 + $0x650] sm:$0xff] %vm266_vm2, %v5103_v41  ;;  %8197 = vmatmul.msk.f32.gmra.mxu0 %vm1807_vm1, %v1385_v15  ;;  %v1642_v41 = vld [vmem:[%s8863_s8 + $0xaf8] sm:$0xff]  ;;  %v1772_v15 = vld [vmem:[%s8863_s8 + $0xf08] sm:$0xff] }
 0x462   : > { %v6773_v55 = vadd.f32 %v12547_v57, %v6257_v14  ;;  %v6385_v34 = vld [vmem:[#allocation2 + $0xe40] sm:$0xff]  ;;  %5744 = vst.msk [vmem:[#allocation2 + $0xa50] sm:$0xff] %vm266_vm2, %v5231_v30  ;;  %8454 = vmatmul.msk.f32.gmra.mxu2 %vm1807_vm1, %v1642_v41  ;;  %8582 = vmatmul.msk.f32.gmra.mxu3 %vm1807_vm1, %v1770_v47 }
 0x463   : > { %v7157_v63 = vmax.f32 %v6645_v24, 0.0  ;;  %v6901_v56 = vadd.f32 %v12547_v57, %v6385_v34  ;;  %v6002_v33 = vld [vmem:[#allocation2 + $0x248] sm:$0xff]  ;;  %5872 = vst.msk [vmem:[#allocation2 + $0xe50] sm:$0xff] %vm266_vm2, %v5359_v13  ;;  %v5104_v13 = vadd.f32 %v12663_v21, %v982_v0  ;;  %v855_v7 = vld [vmem:[#allocation2 + $0x260] sm:$0xff]  ;;  %v5232_v24 = vadd.f32 %v12668_v36, %v1110_v3 }
 0x464   : > { %v7285_v23 = vmax.f32 %v6773_v55, 0.0  ;;  %v6518_v31 = vadd.f32 %v12547_v57, %v6002_v33  ;;  %v6130_v16 = vld [vmem:[#allocation2 + $0x648] sm:$0xff]  ;;  %5489 = vst.msk [vmem:[#allocation2 + $0x258] sm:$0xff] %vm266_vm2, %v4976_v5  ;;  %v983_v14 = vld [vmem:[#allocation2 + $0x660] sm:$0xff]  ;;  %v5360_v55 = vadd.f32 %v12670_v26, %v1238_v12  ;;  %v4977_v21 = vadd.f32 %v12701_v19, %v855_v7 }
 0x465   : > { %7669 = vst.msk [vmem:[%s9095_s11 + $0x640] sm:$0xff] %vm266_vm2, %v7157_v63  ;;  %v7413_v52 = vmax.f32 %v6901_v56, 0.0  ;;  %v6646_v9 = vadd.f32 %v12547_v57, %v6130_v16  ;;  %v6258_v8 = vld [vmem:[#allocation2 + $0xa48] sm:$0xff]  ;;  %v1111_v34 = vld [vmem:[#allocation2 + $0xa60] sm:$0xff]  ;;  %v12811_v63 = vpop.f32.mrf.mxu1  ;;  %v5105_v36 = vadd.f32 %v12703_v53, %v983_v14  ;;  %v12815_v33 = vpop.f32.mrf.mxu2  ;;  %v1514_v16 = vld [vmem:[%s8863_s8 + $0x6f8] sm:$0xff] }
 0x466   : > { %7797 = vst.msk [vmem:[%s9095_s11 + $0xa40] sm:$0xff] %vm266_vm2, %v7285_v23  ;;  %v7030_v35 = vmax.f32 %v6518_v31, 0.0  ;;  %v6774_v10 = vadd.f32 %v12547_v57, %v6258_v8  ;;  %v6386_v42 = vld [vmem:[#allocation2 + $0xe48] sm:$0xff]  ;;  %v12769_v43 = vpop.f32.mrf.mxu0  ;;  %v12817_v26 = vpop.f32.mrf.mxu3  ;;  %v5233_v19 = vadd.f32 %v12707_v2, %v1111_v34  ;;  %v1386_v31 = vld [vmem:[%s8863_s8 + $0x2f8] sm:$0xff]  ;;  %v1771_v8 = vld [vmem:[%s8863_s8 + $0xf00] sm:$0xff] }
 0x467   : > { %7925 = vst.msk [vmem:[%s9095_s11 + $0xe40] sm:$0xff] %vm266_vm2, %v7413_v52  ;;  %v7158_v54 = vmax.f32 %v6646_v9, 0.0  ;;  %v6902_v6 = vadd.f32 %v12547_v57, %v6386_v42  ;;  %v6003_v28 = vld [vmem:[#allocation2 + $0x250] sm:$0xff]  ;;  %v856_v56 = vld [vmem:[#allocation2 + $0x268] sm:$0xff]  ;;  %v1643_v9 = vld [vmem:[%s8863_s8 + $0xb00] sm:$0xff] }
 0x468   : > { %7542 = vst.msk [vmem:[%s9095_s11 + $0x248] sm:$0xff] %vm266_vm2, %v7030_v35  ;;  %v7286_v39 = vmax.f32 %v6774_v10, 0.0  ;;  %v6519_v1 = vadd.f32 %v12547_v57, %v6003_v28  ;;  %v6131_v59 = vld [vmem:[#allocation2 + $0x650] sm:$0xff]  ;;  %v984_v23 = vld [vmem:[#allocation2 + $0x668] sm:$0xff]  ;;  %8326 = vmatmul.msk.f32.gmra.mxu1 %vm1807_vm1, %v1514_v16  ;;  %v4978_v53 = vadd.f32 %v12733_v61, %v856_v56 }
 0x469   : > { %7670 = vst.msk [vmem:[%s9095_s11 + $0x648] sm:$0xff] %vm266_vm2, %v7158_v54  ;;  %v7414_v46 = vmax.f32 %v6902_v6, 0.0  ;;  %v6647_v40 = vadd.f32 %v12547_v57, %v6131_v59  ;;  %v6259_v18 = vld [vmem:[#allocation2 + $0xa50] sm:$0xff]  ;;  %8198 = vmatmul.msk.f32.gmra.mxu0 %vm1807_vm1, %v1386_v31  ;;  %v1240_v52 = vld [vmem:[#allocation2 + $0xe68] sm:$0xff]  ;;  %v5106_v2 = vadd.f32 %v12735_v50, %v984_v23  ;;  %v1387_v59 = vld [vmem:[%s8863_s8 + $0x300] sm:$0xff] }
 0x46a   : > { %7798 = vst.msk [vmem:[%s9095_s11 + $0xa48] sm:$0xff] %vm266_vm2, %v7286_v39  ;;  %v7031_v60 = vmax.f32 %v6519_v1, 0.0  ;;  %v6775_v22 = vadd.f32 %v12547_v57, %v6259_v18  ;;  %v6387_v45 = vld [vmem:[#allocation2 + $0xe50] sm:$0xff]  ;;  %8455 = vmatmul.msk.f32.gmra.mxu2 %vm1807_vm1, %v1643_v9  ;;  %8583 = vmatmul.msk.f32.gmra.mxu3 %vm1807_vm1, %v1771_v8  ;;  %v5362_v61 = vadd.f32 %v12741_v11, %v1240_v52  ;;  %v1388_v23 = vld [vmem:[%s8863_s8 + $0x308] sm:$0xff] }
 0x46b   : > { %7926 = vst.msk [vmem:[%s9095_s11 + $0xe48] sm:$0xff] %vm266_vm2, %v7414_v46  ;;  %v7159_v62 = vmax.f32 %v6647_v40, 0.0  ;;  %v6903_v58 = vadd.f32 %v12547_v57, %v6387_v45  ;;  %v6004_v49 = vld [vmem:[#allocation2 + $0x258] sm:$0xff]  ;;  %v857_v35 = vld [vmem:[#allocation2 + $0x270] sm:$0xff]  ;;  %v1644_v45 = vld [vmem:[%s8863_s8 + $0xb08] sm:$0xff] }
 0x46c   : > { %7543 = vst.msk [vmem:[%s9095_s11 + $0x250] sm:$0xff] %vm266_vm2, %v7031_v60  ;;  %v7287_v32 = vmax.f32 %v6775_v22, 0.0  ;;  %v6520_v25 = vadd.f32 %v12547_v57, %v6004_v49  ;;  %v4979_v50 = vadd.f32 %v12769_v43, %v857_v35  ;;  %v1515_v43 = vld [vmem:[%s8863_s8 + $0x700] sm:$0xff]  ;;  %v985_v34 = vld [vmem:[#allocation2 + $0x670] sm:$0xff]  ;;  %v1516_v31 = vld [vmem:[%s8863_s8 + $0x708] sm:$0xff] }
 0x46d   : > { %7671 = vst.msk [vmem:[%s9095_s11 + $0x650] sm:$0xff] %vm266_vm2, %v7159_v62  ;;  %v7415_v30 = vmax.f32 %v6903_v58, 0.0  ;;  %v12843_v54 = vpop.f32.mrf.mxu1  ;;  %v12847_v37 = vpop.f32.mrf.mxu2  ;;  %v1241_v8 = vld [vmem:[#allocation2 + $0xe70] sm:$0xff] }
 0x46e   : > { %7799 = vst.msk [vmem:[%s9095_s11 + $0xa50] sm:$0xff] %vm266_vm2, %v7287_v32  ;;  %v7032_v5 = vmax.f32 %v6520_v25, 0.0  ;;  %v12809_v29 = vpop.f32.mrf.mxu0  ;;  %v12849_v39 = vpop.f32.mrf.mxu3  ;;  %v1773_v35 = vld [vmem:[%s8863_s8 + $0xf10] sm:$0xff] }
 0x46f   : > { %7927 = vst.msk [vmem:[%s9095_s11 + $0xe50] sm:$0xff] %vm266_vm2, %v7415_v30 }
 0x470   : > { %7544 = vst.msk [vmem:[%s9095_s11 + $0x258] sm:$0xff] %vm266_vm2, %v7032_v5  ;;  %8327 = vmatmul.msk.f32.gmra.mxu1 %vm1807_vm1, %v1515_v43 }
 0x471   : > { %5617 = vst.msk [vmem:[#allocation2 + $0x658] sm:$0xff] %vm266_vm2, %v5104_v13  ;;  %8199 = vmatmul.msk.f32.gmra.mxu0 %vm1807_vm1, %v1387_v59  ;;  %v1242_v59 = vld [vmem:[#allocation2 + $0xe78] sm:$0xff] }
 0x472   : > { %5745 = vst.msk [vmem:[#allocation2 + $0xa58] sm:$0xff] %vm266_vm2, %v5232_v24  ;;  %8456 = vmatmul.msk.f32.gmra.mxu2 %vm1807_vm1, %v1644_v45  ;;  %8584 = vmatmul.msk.f32.gmra.mxu3 %vm1807_vm1, %v1772_v15  ;;  %v5364_v45 = vadd.f32 %v12817_v26, %v1242_v59  ;;  %v1115_v15 = vld [vmem:[#allocation2 + $0xa80] sm:$0xff] }
 0x473   : > { %5873 = vst.msk [vmem:[#allocation2 + $0xe58] sm:$0xff] %vm266_vm2, %v5360_v55  ;;  %v5237_v26 = vadd.f32 %v12847_v37, %v1115_v15 }
 0x474   : > { %5490 = vst.msk [vmem:[#allocation2 + $0x260] sm:$0xff] %vm266_vm2, %v4977_v21 }
 0x475   : > { %5618 = vst.msk [vmem:[#allocation2 + $0x660] sm:$0xff] %vm266_vm2, %v5105_v36  ;;  %v12879_v5 = vpop.f32.mrf.mxu1  ;;  %v12884_v21 = vpop.f32.mrf.mxu2 }
 0x476   : > { %5746 = vst.msk [vmem:[#allocation2 + $0xa60] sm:$0xff] %vm266_vm2, %v5233_v19  ;;  %v12841_v42 = vpop.f32.mrf.mxu0  ;;  %v12886_v38 = vpop.f32.mrf.mxu3 }
 0x477   : > { %5874 = vst.msk [vmem:[#allocation2 + $0xe60] sm:$0xff] %vm266_vm2, %v5361_v27 }
 0x478   : > { %v6132_v10 = vld [vmem:[#allocation2 + $0x658] sm:$0xff]  ;;  %5491 = vst.msk [vmem:[#allocation2 + $0x268] sm:$0xff] %vm266_vm2, %v4978_v53  ;;  %v1113_v53 = vld [vmem:[#allocation2 + $0xa70] sm:$0xff]  ;;  %8328 = vmatmul.msk.f32.gmra.mxu1 %vm1807_vm1, %v1516_v31 }
 0x479   : > { %v6648_v6 = vadd.f32 %v12547_v57, %v6132_v10  ;;  %v6260_v28 = vld [vmem:[#allocation2 + $0xa58] sm:$0xff]  ;;  %5619 = vst.msk [vmem:[#allocation2 + $0x668] sm:$0xff] %vm266_vm2, %v5106_v2  ;;  %8200 = vmatmul.msk.f32.gmra.mxu0 %vm1807_vm1, %v1388_v23  ;;  %v1645_v2 = vld [vmem:[%s8863_s8 + $0xb10] sm:$0xff]  ;;  %v1775_v23 = vld [vmem:[%s8863_s8 + $0xf20] sm:$0xff] }
 0x47a   : > { %v6776_v11 = vadd.f32 %v12547_v57, %v6260_v28  ;;  %v6388_v1 = vld [vmem:[#allocation2 + $0xe58] sm:$0xff]  ;;  %5747 = vst.msk [vmem:[#allocation2 + $0xa68] sm:$0xff] %vm266_vm2, %v5234_v4  ;;  %8457 = vmatmul.msk.f32.gmra.mxu2 %vm1807_vm1, %v1645_v2  ;;  %8585 = vmatmul.msk.f32.gmra.mxu3 %vm1807_vm1, %v1773_v35 }
 0x47b   : > { %v7160_v46 = vmax.f32 %v6648_v6, 0.0  ;;  %v6904_v40 = vadd.f32 %v12547_v57, %v6388_v1  ;;  %v6005_v18 = vld [vmem:[#allocation2 + $0x260] sm:$0xff]  ;;  %5875 = vst.msk [vmem:[#allocation2 + $0xe68] sm:$0xff] %vm266_vm2, %v5362_v61  ;;  %v5107_v61 = vadd.f32 %v12771_v44, %v985_v34  ;;  %v858_v10 = vld [vmem:[#allocation2 + $0x278] sm:$0xff]  ;;  %v5235_v6 = vadd.f32 %v12776_v51, %v1113_v53 }
 0x47c   : > { %v7288_v0 = vmax.f32 %v6776_v11, 0.0  ;;  %v6521_v60 = vadd.f32 %v12547_v57, %v6005_v18  ;;  %v6133_v22 = vld [vmem:[#allocation2 + $0x660] sm:$0xff]  ;;  %5492 = vst.msk [vmem:[#allocation2 + $0x270] sm:$0xff] %vm266_vm2, %v4979_v50  ;;  %v986_v28 = vld [vmem:[#allocation2 + $0x678] sm:$0xff]  ;;  %v5363_v11 = vadd.f32 %v12778_v48, %v1241_v8  ;;  %v4980_v44 = vadd.f32 %v12809_v29, %v858_v10 }
 0x47d   : > { %7672 = vst.msk [vmem:[%s9095_s11 + $0x658] sm:$0xff] %vm266_vm2, %v7160_v46  ;;  %v7416_v20 = vmax.f32 %v6904_v40, 0.0  ;;  %v6649_v62 = vadd.f32 %v12547_v57, %v6133_v22  ;;  %v6261_v58 = vld [vmem:[#allocation2 + $0xa60] sm:$0xff]  ;;  %v1114_v1 = vld [vmem:[#allocation2 + $0xa78] sm:$0xff]  ;;  %v12919_v46 = vpop.f32.mrf.mxu1  ;;  %v5108_v51 = vadd.f32 %v12811_v63, %v986_v28  ;;  %v12923_v18 = vpop.f32.mrf.mxu2  ;;  %v1517_v22 = vld [vmem:[%s8863_s8 + $0x710] sm:$0xff] }
 0x47e   : > { %7800 = vst.msk [vmem:[%s9095_s11 + $0xa58] sm:$0xff] %vm266_vm2, %v7288_v0  ;;  %v7033_v49 = vmax.f32 %v6521_v60, 0.0  ;;  %v6777_v3 = vadd.f32 %v12547_v57, %v6261_v58  ;;  %v6389_v32 = vld [vmem:[#allocation2 + $0xe60] sm:$0xff]  ;;  %v12877_v7 = vpop.f32.mrf.mxu0  ;;  %v12925_v48 = vpop.f32.mrf.mxu3  ;;  %v5236_v29 = vadd.f32 %v12815_v33, %v1114_v1  ;;  %v1389_v60 = vld [vmem:[%s8863_s8 + $0x310] sm:$0xff]  ;;  %v1774_v58 = vld [vmem:[%s8863_s8 + $0xf18] sm:$0xff] }
 0x47f   : > { %7928 = vst.msk [vmem:[%s9095_s11 + $0xe58] sm:$0xff] %vm266_vm2, %v7416_v20  ;;  %v7161_v25 = vmax.f32 %v6649_v62, 0.0  ;;  %v6905_v12 = vadd.f32 %v12547_v57, %v6389_v32  ;;  %v6006_v41 = vld [vmem:[#allocation2 + $0x268] sm:$0xff]  ;;  %v859_v40 = vld [vmem:[#allocation2 + $0x280] sm:$0xff]  ;;  %v1646_v62 = vld [vmem:[%s8863_s8 + $0xb18] sm:$0xff] }
 0x480   : > { %7545 = vst.msk [vmem:[%s9095_s11 + $0x260] sm:$0xff] %vm266_vm2, %v7033_v49  ;;  %v7289_v47 = vmax.f32 %v6777_v3, 0.0  ;;  %v6522_v30 = vadd.f32 %v12547_v57, %v6006_v41  ;;  %v6134_v13 = vld [vmem:[#allocation2 + $0x668] sm:$0xff]  ;;  %v987_v0 = vld [vmem:[#allocation2 + $0x680] sm:$0xff]  ;;  %8329 = vmatmul.msk.f32.gmra.mxu1 %vm1807_vm1, %v1517_v22  ;;  %v4981_v63 = vadd.f32 %v12841_v42, %v859_v40 }
 0x481   : > { %7673 = vst.msk [vmem:[%s9095_s11 + $0x660] sm:$0xff] %vm266_vm2, %v7161_v25  ;;  %v7417_v24 = vmax.f32 %v6905_v12, 0.0  ;;  %v6650_v14 = vadd.f32 %v12547_v57, %v6134_v13  ;;  %v6262_v55 = vld [vmem:[#allocation2 + $0xa68] sm:$0xff]  ;;  %8201 = vmatmul.msk.f32.gmra.mxu0 %vm1807_vm1, %v1389_v60  ;;  %v1243_v20 = vld [vmem:[#allocation2 + $0xe80] sm:$0xff]  ;;  %v5109_v33 = vadd.f32 %v12843_v54, %v987_v0  ;;  %v1390_v13 = vld [vmem:[%s8863_s8 + $0x318] sm:$0xff] }
 0x482   : > { %7801 = vst.msk [vmem:[%s9095_s11 + $0xa60] sm:$0xff] %vm266_vm2, %v7289_v47  ;;  %v7034_v36 = vmax.f32 %v6522_v30, 0.0  ;;  %v6778_v56 = vadd.f32 %v12547_v57, %v6262_v55  ;;  %v6390_v19 = vld [vmem:[#allocation2 + $0xe68] sm:$0xff]  ;;  %8458 = vmatmul.msk.f32.gmra.mxu2 %vm1807_vm1, %v1646_v62  ;;  %8586 = vmatmul.msk.f32.gmra.mxu3 %vm1807_vm1, %v1774_v58  ;;  %v5365_v42 = vadd.f32 %v12849_v39, %v1243_v20  ;;  %v1391_v0 = vld [vmem:[%s8863_s8 + $0x320] sm:$0xff] }
 0x483   : > { %7929 = vst.msk [vmem:[%s9095_s11 + $0xe60] sm:$0xff] %vm266_vm2, %v7417_v24  ;;  %v7162_v16 = vmax.f32 %v6650_v14, 0.0  ;;  %v6906_v27 = vadd.f32 %v12547_v57, %v6390_v19  ;;  %v6007_v17 = vld [vmem:[#allocation2 + $0x270] sm:$0xff]  ;;  %v860_v49 = vld [vmem:[#allocation2 + $0x288] sm:$0xff]  ;;  %v1647_v19 = vld [vmem:[%s8863_s8 + $0xb20] sm:$0xff] }
 0x484   : > { %7546 = vst.msk [vmem:[%s9095_s11 + $0x268] sm:$0xff] %vm266_vm2, %v7034_v36  ;;  %v7290_v52 = vmax.f32 %v6778_v56, 0.0  ;;  %v6523_v9 = vadd.f32 %v12547_v57, %v6007_v17  ;;  %v4982_v54 = vadd.f32 %v12877_v7, %v860_v49  ;;  %v1518_v7 = vld [vmem:[%s8863_s8 + $0x718] sm:$0xff]  ;;  %v988_v1 = vld [vmem:[#allocation2 + $0x688] sm:$0xff]  ;;  %v1519_v60 = vld [vmem:[%s8863_s8 + $0x720] sm:$0xff] }
 0x485   : > { %7674 = vst.msk [vmem:[%s9095_s11 + $0x668] sm:$0xff] %vm266_vm2, %v7162_v16  ;;  %v7418_v4 = vmax.f32 %v6906_v27, 0.0  ;;  %v12951_v25 = vpop.f32.mrf.mxu1  ;;  %v12955_v37 = vpop.f32.mrf.mxu2  ;;  %v1244_v58 = vld [vmem:[#allocation2 + $0xe88] sm:$0xff] }
 0x486   : > { %7802 = vst.msk [vmem:[%s9095_s11 + $0xa68] sm:$0xff] %vm266_vm2, %v7290_v52  ;;  %v7035_v50 = vmax.f32 %v6523_v9, 0.0  ;;  %v12917_v43 = vpop.f32.mrf.mxu0  ;;  %v12957_v47 = vpop.f32.mrf.mxu3  ;;  %v1776_v49 = vld [vmem:[%s8863_s8 + $0xf28] sm:$0xff] }
 0x487   : > { %7930 = vst.msk [vmem:[%s9095_s11 + $0xe68] sm:$0xff] %vm266_vm2, %v7418_v4 }
 0x488   : > { %7547 = vst.msk [vmem:[%s9095_s11 + $0x270] sm:$0xff] %vm266_vm2, %v7035_v50  ;;  %8330 = vmatmul.msk.f32.gmra.mxu1 %vm1807_vm1, %v1518_v7 }
 0x489   : > { %5620 = vst.msk [vmem:[#allocation2 + $0x670] sm:$0xff] %vm266_vm2, %v5107_v61  ;;  %8202 = vmatmul.msk.f32.gmra.mxu0 %vm1807_vm1, %v1390_v13 }
 0x48a   : > { %5748 = vst.msk [vmem:[#allocation2 + $0xa70] sm:$0xff] %vm266_vm2, %v5235_v6  ;;  %8459 = vmatmul.msk.f32.gmra.mxu2 %vm1807_vm1, %v1647_v19  ;;  %8587 = vmatmul.msk.f32.gmra.mxu3 %vm1807_vm1, %v1775_v23  ;;  %v1118_v19 = vld [vmem:[#allocation2 + $0xa98] sm:$0xff] }
 0x48b   : > { %5876 = vst.msk [vmem:[#allocation2 + $0xe70] sm:$0xff] %vm266_vm2, %v5363_v11  ;;  %v1246_v23 = vld [vmem:[#allocation2 + $0xe98] sm:$0xff] }
 0x48c   : > { %5493 = vst.msk [vmem:[#allocation2 + $0x278] sm:$0xff] %vm266_vm2, %v4980_v44 }
 0x48d   : > { %5621 = vst.msk [vmem:[#allocation2 + $0x678] sm:$0xff] %vm266_vm2, %v5108_v51  ;;  %v12987_v50 = vpop.f32.mrf.mxu1  ;;  %v12992_v44 = vpop.f32.mrf.mxu2 }
 0x48e   : > { %5749 = vst.msk [vmem:[#allocation2 + $0xa78] sm:$0xff] %vm266_vm2, %v5236_v29  ;;  %v12949_v32 = vpop.f32.mrf.mxu0  ;;  %v12994_v59 = vpop.f32.mrf.mxu3 }
 0x48f   : > { %5877 = vst.msk [vmem:[#allocation2 + $0xe78] sm:$0xff] %vm266_vm2, %v5364_v45 }
 0x490   : > { %v6135_v3 = vld [vmem:[#allocation2 + $0x670] sm:$0xff]  ;;  %5494 = vst.msk [vmem:[#allocation2 + $0x280] sm:$0xff] %vm266_vm2, %v4981_v63  ;;  %v1116_v63 = vld [vmem:[#allocation2 + $0xa88] sm:$0xff]  ;;  %8331 = vmatmul.msk.f32.gmra.mxu1 %vm1807_vm1, %v1519_v60 }
 0x491   : > { %v6651_v12 = vadd.f32 %v12547_v57, %v6135_v3  ;;  %v6263_v41 = vld [vmem:[#allocation2 + $0xa70] sm:$0xff]  ;;  %5622 = vst.msk [vmem:[#allocation2 + $0x680] sm:$0xff] %vm266_vm2, %v5109_v33  ;;  %8203 = vmatmul.msk.f32.gmra.mxu0 %vm1807_vm1, %v1391_v0  ;;  %v1648_v33 = vld [vmem:[%s8863_s8 + $0xb28] sm:$0xff]  ;;  %v1778_v0 = vld [vmem:[%s8863_s8 + $0xf38] sm:$0xff] }
 0x492   : > { %v6779_v39 = vadd.f32 %v12547_v57, %v6263_v41  ;;  %v6391_v30 = vld [vmem:[#allocation2 + $0xe70] sm:$0xff]  ;;  %5750 = vst.msk [vmem:[#allocation2 + $0xa80] sm:$0xff] %vm266_vm2, %v5237_v26  ;;  %8460 = vmatmul.msk.f32.gmra.mxu2 %vm1807_vm1, %v1648_v33  ;;  %8588 = vmatmul.msk.f32.gmra.mxu3 %vm1807_vm1, %v1776_v49  ;;  %v5366_v41 = vadd.f32 %v12886_v38, %v1244_v58 }
 0x493   : > { %v7163_v24 = vmax.f32 %v6651_v12, 0.0  ;;  %v6907_v14 = vadd.f32 %v12547_v57, %v6391_v30  ;;  %v6008_v55 = vld [vmem:[#allocation2 + $0x278] sm:$0xff]  ;;  %5878 = vst.msk [vmem:[#allocation2 + $0xe80] sm:$0xff] %vm266_vm2, %v5365_v42  ;;  %v5110_v42 = vadd.f32 %v12879_v5, %v988_v1  ;;  %v861_v3 = vld [vmem:[#allocation2 + $0x290] sm:$0xff]  ;;  %v5238_v12 = vadd.f32 %v12884_v21, %v1116_v63 }
 0x494   : > { %v7291_v34 = vmax.f32 %v6779_v39, 0.0  ;;  %v6524_v36 = vadd.f32 %v12547_v57, %v6008_v55  ;;  %v6136_v56 = vld [vmem:[#allocation2 + $0x678] sm:$0xff]  ;;  %5495 = vst.msk [vmem:[#allocation2 + $0x288] sm:$0xff] %vm266_vm2, %v4982_v54  ;;  %v1117_v39 = vld [vmem:[#allocation2 + $0xa90] sm:$0xff]  ;;  %v4983_v5 = vadd.f32 %v12917_v43, %v861_v3 }
 0x495   : > { %7675 = vst.msk [vmem:[%s9095_s11 + $0x670] sm:$0xff] %vm266_vm2, %v7163_v24  ;;  %v7419_v31 = vmax.f32 %v6907_v14, 0.0  ;;  %v6652_v16 = vadd.f32 %v12547_v57, %v6136_v56  ;;  %v6264_v27 = vld [vmem:[#allocation2 + $0xa78] sm:$0xff]  ;;  %v1245_v30 = vld [vmem:[#allocation2 + $0xe90] sm:$0xff]  ;;  %v13027_v7 = vpop.f32.mrf.mxu1  ;;  %v13031_v14 = vpop.f32.mrf.mxu2  ;;  %v5239_v43 = vadd.f32 %v12923_v18, %v1117_v39  ;;  %v991_v39 = vld [vmem:[#allocation2 + $0x6a0] sm:$0xff] }
 0x496   : > { %7803 = vst.msk [vmem:[%s9095_s11 + $0xa70] sm:$0xff] %vm266_vm2, %v7291_v34  ;;  %v7036_v17 = vmax.f32 %v6524_v36, 0.0  ;;  %v6780_v53 = vadd.f32 %v12547_v57, %v6264_v27  ;;  %v6392_v52 = vld [vmem:[#allocation2 + $0xe78] sm:$0xff]  ;;  %v12985_v10 = vpop.f32.mrf.mxu0  ;;  %v13033_v38 = vpop.f32.mrf.mxu3  ;;  %v1392_v34 = vld [vmem:[%s8863_s8 + $0x328] sm:$0xff]  ;;  %v5367_v56 = vadd.f32 %v12925_v48, %v1245_v30  ;;  %v863_v27 = vld [vmem:[#allocation2 + $0x2a0] sm:$0xff]  ;;  %v5240_v48 = vadd.f32 %v12955_v37, %v1118_v19 }
 0x497   : > { %7931 = vst.msk [vmem:[%s9095_s11 + $0xe70] sm:$0xff] %vm266_vm2, %v7419_v31  ;;  %v7164_v9 = vmax.f32 %v6652_v16, 0.0  ;;  %v6908_v8 = vadd.f32 %v12547_v57, %v6392_v52  ;;  %v6009_v2 = vld [vmem:[#allocation2 + $0x280] sm:$0xff]  ;;  %v862_v24 = vld [vmem:[#allocation2 + $0x298] sm:$0xff]  ;;  %v1520_v36 = vld [vmem:[%s8863_s8 + $0x728] sm:$0xff] }
 0x498   : > { %7548 = vst.msk [vmem:[%s9095_s11 + $0x278] sm:$0xff] %vm266_vm2, %v7036_v17  ;;  %v7292_v35 = vmax.f32 %v6780_v53, 0.0  ;;  %v6525_v4 = vadd.f32 %v12547_v57, %v6009_v2  ;;  %v6137_v61 = vld [vmem:[#allocation2 + $0x680] sm:$0xff]  ;;  %v990_v55 = vld [vmem:[#allocation2 + $0x698] sm:$0xff]  ;;  %8332 = vmatmul.msk.f32.gmra.mxu1 %vm1807_vm1, %v1520_v36  ;;  %v1649_v31 = vld [vmem:[%s8863_s8 + $0xb30] sm:$0xff] }
 0x499   : > { %7676 = vst.msk [vmem:[%s9095_s11 + $0x678] sm:$0xff] %vm266_vm2, %v7164_v9  ;;  %v7420_v6 = vmax.f32 %v6908_v8, 0.0  ;;  %v6653_v28 = vadd.f32 %v12547_v57, %v6137_v61  ;;  %v6265_v11 = vld [vmem:[#allocation2 + $0xa80] sm:$0xff]  ;;  %8204 = vmatmul.msk.f32.gmra.mxu0 %vm1807_vm1, %v1392_v34  ;;  %v1777_v16 = vld [vmem:[%s8863_s8 + $0xf30] sm:$0xff]  ;;  %v5112_v18 = vadd.f32 %v12951_v25, %v990_v55  ;;  %v4985_v25 = vadd.f32 %v12985_v10, %v863_v27  ;;  %v1394_v55 = vld [vmem:[%s8863_s8 + $0x338] sm:$0xff] }
 0x49a   : > { %7804 = vst.msk [vmem:[%s9095_s11 + $0xa78] sm:$0xff] %vm266_vm2, %v7292_v35  ;;  %v7037_v51 = vmax.f32 %v6525_v4, 0.0  ;;  %v6781_v40 = vadd.f32 %v12547_v57, %v6265_v11  ;;  %v6393_v29 = vld [vmem:[#allocation2 + $0xe80] sm:$0xff]  ;;  %8461 = vmatmul.msk.f32.gmra.mxu2 %vm1807_vm1, %v1649_v31  ;;  %8589 = vmatmul.msk.f32.gmra.mxu3 %vm1807_vm1, %v1777_v16  ;;  %v1393_v61 = vld [vmem:[%s8863_s8 + $0x330] sm:$0xff]  ;;  %v1522_v34 = vld [vmem:[%s8863_s8 + $0x738] sm:$0xff] }
 0x49b   : > { %7932 = vst.msk [vmem:[%s9095_s11 + $0xe78] sm:$0xff] %vm266_vm2, %v7420_v6  ;;  %v7165_v22 = vmax.f32 %v6653_v28, 0.0  ;;  %v6909_v45 = vadd.f32 %v12547_v57, %v6393_v29  ;;  %v6010_v15 = vld [vmem:[#allocation2 + $0x288] sm:$0xff]  ;;  %v13061_v9 = vld [vmem:[#allocation5] ss:$0 sm:$0xff]  ;;  %v1521_v10 = vld [vmem:[%s8863_s8 + $0x730] sm:$0xff] }
 0x49c   : > { %7549 = vst.msk [vmem:[%s9095_s11 + $0x280] sm:$0xff] %vm266_vm2, %v7037_v51  ;;  %v7293_v20 = vmax.f32 %v6781_v40, 0.0  ;;  %v6526_v62 = vadd.f32 %v12547_v57, %v6010_v15  ;;  %v989_v57 = vld [vmem:[#allocation2 + $0x690] sm:$0xff]  ;;  %v1650_v29 = vld [vmem:[%s8863_s8 + $0xb38] sm:$0xff]  ;;  %v1247_v16 = vld [vmem:[#allocation2 + $0xea0] sm:$0xff] }
 0x49d   : > { %7677 = vst.msk [vmem:[%s9095_s11 + $0x680] sm:$0xff] %vm266_vm2, %v7165_v22  ;;  %v7421_v26 = vmax.f32 %v6909_v45, 0.0  ;;  %v5111_v21 = vadd.f32 %v12919_v46, %v989_v57  ;;  %v4984_v46 = vadd.f32 %v12949_v32, %v862_v24  ;;  %v5368_v32 = vadd.f32 %v12957_v47, %v1246_v23  ;;  %v13059_v52 = vpop.f32.mrf.mxu1  ;;  %v13065_v2 = vpop.f32.mrf.mxu2  ;;  %v1779_v27 = vld [vmem:[%s8863_s8 + $0xf40] sm:$0xff] }
 0x49e   : > { %7805 = vst.msk [vmem:[%s9095_s11 + $0xa80] sm:$0xff] %vm266_vm2, %v7293_v20  ;;  %v7038_v54 = vmax.f32 %v6526_v62, 0.0  ;;  %v13025_v13 = vpop.f32.mrf.mxu0  ;;  %v13067_v47 = vpop.f32.mrf.mxu3 }
 0x49f   : > { %7933 = vst.msk [vmem:[%s9095_s11 + $0xe80] sm:$0xff] %vm266_vm2, %v7421_v26 }
 0x4a0   : > { %7550 = vst.msk [vmem:[%s9095_s11 + $0x288] sm:$0xff] %vm266_vm2, %v7038_v54  ;;  %8333 = vmatmul.msk.f32.gmra.mxu1 %vm1807_vm1, %v1521_v10 }
 0x4a1   : > { %5623 = vst.msk [vmem:[#allocation2 + $0x688] sm:$0xff] %vm266_vm2, %v5110_v42  ;;  %8205 = vmatmul.msk.f32.gmra.mxu0 %vm1807_vm1, %v1393_v61  ;;  %v1248_v61 = vld [vmem:[#allocation2 + $0xea8] sm:$0xff] }
 0x4a2   : > { %5751 = vst.msk [vmem:[#allocation2 + $0xa88] sm:$0xff] %vm266_vm2, %v5238_v12  ;;  %8462 = vmatmul.msk.f32.gmra.mxu2 %vm1807_vm1, %v1650_v29  ;;  %8590 = vmatmul.msk.f32.gmra.mxu3 %vm1807_vm1, %v1778_v0  ;;  %v5370_v29 = vadd.f32 %v13033_v38, %v1248_v61  ;;  %v1121_v0 = vld [vmem:[#allocation2 + $0xab0] sm:$0xff] }
 0x4a3   : > { %5879 = vst.msk [vmem:[#allocation2 + $0xe88] sm:$0xff] %vm266_vm2, %v5366_v41  ;;  %v5243_v38 = vadd.f32 %v13065_v2, %v1121_v0 }
 0x4a4   : > { %5496 = vst.msk [vmem:[#allocation2 + $0x290] sm:$0xff] %vm266_vm2, %v4983_v5 }
 0x4a5   : > { %5624 = vst.msk [vmem:[#allocation2 + $0x690] sm:$0xff] %vm266_vm2, %v5111_v21  ;;  %v13097_v54 = vpop.f32.mrf.mxu1  ;;  %v13102_v5 = vpop.f32.mrf.mxu2 }
 0x4a6   : > { %5752 = vst.msk [vmem:[#allocation2 + $0xa90] sm:$0xff] %vm266_vm2, %v5239_v43  ;;  %v13057_v53 = vpop.f32.mrf.mxu0  ;;  %v13104_v30 = vpop.f32.mrf.mxu3 }
 0x4a7   : > { %5880 = vst.msk [vmem:[#allocation2 + $0xe90] sm:$0xff] %vm266_vm2, %v5367_v56 }
 0x4a8   : > { %v6138_v17 = vld [vmem:[#allocation2 + $0x688] sm:$0xff]  ;;  %5497 = vst.msk [vmem:[#allocation2 + $0x298] sm:$0xff] %vm266_vm2, %v4984_v46  ;;  %v1119_v46 = vld [vmem:[#allocation2 + $0xaa0] sm:$0xff]  ;;  %8334 = vmatmul.msk.f32.gmra.mxu1 %vm1807_vm1, %v1522_v34 }
 0x4a9   : > { %v6654_v8 = vadd.f32 %v13061_v9, %v6138_v17  ;;  %v6266_v37 = vld [vmem:[#allocation2 + $0xa88] sm:$0xff]  ;;  %5625 = vst.msk [vmem:[#allocation2 + $0x698] sm:$0xff] %vm266_vm2, %v5112_v18  ;;  %8206 = vmatmul.msk.f32.gmra.mxu0 %vm1807_vm1, %v1394_v55  ;;  %v1651_v18 = vld [vmem:[%s8863_s8 + $0xb40] sm:$0xff]  ;;  %v1781_v55 = vld [vmem:[%s8863_s8 + $0xf50] sm:$0xff] }
 0x4aa   : > { %v6782_v35 = vadd.f32 %v13061_v9, %v6266_v37  ;;  %v6394_v4 = vld [vmem:[#allocation2 + $0xe88] sm:$0xff]  ;;  %5753 = vst.msk [vmem:[#allocation2 + $0xa98] sm:$0xff] %vm266_vm2, %v5240_v48  ;;  %8463 = vmatmul.msk.f32.gmra.mxu2 %vm1807_vm1, %v1651_v18  ;;  %8591 = vmatmul.msk.f32.gmra.mxu3 %vm1807_vm1, %v1779_v27 }
 0x4ab   : > { %v7166_v6 = vmax.f32 %v6654_v8, 0.0  ;;  %v6910_v28 = vadd.f32 %v13061_v9, %v6394_v4  ;;  %v6011_v11 = vld [vmem:[#allocation2 + $0x290] sm:$0xff]  ;;  %5881 = vst.msk [vmem:[#allocation2 + $0xe98] sm:$0xff] %vm266_vm2, %v5368_v32  ;;  %v5113_v32 = vadd.f32 %v12987_v50, %v991_v39  ;;  %v864_v17 = vld [vmem:[#allocation2 + $0x2a8] sm:$0xff]  ;;  %v5241_v8 = vadd.f32 %v12992_v44, %v1119_v46 }
 0x4ac   : > { %v7294_v1 = vmax.f32 %v6782_v35, 0.0  ;;  %v6527_v51 = vadd.f32 %v13061_v9, %v6011_v11  ;;  %v6139_v40 = vld [vmem:[#allocation2 + $0x690] sm:$0xff]  ;;  %5498 = vst.msk [vmem:[#allocation2 + $0x2a0] sm:$0xff] %vm266_vm2, %v4985_v25  ;;  %v992_v37 = vld [vmem:[#allocation2 + $0x6a8] sm:$0xff]  ;;  %v5369_v35 = vadd.f32 %v12994_v59, %v1247_v16  ;;  %v4986_v50 = vadd.f32 %v13025_v13, %v864_v17 }
 0x4ad   : > { %7678 = vst.msk [vmem:[%s9095_s11 + $0x688] sm:$0xff] %vm266_vm2, %v7166_v6  ;;  %v7422_v60 = vmax.f32 %v6910_v28, 0.0  ;;  %v6655_v22 = vadd.f32 %v13061_v9, %v6139_v40  ;;  %v6267_v45 = vld [vmem:[#allocation2 + $0xa90] sm:$0xff]  ;;  %v1120_v4 = vld [vmem:[#allocation2 + $0xaa8] sm:$0xff]  ;;  %v13137_v6 = vpop.f32.mrf.mxu1  ;;  %v5114_v44 = vadd.f32 %v13027_v7, %v992_v37  ;;  %v13141_v11 = vpop.f32.mrf.mxu2  ;;  %v1523_v40 = vld [vmem:[%s8863_s8 + $0x740] sm:$0xff] }
 0x4ae   : > { %7806 = vst.msk [vmem:[%s9095_s11 + $0xa88] sm:$0xff] %vm266_vm2, %v7294_v1  ;;  %v7039_v15 = vmax.f32 %v6527_v51, 0.0  ;;  %v6783_v63 = vadd.f32 %v13061_v9, %v6267_v45  ;;  %v6395_v20 = vld [vmem:[#allocation2 + $0xe90] sm:$0xff]  ;;  %v13095_v3 = vpop.f32.mrf.mxu0  ;;  %v13143_v59 = vpop.f32.mrf.mxu3  ;;  %v5242_v13 = vadd.f32 %v13031_v14, %v1120_v4  ;;  %v1395_v51 = vld [vmem:[%s8863_s8 + $0x340] sm:$0xff]  ;;  %v1780_v45 = vld [vmem:[%s8863_s8 + $0xf48] sm:$0xff] }
 0x4af   : > { %7934 = vst.msk [vmem:[%s9095_s11 + $0xe88] sm:$0xff] %vm266_vm2, %v7422_v60  ;;  %v7167_v62 = vmax.f32 %v6655_v22, 0.0  ;;  %v6911_v58 = vadd.f32 %v13061_v9, %v6395_v20  ;;  %v6012_v33 = vld [vmem:[#allocation2 + $0x298] sm:$0xff]  ;;  %v865_v28 = vld [vmem:[#allocation2 + $0x2b0] sm:$0xff]  ;;  %v1652_v22 = vld [vmem:[%s8863_s8 + $0xb48] sm:$0xff] }
 0x4b0   : > { %7551 = vst.msk [vmem:[%s9095_s11 + $0x290] sm:$0xff] %vm266_vm2, %v7039_v15  ;;  %v7295_v49 = vmax.f32 %v6783_v63, 0.0  ;;  %v6528_v26 = vadd.f32 %v13061_v9, %v6012_v33  ;;  %v6140_v42 = vld [vmem:[#allocation2 + $0x698] sm:$0xff]  ;;  %v993_v1 = vld [vmem:[#allocation2 + $0x6b0] sm:$0xff]  ;;  %8335 = vmatmul.msk.f32.gmra.mxu1 %vm1807_vm1, %v1523_v40  ;;  %v4987_v7 = vadd.f32 %v13057_v53, %v865_v28 }
 0x4b1   : > { %7679 = vst.msk [vmem:[%s9095_s11 + $0x690] sm:$0xff] %vm266_vm2, %v7167_v62  ;;  %v7423_v12 = vmax.f32 %v6911_v58, 0.0  ;;  %v6656_v57 = vadd.f32 %v13061_v9, %v6140_v42  ;;  %v6268_v41 = vld [vmem:[#allocation2 + $0xa98] sm:$0xff]  ;;  %8207 = vmatmul.msk.f32.gmra.mxu0 %vm1807_vm1, %v1395_v51  ;;  %v1249_v60 = vld [vmem:[#allocation2 + $0xeb0] sm:$0xff]  ;;  %v5115_v14 = vadd.f32 %v13059_v52, %v993_v1  ;;  %v1396_v42 = vld [vmem:[%s8863_s8 + $0x348] sm:$0xff] }
 0x4b2   : > { %7807 = vst.msk [vmem:[%s9095_s11 + $0xa90] sm:$0xff] %vm266_vm2, %v7295_v49  ;;  %v7040_v21 = vmax.f32 %v6528_v26, 0.0  ;;  %v6784_v24 = vadd.f32 %v13061_v9, %v6268_v41  ;;  %v6396_v43 = vld [vmem:[#allocation2 + $0xe98] sm:$0xff]  ;;  %8464 = vmatmul.msk.f32.gmra.mxu2 %vm1807_vm1, %v1652_v22  ;;  %8592 = vmatmul.msk.f32.gmra.mxu3 %vm1807_vm1, %v1780_v45  ;;  %v5371_v53 = vadd.f32 %v13067_v47, %v1249_v60  ;;  %v1397_v1 = vld [vmem:[%s8863_s8 + $0x350] sm:$0xff] }
 0x4b3   : > { %7935 = vst.msk [vmem:[%s9095_s11 + $0xe90] sm:$0xff] %vm266_vm2, %v7423_v12  ;;  %v7168_v36 = vmax.f32 %v6656_v57, 0.0  ;;  %v6912_v56 = vadd.f32 %v13061_v9, %v6396_v43  ;;  %v6013_v19 = vld [vmem:[#allocation2 + $0x2a0] sm:$0xff]  ;;  %v866_v15 = vld [vmem:[#allocation2 + $0x2b8] sm:$0xff]  ;;  %v1653_v43 = vld [vmem:[%s8863_s8 + $0xb50] sm:$0xff] }
 0x4b4   : > { %7552 = vst.msk [vmem:[%s9095_s11 + $0x298] sm:$0xff] %vm266_vm2, %v7040_v21  ;;  %v7296_v23 = vmax.f32 %v6784_v24, 0.0  ;;  %v6529_v31 = vadd.f32 %v13061_v9, %v6013_v19  ;;  %v4988_v52 = vadd.f32 %v13095_v3, %v866_v15  ;;  %v1524_v3 = vld [vmem:[%s8863_s8 + $0x748] sm:$0xff]  ;;  %v994_v4 = vld [vmem:[#allocation2 + $0x6b8] sm:$0xff]  ;;  %v1525_v51 = vld [vmem:[%s8863_s8 + $0x750] sm:$0xff] }
 0x4b5   : > { %7680 = vst.msk [vmem:[%s9095_s11 + $0x698] sm:$0xff] %vm266_vm2, %v7168_v36  ;;  %v7424_v48 = vmax.f32 %v6912_v56, 0.0  ;;  %v13169_v62 = vpop.f32.mrf.mxu1  ;;  %v13173_v2 = vpop.f32.mrf.mxu2  ;;  %v1250_v45 = vld [vmem:[#allocation2 + $0xeb8] sm:$0xff] }
 0x4b6   : > { %7808 = vst.msk [vmem:[%s9095_s11 + $0xa98] sm:$0xff] %vm266_vm2, %v7296_v23  ;;  %v7041_v25 = vmax.f32 %v6529_v31, 0.0  ;;  %v13135_v10 = vpop.f32.mrf.mxu0  ;;  %v13175_v49 = vpop.f32.mrf.mxu3  ;;  %v1782_v15 = vld [vmem:[%s8863_s8 + $0xf58] sm:$0xff] }
 0x4b7   : > { %7936 = vst.msk [vmem:[%s9095_s11 + $0xe98] sm:$0xff] %vm266_vm2, %v7424_v48 }
 0x4b8   : > { %7553 = vst.msk [vmem:[%s9095_s11 + $0x2a0] sm:$0xff] %vm266_vm2, %v7041_v25  ;;  %8336 = vmatmul.msk.f32.gmra.mxu1 %vm1807_vm1, %v1524_v3 }
 0x4b9   : > { %5626 = vst.msk [vmem:[#allocation2 + $0x6a0] sm:$0xff] %vm266_vm2, %v5113_v32  ;;  %8208 = vmatmul.msk.f32.gmra.mxu0 %vm1807_vm1, %v1396_v42  ;;  %v1251_v42 = vld [vmem:[#allocation2 + $0xec0] sm:$0xff] }
 0x4ba   : > { %5754 = vst.msk [vmem:[#allocation2 + $0xaa0] sm:$0xff] %vm266_vm2, %v5241_v8  ;;  %8465 = vmatmul.msk.f32.gmra.mxu2 %vm1807_vm1, %v1653_v43  ;;  %8593 = vmatmul.msk.f32.gmra.mxu3 %vm1807_vm1, %v1781_v55  ;;  %v5373_v43 = vadd.f32 %v13143_v59, %v1251_v42  ;;  %v1124_v55 = vld [vmem:[#allocation2 + $0xac8] sm:$0xff] }
 0x4bb   : > { %5882 = vst.msk [vmem:[#allocation2 + $0xea0] sm:$0xff] %vm266_vm2, %v5369_v35  ;;  %v5246_v59 = vadd.f32 %v13173_v2, %v1124_v55 }
 0x4bc   : > { %5499 = vst.msk [vmem:[#allocation2 + $0x2a8] sm:$0xff] %vm266_vm2, %v4986_v50 }
 0x4bd   : > { %5627 = vst.msk [vmem:[#allocation2 + $0x6a8] sm:$0xff] %vm266_vm2, %v5114_v44  ;;  %v13205_v25 = vpop.f32.mrf.mxu1  ;;  %v13210_v50 = vpop.f32.mrf.mxu2 }
 0x4be   : > { %5755 = vst.msk [vmem:[#allocation2 + $0xaa8] sm:$0xff] %vm266_vm2, %v5242_v13  ;;  %v13167_v20 = vpop.f32.mrf.mxu0  ;;  %v13212_v61 = vpop.f32.mrf.mxu3 }
 0x4bf   : > { %5883 = vst.msk [vmem:[#allocation2 + $0xea8] sm:$0xff] %vm266_vm2, %v5370_v29 }
 0x4c0   : > { %v6141_v63 = vld [vmem:[#allocation2 + $0x6a0] sm:$0xff]  ;;  %5500 = vst.msk [vmem:[#allocation2 + $0x2b0] sm:$0xff] %vm266_vm2, %v4987_v7  ;;  %v1122_v7 = vld [vmem:[#allocation2 + $0xab8] sm:$0xff]  ;;  %8337 = vmatmul.msk.f32.gmra.mxu1 %vm1807_vm1, %v1525_v51 }
 0x4c1   : > { %v6657_v58 = vadd.f32 %v13061_v9, %v6141_v63  ;;  %v6269_v33 = vld [vmem:[#allocation2 + $0xaa0] sm:$0xff]  ;;  %5628 = vst.msk [vmem:[#allocation2 + $0x6b0] sm:$0xff] %vm266_vm2, %v5115_v14  ;;  %8209 = vmatmul.msk.f32.gmra.mxu0 %vm1807_vm1, %v1397_v1  ;;  %v1654_v14 = vld [vmem:[%s8863_s8 + $0xb58] sm:$0xff]  ;;  %v1784_v1 = vld [vmem:[%s8863_s8 + $0xf68] sm:$0xff] }
 0x4c2   : > { %v6785_v47 = vadd.f32 %v13061_v9, %v6269_v33  ;;  %v6397_v26 = vld [vmem:[#allocation2 + $0xea0] sm:$0xff]  ;;  %5756 = vst.msk [vmem:[#allocation2 + $0xab0] sm:$0xff] %vm266_vm2, %v5243_v38  ;;  %8466 = vmatmul.msk.f32.gmra.mxu2 %vm1807_vm1, %v1654_v14  ;;  %8594 = vmatmul.msk.f32.gmra.mxu3 %vm1807_vm1, %v1782_v15 }
 0x4c3   : > { %v7169_v12 = vmax.f32 %v6657_v58, 0.0  ;;  %v6913_v57 = vadd.f32 %v13061_v9, %v6397_v26  ;;  %v6014_v41 = vld [vmem:[#allocation2 + $0x2a8] sm:$0xff]  ;;  %5884 = vst.msk [vmem:[#allocation2 + $0xeb0] sm:$0xff] %vm266_vm2, %v5371_v53  ;;  %v5116_v53 = vadd.f32 %v13097_v54, %v994_v4  ;;  %v867_v63 = vld [vmem:[#allocation2 + $0x2c0] sm:$0xff]  ;;  %v5244_v58 = vadd.f32 %v13102_v5, %v1122_v7 }
 0x4c4   : > { %v7297_v39 = vmax.f32 %v6785_v47, 0.0  ;;  %v6530_v21 = vadd.f32 %v13061_v9, %v6014_v41  ;;  %v6142_v24 = vld [vmem:[#allocation2 + $0x6a8] sm:$0xff]  ;;  %5501 = vst.msk [vmem:[#allocation2 + $0x2b8] sm:$0xff] %vm266_vm2, %v4988_v52  ;;  %v995_v33 = vld [vmem:[#allocation2 + $0x6c0] sm:$0xff]  ;;  %v5372_v47 = vadd.f32 %v13104_v30, %v1250_v45  ;;  %v4989_v54 = vadd.f32 %v13135_v10, %v867_v63 }
 0x4c5   : > { %7681 = vst.msk [vmem:[%s9095_s11 + $0x6a0] sm:$0xff] %vm266_vm2, %v7169_v12  ;;  %v7425_v34 = vmax.f32 %v6913_v57, 0.0  ;;  %v6658_v36 = vadd.f32 %v13061_v9, %v6142_v24  ;;  %v6270_v56 = vld [vmem:[#allocation2 + $0xaa8] sm:$0xff]  ;;  %v1123_v26 = vld [vmem:[#allocation2 + $0xac0] sm:$0xff]  ;;  %v13245_v12 = vpop.f32.mrf.mxu1  ;;  %v5117_v5 = vadd.f32 %v13137_v6, %v995_v33  ;;  %v13249_v41 = vpop.f32.mrf.mxu2  ;;  %v1526_v24 = vld [vmem:[%s8863_s8 + $0x758] sm:$0xff] }
 0x4c6   : > { %7809 = vst.msk [vmem:[%s9095_s11 + $0xaa0] sm:$0xff] %vm266_vm2, %v7297_v39  ;;  %v7042_v19 = vmax.f32 %v6530_v21, 0.0  ;;  %v6786_v46 = vadd.f32 %v13061_v9, %v6270_v56  ;;  %v6398_v23 = vld [vmem:[#allocation2 + $0xea8] sm:$0xff]  ;;  %v13203_v17 = vpop.f32.mrf.mxu0  ;;  %v13251_v30 = vpop.f32.mrf.mxu3  ;;  %v5245_v10 = vadd.f32 %v13141_v11, %v1123_v26  ;;  %v1398_v21 = vld [vmem:[%s8863_s8 + $0x358] sm:$0xff]  ;;  %v1783_v56 = vld [vmem:[%s8863_s8 + $0xf60] sm:$0xff] }
 0x4c7   : > { %7937 = vst.msk [vmem:[%s9095_s11 + $0xea0] sm:$0xff] %vm266_vm2, %v7425_v34  ;;  %v7170_v31 = vmax.f32 %v6658_v36, 0.0  ;;  %v6914_v16 = vadd.f32 %v13061_v9, %v6398_v23  ;;  %v6015_v18 = vld [vmem:[#allocation2 + $0x2b0] sm:$0xff]  ;;  %v868_v57 = vld [vmem:[#allocation2 + $0x2c8] sm:$0xff]  ;;  %v1655_v36 = vld [vmem:[%s8863_s8 + $0xb60] sm:$0xff] }
 0x4c8   : > { %7554 = vst.msk [vmem:[%s9095_s11 + $0x2a8] sm:$0xff] %vm266_vm2, %v7042_v19  ;;  %v7298_v27 = vmax.f32 %v6786_v46, 0.0  ;;  %v6531_v48 = vadd.f32 %v13061_v9, %v6015_v18  ;;  %v6143_v32 = vld [vmem:[#allocation2 + $0x6b0] sm:$0xff]  ;;  %v996_v39 = vld [vmem:[#allocation2 + $0x6c8] sm:$0xff]  ;;  %8338 = vmatmul.msk.f32.gmra.mxu1 %vm1807_vm1, %v1526_v24  ;;  %v4990_v6 = vadd.f32 %v13167_v20, %v868_v57 }
 0x4c9   : > { %7682 = vst.msk [vmem:[%s9095_s11 + $0x6a8] sm:$0xff] %vm266_vm2, %v7170_v31  ;;  %v7426_v8 = vmax.f32 %v6914_v16, 0.0  ;;  %v6659_v37 = vadd.f32 %v13061_v9, %v6143_v32  ;;  %v6271_v35 = vld [vmem:[#allocation2 + $0xab0] sm:$0xff]  ;;  %8210 = vmatmul.msk.f32.gmra.mxu0 %vm1807_vm1, %v1398_v21  ;;  %v1252_v34 = vld [vmem:[#allocation2 + $0xec8] sm:$0xff]  ;;  %v5118_v11 = vadd.f32 %v13169_v62, %v996_v39  ;;  %v1399_v32 = vld [vmem:[%s8863_s8 + $0x360] sm:$0xff] }
 0x4ca   : > { %7810 = vst.msk [vmem:[%s9095_s11 + $0xaa8] sm:$0xff] %vm266_vm2, %v7298_v27  ;;  %v7043_v44 = vmax.f32 %v6531_v48, 0.0  ;;  %v6787_v28 = vadd.f32 %v13061_v9, %v6271_v35  ;;  %v6399_v13 = vld [vmem:[#allocation2 + $0xeb0] sm:$0xff]  ;;  %8467 = vmatmul.msk.f32.gmra.mxu2 %vm1807_vm1, %v1655_v36  ;;  %8595 = vmatmul.msk.f32.gmra.mxu3 %vm1807_vm1, %v1783_v56  ;;  %v5374_v20 = vadd.f32 %v13175_v49, %v1252_v34  ;;  %v1400_v39 = vld [vmem:[%s8863_s8 + $0x368] sm:$0xff] }
 0x4cb   : > { %7938 = vst.msk [vmem:[%s9095_s11 + $0xea8] sm:$0xff] %vm266_vm2, %v7426_v8  ;;  %v7171_v40 = vmax.f32 %v6659_v37, 0.0  ;;  %v6915_v29 = vadd.f32 %v13061_v9, %v6399_v13  ;;  %v6016_v0 = vld [vmem:[#allocation2 + $0x2b8] sm:$0xff]  ;;  %v869_v19 = vld [vmem:[#allocation2 + $0x2d0] sm:$0xff]  ;;  %v1656_v13 = vld [vmem:[%s8863_s8 + $0xb68] sm:$0xff] }
 0x4cc   : > { %7555 = vst.msk [vmem:[%s9095_s11 + $0x2b0] sm:$0xff] %vm266_vm2, %v7043_v44  ;;  %v7299_v60 = vmax.f32 %v6787_v28, 0.0  ;;  %v6532_v22 = vadd.f32 %v13061_v9, %v6016_v0  ;;  %v4991_v62 = vadd.f32 %v13203_v17, %v869_v19  ;;  %v1527_v17 = vld [vmem:[%s8863_s8 + $0x760] sm:$0xff]  ;;  %v997_v26 = vld [vmem:[#allocation2 + $0x6d0] sm:$0xff]  ;;  %v1528_v21 = vld [vmem:[%s8863_s8 + $0x768] sm:$0xff] }
 0x4cd   : > { %7683 = vst.msk [vmem:[%s9095_s11 + $0x6b0] sm:$0xff] %vm266_vm2, %v7171_v40  ;;  %v7427_v38 = vmax.f32 %v6915_v29, 0.0  ;;  %v13277_v31 = vpop.f32.mrf.mxu1  ;;  %v13281_v2 = vpop.f32.mrf.mxu2  ;;  %v1253_v56 = vld [vmem:[#allocation2 + $0xed0] sm:$0xff] }
 0x4ce   : > { %7811 = vst.msk [vmem:[%s9095_s11 + $0xab0] sm:$0xff] %vm266_vm2, %v7299_v60  ;;  %v7044_v52 = vmax.f32 %v6532_v22, 0.0  ;;  %v13243_v3 = vpop.f32.mrf.mxu0  ;;  %v13283_v27 = vpop.f32.mrf.mxu3  ;;  %v1785_v19 = vld [vmem:[%s8863_s8 + $0xf70] sm:$0xff] }
 0x4cf   : > { %7939 = vst.msk [vmem:[%s9095_s11 + $0xeb0] sm:$0xff] %vm266_vm2, %v7427_v38 }
 0x4d0   : > { %7556 = vst.msk [vmem:[%s9095_s11 + $0x2b8] sm:$0xff] %vm266_vm2, %v7044_v52  ;;  %8339 = vmatmul.msk.f32.gmra.mxu1 %vm1807_vm1, %v1527_v17 }
 0x4d1   : > { %5629 = vst.msk [vmem:[#allocation2 + $0x6b8] sm:$0xff] %vm266_vm2, %v5116_v53  ;;  %8211 = vmatmul.msk.f32.gmra.mxu0 %vm1807_vm1, %v1399_v32  ;;  %v1254_v32 = vld [vmem:[#allocation2 + $0xed8] sm:$0xff] }
 0x4d2   : > { %5757 = vst.msk [vmem:[#allocation2 + $0xab8] sm:$0xff] %vm266_vm2, %v5244_v58  ;;  %8468 = vmatmul.msk.f32.gmra.mxu2 %vm1807_vm1, %v1656_v13  ;;  %8596 = vmatmul.msk.f32.gmra.mxu3 %vm1807_vm1, %v1784_v1  ;;  %v5376_v13 = vadd.f32 %v13251_v30, %v1254_v32  ;;  %v1127_v1 = vld [vmem:[#allocation2 + $0xae0] sm:$0xff] }
 0x4d3   : > { %5885 = vst.msk [vmem:[#allocation2 + $0xeb8] sm:$0xff] %vm266_vm2, %v5372_v47  ;;  %v5249_v30 = vadd.f32 %v13281_v2, %v1127_v1 }
 0x4d4   : > { %5502 = vst.msk [vmem:[#allocation2 + $0x2c0] sm:$0xff] %vm266_vm2, %v4989_v54 }
 0x4d5   : > { %5630 = vst.msk [vmem:[#allocation2 + $0x6c0] sm:$0xff] %vm266_vm2, %v5117_v5  ;;  %v13313_v52 = vpop.f32.mrf.mxu1  ;;  %v13318_v54 = vpop.f32.mrf.mxu2 }
 0x4d6   : > { %5758 = vst.msk [vmem:[#allocation2 + $0xac0] sm:$0xff] %vm266_vm2, %v5245_v10  ;;  %v13275_v23 = vpop.f32.mrf.mxu0  ;;  %v13320_v42 = vpop.f32.mrf.mxu3 }
 0x4d7   : > { %5886 = vst.msk [vmem:[#allocation2 + $0xec0] sm:$0xff] %vm266_vm2, %v5373_v43 }
 0x4d8   : > { %v6144_v46 = vld [vmem:[#allocation2 + $0x6b8] sm:$0xff]  ;;  %5503 = vst.msk [vmem:[#allocation2 + $0x2c8] sm:$0xff] %vm266_vm2, %v4990_v6  ;;  %v1125_v6 = vld [vmem:[#allocation2 + $0xad0] sm:$0xff]  ;;  %8340 = vmatmul.msk.f32.gmra.mxu1 %vm1807_vm1, %v1528_v21 }
 0x4d9   : > { %v6660_v16 = vadd.f32 %v13061_v9, %v6144_v46  ;;  %v6272_v18 = vld [vmem:[#allocation2 + $0xab8] sm:$0xff]  ;;  %5631 = vst.msk [vmem:[#allocation2 + $0x6c8] sm:$0xff] %vm266_vm2, %v5118_v11  ;;  %8212 = vmatmul.msk.f32.gmra.mxu0 %vm1807_vm1, %v1400_v39  ;;  %v1657_v11 = vld [vmem:[%s8863_s8 + $0xb70] sm:$0xff]  ;;  %v1787_v39 = vld [vmem:[%s8863_s8 + $0xf80] sm:$0xff] }
 0x4da   : > { %v6788_v49 = vadd.f32 %v13061_v9, %v6272_v18  ;;  %v6400_v48 = vld [vmem:[#allocation2 + $0xeb8] sm:$0xff]  ;;  %5759 = vst.msk [vmem:[#allocation2 + $0xac8] sm:$0xff] %vm266_vm2, %v5246_v59  ;;  %8469 = vmatmul.msk.f32.gmra.mxu2 %vm1807_vm1, %v1657_v11  ;;  %8597 = vmatmul.msk.f32.gmra.mxu3 %vm1807_vm1, %v1785_v19 }
 0x4db   : > { %v7172_v8 = vmax.f32 %v6660_v16, 0.0  ;;  %v6916_v37 = vadd.f32 %v13061_v9, %v6400_v48  ;;  %v6017_v35 = vld [vmem:[#allocation2 + $0x2c0] sm:$0xff]  ;;  %5887 = vst.msk [vmem:[#allocation2 + $0xec8] sm:$0xff] %vm266_vm2, %v5374_v20  ;;  %v5119_v20 = vadd.f32 %v13205_v25, %v997_v26  ;;  %v870_v46 = vld [vmem:[#allocation2 + $0x2d8] sm:$0xff]  ;;  %v5247_v16 = vadd.f32 %v13210_v50, %v1125_v6 }
 0x4dc   : > { %v7300_v4 = vmax.f32 %v6788_v49, 0.0  ;;  %v6533_v44 = vadd.f32 %v13061_v9, %v6017_v35  ;;  %v6145_v28 = vld [vmem:[#allocation2 + $0x6c0] sm:$0xff]  ;;  %5504 = vst.msk [vmem:[#allocation2 + $0x2d0] sm:$0xff] %vm266_vm2, %v4991_v62  ;;  %v998_v18 = vld [vmem:[#allocation2 + $0x6d8] sm:$0xff]  ;;  %v5375_v49 = vadd.f32 %v13212_v61, %v1253_v56  ;;  %v4992_v25 = vadd.f32 %v13243_v3, %v870_v46 }
 0x4dd   : > { %7684 = vst.msk [vmem:[%s9095_s11 + $0x6b8] sm:$0xff] %vm266_vm2, %v7172_v8  ;;  %v7428_v51 = vmax.f32 %v6916_v37, 0.0  ;;  %v6661_v40 = vadd.f32 %v13061_v9, %v6145_v28  ;;  %v6273_v29 = vld [vmem:[#allocation2 + $0xac0] sm:$0xff]  ;;  %v1126_v48 = vld [vmem:[#allocation2 + $0xad8] sm:$0xff]  ;;  %v13353_v8 = vpop.f32.mrf.mxu1  ;;  %v5120_v50 = vadd.f32 %v13245_v12, %v998_v18  ;;  %v13357_v35 = vpop.f32.mrf.mxu2  ;;  %v1529_v28 = vld [vmem:[%s8863_s8 + $0x770] sm:$0xff] }
 0x4de   : > { %7812 = vst.msk [vmem:[%s9095_s11 + $0xab8] sm:$0xff] %vm266_vm2, %v7300_v4  ;;  %v7045_v0 = vmax.f32 %v6533_v44, 0.0  ;;  %v6789_v7 = vadd.f32 %v13061_v9, %v6273_v29  ;;  %v6401_v60 = vld [vmem:[#allocation2 + $0xec0] sm:$0xff]  ;;  %v13311_v63 = vpop.f32.mrf.mxu0  ;;  %v13359_v61 = vpop.f32.mrf.mxu3  ;;  %v5248_v3 = vadd.f32 %v13249_v41, %v1126_v48  ;;  %v1401_v44 = vld [vmem:[%s8863_s8 + $0x370] sm:$0xff]  ;;  %v1786_v29 = vld [vmem:[%s8863_s8 + $0xf78] sm:$0xff] }
 0x4df   : > { %7940 = vst.msk [vmem:[%s9095_s11 + $0xeb8] sm:$0xff] %vm266_vm2, %v7428_v51  ;;  %v7173_v22 = vmax.f32 %v6661_v40, 0.0  ;;  %v6917_v45 = vadd.f32 %v13061_v9, %v6401_v60  ;;  %v6018_v14 = vld [vmem:[#allocation2 + $0x2c8] sm:$0xff]  ;;  %v871_v37 = vld [vmem:[#allocation2 + $0x2e0] sm:$0xff]  ;;  %v1658_v40 = vld [vmem:[%s8863_s8 + $0xb78] sm:$0xff] }
 0x4e0   : > { %7557 = vst.msk [vmem:[%s9095_s11 + $0x2c0] sm:$0xff] %vm266_vm2, %v7045_v0  ;;  %v7301_v15 = vmax.f32 %v6789_v7, 0.0  ;;  %v6534_v38 = vadd.f32 %v13061_v9, %v6018_v14  ;;  %v6146_v53 = vld [vmem:[#allocation2 + $0x6c8] sm:$0xff]  ;;  %v999_v4 = vld [vmem:[#allocation2 + $0x6e0] sm:$0xff]  ;;  %8341 = vmatmul.msk.f32.gmra.mxu1 %vm1807_vm1, %v1529_v28  ;;  %v4993_v12 = vadd.f32 %v13275_v23, %v871_v37 }
 0x4e1   : > { %7685 = vst.msk [vmem:[%s9095_s11 + $0x6c0] sm:$0xff] %vm266_vm2, %v7173_v22  ;;  %v7429_v58 = vmax.f32 %v6917_v45, 0.0  ;;  %v6662_v33 = vadd.f32 %v13061_v9, %v6146_v53  ;;  %v6274_v47 = vld [vmem:[#allocation2 + $0xac8] sm:$0xff]  ;;  %8213 = vmatmul.msk.f32.gmra.mxu0 %vm1807_vm1, %v1401_v44  ;;  %v1255_v51 = vld [vmem:[#allocation2 + $0xee0] sm:$0xff]  ;;  %v5121_v41 = vadd.f32 %v13277_v31, %v999_v4  ;;  %v1402_v53 = vld [vmem:[%s8863_s8 + $0x378] sm:$0xff] }
 0x4e2   : > { %7813 = vst.msk [vmem:[%s9095_s11 + $0xac0] sm:$0xff] %vm266_vm2, %v7301_v15  ;;  %v7046_v5 = vmax.f32 %v6534_v38, 0.0  ;;  %v6790_v57 = vadd.f32 %v13061_v9, %v6274_v47  ;;  %v6402_v10 = vld [vmem:[#allocation2 + $0xec8] sm:$0xff]  ;;  %8470 = vmatmul.msk.f32.gmra.mxu2 %vm1807_vm1, %v1658_v40  ;;  %8598 = vmatmul.msk.f32.gmra.mxu3 %vm1807_vm1, %v1786_v29  ;;  %v5377_v23 = vadd.f32 %v13283_v27, %v1255_v51  ;;  %v1403_v4 = vld [vmem:[%s8863_s8 + $0x380] sm:$0xff] }
 0x4e3   : > { %7941 = vst.msk [vmem:[%s9095_s11 + $0xec0] sm:$0xff] %vm266_vm2, %v7429_v58  ;;  %v7174_v24 = vmax.f32 %v6662_v33, 0.0  ;;  %v6918_v43 = vadd.f32 %v13061_v9, %v6402_v10  ;;  %v6019_v55 = vld [vmem:[#allocation2 + $0x2d0] sm:$0xff]  ;;  %v872_v0 = vld [vmem:[#allocation2 + $0x2e8] sm:$0xff]  ;;  %v1659_v10 = vld [vmem:[%s8863_s8 + $0xb80] sm:$0xff] }
 0x4e4   : > { %7558 = vst.msk [vmem:[%s9095_s11 + $0x2c8] sm:$0xff] %vm266_vm2, %v7046_v5  ;;  %v7302_v34 = vmax.f32 %v6790_v57, 0.0  ;;  %v6535_v36 = vadd.f32 %v13061_v9, %v6019_v55  ;;  %v4994_v31 = vadd.f32 %v13311_v63, %v872_v0  ;;  %v1530_v63 = vld [vmem:[%s8863_s8 + $0x778] sm:$0xff]  ;;  %v1000_v48 = vld [vmem:[#allocation2 + $0x6e8] sm:$0xff]  ;;  %v1531_v44 = vld [vmem:[%s8863_s8 + $0x780] sm:$0xff] }
 0x4e5   : > { %7686 = vst.msk [vmem:[%s9095_s11 + $0x6c8] sm:$0xff] %vm266_vm2, %v7174_v24  ;;  %v7430_v59 = vmax.f32 %v6918_v43, 0.0  ;;  %v13385_v22 = vpop.f32.mrf.mxu1  ;;  %v13389_v2 = vpop.f32.mrf.mxu2  ;;  %v1256_v29 = vld [vmem:[#allocation2 + $0xee8] sm:$0xff] }
 0x4e6   : > { %7814 = vst.msk [vmem:[%s9095_s11 + $0xac8] sm:$0xff] %vm266_vm2, %v7302_v34  ;;  %v7047_v62 = vmax.f32 %v6535_v36, 0.0  ;;  %v13351_v17 = vpop.f32.mrf.mxu0  ;;  %v13391_v15 = vpop.f32.mrf.mxu3  ;;  %v1788_v0 = vld [vmem:[%s8863_s8 + $0xf88] sm:$0xff] }
 0x4e7   : > { %7942 = vst.msk [vmem:[%s9095_s11 + $0xec8] sm:$0xff] %vm266_vm2, %v7430_v59 }
 0x4e8   : > { %7559 = vst.msk [vmem:[%s9095_s11 + $0x2d0] sm:$0xff] %vm266_vm2, %v7047_v62  ;;  %8342 = vmatmul.msk.f32.gmra.mxu1 %vm1807_vm1, %v1530_v63 }
 0x4e9   : > { %5632 = vst.msk [vmem:[#allocation2 + $0x6d0] sm:$0xff] %vm266_vm2, %v5119_v20  ;;  %8214 = vmatmul.msk.f32.gmra.mxu0 %vm1807_vm1, %v1402_v53  ;;  %v1257_v53 = vld [vmem:[#allocation2 + $0xef0] sm:$0xff] }
 0x4ea   : > { %5760 = vst.msk [vmem:[#allocation2 + $0xad0] sm:$0xff] %vm266_vm2, %v5247_v16  ;;  %8471 = vmatmul.msk.f32.gmra.mxu2 %vm1807_vm1, %v1659_v10  ;;  %8599 = vmatmul.msk.f32.gmra.mxu3 %vm1807_vm1, %v1787_v39  ;;  %v5379_v10 = vadd.f32 %v13359_v61, %v1257_v53  ;;  %v1130_v39 = vld [vmem:[#allocation2 + $0xaf8] sm:$0xff] }
 0x4eb   : > { %5888 = vst.msk [vmem:[#allocation2 + $0xed0] sm:$0xff] %vm266_vm2, %v5375_v49  ;;  %v5252_v61 = vadd.f32 %v13389_v2, %v1130_v39 }
 0x4ec   : > { %5505 = vst.msk [vmem:[#allocation2 + $0x2d8] sm:$0xff] %vm266_vm2, %v4992_v25 }
 0x4ed   : > { %5633 = vst.msk [vmem:[#allocation2 + $0x6d8] sm:$0xff] %vm266_vm2, %v5120_v50  ;;  %v13421_v62 = vpop.f32.mrf.mxu1  ;;  %v13426_v25 = vpop.f32.mrf.mxu2 }
 0x4ee   : > { %5761 = vst.msk [vmem:[#allocation2 + $0xad8] sm:$0xff] %vm266_vm2, %v5248_v3  ;;  %v13383_v60 = vpop.f32.mrf.mxu0  ;;  %v13428_v32 = vpop.f32.mrf.mxu3 }
 0x4ef   : > { %5889 = vst.msk [vmem:[#allocation2 + $0xed8] sm:$0xff] %vm266_vm2, %v5376_v13 }
 0x4f0   : > { %v6147_v7 = vld [vmem:[#allocation2 + $0x6d0] sm:$0xff]  ;;  %5506 = vst.msk [vmem:[#allocation2 + $0x2e0] sm:$0xff] %vm266_vm2, %v4993_v12  ;;  %v1128_v12 = vld [vmem:[#allocation2 + $0xae8] sm:$0xff]  ;;  %8343 = vmatmul.msk.f32.gmra.mxu1 %vm1807_vm1, %v1531_v44 }
 0x4f1   : > { %v6663_v45 = vadd.f32 %v13061_v9, %v6147_v7  ;;  %v6275_v14 = vld [vmem:[#allocation2 + $0xad0] sm:$0xff]  ;;  %5634 = vst.msk [vmem:[#allocation2 + $0x6e0] sm:$0xff] %vm266_vm2, %v5121_v41  ;;  %8215 = vmatmul.msk.f32.gmra.mxu0 %vm1807_vm1, %v1403_v4  ;;  %v1660_v41 = vld [vmem:[%s8863_s8 + $0xb88] sm:$0xff]  ;;  %v1790_v4 = vld [vmem:[%s8863_s8 + $0xf98] sm:$0xff] }
 0x4f2   : > { %v6791_v27 = vadd.f32 %v13061_v9, %v6275_v14  ;;  %v6403_v38 = vld [vmem:[#allocation2 + $0xed0] sm:$0xff]  ;;  %5762 = vst.msk [vmem:[#allocation2 + $0xae0] sm:$0xff] %vm266_vm2, %v5249_v30  ;;  %8472 = vmatmul.msk.f32.gmra.mxu2 %vm1807_vm1, %v1660_v41  ;;  %8600 = vmatmul.msk.f32.gmra.mxu3 %vm1807_vm1, %v1788_v0 }
 0x4f3   : > { %v7175_v58 = vmax.f32 %v6663_v45, 0.0  ;;  %v6919_v33 = vadd.f32 %v13061_v9, %v6403_v38  ;;  %v6020_v47 = vld [vmem:[#allocation2 + $0x2d8] sm:$0xff]  ;;  %5890 = vst.msk [vmem:[#allocation2 + $0xee0] sm:$0xff] %vm266_vm2, %v5377_v23  ;;  %v5122_v23 = vadd.f32 %v13313_v52, %v1000_v48  ;;  %v873_v7 = vld [vmem:[#allocation2 + $0x2f0] sm:$0xff]  ;;  %v5250_v45 = vadd.f32 %v13318_v54, %v1128_v12 }
 0x4f4   : > { %v7303_v26 = vmax.f32 %v6791_v27, 0.0  ;;  %v6536_v5 = vadd.f32 %v13061_v9, %v6020_v47  ;;  %v6148_v57 = vld [vmem:[#allocation2 + $0x6d8] sm:$0xff]  ;;  %5507 = vst.msk [vmem:[#allocation2 + $0x2e8] sm:$0xff] %vm266_vm2, %v4994_v31  ;;  %v1001_v14 = vld [vmem:[#allocation2 + $0x6f0] sm:$0xff]  ;;  %v5378_v27 = vadd.f32 %v13320_v42, %v1256_v29  ;;  %v4995_v52 = vadd.f32 %v13351_v17, %v873_v7  ;;  %v13523_v29 = vld [vmem:[#allocation5] ss:$0 sm:$0xff] }
 0x4f5   : > { %7687 = vst.msk [vmem:[%s9095_s11 + $0x6d0] sm:$0xff] %vm266_vm2, %v7175_v58  ;;  %v7431_v21 = vmax.f32 %v6919_v33, 0.0  ;;  %v6664_v24 = vadd.f32 %v13061_v9, %v6148_v57  ;;  %v6276_v43 = vld [vmem:[#allocation2 + $0xad8] sm:$0xff]  ;;  %v1129_v38 = vld [vmem:[#allocation2 + $0xaf0] sm:$0xff]  ;;  %v13461_v58 = vpop.f32.mrf.mxu1  ;;  %v5123_v54 = vadd.f32 %v13353_v8, %v1001_v14  ;;  %v13465_v47 = vpop.f32.mrf.mxu2  ;;  %v1532_v57 = vld [vmem:[%s8863_s8 + $0x788] sm:$0xff] }
 0x4f6   : > { %7815 = vst.msk [vmem:[%s9095_s11 + $0xad0] sm:$0xff] %vm266_vm2, %v7303_v26  ;;  %v7048_v55 = vmax.f32 %v6536_v5, 0.0  ;;  %v6792_v6 = vadd.f32 %v13061_v9, %v6276_v43  ;;  %v6404_v34 = vld [vmem:[#allocation2 + $0xed8] sm:$0xff]  ;;  %v13419_v46 = vpop.f32.mrf.mxu0  ;;  %v13467_v42 = vpop.f32.mrf.mxu3  ;;  %v5251_v17 = vadd.f32 %v13357_v35, %v1129_v38  ;;  %v1404_v5 = vld [vmem:[%s8863_s8 + $0x388] sm:$0xff]  ;;  %v1789_v43 = vld [vmem:[%s8863_s8 + $0xf90] sm:$0xff] }
 0x4f7   : > { %7943 = vst.msk [vmem:[%s9095_s11 + $0xed0] sm:$0xff] %vm266_vm2, %v7431_v21  ;;  %v7176_v36 = vmax.f32 %v6664_v24, 0.0  ;;  %v6920_v56 = vadd.f32 %v13061_v9, %v6404_v34  ;;  %v6021_v11 = vld [vmem:[#allocation2 + $0x2e0] sm:$0xff]  ;;  %v874_v33 = vld [vmem:[#allocation2 + $0x2f8] sm:$0xff]  ;;  %v1661_v24 = vld [vmem:[%s8863_s8 + $0xb90] sm:$0xff] }
 0x4f8   : > { %7560 = vst.msk [vmem:[%s9095_s11 + $0x2d8] sm:$0xff] %vm266_vm2, %v7048_v55  ;;  %v7304_v19 = vmax.f32 %v6792_v6, 0.0  ;;  %v6537_v59 = vadd.f32 %v13061_v9, %v6021_v11  ;;  %v6149_v20 = vld [vmem:[#allocation2 + $0x6e0] sm:$0xff]  ;;  %v1002_v26 = vld [vmem:[#allocation2 + $0x6f8] sm:$0xff]  ;;  %8344 = vmatmul.msk.f32.gmra.mxu1 %vm1807_vm1, %v1532_v57  ;;  %v4996_v8 = vadd.f32 %v13383_v60, %v874_v33 }
 0x4f9   : > { %7688 = vst.msk [vmem:[%s9095_s11 + $0x6d8] sm:$0xff] %vm266_vm2, %v7176_v36  ;;  %v7432_v16 = vmax.f32 %v6920_v56, 0.0  ;;  %v6665_v18 = vadd.f32 %v13061_v9, %v6149_v20  ;;  %v6277_v49 = vld [vmem:[#allocation2 + $0xae0] sm:$0xff]  ;;  %8216 = vmatmul.msk.f32.gmra.mxu0 %vm1807_vm1, %v1404_v5  ;;  %v1258_v21 = vld [vmem:[#allocation2 + $0xef8] sm:$0xff]  ;;  %v5124_v35 = vadd.f32 %v13385_v22, %v1002_v26  ;;  %v1405_v20 = vld [vmem:[%s8863_s8 + $0x390] sm:$0xff] }
 0x4fa   : > { %7816 = vst.msk [vmem:[%s9095_s11 + $0xad8] sm:$0xff] %vm266_vm2, %v7304_v19  ;;  %v7049_v50 = vmax.f32 %v6537_v59, 0.0  ;;  %v6793_v37 = vadd.f32 %v13061_v9, %v6277_v49  ;;  %v6405_v3 = vld [vmem:[#allocation2 + $0xee0] sm:$0xff]  ;;  %8473 = vmatmul.msk.f32.gmra.mxu2 %vm1807_vm1, %v1661_v24  ;;  %8601 = vmatmul.msk.f32.gmra.mxu3 %vm1807_vm1, %v1789_v43  ;;  %v5380_v60 = vadd.f32 %v13391_v15, %v1258_v21  ;;  %v1406_v26 = vld [vmem:[%s8863_s8 + $0x398] sm:$0xff] }
 0x4fb   : > { %7944 = vst.msk [vmem:[%s9095_s11 + $0xed8] sm:$0xff] %vm266_vm2, %v7432_v16  ;;  %v7177_v28 = vmax.f32 %v6665_v18, 0.0  ;;  %v6921_v13 = vadd.f32 %v13061_v9, %v6405_v3  ;;  %v6022_v1 = vld [vmem:[#allocation2 + $0x2e8] sm:$0xff]  ;;  %v875_v55 = vld [vmem:[#allocation2 + $0x300] sm:$0xff]  ;;  %v1662_v3 = vld [vmem:[%s8863_s8 + $0xb98] sm:$0xff] }
 0x4fc   : > { %7561 = vst.msk [vmem:[%s9095_s11 + $0x2e0] sm:$0xff] %vm266_vm2, %v7049_v50  ;;  %v7305_v51 = vmax.f32 %v6793_v37, 0.0  ;;  %v6538_v40 = vadd.f32 %v13061_v9, %v6022_v1  ;;  %v4997_v22 = vadd.f32 %v13419_v46, %v875_v55  ;;  %v1533_v46 = vld [vmem:[%s8863_s8 + $0x790] sm:$0xff]  ;;  %v1003_v38 = vld [vmem:[#allocation2 + $0x700] sm:$0xff]  ;;  %v1534_v5 = vld [vmem:[%s8863_s8 + $0x798] sm:$0xff] }
 0x4fd   : > { %7689 = vst.msk [vmem:[%s9095_s11 + $0x6e0] sm:$0xff] %vm266_vm2, %v7177_v28  ;;  %v7433_v30 = vmax.f32 %v6921_v13, 0.0  ;;  %v13493_v36 = vpop.f32.mrf.mxu1  ;;  %v13497_v2 = vpop.f32.mrf.mxu2  ;;  %v1259_v43 = vld [vmem:[#allocation2 + $0xf00] sm:$0xff] }
 0x4fe   : > { %7817 = vst.msk [vmem:[%s9095_s11 + $0xae0] sm:$0xff] %vm266_vm2, %v7305_v51  ;;  %v7050_v31 = vmax.f32 %v6538_v40, 0.0  ;;  %v13459_v63 = vpop.f32.mrf.mxu0  ;;  %v13499_v19 = vpop.f32.mrf.mxu3  ;;  %v1791_v55 = vld [vmem:[%s8863_s8 + $0xfa0] sm:$0xff] }
 0x4ff   : > { %7945 = vst.msk [vmem:[%s9095_s11 + $0xee0] sm:$0xff] %vm266_vm2, %v7433_v30 }
 0x500   : > { %7562 = vst.msk [vmem:[%s9095_s11 + $0x2e8] sm:$0xff] %vm266_vm2, %v7050_v31  ;;  %8345 = vmatmul.msk.f32.gmra.mxu1 %vm1807_vm1, %v1533_v46 }
 0x501   : > { %5635 = vst.msk [vmem:[#allocation2 + $0x6e8] sm:$0xff] %vm266_vm2, %v5122_v23  ;;  %8217 = vmatmul.msk.f32.gmra.mxu0 %vm1807_vm1, %v1405_v20  ;;  %v1260_v20 = vld [vmem:[#allocation2 + $0xf08] sm:$0xff] }
 0x502   : > { %5763 = vst.msk [vmem:[#allocation2 + $0xae8] sm:$0xff] %vm266_vm2, %v5250_v45  ;;  %8474 = vmatmul.msk.f32.gmra.mxu2 %vm1807_vm1, %v1662_v3  ;;  %8602 = vmatmul.msk.f32.gmra.mxu3 %vm1807_vm1, %v1790_v4  ;;  %v5382_v3 = vadd.f32 %v13467_v42, %v1260_v20  ;;  %v1133_v4 = vld [vmem:[#allocation2 + $0xb10] sm:$0xff] }
 0x503   : > { %5891 = vst.msk [vmem:[#allocation2 + $0xee8] sm:$0xff] %vm266_vm2, %v5378_v27  ;;  %v5255_v42 = vadd.f32 %v13497_v2, %v1133_v4 }
 0x504   : > { %5508 = vst.msk [vmem:[#allocation2 + $0x2f0] sm:$0xff] %vm266_vm2, %v4995_v52 }
 0x505   : > { %5636 = vst.msk [vmem:[#allocation2 + $0x6f0] sm:$0xff] %vm266_vm2, %v5123_v54  ;;  %v13531_v31 = vpop.f32.mrf.mxu1  ;;  %v13536_v52 = vpop.f32.mrf.mxu2 }
 0x506   : > { %5764 = vst.msk [vmem:[#allocation2 + $0xaf0] sm:$0xff] %vm266_vm2, %v5251_v17  ;;  %v13491_v34 = vpop.f32.mrf.mxu0  ;;  %v13538_v53 = vpop.f32.mrf.mxu3 }
 0x507   : > { %5892 = vst.msk [vmem:[#allocation2 + $0xef0] sm:$0xff] %vm266_vm2, %v5379_v10 }
 0x508   : > { %v6150_v6 = vld [vmem:[#allocation2 + $0x6e8] sm:$0xff]  ;;  %5509 = vst.msk [vmem:[#allocation2 + $0x2f8] sm:$0xff] %vm266_vm2, %v4996_v8  ;;  %v1131_v8 = vld [vmem:[#allocation2 + $0xb00] sm:$0xff]  ;;  %8346 = vmatmul.msk.f32.gmra.mxu1 %vm1807_vm1, %v1534_v5 }
 0x509   : > { %v6666_v56 = vadd.f32 %v13061_v9, %v6150_v6  ;;  %v6278_v11 = vld [vmem:[#allocation2 + $0xae8] sm:$0xff]  ;;  %5637 = vst.msk [vmem:[#allocation2 + $0x6f8] sm:$0xff] %vm266_vm2, %v5124_v35  ;;  %8218 = vmatmul.msk.f32.gmra.mxu0 %vm1807_vm1, %v1406_v26  ;;  %v1663_v35 = vld [vmem:[%s8863_s8 + $0xba0] sm:$0xff]  ;;  %v1793_v26 = vld [vmem:[%s8863_s8 + $0xfb0] sm:$0xff] }
 0x50a   : > { %v6794_v15 = vadd.f32 %v13061_v9, %v6278_v11  ;;  %v6406_v59 = vld [vmem:[#allocation2 + $0xee8] sm:$0xff]  ;;  %5765 = vst.msk [vmem:[#allocation2 + $0xaf8] sm:$0xff] %vm266_vm2, %v5252_v61  ;;  %8475 = vmatmul.msk.f32.gmra.mxu2 %vm1807_vm1, %v1663_v35  ;;  %8603 = vmatmul.msk.f32.gmra.mxu3 %vm1807_vm1, %v1791_v55 }
 0x50b   : > { %v7178_v16 = vmax.f32 %v6666_v56, 0.0  ;;  %v6922_v18 = vadd.f32 %v13061_v9, %v6406_v59  ;;  %v6023_v49 = vld [vmem:[#allocation2 + $0x2f0] sm:$0xff]  ;;  %5893 = vst.msk [vmem:[#allocation2 + $0xef8] sm:$0xff] %vm266_vm2, %v5380_v60  ;;  %v5125_v60 = vadd.f32 %v13421_v62, %v1003_v38  ;;  %v876_v6 = vld [vmem:[#allocation2 + $0x308] sm:$0xff]  ;;  %v5253_v56 = vadd.f32 %v13426_v25, %v1131_v8 }
 0x50c   : > { %v7306_v48 = vmax.f32 %v6794_v15, 0.0  ;;  %v6539_v50 = vadd.f32 %v13061_v9, %v6023_v49  ;;  %v6151_v37 = vld [vmem:[#allocation2 + $0x6f0] sm:$0xff]  ;;  %5510 = vst.msk [vmem:[#allocation2 + $0x300] sm:$0xff] %vm266_vm2, %v4997_v22  ;;  %v1004_v11 = vld [vmem:[#allocation2 + $0x708] sm:$0xff]  ;;  %v5381_v15 = vadd.f32 %v13428_v32, %v1259_v43  ;;  %v4998_v62 = vadd.f32 %v13459_v63, %v876_v6 }
 0x50d   : > { %7690 = vst.msk [vmem:[%s9095_s11 + $0x6e8] sm:$0xff] %vm266_vm2, %v7178_v16  ;;  %v7434_v44 = vmax.f32 %v6922_v18, 0.0  ;;  %v6667_v28 = vadd.f32 %v13061_v9, %v6151_v37  ;;  %v6279_v13 = vld [vmem:[#allocation2 + $0xaf0] sm:$0xff]  ;;  %v1132_v59 = vld [vmem:[#allocation2 + $0xb08] sm:$0xff]  ;;  %v13571_v16 = vpop.f32.mrf.mxu1  ;;  %v5126_v25 = vadd.f32 %v13461_v58, %v1004_v11  ;;  %v13575_v49 = vpop.f32.mrf.mxu2  ;;  %v1535_v37 = vld [vmem:[%s8863_s8 + $0x7a0] sm:$0xff] }
 0x50e   : > { %7818 = vst.msk [vmem:[%s9095_s11 + $0xae8] sm:$0xff] %vm266_vm2, %v7306_v48  ;;  %v7051_v1 = vmax.f32 %v6539_v50, 0.0  ;;  %v6795_v12 = vadd.f32 %v13061_v9, %v6279_v13  ;;  %v6407_v51 = vld [vmem:[#allocation2 + $0xef0] sm:$0xff]  ;;  %v13529_v9 = vpop.f32.mrf.mxu0  ;;  %v13577_v32 = vpop.f32.mrf.mxu3  ;;  %v5254_v63 = vadd.f32 %v13465_v47, %v1132_v59  ;;  %v1407_v50 = vld [vmem:[%s8863_s8 + $0x3a0] sm:$0xff]  ;;  %v1792_v13 = vld [vmem:[%s8863_s8 + $0xfa8] sm:$0xff] }
 0x50f   : > { %7946 = vst.msk [vmem:[%s9095_s11 + $0xee8] sm:$0xff] %vm266_vm2, %v7434_v44  ;;  %v7179_v40 = vmax.f32 %v6667_v28, 0.0  ;;  %v6923_v41 = vadd.f32 %v13523_v29, %v6407_v51  ;;  %v6024_v0 = vld [vmem:[#allocation2 + $0x2f8] sm:$0xff]  ;;  %v877_v18 = vld [vmem:[#allocation2 + $0x310] sm:$0xff]  ;;  %v1664_v28 = vld [vmem:[%s8863_s8 + $0xba8] sm:$0xff] }
 0x510   : > { %7563 = vst.msk [vmem:[%s9095_s11 + $0x2f0] sm:$0xff] %vm266_vm2, %v7051_v1  ;;  %v7307_v30 = vmax.f32 %v6795_v12, 0.0  ;;  %v6540_v23 = vadd.f32 %v13523_v29, %v6024_v0  ;;  %v6152_v7 = vld [vmem:[#allocation2 + $0x6f8] sm:$0xff]  ;;  %v1005_v48 = vld [vmem:[#allocation2 + $0x710] sm:$0xff]  ;;  %8347 = vmatmul.msk.f32.gmra.mxu1 %vm1807_vm1, %v1535_v37  ;;  %v4999_v58 = vadd.f32 %v13491_v34, %v877_v18 }
 0x511   : > { %7691 = vst.msk [vmem:[%s9095_s11 + $0x6f0] sm:$0xff] %vm266_vm2, %v7179_v40  ;;  %v7435_v45 = vmax.f32 %v6923_v41, 0.0  ;;  %v6668_v14 = vadd.f32 %v13523_v29, %v6152_v7  ;;  %v6280_v27 = vld [vmem:[#allocation2 + $0xaf8] sm:$0xff]  ;;  %8219 = vmatmul.msk.f32.gmra.mxu0 %vm1807_vm1, %v1407_v50  ;;  %v1261_v44 = vld [vmem:[#allocation2 + $0xf10] sm:$0xff]  ;;  %v5127_v47 = vadd.f32 %v13493_v36, %v1005_v48  ;;  %v1408_v7 = vld [vmem:[%s8863_s8 + $0x3a8] sm:$0xff] }
 0x512   : > { %7819 = vst.msk [vmem:[%s9095_s11 + $0xaf0] sm:$0xff] %vm266_vm2, %v7307_v30  ;;  %v7052_v54 = vmax.f32 %v6540_v23, 0.0  ;;  %v6796_v33 = vadd.f32 %v13523_v29, %v6280_v27  ;;  %v6408_v17 = vld [vmem:[#allocation2 + $0xef8] sm:$0xff]  ;;  %8476 = vmatmul.msk.f32.gmra.mxu2 %vm1807_vm1, %v1664_v28  ;;  %8604 = vmatmul.msk.f32.gmra.mxu3 %vm1807_vm1, %v1792_v13  ;;  %v5383_v34 = vadd.f32 %v13499_v19, %v1261_v44  ;;  %v1409_v48 = vld [vmem:[%s8863_s8 + $0x3b0] sm:$0xff] }
 0x513   : > { %7947 = vst.msk [vmem:[%s9095_s11 + $0xef0] sm:$0xff] %vm266_vm2, %v7435_v45  ;;  %v7180_v57 = vmax.f32 %v6668_v14, 0.0  ;;  %v6924_v10 = vadd.f32 %v13523_v29, %v6408_v17  ;;  %v6025_v39 = vld [vmem:[#allocation2 + $0x300] sm:$0xff]  ;;  %v878_v1 = vld [vmem:[#allocation2 + $0x318] sm:$0xff]  ;;  %v1665_v17 = vld [vmem:[%s8863_s8 + $0xbb0] sm:$0xff] }
 0x514   : > { %7564 = vst.msk [vmem:[%s9095_s11 + $0x2f8] sm:$0xff] %vm266_vm2, %v7052_v54  ;;  %v7308_v21 = vmax.f32 %v6796_v33, 0.0  ;;  %v6541_v24 = vadd.f32 %v13523_v29, %v6025_v39  ;;  %v5000_v36 = vadd.f32 %v13529_v9, %v878_v1  ;;  %v1536_v9 = vld [vmem:[%s8863_s8 + $0x7a8] sm:$0xff]  ;;  %v1006_v59 = vld [vmem:[#allocation2 + $0x718] sm:$0xff]  ;;  %v1537_v50 = vld [vmem:[%s8863_s8 + $0x7b0] sm:$0xff] }
 0x515   : > { %7692 = vst.msk [vmem:[%s9095_s11 + $0x6f8] sm:$0xff] %vm266_vm2, %v7180_v57  ;;  %v7436_v61 = vmax.f32 %v6924_v10, 0.0  ;;  %v13603_v40 = vpop.f32.mrf.mxu1  ;;  %v13607_v2 = vpop.f32.mrf.mxu2  ;;  %v1262_v13 = vld [vmem:[#allocation2 + $0xf18] sm:$0xff] }
 0x516   : > { %7820 = vst.msk [vmem:[%s9095_s11 + $0xaf8] sm:$0xff] %vm266_vm2, %v7308_v21  ;;  %v7053_v22 = vmax.f32 %v6541_v24, 0.0  ;;  %v13569_v46 = vpop.f32.mrf.mxu0  ;;  %v13609_v30 = vpop.f32.mrf.mxu3  ;;  %v1794_v1 = vld [vmem:[%s8863_s8 + $0xfb8] sm:$0xff] }
 0x517   : > { %7948 = vst.msk [vmem:[%s9095_s11 + $0xef8] sm:$0xff] %vm266_vm2, %v7436_v61 }
 0x518   : > { %7565 = vst.msk [vmem:[%s9095_s11 + $0x300] sm:$0xff] %vm266_vm2, %v7053_v22  ;;  %8348 = vmatmul.msk.f32.gmra.mxu1 %vm1807_vm1, %v1536_v9 }
 0x519   : > { %5638 = vst.msk [vmem:[#allocation2 + $0x700] sm:$0xff] %vm266_vm2, %v5125_v60  ;;  %8220 = vmatmul.msk.f32.gmra.mxu0 %vm1807_vm1, %v1408_v7  ;;  %v1263_v7 = vld [vmem:[#allocation2 + $0xf20] sm:$0xff] }
 0x51a   : > { %5766 = vst.msk [vmem:[#allocation2 + $0xb00] sm:$0xff] %vm266_vm2, %v5253_v56  ;;  %8477 = vmatmul.msk.f32.gmra.mxu2 %vm1807_vm1, %v1665_v17  ;;  %8605 = vmatmul.msk.f32.gmra.mxu3 %vm1807_vm1, %v1793_v26  ;;  %v5385_v17 = vadd.f32 %v13577_v32, %v1263_v7  ;;  %v1136_v26 = vld [vmem:[#allocation2 + $0xb28] sm:$0xff] }
 0x51b   : > { %5894 = vst.msk [vmem:[#allocation2 + $0xf00] sm:$0xff] %vm266_vm2, %v5381_v15  ;;  %v5258_v32 = vadd.f32 %v13607_v2, %v1136_v26 }
 0x51c   : > { %5511 = vst.msk [vmem:[#allocation2 + $0x308] sm:$0xff] %vm266_vm2, %v4998_v62 }
 0x51d   : > { %5639 = vst.msk [vmem:[#allocation2 + $0x708] sm:$0xff] %vm266_vm2, %v5126_v25  ;;  %v13639_v22 = vpop.f32.mrf.mxu1  ;;  %v13644_v62 = vpop.f32.mrf.mxu2 }
 0x51e   : > { %5767 = vst.msk [vmem:[#allocation2 + $0xb08] sm:$0xff] %vm266_vm2, %v5254_v63  ;;  %v13601_v51 = vpop.f32.mrf.mxu0  ;;  %v13646_v20 = vpop.f32.mrf.mxu3 }
 0x51f   : > { %5895 = vst.msk [vmem:[#allocation2 + $0xf08] sm:$0xff] %vm266_vm2, %v5382_v3 }
 0x520   : > { %v6153_v12 = vld [vmem:[#allocation2 + $0x700] sm:$0xff]  ;;  %5512 = vst.msk [vmem:[#allocation2 + $0x310] sm:$0xff] %vm266_vm2, %v4999_v58  ;;  %v1134_v58 = vld [vmem:[#allocation2 + $0xb18] sm:$0xff]  ;;  %8349 = vmatmul.msk.f32.gmra.mxu1 %vm1807_vm1, %v1537_v50 }
 0x521   : > { %v6669_v41 = vadd.f32 %v13523_v29, %v6153_v12  ;;  %v6281_v0 = vld [vmem:[#allocation2 + $0xb00] sm:$0xff]  ;;  %5640 = vst.msk [vmem:[#allocation2 + $0x710] sm:$0xff] %vm266_vm2, %v5127_v47  ;;  %8221 = vmatmul.msk.f32.gmra.mxu0 %vm1807_vm1, %v1409_v48  ;;  %v1666_v47 = vld [vmem:[%s8863_s8 + $0xbb8] sm:$0xff]  ;;  %v1796_v48 = vld [vmem:[%s8863_s8 + $0xfc8] sm:$0xff] }
 0x522   : > { %v6797_v19 = vadd.f32 %v13523_v29, %v6281_v0  ;;  %v6409_v23 = vld [vmem:[#allocation2 + $0xf00] sm:$0xff]  ;;  %5768 = vst.msk [vmem:[#allocation2 + $0xb10] sm:$0xff] %vm266_vm2, %v5255_v42  ;;  %8478 = vmatmul.msk.f32.gmra.mxu2 %vm1807_vm1, %v1666_v47  ;;  %8606 = vmatmul.msk.f32.gmra.mxu3 %vm1807_vm1, %v1794_v1 }
 0x523   : > { %v7181_v45 = vmax.f32 %v6669_v41, 0.0  ;;  %v6925_v14 = vadd.f32 %v13523_v29, %v6409_v23  ;;  %v6026_v27 = vld [vmem:[#allocation2 + $0x308] sm:$0xff]  ;;  %5896 = vst.msk [vmem:[#allocation2 + $0xf10] sm:$0xff] %vm266_vm2, %v5383_v34  ;;  %v5128_v34 = vadd.f32 %v13531_v31, %v1006_v59  ;;  %v879_v12 = vld [vmem:[#allocation2 + $0x320] sm:$0xff]  ;;  %v5256_v41 = vadd.f32 %v13536_v52, %v1134_v58 }
 0x524   : > { %v7309_v38 = vmax.f32 %v6797_v19, 0.0  ;;  %v6542_v54 = vadd.f32 %v13523_v29, %v6026_v27  ;;  %v6154_v33 = vld [vmem:[#allocation2 + $0x708] sm:$0xff]  ;;  %5513 = vst.msk [vmem:[#allocation2 + $0x318] sm:$0xff] %vm266_vm2, %v5000_v36  ;;  %v1007_v0 = vld [vmem:[#allocation2 + $0x720] sm:$0xff]  ;;  %v5384_v19 = vadd.f32 %v13538_v53, %v1262_v13  ;;  %v5001_v31 = vadd.f32 %v13569_v46, %v879_v12 }
 0x525   : > { %7693 = vst.msk [vmem:[%s9095_s11 + $0x700] sm:$0xff] %vm266_vm2, %v7181_v45  ;;  %v7437_v5 = vmax.f32 %v6925_v14, 0.0  ;;  %v6670_v57 = vadd.f32 %v13523_v29, %v6154_v33  ;;  %v6282_v10 = vld [vmem:[#allocation2 + $0xb08] sm:$0xff]  ;;  %v1135_v23 = vld [vmem:[#allocation2 + $0xb20] sm:$0xff]  ;;  %v13679_v45 = vpop.f32.mrf.mxu1  ;;  %v5129_v52 = vadd.f32 %v13571_v16, %v1007_v0  ;;  %v13683_v27 = vpop.f32.mrf.mxu2  ;;  %v1538_v33 = vld [vmem:[%s8863_s8 + $0x7b8] sm:$0xff] }
 0x526   : > { %7821 = vst.msk [vmem:[%s9095_s11 + $0xb00] sm:$0xff] %vm266_vm2, %v7309_v38  ;;  %v7054_v39 = vmax.f32 %v6542_v54, 0.0  ;;  %v6798_v8 = vadd.f32 %v13523_v29, %v6282_v10  ;;  %v6410_v21 = vld [vmem:[#allocation2 + $0xf08] sm:$0xff]  ;;  %v13637_v6 = vpop.f32.mrf.mxu0  ;;  %v13685_v53 = vpop.f32.mrf.mxu3  ;;  %v5257_v46 = vadd.f32 %v13575_v49, %v1135_v23  ;;  %v1410_v54 = vld [vmem:[%s8863_s8 + $0x3b8] sm:$0xff]  ;;  %v1795_v10 = vld [vmem:[%s8863_s8 + $0xfc0] sm:$0xff] }
 0x527   : > { %7949 = vst.msk [vmem:[%s9095_s11 + $0xf00] sm:$0xff] %vm266_vm2, %v7437_v5  ;;  %v7182_v24 = vmax.f32 %v6670_v57, 0.0  ;;  %v6926_v43 = vadd.f32 %v13523_v29, %v6410_v21  ;;  %v6027_v35 = vld [vmem:[#allocation2 + $0x310] sm:$0xff]  ;;  %v880_v14 = vld [vmem:[#allocation2 + $0x328] sm:$0xff]  ;;  %v1667_v57 = vld [vmem:[%s8863_s8 + $0xbc0] sm:$0xff] }
 0x528   : > { %7566 = vst.msk [vmem:[%s9095_s11 + $0x308] sm:$0xff] %vm266_vm2, %v7054_v39  ;;  %v7310_v55 = vmax.f32 %v6798_v8, 0.0  ;;  %v6543_v61 = vadd.f32 %v13523_v29, %v6027_v35  ;;  %v6155_v60 = vld [vmem:[#allocation2 + $0x710] sm:$0xff]  ;;  %v1008_v38 = vld [vmem:[#allocation2 + $0x728] sm:$0xff]  ;;  %8350 = vmatmul.msk.f32.gmra.mxu1 %vm1807_vm1, %v1538_v33  ;;  %v5002_v16 = vadd.f32 %v13601_v51, %v880_v14 }
 0x529   : > { %7694 = vst.msk [vmem:[%s9095_s11 + $0x708] sm:$0xff] %vm266_vm2, %v7182_v24  ;;  %v7438_v56 = vmax.f32 %v6926_v43, 0.0  ;;  %v6671_v11 = vadd.f32 %v13523_v29, %v6155_v60  ;;  %v6283_v15 = vld [vmem:[#allocation2 + $0xb10] sm:$0xff]  ;;  %8222 = vmatmul.msk.f32.gmra.mxu0 %vm1807_vm1, %v1410_v54  ;;  %v1264_v5 = vld [vmem:[#allocation2 + $0xf28] sm:$0xff]  ;;  %v5130_v49 = vadd.f32 %v13603_v40, %v1008_v38  ;;  %v1411_v60 = vld [vmem:[%s8863_s8 + $0x3c0] sm:$0xff] }
 0x52a   : > { %7822 = vst.msk [vmem:[%s9095_s11 + $0xb08] sm:$0xff] %vm266_vm2, %v7310_v55  ;;  %v7055_v25 = vmax.f32 %v6543_v61, 0.0  ;;  %v6799_v18 = vadd.f32 %v13523_v29, %v6283_v15  ;;  %v6411_v63 = vld [vmem:[#allocation2 + $0xf10] sm:$0xff]  ;;  %8479 = vmatmul.msk.f32.gmra.mxu2 %vm1807_vm1, %v1667_v57  ;;  %8607 = vmatmul.msk.f32.gmra.mxu3 %vm1807_vm1, %v1795_v10  ;;  %v5386_v51 = vadd.f32 %v13609_v30, %v1264_v5  ;;  %v1412_v38 = vld [vmem:[%s8863_s8 + $0x3c8] sm:$0xff] }
 0x52b   : > { %7950 = vst.msk [vmem:[%s9095_s11 + $0xf08] sm:$0xff] %vm266_vm2, %v7438_v56  ;;  %v7183_v37 = vmax.f32 %v6671_v11, 0.0  ;;  %v6927_v3 = vadd.f32 %v13523_v29, %v6411_v63  ;;  %v6028_v4 = vld [vmem:[#allocation2 + $0x318] sm:$0xff]  ;;  %v881_v39 = vld [vmem:[#allocation2 + $0x330] sm:$0xff]  ;;  %v1668_v63 = vld [vmem:[%s8863_s8 + $0xbc8] sm:$0xff] }
 0x52c   : > { %7567 = vst.msk [vmem:[%s9095_s11 + $0x310] sm:$0xff] %vm266_vm2, %v7055_v25  ;;  %v7311_v44 = vmax.f32 %v6799_v18, 0.0  ;;  %v6544_v28 = vadd.f32 %v13523_v29, %v6028_v4  ;;  %v5003_v40 = vadd.f32 %v13637_v6, %v881_v39  ;;  %v1539_v6 = vld [vmem:[%s8863_s8 + $0x7c0] sm:$0xff]  ;;  %v1009_v23 = vld [vmem:[#allocation2 + $0x730] sm:$0xff]  ;;  %v1540_v54 = vld [vmem:[%s8863_s8 + $0x7c8] sm:$0xff] }
 0x52d   : > { %7695 = vst.msk [vmem:[%s9095_s11 + $0x710] sm:$0xff] %vm266_vm2, %v7183_v37  ;;  %v7439_v42 = vmax.f32 %v6927_v3, 0.0  ;;  %v13711_v24 = vpop.f32.mrf.mxu1  ;;  %v13715_v2 = vpop.f32.mrf.mxu2  ;;  %v1265_v10 = vld [vmem:[#allocation2 + $0xf30] sm:$0xff] }
 0x52e   : > { %7823 = vst.msk [vmem:[%s9095_s11 + $0xb10] sm:$0xff] %vm266_vm2, %v7311_v44  ;;  %v7056_v36 = vmax.f32 %v6544_v28, 0.0  ;;  %v13677_v9 = vpop.f32.mrf.mxu0  ;;  %v13717_v55 = vpop.f32.mrf.mxu3  ;;  %v1797_v39 = vld [vmem:[%s8863_s8 + $0xfd0] sm:$0xff] }
 0x52f   : > { %7951 = vst.msk [vmem:[%s9095_s11 + $0xf10] sm:$0xff] %vm266_vm2, %v7439_v42 }
 0x530   : > { %7568 = vst.msk [vmem:[%s9095_s11 + $0x318] sm:$0xff] %vm266_vm2, %v7056_v36  ;;  %8351 = vmatmul.msk.f32.gmra.mxu1 %vm1807_vm1, %v1539_v6 }
 0x531   : > { %5641 = vst.msk [vmem:[#allocation2 + $0x718] sm:$0xff] %vm266_vm2, %v5128_v34  ;;  %8223 = vmatmul.msk.f32.gmra.mxu0 %vm1807_vm1, %v1411_v60  ;;  %v1266_v60 = vld [vmem:[#allocation2 + $0xf38] sm:$0xff] }
 0x532   : > { %5769 = vst.msk [vmem:[#allocation2 + $0xb18] sm:$0xff] %vm266_vm2, %v5256_v41  ;;  %8480 = vmatmul.msk.f32.gmra.mxu2 %vm1807_vm1, %v1668_v63  ;;  %8608 = vmatmul.msk.f32.gmra.mxu3 %vm1807_vm1, %v1796_v48  ;;  %v5388_v63 = vadd.f32 %v13685_v53, %v1266_v60  ;;  %v1139_v48 = vld [vmem:[#allocation2 + $0xb40] sm:$0xff] }
 0x533   : > { %5897 = vst.msk [vmem:[#allocation2 + $0xf18] sm:$0xff] %vm266_vm2, %v5384_v19  ;;  %v5261_v53 = vadd.f32 %v13715_v2, %v1139_v48 }
 0x534   : > { %5514 = vst.msk [vmem:[#allocation2 + $0x320] sm:$0xff] %vm266_vm2, %v5001_v31 }
 0x535   : > { %5642 = vst.msk [vmem:[#allocation2 + $0x720] sm:$0xff] %vm266_vm2, %v5129_v52  ;;  %v13747_v36 = vpop.f32.mrf.mxu1  ;;  %v13752_v31 = vpop.f32.mrf.mxu2 }
 0x536   : > { %5770 = vst.msk [vmem:[#allocation2 + $0xb20] sm:$0xff] %vm266_vm2, %v5257_v46  ;;  %v13709_v21 = vpop.f32.mrf.mxu0  ;;  %v13754_v7 = vpop.f32.mrf.mxu3 }
 0x537   : > { %5898 = vst.msk [vmem:[#allocation2 + $0xf20] sm:$0xff] %vm266_vm2, %v5385_v17 }
 0x538   : > { %v6156_v8 = vld [vmem:[#allocation2 + $0x718] sm:$0xff]  ;;  %5515 = vst.msk [vmem:[#allocation2 + $0x328] sm:$0xff] %vm266_vm2, %v5002_v16  ;;  %v1137_v16 = vld [vmem:[#allocation2 + $0xb30] sm:$0xff]  ;;  %8352 = vmatmul.msk.f32.gmra.mxu1 %vm1807_vm1, %v1540_v54 }
 0x539   : > { %v6672_v43 = vadd.f32 %v13523_v29, %v6156_v8  ;;  %v6284_v35 = vld [vmem:[#allocation2 + $0xb18] sm:$0xff]  ;;  %5643 = vst.msk [vmem:[#allocation2 + $0x728] sm:$0xff] %vm266_vm2, %v5130_v49  ;;  %8224 = vmatmul.msk.f32.gmra.mxu0 %vm1807_vm1, %v1412_v38  ;;  %v1669_v49 = vld [vmem:[%s8863_s8 + $0xbd0] sm:$0xff]  ;;  %v1799_v38 = vld [vmem:[%s8863_s8 + $0xfe0] sm:$0xff] }
 0x53a   : > { %v6800_v30 = vadd.f32 %v13523_v29, %v6284_v35  ;;  %v6412_v61 = vld [vmem:[#allocation2 + $0xf18] sm:$0xff]  ;;  %5771 = vst.msk [vmem:[#allocation2 + $0xb28] sm:$0xff] %vm266_vm2, %v5258_v32  ;;  %8481 = vmatmul.msk.f32.gmra.mxu2 %vm1807_vm1, %v1669_v49  ;;  %8609 = vmatmul.msk.f32.gmra.mxu3 %vm1807_vm1, %v1797_v39 }
 0x53b   : > { %v7184_v56 = vmax.f32 %v6672_v43, 0.0  ;;  %v6928_v11 = vadd.f32 %v13523_v29, %v6412_v61  ;;  %v6029_v15 = vld [vmem:[#allocation2 + $0x320] sm:$0xff]  ;;  %5899 = vst.msk [vmem:[#allocation2 + $0xf28] sm:$0xff] %vm266_vm2, %v5386_v51  ;;  %v5131_v51 = vadd.f32 %v13639_v22, %v1009_v23  ;;  %v882_v8 = vld [vmem:[#allocation2 + $0x338] sm:$0xff]  ;;  %v5259_v43 = vadd.f32 %v13644_v62, %v1137_v16 }
 0x53c   : > { %v7312_v59 = vmax.f32 %v6800_v30, 0.0  ;;  %v6545_v25 = vadd.f32 %v13523_v29, %v6029_v15  ;;  %v6157_v18 = vld [vmem:[#allocation2 + $0x720] sm:$0xff]  ;;  %5516 = vst.msk [vmem:[#allocation2 + $0x330] sm:$0xff] %vm266_vm2, %v5003_v40  ;;  %v1010_v35 = vld [vmem:[#allocation2 + $0x738] sm:$0xff]  ;;  %v5387_v30 = vadd.f32 %v13646_v20, %v1265_v10  ;;  %v5004_v22 = vadd.f32 %v13677_v9, %v882_v8 }
 0x53d   : > { %7696 = vst.msk [vmem:[%s9095_s11 + $0x718] sm:$0xff] %vm266_vm2, %v7184_v56  ;;  %v7440_v50 = vmax.f32 %v6928_v11, 0.0  ;;  %v6673_v37 = vadd.f32 %v13523_v29, %v6157_v18  ;;  %v6285_v3 = vld [vmem:[#allocation2 + $0xb20] sm:$0xff]  ;;  %v1138_v61 = vld [vmem:[#allocation2 + $0xb38] sm:$0xff]  ;;  %v13787_v56 = vpop.f32.mrf.mxu1  ;;  %v5132_v62 = vadd.f32 %v13679_v45, %v1010_v35  ;;  %v13791_v15 = vpop.f32.mrf.mxu2  ;;  %v1541_v18 = vld [vmem:[%s8863_s8 + $0x7d0] sm:$0xff] }
 0x53e   : > { %7824 = vst.msk [vmem:[%s9095_s11 + $0xb18] sm:$0xff] %vm266_vm2, %v7312_v59  ;;  %v7057_v4 = vmax.f32 %v6545_v25, 0.0  ;;  %v6801_v58 = vadd.f32 %v13523_v29, %v6285_v3  ;;  %v6413_v44 = vld [vmem:[#allocation2 + $0xf20] sm:$0xff]  ;;  %v13745_v12 = vpop.f32.mrf.mxu0  ;;  %v13793_v20 = vpop.f32.mrf.mxu3  ;;  %v5260_v9 = vadd.f32 %v13683_v27, %v1138_v61  ;;  %v1413_v25 = vld [vmem:[%s8863_s8 + $0x3d0] sm:$0xff]  ;;  %v1798_v3 = vld [vmem:[%s8863_s8 + $0xfd8] sm:$0xff] }
 0x53f   : > { %7952 = vst.msk [vmem:[%s9095_s11 + $0xf18] sm:$0xff] %vm266_vm2, %v7440_v50  ;;  %v7185_v28 = vmax.f32 %v6673_v37, 0.0  ;;  %v6929_v13 = vadd.f32 %v13523_v29, %v6413_v44  ;;  %v6030_v47 = vld [vmem:[#allocation2 + $0x328] sm:$0xff]  ;;  %v883_v11 = vld [vmem:[#allocation2 + $0x340] sm:$0xff]  ;;  %v1670_v37 = vld [vmem:[%s8863_s8 + $0xbd8] sm:$0xff] }
 0x540   : > { %7569 = vst.msk [vmem:[%s9095_s11 + $0x320] sm:$0xff] %vm266_vm2, %v7057_v4  ;;  %v7313_v1 = vmax.f32 %v6801_v58, 0.0  ;;  %v6546_v42 = vadd.f32 %v13523_v29, %v6030_v47  ;;  %v6158_v34 = vld [vmem:[#allocation2 + $0x728] sm:$0xff]  ;;  %v1011_v59 = vld [vmem:[#allocation2 + $0x740] sm:$0xff]  ;;  %8353 = vmatmul.msk.f32.gmra.mxu1 %vm1807_vm1, %v1541_v18  ;;  %v5005_v45 = vadd.f32 %v13709_v21, %v883_v11 }
 0x541   : > { %7697 = vst.msk [vmem:[%s9095_s11 + $0x720] sm:$0xff] %vm266_vm2, %v7185_v28  ;;  %v7441_v41 = vmax.f32 %v6929_v13, 0.0  ;;  %v6674_v0 = vadd.f32 %v13523_v29, %v6158_v34  ;;  %v6286_v19 = vld [vmem:[#allocation2 + $0xb28] sm:$0xff]  ;;  %8225 = vmatmul.msk.f32.gmra.mxu0 %vm1807_vm1, %v1413_v25  ;;  %v1267_v50 = vld [vmem:[#allocation2 + $0xf40] sm:$0xff]  ;;  %v5133_v27 = vadd.f32 %v13711_v24, %v1011_v59  ;;  %v1414_v34 = vld [vmem:[%s8863_s8 + $0x3d8] sm:$0xff] }
 0x542   : > { %7825 = vst.msk [vmem:[%s9095_s11 + $0xb20] sm:$0xff] %vm266_vm2, %v7313_v1  ;;  %v7058_v52 = vmax.f32 %v6546_v42, 0.0  ;;  %v6802_v14 = vadd.f32 %v13523_v29, %v6286_v19  ;;  %v6414_v46 = vld [vmem:[#allocation2 + $0xf28] sm:$0xff]  ;;  %8482 = vmatmul.msk.f32.gmra.mxu2 %vm1807_vm1, %v1670_v37  ;;  %8610 = vmatmul.msk.f32.gmra.mxu3 %vm1807_vm1, %v1798_v3  ;;  %v5389_v21 = vadd.f32 %v13717_v55, %v1267_v50  ;;  %v1415_v59 = vld [vmem:[%s8863_s8 + $0x3e0] sm:$0xff] }
 0x543   : > { %7953 = vst.msk [vmem:[%s9095_s11 + $0xf20] sm:$0xff] %vm266_vm2, %v7441_v41  ;;  %v7186_v33 = vmax.f32 %v6674_v0, 0.0  ;;  %v6930_v17 = vadd.f32 %v13523_v29, %v6414_v46  ;;  %v6031_v26 = vld [vmem:[#allocation2 + $0x330] sm:$0xff]  ;;  %v884_v4 = vld [vmem:[#allocation2 + $0x348] sm:$0xff]  ;;  %v1671_v46 = vld [vmem:[%s8863_s8 + $0xbe0] sm:$0xff] }
 0x544   : > { %7570 = vst.msk [vmem:[%s9095_s11 + $0x328] sm:$0xff] %vm266_vm2, %v7058_v52  ;;  %v7314_v5 = vmax.f32 %v6802_v14, 0.0  ;;  %v6547_v57 = vadd.f32 %v13523_v29, %v6031_v26  ;;  %v5006_v24 = vadd.f32 %v13745_v12, %v884_v4  ;;  %v1542_v12 = vld [vmem:[%s8863_s8 + $0x7d8] sm:$0xff]  ;;  %v1012_v61 = vld [vmem:[#allocation2 + $0x748] sm:$0xff]  ;;  %v1543_v25 = vld [vmem:[%s8863_s8 + $0x7e0] sm:$0xff] }
 0x545   : > { %7698 = vst.msk [vmem:[%s9095_s11 + $0x728] sm:$0xff] %vm266_vm2, %v7186_v33  ;;  %v7442_v32 = vmax.f32 %v6930_v17, 0.0  ;;  %v13819_v28 = vpop.f32.mrf.mxu1  ;;  %v13823_v2 = vpop.f32.mrf.mxu2  ;;  %v1268_v3 = vld [vmem:[#allocation2 + $0xf48] sm:$0xff] }
 0x546   : > { %7826 = vst.msk [vmem:[%s9095_s11 + $0xb28] sm:$0xff] %vm266_vm2, %v7314_v5  ;;  %v7059_v40 = vmax.f32 %v6547_v57, 0.0  ;;  %v13785_v6 = vpop.f32.mrf.mxu0  ;;  %v13825_v1 = vpop.f32.mrf.mxu3  ;;  %v1800_v4 = vld [vmem:[%s8863_s8 + $0xfe8] sm:$0xff] }
 0x547   : > { %7954 = vst.msk [vmem:[%s9095_s11 + $0xf28] sm:$0xff] %vm266_vm2, %v7442_v32 }
 0x548   : > { %7571 = vst.msk [vmem:[%s9095_s11 + $0x330] sm:$0xff] %vm266_vm2, %v7059_v40  ;;  %8354 = vmatmul.msk.f32.gmra.mxu1 %vm1807_vm1, %v1542_v12 }
 0x549   : > { %5644 = vst.msk [vmem:[#allocation2 + $0x730] sm:$0xff] %vm266_vm2, %v5131_v51  ;;  %8226 = vmatmul.msk.f32.gmra.mxu0 %vm1807_vm1, %v1414_v34  ;;  %v1269_v34 = vld [vmem:[#allocation2 + $0xf50] sm:$0xff] }
 0x54a   : > { %5772 = vst.msk [vmem:[#allocation2 + $0xb30] sm:$0xff] %vm266_vm2, %v5259_v43  ;;  %8483 = vmatmul.msk.f32.gmra.mxu2 %vm1807_vm1, %v1671_v46  ;;  %8611 = vmatmul.msk.f32.gmra.mxu3 %vm1807_vm1, %v1799_v38  ;;  %v5391_v46 = vadd.f32 %v13793_v20, %v1269_v34  ;;  %v1142_v38 = vld [vmem:[#allocation2 + $0xb58] sm:$0xff] }
 0x54b   : > { %5900 = vst.msk [vmem:[#allocation2 + $0xf30] sm:$0xff] %vm266_vm2, %v5387_v30  ;;  %v5264_v20 = vadd.f32 %v13823_v2, %v1142_v38 }
 0x54c   : > { %5517 = vst.msk [vmem:[#allocation2 + $0x338] sm:$0xff] %vm266_vm2, %v5004_v22 }
 0x54d   : > { %5645 = vst.msk [vmem:[#allocation2 + $0x738] sm:$0xff] %vm266_vm2, %v5132_v62  ;;  %v13855_v40 = vpop.f32.mrf.mxu1  ;;  %v13860_v22 = vpop.f32.mrf.mxu2 }
 0x54e   : > { %5773 = vst.msk [vmem:[#allocation2 + $0xb38] sm:$0xff] %vm266_vm2, %v5260_v9  ;;  %v13817_v44 = vpop.f32.mrf.mxu0  ;;  %v13862_v60 = vpop.f32.mrf.mxu3 }
 0x54f   : > { %5901 = vst.msk [vmem:[#allocation2 + $0xf38] sm:$0xff] %vm266_vm2, %v5388_v63 }
 0x550   : > { %v6159_v58 = vld [vmem:[#allocation2 + $0x730] sm:$0xff]  ;;  %5518 = vst.msk [vmem:[#allocation2 + $0x340] sm:$0xff] %vm266_vm2, %v5005_v45  ;;  %v1140_v45 = vld [vmem:[#allocation2 + $0xb48] sm:$0xff]  ;;  %8355 = vmatmul.msk.f32.gmra.mxu1 %vm1807_vm1, %v1543_v25 }
 0x551   : > { %v6675_v13 = vadd.f32 %v13523_v29, %v6159_v58  ;;  %v6287_v47 = vld [vmem:[#allocation2 + $0xb30] sm:$0xff]  ;;  %5646 = vst.msk [vmem:[#allocation2 + $0x740] sm:$0xff] %vm266_vm2, %v5133_v27  ;;  %8227 = vmatmul.msk.f32.gmra.mxu0 %vm1807_vm1, %v1415_v59  ;;  %v1672_v27 = vld [vmem:[%s8863_s8 + $0xbe8] sm:$0xff]  ;;  %v1802_v59 = vld [vmem:[%s8863_s8 + $0xff8] sm:$0xff] }
 0x552   : > { %v6803_v55 = vadd.f32 %v13523_v29, %v6287_v47  ;;  %v6415_v42 = vld [vmem:[#allocation2 + $0xf30] sm:$0xff]  ;;  %5774 = vst.msk [vmem:[#allocation2 + $0xb40] sm:$0xff] %vm266_vm2, %v5261_v53  ;;  %8484 = vmatmul.msk.f32.gmra.mxu2 %vm1807_vm1, %v1672_v27  ;;  %8612 = vmatmul.msk.f32.gmra.mxu3 %vm1807_vm1, %v1800_v4 }
 0x553   : > { %v7187_v41 = vmax.f32 %v6675_v13, 0.0  ;;  %v6931_v0 = vadd.f32 %v13523_v29, %v6415_v42  ;;  %v6032_v19 = vld [vmem:[#allocation2 + $0x338] sm:$0xff]  ;;  %5902 = vst.msk [vmem:[#allocation2 + $0xf40] sm:$0xff] %vm266_vm2, %v5389_v21  ;;  %v5134_v21 = vadd.f32 %v13747_v36, %v1012_v61  ;;  %v885_v58 = vld [vmem:[#allocation2 + $0x350] sm:$0xff]  ;;  %v5262_v13 = vadd.f32 %v13752_v31, %v1140_v45 }
 0x554   : > { %v7315_v23 = vmax.f32 %v6803_v55, 0.0  ;;  %v6548_v52 = vadd.f32 %v13523_v29, %v6032_v19  ;;  %v6160_v14 = vld [vmem:[#allocation2 + $0x738] sm:$0xff]  ;;  %5519 = vst.msk [vmem:[#allocation2 + $0x348] sm:$0xff] %vm266_vm2, %v5006_v24  ;;  %v1013_v47 = vld [vmem:[#allocation2 + $0x750] sm:$0xff]  ;;  %v5390_v55 = vadd.f32 %v13754_v7, %v1268_v3  ;;  %v5007_v36 = vadd.f32 %v13785_v6, %v885_v58 }
 0x555   : > { %7699 = vst.msk [vmem:[%s9095_s11 + $0x730] sm:$0xff] %vm266_vm2, %v7187_v41  ;;  %v7443_v54 = vmax.f32 %v6931_v0, 0.0  ;;  %v6676_v33 = vadd.f32 %v13523_v29, %v6160_v14  ;;  %v6288_v17 = vld [vmem:[#allocation2 + $0xb38] sm:$0xff]  ;;  %v1141_v42 = vld [vmem:[#allocation2 + $0xb50] sm:$0xff]  ;;  %v13895_v41 = vpop.f32.mrf.mxu1  ;;  %v5135_v31 = vadd.f32 %v13787_v56, %v1013_v47  ;;  %v13899_v19 = vpop.f32.mrf.mxu2  ;;  %v1544_v14 = vld [vmem:[%s8863_s8 + $0x7e8] sm:$0xff] }
 0x556   : > { %7827 = vst.msk [vmem:[%s9095_s11 + $0xb30] sm:$0xff] %vm266_vm2, %v7315_v23  ;;  %v7060_v26 = vmax.f32 %v6548_v52, 0.0  ;;  %v6804_v16 = vadd.f32 %v13523_v29, %v6288_v17  ;;  %v6416_v5 = vld [vmem:[#allocation2 + $0xf38] sm:$0xff]  ;;  %v13853_v8 = vpop.f32.mrf.mxu0  ;;  %v13901_v7 = vpop.f32.mrf.mxu3  ;;  %v5263_v6 = vadd.f32 %v13791_v15, %v1141_v42  ;;  %v1416_v52 = vld [vmem:[%s8863_s8 + $0x3e8] sm:$0xff]  ;;  %v1801_v17 = vld [vmem:[%s8863_s8 + $0xff0] sm:$0xff] }
 0x557   : > { %7955 = vst.msk [vmem:[%s9095_s11 + $0xf30] sm:$0xff] %vm266_vm2, %v7443_v54  ;;  %v7188_v57 = vmax.f32 %v6676_v33, 0.0  ;;  %v6932_v10 = vadd.f32 %v13523_v29, %v6416_v5  ;;  %v6033_v49 = vld [vmem:[#allocation2 + $0x340] sm:$0xff]  ;;  %v886_v0 = vld [vmem:[#allocation2 + $0x358] sm:$0xff]  ;;  %v1673_v33 = vld [vmem:[%s8863_s8 + $0xbf0] sm:$0xff] }
 0x558   : > { %7572 = vst.msk [vmem:[%s9095_s11 + $0x338] sm:$0xff] %vm266_vm2, %v7060_v26  ;;  %v7316_v39 = vmax.f32 %v6804_v16, 0.0  ;;  %v6549_v32 = vadd.f32 %v13523_v29, %v6033_v49  ;;  %v6161_v51 = vld [vmem:[#allocation2 + $0x740] sm:$0xff]  ;;  %v1014_v23 = vld [vmem:[#allocation2 + $0x758] sm:$0xff]  ;;  %8356 = vmatmul.msk.f32.gmra.mxu1 %vm1807_vm1, %v1544_v14  ;;  %v5008_v56 = vadd.f32 %v13817_v44, %v886_v0 }
 0x559   : > { %7700 = vst.msk [vmem:[%s9095_s11 + $0x738] sm:$0xff] %vm266_vm2, %v7188_v57  ;;  %v7444_v43 = vmax.f32 %v6932_v10, 0.0  ;;  %v6677_v35 = vadd.f32 %v13523_v29, %v6161_v51  ;;  %v6289_v30 = vld [vmem:[#allocation2 + $0xb40] sm:$0xff]  ;;  %8228 = vmatmul.msk.f32.gmra.mxu0 %vm1807_vm1, %v1416_v52  ;;  %v1270_v54 = vld [vmem:[#allocation2 + $0xf58] sm:$0xff]  ;;  %v5136_v15 = vadd.f32 %v13819_v28, %v1014_v23  ;;  %v1417_v51 = vld [vmem:[%s8863_s8 + $0x3f0] sm:$0xff] }
 0x55a   : > { %7828 = vst.msk [vmem:[%s9095_s11 + $0xb38] sm:$0xff] %vm266_vm2, %v7316_v39  ;;  %v7061_v62 = vmax.f32 %v6549_v32, 0.0  ;;  %v6805_v11 = vadd.f32 %v13523_v29, %v6289_v30  ;;  %v6417_v9 = vld [vmem:[#allocation2 + $0xf40] sm:$0xff]  ;;  %8485 = vmatmul.msk.f32.gmra.mxu2 %vm1807_vm1, %v1673_v33  ;;  %8613 = vmatmul.msk.f32.gmra.mxu3 %vm1807_vm1, %v1801_v17  ;;  %v5392_v44 = vadd.f32 %v13825_v1, %v1270_v54  ;;  %v1418_v23 = vld [vmem:[%s8863_s8 + $0x3f8] sm:$0xff] }
 0x55b   : > { %7956 = vst.msk [vmem:[%s9095_s11 + $0xf38] sm:$0xff] %vm266_vm2, %v7444_v43  ;;  %v7189_v18 = vmax.f32 %v6677_v35, 0.0  ;;  %v6933_v63 = vadd.f32 %v13523_v29, %v6417_v9  ;;  %v6034_v48 = vld [vmem:[#allocation2 + $0x348] sm:$0xff]  ;;  %v887_v26 = vld [vmem:[#allocation2 + $0x360] sm:$0xff]  ;;  %v1674_v9 = vld [vmem:[%s8863_s8 + $0xbf8] sm:$0xff] }
 0x55c   : > { %7573 = vst.msk [vmem:[%s9095_s11 + $0x340] sm:$0xff] %vm266_vm2, %v7061_v62  ;;  %v7317_v50 = vmax.f32 %v6805_v11, 0.0  ;;  %v6550_v37 = vadd.f32 %v13523_v29, %v6034_v48  ;;  %v5009_v28 = vadd.f32 %v13853_v8, %v887_v26  ;;  %v1545_v8 = vld [vmem:[%s8863_s8 + $0x7f0] sm:$0xff]  ;;  %v1015_v42 = vld [vmem:[#allocation2 + $0x760] sm:$0xff]  ;;  %v1546_v52 = vld [vmem:[%s8863_s8 + $0x7f8] sm:$0xff] }
 0x55d   : > { %7701 = vst.msk [vmem:[%s9095_s11 + $0x740] sm:$0xff] %vm266_vm2, %v7189_v18  ;;  %v7445_v53 = vmax.f32 %v6933_v63, 0.0  ;;  %v13927_v57 = vpop.f32.mrf.mxu1  ;;  %v13931_v2 = vpop.f32.mrf.mxu2  ;;  %v1271_v17 = vld [vmem:[#allocation2 + $0xf60] sm:$0xff]  ;;  %v5137_v26 = vadd.f32 %v13855_v40, %v1015_v42 }
 0x55e   : > { %7829 = vst.msk [vmem:[%s9095_s11 + $0xb40] sm:$0xff] %vm266_vm2, %v7317_v50  ;;  %v7062_v24 = vmax.f32 %v6550_v37, 0.0  ;;  %v13893_v12 = vpop.f32.mrf.mxu0  ;;  %v13933_v39 = vpop.f32.mrf.mxu3 }
 0x55f   : > { %7957 = vst.msk [vmem:[%s9095_s11 + $0xf40] sm:$0xff] %vm266_vm2, %v7445_v53 }
 0x560   : > { %7574 = vst.msk [vmem:[%s9095_s11 + $0x348] sm:$0xff] %vm266_vm2, %v7062_v24  ;;  %8357 = vmatmul.msk.f32.gmra.mxu1 %vm1807_vm1, %v1545_v8 }
 0x561   : > { %5647 = vst.msk [vmem:[#allocation2 + $0x748] sm:$0xff] %vm266_vm2, %v5134_v21  ;;  %8229 = vmatmul.msk.f32.gmra.mxu0 %vm1807_vm1, %v1417_v51 }
 0x562   : > { %5775 = vst.msk [vmem:[#allocation2 + $0xb48] sm:$0xff] %vm266_vm2, %v5262_v13  ;;  %8486 = vmatmul.msk.f32.gmra.mxu2 %vm1807_vm1, %v1674_v9  ;;  %8614 = vmatmul.msk.f32.gmra.mxu3 %vm1807_vm1, %v1802_v59 }
 0x563   : > { %5903 = vst.msk [vmem:[#allocation2 + $0xf48] sm:$0xff] %vm266_vm2, %v5390_v55 }
 0x564   : > { %5520 = vst.msk [vmem:[#allocation2 + $0x350] sm:$0xff] %vm266_vm2, %v5007_v36 }
 0x565   : > { %5648 = vst.msk [vmem:[#allocation2 + $0x750] sm:$0xff] %vm266_vm2, %v5135_v31  ;;  %v13963_v24 = vpop.f32.mrf.mxu1  ;;  %v13968_v36 = vpop.f32.mrf.mxu2 }
 0x566   : > { %5776 = vst.msk [vmem:[#allocation2 + $0xb50] sm:$0xff] %vm266_vm2, %v5263_v6  ;;  %v13925_v5 = vpop.f32.mrf.mxu0  ;;  %v13970_v34 = vpop.f32.mrf.mxu3 }
 0x567   : > { %5904 = vst.msk [vmem:[#allocation2 + $0xf50] sm:$0xff] %vm266_vm2, %v5391_v46 }
 0x568   : > { %v6162_v16 = vld [vmem:[#allocation2 + $0x748] sm:$0xff]  ;;  %5521 = vst.msk [vmem:[#allocation2 + $0x358] sm:$0xff] %vm266_vm2, %v5008_v56  ;;  %v1143_v56 = vld [vmem:[#allocation2 + $0xb60] sm:$0xff]  ;;  %8358 = vmatmul.msk.f32.gmra.mxu1 %vm1807_vm1, %v1546_v52 }
 0x569   : > { %v6678_v10 = vadd.f32 %v13523_v29, %v6162_v16  ;;  %v6290_v49 = vld [vmem:[#allocation2 + $0xb48] sm:$0xff]  ;;  %5649 = vst.msk [vmem:[#allocation2 + $0x758] sm:$0xff] %vm266_vm2, %v5136_v15  ;;  %8230 = vmatmul.msk.f32.gmra.mxu0 %vm1807_vm1, %v1418_v23  ;;  %v5265_v16 = vadd.f32 %v13860_v22, %v1143_v56  ;;  %v889_v22 = vld [vmem:[#allocation2 + $0x370] sm:$0xff] }
 0x56a   : > { %v6806_v1 = vadd.f32 %v13523_v29, %v6290_v49  ;;  %v6418_v32 = vld [vmem:[#allocation2 + $0xf48] sm:$0xff]  ;;  %5777 = vst.msk [vmem:[#allocation2 + $0xb58] sm:$0xff] %vm266_vm2, %v5264_v20 }
 0x56b   : > { %v7190_v43 = vmax.f32 %v6678_v10, 0.0  ;;  %v6934_v35 = vadd.f32 %v13523_v29, %v6418_v32  ;;  %v6035_v30 = vld [vmem:[#allocation2 + $0x350] sm:$0xff]  ;;  %5905 = vst.msk [vmem:[#allocation2 + $0xf58] sm:$0xff] %vm266_vm2, %v5392_v44  ;;  %v888_v20 = vld [vmem:[#allocation2 + $0x368] sm:$0xff]  ;;  %v5393_v10 = vadd.f32 %v13862_v60, %v1271_v17 }
 0x56c   : > { %v7318_v61 = vmax.f32 %v6806_v1, 0.0  ;;  %v6551_v62 = vadd.f32 %v13523_v29, %v6035_v30  ;;  %v6163_v11 = vld [vmem:[#allocation2 + $0x750] sm:$0xff]  ;;  %5522 = vst.msk [vmem:[#allocation2 + $0x360] sm:$0xff] %vm266_vm2, %v5009_v28  ;;  %v1016_v28 = vld [vmem:[#allocation2 + $0x768] sm:$0xff] }
 0x56d   : > { %7702 = vst.msk [vmem:[%s9095_s11 + $0x748] sm:$0xff] %vm266_vm2, %v7190_v43  ;;  %v7446_v25 = vmax.f32 %v6934_v35, 0.0  ;;  %v6679_v18 = vadd.f32 %v13523_v29, %v6163_v11  ;;  %v6291_v63 = vld [vmem:[#allocation2 + $0xb50] sm:$0xff]  ;;  %v1144_v49 = vld [vmem:[#allocation2 + $0xb68] sm:$0xff]  ;;  %v13999_v40 = vpop.f32.mrf.mxu1  ;;  %v5138_v51 = vadd.f32 %v13895_v41, %v1016_v28  ;;  %v14003_v8 = vpop.f32.mrf.mxu2  ;;  %v890_v11 = vld [vmem:[#allocation2 + $0x378] sm:$0xff] }
 0x56e   : > { %7830 = vst.msk [vmem:[%s9095_s11 + $0xb48] sm:$0xff] %vm266_vm2, %v7318_v61  ;;  %v7063_v48 = vmax.f32 %v6551_v62, 0.0  ;;  %v6807_v45 = vadd.f32 %v13523_v29, %v6291_v63  ;;  %v6419_v50 = vld [vmem:[#allocation2 + $0xf50] sm:$0xff]  ;;  %v13961_v58 = vpop.f32.mrf.mxu0  ;;  %v1272_v1 = vld [vmem:[#allocation2 + $0xf68] sm:$0xff]  ;;  %v14005_v43 = vpop.f32.mrf.mxu3  ;;  %v5266_v60 = vadd.f32 %v13899_v19, %v1144_v49  ;;  %v5011_v61 = vadd.f32 %v13925_v5, %v889_v22  ;;  %v1274_v22 = vld [vmem:[#allocation2 + $0xf78] sm:$0xff] }
 0x56f   : > { %7958 = vst.msk [vmem:[%s9095_s11 + $0xf48] sm:$0xff] %vm266_vm2, %v7446_v25  ;;  %v7191_v37 = vmax.f32 %v6679_v18, 0.0  ;;  %v6935_v3 = vadd.f32 %v13523_v29, %v6419_v50  ;;  %v6036_v27 = vld [vmem:[#allocation2 + $0x358] sm:$0xff]  ;;  %v1017_v35 = vld [vmem:[#allocation2 + $0x770] sm:$0xff]  ;;  %v5012_v59 = vadd.f32 %v13961_v58, %v890_v11  ;;  %v14025_v18 = vld [vmem:[#allocation5] ss:$0 sm:$0xff] }
 0x570   : > { %7575 = vst.msk [vmem:[%s9095_s11 + $0x350] sm:$0xff] %vm266_vm2, %v7063_v48  ;;  %v7319_v4 = vmax.f32 %v6807_v45, 0.0  ;;  %v6552_v53 = vadd.f32 %v13523_v29, %v6036_v27  ;;  %v6164_v21 = vld [vmem:[#allocation2 + $0x758] sm:$0xff]  ;;  %v1145_v30 = vld [vmem:[#allocation2 + $0xb70] sm:$0xff]  ;;  %v5139_v62 = vadd.f32 %v13927_v57, %v1017_v35  ;;  %v1147_v11 = vld [vmem:[#allocation2 + $0xb80] sm:$0xff] }
 0x571   : > { %7703 = vst.msk [vmem:[%s9095_s11 + $0x750] sm:$0xff] %vm266_vm2, %v7191_v37  ;;  %v7447_v13 = vmax.f32 %v6935_v3, 0.0  ;;  %v6680_v47 = vadd.f32 %v13523_v29, %v6164_v21  ;;  %v6292_v55 = vld [vmem:[#allocation2 + $0xb58] sm:$0xff]  ;;  %v1273_v41 = vld [vmem:[#allocation2 + $0xf70] sm:$0xff]  ;;  %v5267_v19 = vadd.f32 %v13931_v2, %v1145_v30 }
 0x572   : > { %7831 = vst.msk [vmem:[%s9095_s11 + $0xb50] sm:$0xff] %vm266_vm2, %v7319_v4  ;;  %v7064_v31 = vmax.f32 %v6552_v53, 0.0  ;;  %v6808_v0 = vadd.f32 %v13523_v29, %v6292_v55  ;;  %v6420_v6 = vld [vmem:[#allocation2 + $0xf58] sm:$0xff]  ;;  %v5395_v9 = vadd.f32 %v13933_v39, %v1273_v41  ;;  %v1019_v41 = vld [vmem:[#allocation2 + $0x780] sm:$0xff] }
 0x573   : > { %7959 = vst.msk [vmem:[%s9095_s11 + $0xf50] sm:$0xff] %vm266_vm2, %v7447_v13  ;;  %v7192_v14 = vmax.f32 %v6680_v47, 0.0  ;;  %v6936_v46 = vadd.f32 %v13523_v29, %v6420_v6  ;;  %v6037_v38 = vld [vmem:[#allocation2 + $0x360] sm:$0xff] }
 0x574   : > { %7576 = vst.msk [vmem:[%s9095_s11 + $0x358] sm:$0xff] %vm266_vm2, %v7064_v31  ;;  %v7320_v54 = vmax.f32 %v6808_v0, 0.0  ;;  %v6553_v33 = vadd.f32 %v13523_v29, %v6037_v38  ;;  %v5010_v29 = vadd.f32 %v13893_v12, %v888_v20  ;;  %v5394_v12 = vadd.f32 %v13901_v7, %v1272_v1 }
 0x575   : > { %7704 = vst.msk [vmem:[%s9095_s11 + $0x758] sm:$0xff] %vm266_vm2, %v7192_v14  ;;  %v7448_v15 = vmax.f32 %v6936_v46, 0.0  ;;  %v14023_v25 = vpop.f32.mrf.mxu1  ;;  %v14029_v2 = vpop.f32.mrf.mxu2 }
 0x576   : > { %7832 = vst.msk [vmem:[%s9095_s11 + $0xb58] sm:$0xff] %vm266_vm2, %v7320_v54  ;;  %v7065_v44 = vmax.f32 %v6553_v33, 0.0  ;;  %v13997_v32 = vpop.f32.mrf.mxu0  ;;  %v14031_v39 = vpop.f32.mrf.mxu3 }
 0x577   : > { %7960 = vst.msk [vmem:[%s9095_s11 + $0xf58] sm:$0xff] %vm266_vm2, %v7448_v15 }
 0x578   : > { %7577 = vst.msk [vmem:[%s9095_s11 + $0x360] sm:$0xff] %vm266_vm2, %v7065_v44 }
 0x579   : > { %5650 = vst.msk [vmem:[#allocation2 + $0x760] sm:$0xff] %vm266_vm2, %v5137_v26 }
 0x57a   : > { %5778 = vst.msk [vmem:[#allocation2 + $0xb60] sm:$0xff] %vm266_vm2, %v5265_v16  ;;  %v1018_v16 = vld [vmem:[#allocation2 + $0x778] sm:$0xff] }
 0x57b   : > { %5906 = vst.msk [vmem:[#allocation2 + $0xf60] sm:$0xff] %vm266_vm2, %v5393_v10  ;;  %v5140_v35 = vadd.f32 %v13963_v24, %v1018_v16 }
 0x57c   : > { %5523 = vst.msk [vmem:[#allocation2 + $0x368] sm:$0xff] %vm266_vm2, %v5010_v29  ;;  %v1146_v29 = vld [vmem:[#allocation2 + $0xb78] sm:$0xff] }
 0x57d   : > { %5651 = vst.msk [vmem:[#allocation2 + $0x768] sm:$0xff] %vm266_vm2, %v5138_v51  ;;  %v14051_v38 = vpop.f32.mrf.mxu1  ;;  %v14056_v17 = vpop.f32.mrf.mxu2 }
 0x57e   : > { %5779 = vst.msk [vmem:[#allocation2 + $0xb68] sm:$0xff] %vm266_vm2, %v5266_v60  ;;  %v14021_v5 = vpop.f32.mrf.mxu0  ;;  %v14058_v15 = vpop.f32.mrf.mxu3 }
 0x57f   : > { %5907 = vst.msk [vmem:[#allocation2 + $0xf68] sm:$0xff] %vm266_vm2, %v5394_v12  ;;  %v891_v12 = vld [vmem:[#allocation2 + $0x380] sm:$0xff] }
 0x580   : > { %v6165_v7 = vld [vmem:[#allocation2 + $0x760] sm:$0xff]  ;;  %5524 = vst.msk [vmem:[#allocation2 + $0x370] sm:$0xff] %vm266_vm2, %v5011_v61  ;;  %v5268_v61 = vadd.f32 %v13968_v36, %v1146_v29  ;;  %v892_v36 = vld [vmem:[#allocation2 + $0x388] sm:$0xff] }
 0x581   : > { %v6681_v57 = vadd.f32 %v14025_v18, %v6165_v7  ;;  %v6293_v63 = vld [vmem:[#allocation2 + $0xb60] sm:$0xff]  ;;  %5652 = vst.msk [vmem:[#allocation2 + $0x770] sm:$0xff] %vm266_vm2, %v5139_v62  ;;  %v5396_v62 = vadd.f32 %v13970_v34, %v1274_v22  ;;  %v5269_v34 = vadd.f32 %v14003_v8, %v1147_v11 }
 0x582   : > { %v6809_v48 = vadd.f32 %v14025_v18, %v6293_v63  ;;  %v6421_v45 = vld [vmem:[#allocation2 + $0xf60] sm:$0xff]  ;;  %5780 = vst.msk [vmem:[#allocation2 + $0xb70] sm:$0xff] %vm266_vm2, %v5267_v19  ;;  %v5013_v19 = vadd.f32 %v13997_v32, %v891_v12 }
 0x583   : > { %v7193_v50 = vmax.f32 %v6681_v57, 0.0  ;;  %v6937_v37 = vadd.f32 %v14025_v18, %v6421_v45  ;;  %v6038_v3 = vld [vmem:[#allocation2 + $0x368] sm:$0xff]  ;;  %5908 = vst.msk [vmem:[#allocation2 + $0xf70] sm:$0xff] %vm266_vm2, %v5395_v9  ;;  %v1275_v9 = vld [vmem:[#allocation2 + $0xf80] sm:$0xff] }
 0x584   : > { %v7321_v27 = vmax.f32 %v6809_v48, 0.0  ;;  %v6554_v4 = vadd.f32 %v14025_v18, %v6038_v3  ;;  %v6166_v53 = vld [vmem:[#allocation2 + $0x768] sm:$0xff]  ;;  %5525 = vst.msk [vmem:[#allocation2 + $0x378] sm:$0xff] %vm266_vm2, %v5012_v59  ;;  %v5141_v59 = vadd.f32 %v13999_v40, %v1019_v41  ;;  %v5397_v32 = vadd.f32 %v14005_v43, %v1275_v9  ;;  %v893_v3 = vld [vmem:[#allocation2 + $0x390] sm:$0xff] }
 0x585   : > { %7705 = vst.msk [vmem:[%s9095_s11 + $0x760] sm:$0xff] %vm266_vm2, %v7193_v50  ;;  %v7449_v21 = vmax.f32 %v6937_v37, 0.0  ;;  %v6682_v58 = vadd.f32 %v14025_v18, %v6166_v53  ;;  %v6294_v13 = vld [vmem:[#allocation2 + $0xb68] sm:$0xff]  ;;  %v14083_v24 = vpop.f32.mrf.mxu1  ;;  %v14087_v57 = vpop.f32.mrf.mxu2  ;;  %v5014_v50 = vadd.f32 %v14021_v5, %v892_v36 }
 0x586   : > { %7833 = vst.msk [vmem:[%s9095_s11 + $0xb60] sm:$0xff] %vm266_vm2, %v7321_v27  ;;  %v7066_v47 = vmax.f32 %v6554_v4, 0.0  ;;  %v6810_v55 = vadd.f32 %v14025_v18, %v6294_v13  ;;  %v6422_v42 = vld [vmem:[#allocation2 + $0xf68] sm:$0xff]  ;;  %v3707_v46 = vpop.f32.mrf.mxu0  ;;  %v14089_v63 = vpop.f32.mrf.mxu3 }
 0x587   : > { %7961 = vst.msk [vmem:[%s9095_s11 + $0xf60] sm:$0xff] %vm266_vm2, %v7449_v21  ;;  %v7194_v31 = vmax.f32 %v6682_v58, 0.0  ;;  %v6938_v0 = vadd.f32 %v14025_v18, %v6422_v42  ;;  %v6039_v6 = vld [vmem:[#allocation2 + $0x370] sm:$0xff]  ;;  %v1020_v48 = vld [vmem:[#allocation2 + $0x788] sm:$0xff]  ;;  %v5015_v4 = vadd.f32 %v3707_v46, %v893_v3  ;;  %v1150_v3 = vld [vmem:[#allocation2 + $0xb98] sm:$0xff] }
 0x588   : > { %7578 = vst.msk [vmem:[%s9095_s11 + $0x368] sm:$0xff] %vm266_vm2, %v7066_v47  ;;  %v7322_v23 = vmax.f32 %v6810_v55, 0.0  ;;  %v6555_v52 = vadd.f32 %v14025_v18, %v6039_v6  ;;  %v6167_v14 = vld [vmem:[#allocation2 + $0x770] sm:$0xff]  ;;  %v1148_v45 = vld [vmem:[#allocation2 + $0xb88] sm:$0xff]  ;;  %v5142_v37 = vadd.f32 %v14023_v25, %v1020_v48 }
 0x589   : > { %7706 = vst.msk [vmem:[%s9095_s11 + $0x768] sm:$0xff] %vm266_vm2, %v7194_v31  ;;  %v7450_v56 = vmax.f32 %v6938_v0, 0.0  ;;  %v6683_v54 = vadd.f32 %v14025_v18, %v6167_v14  ;;  %v6295_v33 = vld [vmem:[#allocation2 + $0xb70] sm:$0xff]  ;;  %v1276_v40 = vld [vmem:[#allocation2 + $0xf88] sm:$0xff]  ;;  %v5270_v8 = vadd.f32 %v14029_v2, %v1148_v45 }
 0x58a   : > { %7834 = vst.msk [vmem:[%s9095_s11 + $0xb68] sm:$0xff] %vm266_vm2, %v7322_v23  ;;  %v7067_v26 = vmax.f32 %v6555_v52, 0.0  ;;  %v6811_v20 = vadd.f32 %v14025_v18, %v6295_v33  ;;  %v6423_v44 = vld [vmem:[#allocation2 + $0xf70] sm:$0xff]  ;;  %v5398_v27 = vadd.f32 %v14031_v39, %v1276_v40  ;;  %v1022_v40 = vld [vmem:[#allocation2 + $0x798] sm:$0xff] }
 0x58b   : > { %7962 = vst.msk [vmem:[%s9095_s11 + $0xf68] sm:$0xff] %vm266_vm2, %v7450_v56  ;;  %v7195_v28 = vmax.f32 %v6683_v54, 0.0  ;;  %v6939_v10 = vadd.f32 %v14025_v18, %v6423_v44  ;;  %v6040_v49 = vld [vmem:[#allocation2 + $0x378] sm:$0xff] }
 0x58c   : > { %7579 = vst.msk [vmem:[%s9095_s11 + $0x370] sm:$0xff] %vm266_vm2, %v7067_v26  ;;  %v7323_v1 = vmax.f32 %v6811_v20, 0.0  ;;  %v6556_v51 = vadd.f32 %v14025_v18, %v6040_v49 }
 0x58d   : > { %7707 = vst.msk [vmem:[%s9095_s11 + $0x770] sm:$0xff] %vm266_vm2, %v7195_v28  ;;  %v7451_v60 = vmax.f32 %v6939_v10, 0.0  ;;  %v14106_v5 = vpop.f32.mrf.mxu1  ;;  %v14110_v58 = vpop.f32.mrf.mxu2 }
 0x58e   : > { %7835 = vst.msk [vmem:[%s9095_s11 + $0xb70] sm:$0xff] %vm266_vm2, %v7323_v1  ;;  %v7068_v30 = vmax.f32 %v6556_v51, 0.0  ;;  %v14081_v7 = vpop.f32.mrf.mxu0  ;;  %v14114_v13 = vpop.f32.mrf.mxu3 }
 0x58f   : > { %7963 = vst.msk [vmem:[%s9095_s11 + $0xf70] sm:$0xff] %vm266_vm2, %v7451_v60 }
 0x590   : > { %7580 = vst.msk [vmem:[%s9095_s11 + $0x378] sm:$0xff] %vm266_vm2, %v7068_v30 }
 0x591   : > { %5653 = vst.msk [vmem:[#allocation2 + $0x778] sm:$0xff] %vm266_vm2, %v5140_v35  ;;  %v1021_v35 = vld [vmem:[#allocation2 + $0x790] sm:$0xff] }
 0x592   : > { %5781 = vst.msk [vmem:[#allocation2 + $0xb78] sm:$0xff] %vm266_vm2, %v5268_v61  ;;  %v5143_v48 = vadd.f32 %v14051_v38, %v1021_v35  ;;  %v5144_v38 = vadd.f32 %v14083_v24, %v1022_v40  ;;  %v1152_v40 = vld [vmem:[#allocation2 + $0xba8] sm:$0xff] }
 0x593   : > { %5909 = vst.msk [vmem:[#allocation2 + $0xf78] sm:$0xff] %vm266_vm2, %v5396_v62  ;;  %v1149_v62 = vld [vmem:[#allocation2 + $0xb90] sm:$0xff] }
 0x594   : > { %5526 = vst.msk [vmem:[#allocation2 + $0x380] sm:$0xff] %vm266_vm2, %v5013_v19 }
 0x595   : > { %5654 = vst.msk [vmem:[#allocation2 + $0x780] sm:$0xff] %vm266_vm2, %v5141_v59  ;;  %v14138_v12 = vpop.f32.mrf.mxu1  ;;  %v14143_v11 = vpop.f32.mrf.mxu2  ;;  %v1277_v59 = vld [vmem:[#allocation2 + $0xf90] sm:$0xff] }
 0x596   : > { %5782 = vst.msk [vmem:[#allocation2 + $0xb80] sm:$0xff] %vm266_vm2, %v5269_v34  ;;  %v14104_v53 = vpop.f32.mrf.mxu0  ;;  %v14148_v36 = vpop.f32.mrf.mxu3 }
 0x597   : > { %5910 = vst.msk [vmem:[#allocation2 + $0xf80] sm:$0xff] %vm266_vm2, %v5397_v32  ;;  %v894_v32 = vld [vmem:[#allocation2 + $0x398] sm:$0xff] }
 0x598   : > { %v6168_v43 = vld [vmem:[#allocation2 + $0x778] sm:$0xff]  ;;  %5527 = vst.msk [vmem:[#allocation2 + $0x388] sm:$0xff] %vm266_vm2, %v5014_v50  ;;  %v5271_v50 = vadd.f32 %v14056_v17, %v1149_v62  ;;  %v5272_v17 = vadd.f32 %v14087_v57, %v1150_v3 }
 0x599   : > { %v6684_v21 = vadd.f32 %v14025_v18, %v6168_v43  ;;  %v6296_v25 = vld [vmem:[#allocation2 + $0xb78] sm:$0xff]  ;;  %5655 = vst.msk [vmem:[#allocation2 + $0x788] sm:$0xff] %vm266_vm2, %v5142_v37  ;;  %v5399_v37 = vadd.f32 %v14058_v15, %v1277_v59 }
 0x59a   : > { %v6812_v2 = vadd.f32 %v14025_v18, %v6296_v25  ;;  %v6424_v39 = vld [vmem:[#allocation2 + $0xf78] sm:$0xff]  ;;  %5783 = vst.msk [vmem:[#allocation2 + $0xb88] sm:$0xff] %vm266_vm2, %v5270_v8  ;;  %v5016_v8 = vadd.f32 %v14081_v7, %v894_v32  ;;  %v1151_v25 = vld [vmem:[#allocation2 + $0xba0] sm:$0xff] }
 0x59b   : > { %v7196_v47 = vmax.f32 %v6684_v21, 0.0  ;;  %v6940_v55 = vadd.f32 %v14025_v18, %v6424_v39  ;;  %v6041_v42 = vld [vmem:[#allocation2 + $0x380] sm:$0xff]  ;;  %5911 = vst.msk [vmem:[#allocation2 + $0xf88] sm:$0xff] %vm266_vm2, %v5398_v27  ;;  %v1278_v27 = vld [vmem:[#allocation2 + $0xf98] sm:$0xff]  ;;  %v5273_v57 = vadd.f32 %v14110_v58, %v1151_v25 }
 0x59c   : > { %v7324_v31 = vmax.f32 %v6812_v2, 0.0  ;;  %v6557_v0 = vadd.f32 %v14025_v18, %v6041_v42  ;;  %v6169_v6 = vld [vmem:[#allocation2 + $0x780] sm:$0xff]  ;;  %5528 = vst.msk [vmem:[#allocation2 + $0x390] sm:$0xff] %vm266_vm2, %v5015_v4  ;;  %v5400_v15 = vadd.f32 %v14089_v63, %v1278_v27 }
 0x59d   : > { %7708 = vst.msk [vmem:[%s9095_s11 + $0x778] sm:$0xff] %vm266_vm2, %v7196_v47  ;;  %v7452_v23 = vmax.f32 %v6940_v55, 0.0  ;;  %v6685_v52 = vadd.f32 %v14025_v18, %v6169_v6  ;;  %v6297_v14 = vld [vmem:[#allocation2 + $0xb80] sm:$0xff]  ;;  %v14172_v39 = vpop.f32.mrf.mxu1  ;;  %v896_v47 = vld [vmem:[#allocation2 + $0x3a8] sm:$0xff]  ;;  %v14176_v55 = vpop.f32.mrf.mxu2 }
 0x59e   : > { %7836 = vst.msk [vmem:[%s9095_s11 + $0xb78] sm:$0xff] %vm266_vm2, %v7324_v31  ;;  %v7069_v46 = vmax.f32 %v6557_v0, 0.0  ;;  %v6813_v56 = vadd.f32 %v14025_v18, %v6297_v14  ;;  %v6425_v54 = vld [vmem:[#allocation2 + $0xf80] sm:$0xff]  ;;  %v3716_v10 = vpop.f32.mrf.mxu0  ;;  %v14180_v63 = vpop.f32.mrf.mxu3 }
 0x59f   : > { %7964 = vst.msk [vmem:[%s9095_s11 + $0xf78] sm:$0xff] %vm266_vm2, %v7452_v23  ;;  %v7197_v33 = vmax.f32 %v6685_v52, 0.0  ;;  %v6941_v26 = vadd.f32 %v14025_v18, %v6425_v54  ;;  %v6042_v20 = vld [vmem:[#allocation2 + $0x388] sm:$0xff]  ;;  %v895_v4 = vld [vmem:[#allocation2 + $0x3a0] sm:$0xff]  ;;  %v5018_v31 = vadd.f32 %v3716_v10, %v896_v47 }
 0x5a0   : > { %7581 = vst.msk [vmem:[%s9095_s11 + $0x380] sm:$0xff] %vm266_vm2, %v7069_v46  ;;  %v7325_v44 = vmax.f32 %v6813_v56, 0.0  ;;  %v6558_v16 = vadd.f32 %v14025_v18, %v6042_v20  ;;  %v6170_v28 = vld [vmem:[#allocation2 + $0x788] sm:$0xff]  ;;  %v1023_v21 = vld [vmem:[#allocation2 + $0x7a0] sm:$0xff]  ;;  %v5017_v7 = vadd.f32 %v14104_v53, %v895_v4  ;;  %v897_v4 = vld [vmem:[#allocation2 + $0x3b0] sm:$0xff] }
 0x5a1   : > { %7709 = vst.msk [vmem:[%s9095_s11 + $0x780] sm:$0xff] %vm266_vm2, %v7197_v33  ;;  %v7453_v49 = vmax.f32 %v6941_v26, 0.0  ;;  %v6686_v29 = vadd.f32 %v14025_v18, %v6170_v28  ;;  %v6298_v1 = vld [vmem:[#allocation2 + $0xb88] sm:$0xff]  ;;  %v1279_v2 = vld [vmem:[#allocation2 + $0xfa0] sm:$0xff]  ;;  %v5145_v24 = vadd.f32 %v14106_v5, %v1023_v21  ;;  %v5274_v21 = vadd.f32 %v14143_v11, %v1152_v40 }
 0x5a2   : > { %7837 = vst.msk [vmem:[%s9095_s11 + $0xb80] sm:$0xff] %vm266_vm2, %v7325_v44  ;;  %v7070_v51 = vmax.f32 %v6558_v16, 0.0  ;;  %v6814_v22 = vadd.f32 %v14025_v18, %v6298_v1  ;;  %v6426_v60 = vld [vmem:[#allocation2 + $0xf88] sm:$0xff]  ;;  %v5401_v53 = vadd.f32 %v14114_v13, %v1279_v2 }
 0x5a3   : > { %7965 = vst.msk [vmem:[%s9095_s11 + $0xf80] sm:$0xff] %vm266_vm2, %v7453_v49  ;;  %v7198_v30 = vmax.f32 %v6686_v29, 0.0  ;;  %v6942_v61 = vadd.f32 %v14025_v18, %v6426_v60  ;;  %v6043_v41 = vld [vmem:[#allocation2 + $0x390] sm:$0xff] }
 0x5a4   : > { %7582 = vst.msk [vmem:[%s9095_s11 + $0x388] sm:$0xff] %vm266_vm2, %v7070_v51  ;;  %v7326_v19 = vmax.f32 %v6814_v22, 0.0  ;;  %v6559_v9 = vadd.f32 %v14025_v18, %v6043_v41 }
 0x5a5   : > { %7710 = vst.msk [vmem:[%s9095_s11 + $0x788] sm:$0xff] %vm266_vm2, %v7198_v30  ;;  %v7454_v34 = vmax.f32 %v6942_v61, 0.0  ;;  %v4106_v10 = vpop.f32.mrf.mxu1  ;;  %v4490_v51 = vpop.f32.mrf.mxu2 }
 0x5a6   : > { %7838 = vst.msk [vmem:[%s9095_s11 + $0xb88] sm:$0xff] %vm266_vm2, %v7326_v19  ;;  %v7071_v45 = vmax.f32 %v6559_v9, 0.0  ;;  %v14162_v43 = vpop.f32.mrf.mxu0  ;;  %v4874_v30 = vpop.f32.mrf.mxu3 }
 0x5a7   : > { %7966 = vst.msk [vmem:[%s9095_s11 + $0xf88] sm:$0xff] %vm266_vm2, %v7454_v34  ;;  %v5019_v2 = vadd.f32 %v14162_v43, %v897_v4 }
 0x5a8   : > { %7583 = vst.msk [vmem:[%s9095_s11 + $0x390] sm:$0xff] %vm266_vm2, %v7071_v45 }
 0x5a9   : > { %5656 = vst.msk [vmem:[#allocation2 + $0x790] sm:$0xff] %vm266_vm2, %v5143_v48  ;;  %v1024_v48 = vld [vmem:[#allocation2 + $0x7a8] sm:$0xff] }
 0x5aa   : > { %5784 = vst.msk [vmem:[#allocation2 + $0xb90] sm:$0xff] %vm266_vm2, %v5271_v50 }
 0x5ab   : > { %5912 = vst.msk [vmem:[#allocation2 + $0xf90] sm:$0xff] %vm266_vm2, %v5399_v37 }
 0x5ac   : > { %5529 = vst.msk [vmem:[#allocation2 + $0x398] sm:$0xff] %vm266_vm2, %v5016_v8  ;;  %v1280_v8 = vld [vmem:[#allocation2 + $0xfa8] sm:$0xff] }
 0x5ad   : > { %5657 = vst.msk [vmem:[#allocation2 + $0x798] sm:$0xff] %vm266_vm2, %v5144_v38  ;;  %v5146_v38 = vadd.f32 %v14138_v12, %v1024_v48  ;;  %v5402_v25 = vadd.f32 %v14148_v36, %v1280_v8  ;;  %v14231_v47 = vpop.f32.mrf.mxu1  ;;  %v1026_v36 = vld [vmem:[#allocation2 + $0x7b8] sm:$0xff] }
 0x5ae   : > { %5785 = vst.msk [vmem:[#allocation2 + $0xb98] sm:$0xff] %vm266_vm2, %v5272_v17  ;;  %v14185_v0 = vpop.f32.mrf.mxu0 }
 0x5af   : > { %5913 = vst.msk [vmem:[#allocation2 + $0xf98] sm:$0xff] %vm266_vm2, %v5400_v15  ;;  %v1025_v15 = vld [vmem:[#allocation2 + $0x7b0] sm:$0xff] }
 0x5b0   : > { %v6171_v42 = vld [vmem:[#allocation2 + $0x790] sm:$0xff]  ;;  %5530 = vst.msk [vmem:[#allocation2 + $0x3a0] sm:$0xff] %vm266_vm2, %v5017_v7  ;;  %v5147_v12 = vadd.f32 %v14172_v39, %v1025_v15 }
 0x5b1   : > { %v6687_v5 = vadd.f32 %v14025_v18, %v6171_v42  ;;  %v6299_v6 = vld [vmem:[#allocation2 + $0xb90] sm:$0xff]  ;;  %5658 = vst.msk [vmem:[#allocation2 + $0x7a0] sm:$0xff] %vm266_vm2, %v5145_v24  ;;  %v14239_v42 = vpop.f32.mrf.mxu3 }
 0x5b2   : > { %v6815_v58 = vadd.f32 %v14025_v18, %v6299_v6  ;;  %v6427_v23 = vld [vmem:[#allocation2 + $0xf90] sm:$0xff]  ;;  %5786 = vst.msk [vmem:[#allocation2 + $0xba0] sm:$0xff] %vm266_vm2, %v5273_v57  ;;  %v898_v57 = vld [vmem:[#allocation2 + $0x3b8] sm:$0xff] }
 0x5b3   : > { %v7199_v52 = vmax.f32 %v6687_v5, 0.0  ;;  %v6943_v13 = vadd.f32 %v14025_v18, %v6427_v23  ;;  %v6044_v14 = vld [vmem:[#allocation2 + $0x398] sm:$0xff]  ;;  %5914 = vst.msk [vmem:[#allocation2 + $0xfa0] sm:$0xff] %vm266_vm2, %v5401_v53  ;;  %v1153_v7 = vld [vmem:[#allocation2 + $0xbb0] sm:$0xff]  ;;  %v14235_v53 = vpop.f32.mrf.mxu2  ;;  %v5020_v39 = vadd.f32 %v14185_v0, %v898_v57  ;;  %v899_v23 = vld [vmem:[#allocation2 + $0x3c0] sm:$0xff] }
 0x5b4   : > { %v7327_v46 = vmax.f32 %v6815_v58, 0.0  ;;  %v6560_v56 = vadd.f32 %v14025_v18, %v6044_v14  ;;  %v6172_v54 = vld [vmem:[#allocation2 + $0x798] sm:$0xff]  ;;  %5531 = vst.msk [vmem:[#allocation2 + $0x3a8] sm:$0xff] %vm266_vm2, %v5018_v31  ;;  %v1281_v24 = vld [vmem:[#allocation2 + $0xfb0] sm:$0xff]  ;;  %v5275_v11 = vadd.f32 %v14176_v55, %v1153_v7  ;;  %v5148_v58 = vadd.f32 %v4106_v10, %v1026_v36 }
 0x5b5   : > { %7711 = vst.msk [vmem:[%s9095_s11 + $0x790] sm:$0xff] %vm266_vm2, %v7199_v52  ;;  %v7455_v33 = vmax.f32 %v6943_v13, 0.0  ;;  %v6688_v26 = vadd.f32 %v14025_v18, %v6172_v54  ;;  %v6300_v20 = vld [vmem:[#allocation2 + $0xb98] sm:$0xff]  ;;  %v5403_v43 = vadd.f32 %v14180_v63, %v1281_v24  ;;  %v14255_v54 = vpop.f32.mrf.mxu1 }
 0x5b6   : > { %7839 = vst.msk [vmem:[%s9095_s11 + $0xb90] sm:$0xff] %vm266_vm2, %v7327_v46  ;;  %v7072_v44 = vmax.f32 %v6560_v56, 0.0  ;;  %v6816_v16 = vadd.f32 %v14025_v18, %v6300_v20  ;;  %v6428_v28 = vld [vmem:[#allocation2 + $0xf98] sm:$0xff]  ;;  %v3725_v19 = vpop.f32.mrf.mxu0 }
 0x5b7   : > { %7967 = vst.msk [vmem:[%s9095_s11 + $0xf90] sm:$0xff] %vm266_vm2, %v7455_v33  ;;  %v7200_v49 = vmax.f32 %v6688_v26, 0.0  ;;  %v6944_v29 = vadd.f32 %v14025_v18, %v6428_v28  ;;  %v6045_v1 = vld [vmem:[#allocation2 + $0x3a0] sm:$0xff]  ;;  %v1154_v31 = vld [vmem:[#allocation2 + $0xbb8] sm:$0xff]  ;;  %v5021_v63 = vadd.f32 %v3725_v19, %v899_v23  ;;  %v901_v23 = vld [vmem:[#allocation2 + $0x3d0] sm:$0xff] }
 0x5b8   : > { %7584 = vst.msk [vmem:[%s9095_s11 + $0x398] sm:$0xff] %vm266_vm2, %v7072_v44  ;;  %v7328_v22 = vmax.f32 %v6816_v16, 0.0  ;;  %v6561_v60 = vadd.f32 %v14025_v18, %v6045_v1  ;;  %v6173_v35 = vld [vmem:[#allocation2 + $0x7a0] sm:$0xff]  ;;  %v1282_v6 = vld [vmem:[#allocation2 + $0xfb8] sm:$0xff]  ;;  %v5276_v55 = vadd.f32 %v4490_v51, %v1154_v31  ;;  %v1156_v31 = vld [vmem:[#allocation2 + $0xbc8] sm:$0xff] }
 0x5b9   : > { %7712 = vst.msk [vmem:[%s9095_s11 + $0x798] sm:$0xff] %vm266_vm2, %v7200_v49  ;;  %v7456_v61 = vmax.f32 %v6944_v29, 0.0  ;;  %v6689_v41 = vadd.f32 %v14025_v18, %v6173_v35  ;;  %v6301_v62 = vld [vmem:[#allocation2 + $0xba0] sm:$0xff]  ;;  %v5404_v52 = vadd.f32 %v4874_v30, %v1282_v6  ;;  %v4880_v49 = vpop.f32.mrf.mxu3 }
 0x5ba   : > { %7840 = vst.msk [vmem:[%s9095_s11 + $0xb98] sm:$0xff] %vm266_vm2, %v7328_v22  ;;  %v7073_v9 = vmax.f32 %v6561_v60, 0.0  ;;  %v6817_v59 = vadd.f32 %v14025_v18, %v6301_v62  ;;  %v6429_v34 = vld [vmem:[#allocation2 + $0xfa0] sm:$0xff] }
 0x5bb   : > { %7968 = vst.msk [vmem:[%s9095_s11 + $0xf98] sm:$0xff] %vm266_vm2, %v7456_v61  ;;  %v7201_v32 = vmax.f32 %v6689_v41, 0.0  ;;  %v6945_v45 = vadd.f32 %v14025_v18, %v6429_v34  ;;  %v6046_v50 = vld [vmem:[#allocation2 + $0x3a8] sm:$0xff]  ;;  %v14259_v44 = vpop.f32.mrf.mxu2 }
 0x5bc   : > { %7585 = vst.msk [vmem:[%s9095_s11 + $0x3a0] sm:$0xff] %vm266_vm2, %v7073_v9  ;;  %v7329_v37 = vmax.f32 %v6817_v59, 0.0  ;;  %v6562_v3 = vadd.f32 %v14025_v18, %v6046_v50 }
 0x5bd   : > { %7713 = vst.msk [vmem:[%s9095_s11 + $0x7a0] sm:$0xff] %vm266_vm2, %v7201_v32  ;;  %v7457_v27 = vmax.f32 %v6945_v45, 0.0  ;;  %v4115_v15 = vpop.f32.mrf.mxu1 }
 0x5be   : > { %7841 = vst.msk [vmem:[%s9095_s11 + $0xba0] sm:$0xff] %vm266_vm2, %v7329_v37  ;;  %v7074_v17 = vmax.f32 %v6562_v3, 0.0  ;;  %v14243_v5 = vpop.f32.mrf.mxu0  ;;  %v1027_v37 = vld [vmem:[#allocation2 + $0x7c0] sm:$0xff] }
 0x5bf   : > { %7969 = vst.msk [vmem:[%s9095_s11 + $0xfa0] sm:$0xff] %vm266_vm2, %v7457_v27  ;;  %v5149_v7 = vadd.f32 %v14231_v47, %v1027_v37  ;;  %v1284_v47 = vld [vmem:[#allocation2 + $0xfc8] sm:$0xff] }
 0x5c0   : > { %7586 = vst.msk [vmem:[%s9095_s11 + $0x3a8] sm:$0xff] %vm266_vm2, %v7074_v17 }
 0x5c1   : > { %5659 = vst.msk [vmem:[#allocation2 + $0x7a8] sm:$0xff] %vm266_vm2, %v5146_v38  ;;  %v1155_v38 = vld [vmem:[#allocation2 + $0xbc0] sm:$0xff]  ;;  %v4883_v36 = vpop.f32.mrf.mxu3 }
 0x5c2   : > { %5787 = vst.msk [vmem:[#allocation2 + $0xba8] sm:$0xff] %vm266_vm2, %v5274_v21  ;;  %v1283_v21 = vld [vmem:[#allocation2 + $0xfc0] sm:$0xff]  ;;  %v5277_v57 = vadd.f32 %v14235_v53, %v1155_v38  ;;  %v5278_v53 = vadd.f32 %v14259_v44, %v1156_v31 }
 0x5c3   : > { %5915 = vst.msk [vmem:[#allocation2 + $0xfa8] sm:$0xff] %vm266_vm2, %v5402_v25  ;;  %v4499_v24 = vpop.f32.mrf.mxu2 }
 0x5c4   : > { %5532 = vst.msk [vmem:[#allocation2 + $0x3b0] sm:$0xff] %vm266_vm2, %v5019_v2  ;;  %v900_v2 = vld [vmem:[#allocation2 + $0x3c8] sm:$0xff] }
 0x5c5   : > { %5660 = vst.msk [vmem:[#allocation2 + $0x7b0] sm:$0xff] %vm266_vm2, %v5147_v12  ;;  %v5022_v6 = vadd.f32 %v14243_v5, %v900_v2 }
 0x5c6   : > { %5788 = vst.msk [vmem:[#allocation2 + $0xbb0] sm:$0xff] %vm266_vm2, %v5275_v11  ;;  %v3731_v22 = vpop.f32.mrf.mxu0  ;;  %v1028_v11 = vld [vmem:[#allocation2 + $0x7c8] sm:$0xff] }
 0x5c7   : > { %5916 = vst.msk [vmem:[#allocation2 + $0xfb0] sm:$0xff] %vm266_vm2, %v5403_v43  ;;  %v5405_v43 = vadd.f32 %v14239_v42, %v1283_v21  ;;  %v5406_v42 = vadd.f32 %v4880_v49, %v1284_v47  ;;  %v1030_v21 = vld [vmem:[#allocation2 + $0x7d8] sm:$0xff] }
 0x5c8   : > { %v6174_v13 = vld [vmem:[#allocation2 + $0x7a8] sm:$0xff]  ;;  %5533 = vst.msk [vmem:[#allocation2 + $0x3b8] sm:$0xff] %vm266_vm2, %v5020_v39 }
 0x5c9   : > { %v6690_v14 = vadd.f32 %v14025_v18, %v6174_v13  ;;  %v6302_v46 = vld [vmem:[#allocation2 + $0xba8] sm:$0xff]  ;;  %5661 = vst.msk [vmem:[#allocation2 + $0x7b8] sm:$0xff] %vm266_vm2, %v5148_v58  ;;  %v5150_v58 = vadd.f32 %v14255_v54, %v1028_v11  ;;  %v5023_v13 = vadd.f32 %v3731_v22, %v901_v23 }
 0x5ca   : > { %v6818_v0 = vadd.f32 %v14025_v18, %v6302_v46  ;;  %v6430_v56 = vld [vmem:[#allocation2 + $0xfa8] sm:$0xff]  ;;  %5789 = vst.msk [vmem:[#allocation2 + $0xbb8] sm:$0xff] %vm266_vm2, %v5276_v55  ;;  %v1029_v55 = vld [vmem:[#allocation2 + $0x7d0] sm:$0xff] }
 0x5cb   : > { %v7202_v33 = vmax.f32 %v6690_v14, 0.0  ;;  %v6946_v26 = vadd.f32 %v14025_v18, %v6430_v56  ;;  %v6047_v20 = vld [vmem:[#allocation2 + $0x3b0] sm:$0xff]  ;;  %5917 = vst.msk [vmem:[#allocation2 + $0xfb8] sm:$0xff] %vm266_vm2, %v5404_v52  ;;  %v5151_v5 = vadd.f32 %v4115_v15, %v1029_v55  ;;  %v902_v14 = vld [vmem:[#allocation2 + $0x3d8] sm:$0xff]  ;;  %v14310_v54 = vpop.f32.mrf.mxu2 }
 0x5cc   : > { %v7330_v16 = vmax.f32 %v6818_v0, 0.0  ;;  %v6563_v28 = vadd.f32 %v14025_v18, %v6047_v20  ;;  %v6175_v10 = vld [vmem:[#allocation2 + $0x7b0] sm:$0xff]  ;;  %5534 = vst.msk [vmem:[#allocation2 + $0x3c0] sm:$0xff] %vm266_vm2, %v5021_v63  ;;  %v14307_v0 = vpop.f32.mrf.mxu1  ;;  %v14313_v20 = vpop.f32.mrf.mxu3 }
 0x5cd   : > { %7714 = vst.msk [vmem:[%s9095_s11 + $0x7a8] sm:$0xff] %vm266_vm2, %v7202_v33  ;;  %v7458_v29 = vmax.f32 %v6946_v26, 0.0  ;;  %v6691_v1 = vadd.f32 %v14025_v18, %v6175_v10  ;;  %v6303_v51 = vld [vmem:[#allocation2 + $0xbb0] sm:$0xff]  ;;  %v5152_v31 = vadd.f32 %v14307_v0, %v1030_v21  ;;  %v1160_v0 = vld [vmem:[#allocation2 + $0xbe8] sm:$0xff] }
 0x5ce   : > { %7842 = vst.msk [vmem:[%s9095_s11 + $0xba8] sm:$0xff] %vm266_vm2, %v7330_v16  ;;  %v7075_v60 = vmax.f32 %v6563_v28, 0.0  ;;  %v6819_v35 = vadd.f32 %v14025_v18, %v6303_v51  ;;  %v6431_v30 = vld [vmem:[#allocation2 + $0xfb0] sm:$0xff]  ;;  %v3734_v39 = vpop.f32.mrf.mxu0 }
 0x5cf   : > { %7970 = vst.msk [vmem:[%s9095_s11 + $0xfa8] sm:$0xff] %vm266_vm2, %v7458_v29  ;;  %v7203_v61 = vmax.f32 %v6691_v1, 0.0  ;;  %v6947_v41 = vadd.f32 %v14025_v18, %v6431_v30  ;;  %v6048_v62 = vld [vmem:[#allocation2 + $0x3b8] sm:$0xff]  ;;  %v1157_v52 = vld [vmem:[#allocation2 + $0xbd0] sm:$0xff]  ;;  %v5024_v26 = vadd.f32 %v3734_v39, %v902_v14  ;;  %v903_v39 = vld [vmem:[#allocation2 + $0x3e0] sm:$0xff] }
 0x5d0   : > { %7587 = vst.msk [vmem:[%s9095_s11 + $0x3b0] sm:$0xff] %vm266_vm2, %v7075_v60  ;;  %v7331_v19 = vmax.f32 %v6819_v35, 0.0  ;;  %v6564_v9 = vadd.f32 %v14025_v18, %v6048_v62  ;;  %v6176_v59 = vld [vmem:[#allocation2 + $0x7b8] sm:$0xff]  ;;  %v1285_v63 = vld [vmem:[#allocation2 + $0xfd0] sm:$0xff]  ;;  %v5279_v46 = vadd.f32 %v4499_v24, %v1157_v52 }
 0x5d1   : > { %7715 = vst.msk [vmem:[%s9095_s11 + $0x7b0] sm:$0xff] %vm266_vm2, %v7203_v61  ;;  %v7459_v34 = vmax.f32 %v6947_v41, 0.0  ;;  %v6692_v48 = vadd.f32 %v14025_v18, %v6176_v59  ;;  %v6304_v32 = vld [vmem:[#allocation2 + $0xbb8] sm:$0xff]  ;;  %v5407_v56 = vadd.f32 %v4883_v36, %v1285_v63 }
 0x5d2   : > { %7843 = vst.msk [vmem:[%s9095_s11 + $0xbb0] sm:$0xff] %vm266_vm2, %v7331_v19  ;;  %v7076_v45 = vmax.f32 %v6564_v9, 0.0  ;;  %v6820_v50 = vadd.f32 %v14025_v18, %v6304_v32  ;;  %v6432_v40 = vld [vmem:[#allocation2 + $0xfb8] sm:$0xff] }
 0x5d3   : > { %7971 = vst.msk [vmem:[%s9095_s11 + $0xfb0] sm:$0xff] %vm266_vm2, %v7459_v34  ;;  %v7204_v3 = vmax.f32 %v6692_v48, 0.0  ;;  %v6948_v8 = vadd.f32 %v14025_v18, %v6432_v40  ;;  %v6049_v27 = vld [vmem:[#allocation2 + $0x3c0] sm:$0xff]  ;;  %v1158_v24 = vld [vmem:[#allocation2 + $0xbd8] sm:$0xff] }
 0x5d4   : > { %7588 = vst.msk [vmem:[%s9095_s11 + $0x3b8] sm:$0xff] %vm266_vm2, %v7076_v45  ;;  %v7332_v4 = vmax.f32 %v6820_v50, 0.0  ;;  %v6565_v17 = vadd.f32 %v14025_v18, %v6049_v27  ;;  %v4121_v40 = vpop.f32.mrf.mxu1  ;;  %v4505_v27 = vpop.f32.mrf.mxu2  ;;  %v1286_v36 = vld [vmem:[#allocation2 + $0xfd8] sm:$0xff]  ;;  %v5280_v47 = vadd.f32 %v14310_v54, %v1158_v24 }
 0x5d5   : > { %7716 = vst.msk [vmem:[%s9095_s11 + $0x7b8] sm:$0xff] %vm266_vm2, %v7204_v3  ;;  %v7460_v25 = vmax.f32 %v6948_v8, 0.0  ;;  %v4889_v15 = vpop.f32.mrf.mxu3  ;;  %v5408_v23 = vadd.f32 %v14313_v20, %v1286_v36 }
 0x5d6   : > { %7844 = vst.msk [vmem:[%s9095_s11 + $0xbb8] sm:$0xff] %vm266_vm2, %v7332_v4  ;;  %v7077_v12 = vmax.f32 %v6565_v17, 0.0  ;;  %v3737_v28 = vpop.f32.mrf.mxu0 }
 0x5d7   : > { %7972 = vst.msk [vmem:[%s9095_s11 + $0xfb8] sm:$0xff] %vm266_vm2, %v7460_v25  ;;  %v5025_v55 = vadd.f32 %v3737_v28, %v903_v39 }
 0x5d8   : > { %7589 = vst.msk [vmem:[%s9095_s11 + $0x3c0] sm:$0xff] %vm266_vm2, %v7077_v12 }
 0x5d9   : > { %5662 = vst.msk [vmem:[#allocation2 + $0x7c0] sm:$0xff] %vm266_vm2, %v5149_v7 }
 0x5da   : > { %5790 = vst.msk [vmem:[#allocation2 + $0xbc0] sm:$0xff] %vm266_vm2, %v5277_v57 }
 0x5db   : > { %5918 = vst.msk [vmem:[#allocation2 + $0xfc0] sm:$0xff] %vm266_vm2, %v5405_v43 }
 0x5dc   : > { %5535 = vst.msk [vmem:[#allocation2 + $0x3c8] sm:$0xff] %vm266_vm2, %v5022_v6  ;;  %v4124_v14 = vpop.f32.mrf.mxu1 }
 0x5dd   : > { %5663 = vst.msk [vmem:[#allocation2 + $0x7c8] sm:$0xff] %vm266_vm2, %v5150_v58  ;;  %v1031_v58 = vld [vmem:[#allocation2 + $0x7e0] sm:$0xff] }
 0x5de   : > { %5791 = vst.msk [vmem:[#allocation2 + $0xbc8] sm:$0xff] %vm266_vm2, %v5278_v53  ;;  %v3740_v12 = vpop.f32.mrf.mxu0  ;;  %v1159_v53 = vld [vmem:[#allocation2 + $0xbe0] sm:$0xff]  ;;  %v5153_v52 = vadd.f32 %v4121_v40, %v1031_v58 }
 0x5df   : > { %5919 = vst.msk [vmem:[#allocation2 + $0xfc8] sm:$0xff] %vm266_vm2, %v5406_v42  ;;  %v1287_v42 = vld [vmem:[#allocation2 + $0xfe0] sm:$0xff]  ;;  %v5281_v63 = vadd.f32 %v4505_v27, %v1159_v53 }
 0x5e0   : > { %v6177_v33 = vld [vmem:[#allocation2 + $0x7c0] sm:$0xff]  ;;  %5536 = vst.msk [vmem:[#allocation2 + $0x3d0] sm:$0xff] %vm266_vm2, %v5023_v13  ;;  %v904_v13 = vld [vmem:[#allocation2 + $0x3e8] sm:$0xff] }
 0x5e1   : > { %v6693_v44 = vadd.f32 %v14025_v18, %v6177_v33  ;;  %v6305_v16 = vld [vmem:[#allocation2 + $0xbc0] sm:$0xff]  ;;  %5664 = vst.msk [vmem:[#allocation2 + $0x7d0] sm:$0xff] %vm266_vm2, %v5151_v5  ;;  %v1032_v5 = vld [vmem:[#allocation2 + $0x7e8] sm:$0xff]  ;;  %v5026_v54 = vadd.f32 %v3740_v12, %v904_v13  ;;  %v1033_v12 = vld [vmem:[#allocation2 + $0x7f0] sm:$0xff] }
 0x5e2   : > { %v6821_v10 = vadd.f32 %v14025_v18, %v6305_v16  ;;  %v6433_v49 = vld [vmem:[#allocation2 + $0xfc0] sm:$0xff]  ;;  %5792 = vst.msk [vmem:[#allocation2 + $0xbd0] sm:$0xff] %vm266_vm2, %v5279_v46  ;;  %v5409_v46 = vadd.f32 %v4889_v15, %v1287_v42  ;;  %v1288_v33 = vld [vmem:[#allocation2 + $0xfe8] sm:$0xff]  ;;  %v5154_v20 = vadd.f32 %v4124_v14, %v1032_v5  ;;  %v1162_v5 = vld [vmem:[#allocation2 + $0xbf8] sm:$0xff] }
 0x5e3   : > { %v7205_v29 = vmax.f32 %v6693_v44, 0.0  ;;  %v6949_v1 = vadd.f32 %v14025_v18, %v6433_v49  ;;  %v6050_v51 = vld [vmem:[#allocation2 + $0x3c8] sm:$0xff]  ;;  %5920 = vst.msk [vmem:[#allocation2 + $0xfd0] sm:$0xff] %vm266_vm2, %v5407_v56  ;;  %v4508_v56 = vpop.f32.mrf.mxu2  ;;  %v905_v44 = vld [vmem:[#allocation2 + $0x3f0] sm:$0xff] }
 0x5e4   : > { %v7333_v22 = vmax.f32 %v6821_v10, 0.0  ;;  %v6566_v60 = vadd.f32 %v14025_v18, %v6050_v51  ;;  %v6178_v35 = vld [vmem:[#allocation2 + $0x7c8] sm:$0xff]  ;;  %5537 = vst.msk [vmem:[#allocation2 + $0x3d8] sm:$0xff] %vm266_vm2, %v5024_v26  ;;  %v4892_v26 = vpop.f32.mrf.mxu3  ;;  %v5282_v28 = vadd.f32 %v4508_v56, %v1160_v0  ;;  %v1290_v0 = vld [vmem:[#allocation2 + $0xff8] sm:$0xff] }
 0x5e5   : > { %7717 = vst.msk [vmem:[%s9095_s11 + $0x7c0] sm:$0xff] %vm266_vm2, %v7205_v29  ;;  %v7461_v30 = vmax.f32 %v6949_v1, 0.0  ;;  %v6694_v61 = vadd.f32 %v14025_v18, %v6178_v35  ;;  %v6306_v41 = vld [vmem:[#allocation2 + $0xbc8] sm:$0xff]  ;;  %v5410_v10 = vadd.f32 %v4892_v26, %v1288_v33 }
 0x5e6   : > { %7845 = vst.msk [vmem:[%s9095_s11 + $0xbc0] sm:$0xff] %vm266_vm2, %v7333_v22  ;;  %v7078_v62 = vmax.f32 %v6566_v60, 0.0  ;;  %v6822_v19 = vadd.f32 %v14025_v18, %v6306_v41  ;;  %v6434_v9 = vld [vmem:[#allocation2 + $0xfc8] sm:$0xff]  ;;  %v3743_v16 = vpop.f32.mrf.mxu0 }
 0x5e7   : > { %7973 = vst.msk [vmem:[%s9095_s11 + $0xfc0] sm:$0xff] %vm266_vm2, %v7461_v30  ;;  %v7206_v59 = vmax.f32 %v6694_v61, 0.0  ;;  %v6950_v34 = vadd.f32 %v14025_v18, %v6434_v9  ;;  %v6051_v48 = vld [vmem:[#allocation2 + $0x3d0] sm:$0xff]  ;;  %v5027_v29 = vadd.f32 %v3743_v16, %v905_v44  ;;  %v4127_v9 = vpop.f32.mrf.mxu1 }
 0x5e8   : > { %7590 = vst.msk [vmem:[%s9095_s11 + $0x3c8] sm:$0xff] %vm266_vm2, %v7078_v62  ;;  %v7334_v32 = vmax.f32 %v6822_v19, 0.0  ;;  %v6567_v45 = vadd.f32 %v14025_v18, %v6051_v48  ;;  %v6179_v50 = vld [vmem:[#allocation2 + $0x7d0] sm:$0xff]  ;;  %v5155_v58 = vadd.f32 %v4127_v9, %v1033_v12 }
 0x5e9   : > { %7718 = vst.msk [vmem:[%s9095_s11 + $0x7c8] sm:$0xff] %vm266_vm2, %v7206_v59  ;;  %v7462_v37 = vmax.f32 %v6950_v34, 0.0  ;;  %v6695_v3 = vadd.f32 %v14025_v18, %v6179_v50  ;;  %v6307_v8 = vld [vmem:[#allocation2 + $0xbd0] sm:$0xff] }
 0x5ea   : > { %7846 = vst.msk [vmem:[%s9095_s11 + $0xbc8] sm:$0xff] %vm266_vm2, %v7334_v32  ;;  %v7079_v38 = vmax.f32 %v6567_v45, 0.0  ;;  %v6823_v4 = vadd.f32 %v14025_v18, %v6307_v8  ;;  %v6435_v17 = vld [vmem:[#allocation2 + $0xfd0] sm:$0xff] }
 0x5eb   : > { %7974 = vst.msk [vmem:[%s9095_s11 + $0xfc8] sm:$0xff] %vm266_vm2, %v7462_v37  ;;  %v7207_v25 = vmax.f32 %v6695_v3, 0.0  ;;  %v6951_v7 = vadd.f32 %v14025_v18, %v6435_v17  ;;  %v6052_v2 = vld [vmem:[#allocation2 + $0x3d8] sm:$0xff]  ;;  %v4511_v32 = vpop.f32.mrf.mxu2 }
 0x5ec   : > { %7591 = vst.msk [vmem:[%s9095_s11 + $0x3d0] sm:$0xff] %vm266_vm2, %v7079_v38  ;;  %v7335_v57 = vmax.f32 %v6823_v4, 0.0  ;;  %v6568_v11 = vadd.f32 %v14025_v18, %v6052_v2  ;;  %v4895_v37 = vpop.f32.mrf.mxu3 }
 0x5ed   : > { %7719 = vst.msk [vmem:[%s9095_s11 + $0x7d0] sm:$0xff] %vm266_vm2, %v7207_v25  ;;  %v7463_v43 = vmax.f32 %v6951_v7, 0.0 }
 0x5ee   : > { %7847 = vst.msk [vmem:[%s9095_s11 + $0xbd0] sm:$0xff] %vm266_vm2, %v7335_v57  ;;  %v7080_v6 = vmax.f32 %v6568_v11, 0.0  ;;  %v8687_v11 = vld [vmem:[#allocation5] ss:$0 sm:$0xff]  ;;  %v3746_v53 = vpop.f32.mrf.mxu0 }
 0x5ef   : > { %7975 = vst.msk [vmem:[%s9095_s11 + $0xfd0] sm:$0xff] %vm266_vm2, %v7463_v43  ;;  %v4130_v13 = vpop.f32.mrf.mxu1 }
 0x5f0   : > { %7592 = vst.msk [vmem:[%s9095_s11 + $0x3d8] sm:$0xff] %vm266_vm2, %v7080_v6 }
 0x5f1   : > { %5665 = vst.msk [vmem:[#allocation2 + $0x7d8] sm:$0xff] %vm266_vm2, %v5152_v31  ;;  %v1161_v31 = vld [vmem:[#allocation2 + $0xbf0] sm:$0xff] }
 0x5f2   : > { %5793 = vst.msk [vmem:[#allocation2 + $0xbd8] sm:$0xff] %vm266_vm2, %v5280_v47  ;;  %v1289_v47 = vld [vmem:[#allocation2 + $0xff0] sm:$0xff]  ;;  %v5283_v42 = vadd.f32 %v4511_v32, %v1161_v31 }
 0x5f3   : > { %5921 = vst.msk [vmem:[#allocation2 + $0xfd8] sm:$0xff] %vm266_vm2, %v5408_v23  ;;  %v906_v23 = vld [vmem:[#allocation2 + $0x3f8] sm:$0xff]  ;;  %v4514_v14 = vpop.f32.mrf.mxu2 }
 0x5f4   : > { %5538 = vst.msk [vmem:[#allocation2 + $0x3e0] sm:$0xff] %vm266_vm2, %v5025_v55  ;;  %v4898_v56 = vpop.f32.mrf.mxu3  ;;  %v5284_v33 = vadd.f32 %v4514_v14, %v1162_v5 }
 0x5f5   : > { %5666 = vst.msk [vmem:[#allocation2 + $0x7e0] sm:$0xff] %vm266_vm2, %v5153_v52  ;;  %v1034_v52 = vld [vmem:[#allocation2 + $0x7f8] sm:$0xff]  ;;  %v5412_v26 = vadd.f32 %v4898_v56, %v1290_v0 }
 0x5f6   : > { %5794 = vst.msk [vmem:[#allocation2 + $0xbe0] sm:$0xff] %vm266_vm2, %v5281_v63  ;;  %v5411_v63 = vadd.f32 %v4895_v37, %v1289_v47 }
 0x5f7   : > { %5922 = vst.msk [vmem:[#allocation2 + $0xfe0] sm:$0xff] %vm266_vm2, %v5409_v46  ;;  %v5028_v46 = vadd.f32 %v3746_v53, %v906_v23 }
 0x5f8   : > { %v6180_v49 = vld [vmem:[#allocation2 + $0x7d8] sm:$0xff]  ;;  %5539 = vst.msk [vmem:[#allocation2 + $0x3e8] sm:$0xff] %vm266_vm2, %v5026_v54  ;;  %v5156_v54 = vadd.f32 %v4130_v13, %v1034_v52 }
 0x5f9   : > { %v6696_v1 = vadd.f32 %v14025_v18, %v6180_v49  ;;  %v6308_v51 = vld [vmem:[#allocation2 + $0xbd8] sm:$0xff]  ;;  %5667 = vst.msk [vmem:[#allocation2 + $0x7e8] sm:$0xff] %vm266_vm2, %v5154_v20 }
 0x5fa   : > { %v6824_v22 = vadd.f32 %v14025_v18, %v6308_v51  ;;  %v6436_v60 = vld [vmem:[#allocation2 + $0xfd8] sm:$0xff]  ;;  %5795 = vst.msk [vmem:[#allocation2 + $0xbe8] sm:$0xff] %vm266_vm2, %v5282_v28 }
 0x5fb   : > { %v7208_v35 = vmax.f32 %v6696_v1, 0.0  ;;  %v6952_v30 = vadd.f32 %v14025_v18, %v6436_v60  ;;  %v6053_v61 = vld [vmem:[#allocation2 + $0x3e0] sm:$0xff]  ;;  %5923 = vst.msk [vmem:[#allocation2 + $0xfe8] sm:$0xff] %vm266_vm2, %v5410_v10 }
 0x5fc   : > { %v7336_v41 = vmax.f32 %v6824_v22, 0.0  ;;  %v6569_v62 = vadd.f32 %v14025_v18, %v6053_v61  ;;  %v6181_v19 = vld [vmem:[#allocation2 + $0x7e0] sm:$0xff]  ;;  %5540 = vst.msk [vmem:[#allocation2 + $0x3f0] sm:$0xff] %vm266_vm2, %v5027_v29 }
 0x5fd   : > { %7720 = vst.msk [vmem:[%s9095_s11 + $0x7d8] sm:$0xff] %vm266_vm2, %v7208_v35  ;;  %v7464_v59 = vmax.f32 %v6952_v30, 0.0  ;;  %v6697_v34 = vadd.f32 %v14025_v18, %v6181_v19  ;;  %v6309_v48 = vld [vmem:[#allocation2 + $0xbe0] sm:$0xff] }
 0x5fe   : > { %7848 = vst.msk [vmem:[%s9095_s11 + $0xbd8] sm:$0xff] %vm266_vm2, %v7336_v41  ;;  %v7081_v45 = vmax.f32 %v6569_v62, 0.0  ;;  %v6825_v50 = vadd.f32 %v14025_v18, %v6309_v48  ;;  %v6437_v40 = vld [vmem:[#allocation2 + $0xfe0] sm:$0xff] }
 0x5ff   : > { %7976 = vst.msk [vmem:[%s9095_s11 + $0xfd8] sm:$0xff] %vm266_vm2, %v7464_v59  ;;  %v7209_v3 = vmax.f32 %v6697_v34, 0.0  ;;  %v6953_v8 = vadd.f32 %v14025_v18, %v6437_v40  ;;  %v6054_v27 = vld [vmem:[#allocation2 + $0x3e8] sm:$0xff] }
 0x600   : > { %7593 = vst.msk [vmem:[%s9095_s11 + $0x3e0] sm:$0xff] %vm266_vm2, %v7081_v45  ;;  %v7337_v38 = vmax.f32 %v6825_v50, 0.0  ;;  %v6570_v4 = vadd.f32 %v14025_v18, %v6054_v27  ;;  %v6182_v17 = vld [vmem:[#allocation2 + $0x7e8] sm:$0xff] }
 0x601   : > { %7721 = vst.msk [vmem:[%s9095_s11 + $0x7e0] sm:$0xff] %vm266_vm2, %v7209_v3  ;;  %v7465_v21 = vmax.f32 %v6953_v8, 0.0  ;;  %v6698_v15 = vadd.f32 %v14025_v18, %v6182_v17  ;;  %v6310_v25 = vld [vmem:[#allocation2 + $0xbe8] sm:$0xff] }
 0x602   : > { %7849 = vst.msk [vmem:[%s9095_s11 + $0xbe0] sm:$0xff] %vm266_vm2, %v7337_v38  ;;  %v7082_v7 = vmax.f32 %v6570_v4, 0.0  ;;  %v6826_v2 = vadd.f32 %v14025_v18, %v6310_v25  ;;  %v6438_v24 = vld [vmem:[#allocation2 + $0xfe8] sm:$0xff] }
 0x603   : > { %7977 = vst.msk [vmem:[%s9095_s11 + $0xfe0] sm:$0xff] %vm266_vm2, %v7465_v21  ;;  %v7210_v57 = vmax.f32 %v6698_v15, 0.0  ;;  %v6954_v36 = vadd.f32 %v8687_v11, %v6438_v24  ;;  %v6055_v43 = vld [vmem:[#allocation2 + $0x3f0] sm:$0xff] }
 0x604   : > { %7594 = vst.msk [vmem:[%s9095_s11 + $0x3e8] sm:$0xff] %vm266_vm2, %v7082_v7  ;;  %v7338_v39 = vmax.f32 %v6826_v2, 0.0  ;;  %v6571_v6 = vadd.f32 %v8687_v11, %v6055_v43 }
 0x605   : > { %7722 = vst.msk [vmem:[%s9095_s11 + $0x7e8] sm:$0xff] %vm266_vm2, %v7210_v57  ;;  %v7466_v18 = vmax.f32 %v6954_v36, 0.0 }
 0x606   : > { %7850 = vst.msk [vmem:[%s9095_s11 + $0xbe8] sm:$0xff] %vm266_vm2, %v7338_v39  ;;  %v7083_v55 = vmax.f32 %v6571_v6, 0.0 }
 0x607   : > { %7978 = vst.msk [vmem:[%s9095_s11 + $0xfe8] sm:$0xff] %vm266_vm2, %v7466_v18 }
 0x608   : > { %7595 = vst.msk [vmem:[%s9095_s11 + $0x3f0] sm:$0xff] %vm266_vm2, %v7083_v55 }
 0x609   : > { %5668 = vst.msk [vmem:[#allocation2 + $0x7f0] sm:$0xff] %vm266_vm2, %v5155_v58 }
 0x60a   : > { %5796 = vst.msk [vmem:[#allocation2 + $0xbf0] sm:$0xff] %vm266_vm2, %v5283_v42 }
 0x60b   : > { %5924 = vst.msk [vmem:[#allocation2 + $0xff0] sm:$0xff] %vm266_vm2, %v5411_v63 }
 0x60c   : > { %5541 = vst.msk [vmem:[#allocation2 + $0x3f8] sm:$0xff] %vm266_vm2, %v5028_v46 }
 0x60d   : > { %5669 = vst.msk [vmem:[#allocation2 + $0x7f8] sm:$0xff] %vm266_vm2, %v5156_v54 }
 0x60e   : > { %5797 = vst.msk [vmem:[#allocation2 + $0xbf8] sm:$0xff] %vm266_vm2, %v5284_v33 }
 0x60f   : > { %5925 = vst.msk [vmem:[#allocation2 + $0xff8] sm:$0xff] %vm266_vm2, %v5412_v26 }
 0x610   : > { %v6183_v20 = vld [vmem:[#allocation2 + $0x7f0] sm:$0xff] }
 0x611   : > { %v6699_v44 = vadd.f32 %v8687_v11, %v6183_v20  ;;  %v6311_v16 = vld [vmem:[#allocation2 + $0xbf0] sm:$0xff] }
 0x612   : > { %v6827_v28 = vadd.f32 %v8687_v11, %v6311_v16  ;;  %v6439_v10 = vld [vmem:[#allocation2 + $0xff0] sm:$0xff] }
 0x613   : > { %v7211_v49 = vmax.f32 %v6699_v44, 0.0  ;;  %v6955_v29 = vadd.f32 %v8687_v11, %v6439_v10  ;;  %v6056_v1 = vld [vmem:[#allocation2 + $0x3f8] sm:$0xff] }
 0x614   : > { %v7339_v51 = vmax.f32 %v6827_v28, 0.0  ;;  %v6572_v22 = vadd.f32 %v8687_v11, %v6056_v1  ;;  %v6184_v60 = vld [vmem:[#allocation2 + $0x7f8] sm:$0xff] }
 0x615   : > { %7723 = vst.msk [vmem:[%s9095_s11 + $0x7f0] sm:$0xff] %vm266_vm2, %v7211_v49  ;;  %v7467_v35 = vmax.f32 %v6955_v29, 0.0  ;;  %v6700_v30 = vadd.f32 %v8687_v11, %v6184_v60  ;;  %v6312_v61 = vld [vmem:[#allocation2 + $0xbf8] sm:$0xff] }
 0x616   : > { %7851 = vst.msk [vmem:[%s9095_s11 + $0xbf0] sm:$0xff] %vm266_vm2, %v7339_v51  ;;  %v7084_v41 = vmax.f32 %v6572_v22, 0.0  ;;  %v6828_v62 = vadd.f32 %v8687_v11, %v6312_v61  ;;  %v6440_v19 = vld [vmem:[#allocation2 + $0xff8] sm:$0xff] }
 0x617   : > { %7979 = vst.msk [vmem:[%s9095_s11 + $0xff0] sm:$0xff] %vm266_vm2, %v7467_v35  ;;  %v7212_v9 = vmax.f32 %v6700_v30, 0.0  ;;  %v6956_v59 = vadd.f32 %v8687_v11, %v6440_v19 }
 0x618   : > { %7596 = vst.msk [vmem:[%s9095_s11 + $0x3f8] sm:$0xff] %vm266_vm2, %v7084_v41  ;;  %v7340_v34 = vmax.f32 %v6828_v62, 0.0 }
 0x619   : > { %7724 = vst.msk [vmem:[%s9095_s11 + $0x7f8] sm:$0xff] %vm266_vm2, %v7212_v9  ;;  %v7468_v48 = vmax.f32 %v6956_v59, 0.0 }
 0x61a   : > { %7852 = vst.msk [vmem:[%s9095_s11 + $0xbf8] sm:$0xff] %vm266_vm2, %v7340_v34 }
 0x61b   : > { %7980 = vst.msk [vmem:[%s9095_s11 + $0xff8] sm:$0xff] %vm266_vm2, %v7468_v48 }
 0x61c PF: > { %s15_s14 = sadd.s32 1, %s8778_s14   ;;  %s14440_s12 = smov %s8774_s13 }
 0x61d   : > { %p12_p8 = scmp.ge.s32.totalorder %s15_s14, 26   ;;  %s14441_s13 = smov %s14443_s16 }
 0x61f   :  { %14 = sbr.rel (!%p12_p8) target bundleno = 3 (0x3), region = 81 }
 0x624   :  { %8009 = vsyncpa [#allocation4], 1 }
 0x625   :  { %8011 = vsyncpa [#allocation4 + $0x1], 1 }
 0x626   :  { %8012 = vsyncpa [#allocation6], 1 }

</bundles_post_ra>
